<compile_context>
chip_gen: v7x
topology: tpu7x:2x2x1
jax: 0.10.0
libtpu: 0.0.40
codegen_flags: <defaults>
</compile_context>

<pallas_src>
import math

import jax
import jax.numpy as jnp
from jax.experimental import pallas as pl
from jax.experimental.pallas import tpu as pltpu

NEG = -1e30   # finite additive mask value
LANE = 128    # vocab padding granularity (lane width)


# ----------------------------- in-kernel helpers -----------------------------

def _ln(x, g, b):
    """LayerNorm over the last dim; x (R, D) f32, g/b (1, D) f32."""
    mean = jnp.mean(x, axis=-1, keepdims=True)
    var = jnp.mean(jnp.square(x - mean), axis=-1, keepdims=True)
    return (x - mean) * jax.lax.rsqrt(var + 1e-5) * g + b


def _heads_attend(q_all, k_all, v_all, bias, wo_ref, bo_ref, num_heads, head_dim):
    """Per-head attention on already-projected Q/K/V.

    q_all (Sq, D) f32 (1/sqrt(Dh) already folded into the Q weights),
    k_all / v_all (Sk, D) f32, bias broadcastable to (Sq, Sk) f32,
    wo stacked per head (H, Dh, D) bf16, bo (1, D) f32.
    """
    sq, d = q_all.shape
    out = jnp.zeros((sq, d), jnp.float32)
    for h in range(num_heads):
        sl = slice(h * head_dim, (h + 1) * head_dim)
        q = q_all[:, sl].astype(jnp.bfloat16)
        k = k_all[:, sl].astype(jnp.bfloat16)
        v = v_all[:, sl].astype(jnp.bfloat16)
        # q @ k.T without an explicit transpose (contract dim 1 with dim 1)
        s = jax.lax.dot_general(q, k, (((1,), (1,)), ((), ())),
                                preferred_element_type=jnp.float32)
        s = s + bias
        s = s - jnp.max(s, axis=-1, keepdims=True)
        p = jnp.exp(s)
        # approx reciprocal -> EUP slot; tolerance-level deviation vs exact softmax
        p = p * pl.reciprocal(jnp.sum(p, axis=-1, keepdims=True), approx=True)
        o = jnp.dot(p.astype(jnp.bfloat16), v, preferred_element_type=jnp.float32)
        # concat_h(o_h) @ Wo == sum_h o_h @ Wo_h  (out-projection folded per head)
        out = out + jnp.dot(o.astype(jnp.bfloat16), wo_ref[h],
                            preferred_element_type=jnp.float32)
    return out + bo_ref[...]


def _mha_self(x, bias, wqkv_ref, bqkv_ref, wo_ref, bo_ref, num_heads, head_dim):
    """Self-attention with one fused (S, D) @ (D, 3D) QKV projection."""
    d = x.shape[-1]
    qkv = jnp.dot(x.astype(jnp.bfloat16), wqkv_ref[...],
                  preferred_element_type=jnp.float32) + bqkv_ref[...]
    return _heads_attend(qkv[:, :d], qkv[:, d:2 * d], qkv[:, 2 * d:],
                         bias, wo_ref, bo_ref, num_heads, head_dim)


def _mha_cross(x, mem_bf16, bias, wq_ref, bq_ref, wkv_ref, bkv_ref,
               wo_ref, bo_ref, num_heads, head_dim):
    """Cross-attention with a fused (Sm, D) @ (D, 2D) K/V projection."""
    d = x.shape[-1]
    q = jnp.dot(x.astype(jnp.bfloat16), wq_ref[...],
                preferred_element_type=jnp.float32) + bq_ref[...]
    kv = jnp.dot(mem_bf16, wkv_ref[...],
                 preferred_element_type=jnp.float32) + bkv_ref[...]
    return _heads_attend(q, kv[:, :d], kv[:, d:], bias, wo_ref, bo_ref,
                         num_heads, head_dim)


def _ffn(x, w1_ref, b1_ref, w2_ref, b2_ref):
    h = jnp.dot(x.astype(jnp.bfloat16), w1_ref[...],
                preferred_element_type=jnp.float32) + b1_ref[...]
    h = jnp.maximum(h, 0.0)
    return jnp.dot(h.astype(jnp.bfloat16), w2_ref[...],
                   preferred_element_type=jnp.float32) + b2_ref[...]


# --------------------------- fused whole-forward kernel -----------------------

_ENC_KEYS = ("wqkv", "bqkv", "wo", "bo", "ln1_g", "ln1_b",
             "w1", "b1", "w2", "b2", "ln2_g", "ln2_b")
_DEC_KEYS = ("sa_wqkv", "sa_bqkv", "sa_wo", "sa_bo", "ln1_g", "ln1_b",
             "ca_wq", "ca_bq", "ca_wkv", "ca_bkv", "ca_wo", "ca_bo",
             "ln2_g", "ln2_b", "w1", "b1", "w2", "b2", "ln3_g", "ln3_b")


def _make_forward_kernel(n_enc, n_dec, num_heads, head_dim):
    ne, nd = len(_ENC_KEYS), len(_DEC_KEYS)

    def kernel(*refs):
        src_ref, tgt_ref, skb_ref, tkb_ref = refs[:4]
        o_ref = refs[-1]
        wrefs = refs[4:-1]

        cursor = [0]

        def take(n):
            out = wrefs[cursor[0]:cursor[0] + n]
            cursor[0] += n
            return out

        src = src_ref[...].astype(jnp.float32)     # (Ss, D)
        tgt = tgt_ref[...].astype(jnp.float32)     # (St, D)
        skb = skb_ref[...]                         # (1, Ss) additive key-pad bias
        tkb = tkb_ref[...]                         # (1, St)

        # ------------------------------ encoder ------------------------------
        x = src
        for _ in range(n_enc):
            (wqkv, bqkv, wo, bo, ln1g, ln1b,
             w1, b1, w2, b2, ln2g, ln2b) = take(ne)
            attn = _mha_self(x, skb, wqkv, bqkv, wo, bo, num_heads, head_dim)
            x = _ln(x + attn, ln1g[...], ln1b[...])
            ff = _ffn(x, w1, b1, w2, b2)
            x = _ln(x + ff, ln2g[...], ln2b[...])
        eng, enb = take(2)
        # final encoder LayerNorm fused here; memory stays resident (bf16) for
        # every decoder cross-attention — never written back to HBM.
        mem_bf = _ln(x, eng[...], enb[...]).astype(jnp.bfloat16)

        # ------------------------------ decoder ------------------------------
        st = tgt.shape[0]
        row = jax.lax.broadcasted_iota(jnp.int32, (st, st), 0)
        col = jax.lax.broadcasted_iota(jnp.int32, (st, st), 1)
        self_bias = jnp.where(col > row, NEG, 0.0).astype(jnp.float32) + tkb

        y = tgt
        for _ in range(n_dec):
            (sa_wqkv, sa_bqkv, sa_wo, sa_bo, ln1g, ln1b,
             ca_wq, ca_bq, ca_wkv, ca_bkv, ca_wo, ca_bo,
             ln2g, ln2b, w1, b1, w2, b2, ln3g, ln3b) = take(nd)
            attn = _mha_self(y, self_bias, sa_wqkv, sa_bqkv, sa_wo, sa_bo,
                             num_heads, head_dim)
            y = _ln(y + attn, ln1g[...], ln1b[...])
            cattn = _mha_cross(y, mem_bf, skb, ca_wq, ca_bq, ca_wkv, ca_bkv,
                               ca_wo, ca_bo, num_heads, head_dim)
            y = _ln(y + cattn, ln2g[...], ln2b[...])
            ff = _ffn(y, w1, b1, w2, b2)
            y = _ln(y + ff, ln3g[...], ln3b[...])

        dng, dnb, ow, ob = take(4)
        y = _ln(y, dng[...], dnb[...])
        # final decoder LayerNorm fused with the lane-padded vocab projection;
        # (St, Vp) with Vp a multiple of 128 -> unmasked lane-dense stores.
        o_ref[...] = (jnp.dot(y.astype(jnp.bfloat16), ow[...],
                              preferred_element_type=jnp.float32)
                      + ob[...]).astype(o_ref.dtype)

    return kernel


# ------------------------------ pallas wrapper --------------------------------

def _weight_spec(arr):
    nd = arr.ndim
    # Grid-invariant weight block.  At production sizes, add
    # pipeline_mode=pl.Buffered(1) so the unused second pipeline buffer is not
    # allocated (VMEM budget matters on v7x's 64 MiB); negligible at this size.
    return pl.BlockSpec(arr.shape, lambda b, _n=nd: (0,) * _n)


def _flatten_params(params):
    flat = []
    for lp in params["encoder_layers"]:
        flat.extend(lp[k] for k in _ENC_KEYS)
    flat.extend((params["enc_norm_g"], params["enc_norm_b"]))
    for lp in params["decoder_layers"]:
        flat.extend(lp[k] for k in _DEC_KEYS)
    flat.extend((params["dec_norm_g"], params["dec_norm_b"],
                 params["out_w"], params["out_b"]))
    return flat


def transformer_forward(params, cfg, src_tok, tgt_tok):
    B, Ss = src_tok.shape
    _, St = tgt_tok.shape
    D = cfg["d_model"]
    H = cfg["num_heads"]
    Dh = D // H
    pad = cfg["pad_id"]
    V = cfg["vocab_size"]
    Vp = params["out_w"].shape[1]            # vocab padded to a multiple of 128

    # tiny per-batch additive key-padding biases (B, 1, S); expanded in-kernel
    src_kb = jnp.where(src_tok == pad, NEG, 0.0).astype(jnp.float32)[:, None, :]
    tgt_kb = jnp.where(tgt_tok == pad, NEG, 0.0).astype(jnp.float32)[:, None, :]

    # embedding lookup (gather) in plain JAX
    src = jnp.take(params["embedding"], src_tok, axis=0)      # (B, Ss, D)
    tgt = jnp.take(params["embedding"], tgt_tok, axis=0)      # (B, St, D)

    # Reproduces PositionalEncoding.forward on batch-first input: pe[:B] has
    # shape (B, 1, D) and broadcasts across the sequence axis.
    pe = params["pe"]
    src = src + pe[:B]
    tgt = tgt + pe[:B]

    flat = _flatten_params(params)
    kernel = _make_forward_kernel(len(params["encoder_layers"]),
                                  len(params["decoder_layers"]), H, Dh)

    in_specs = [
        pl.BlockSpec((pl.Squeezed(), Ss, D), lambda b: (b, 0, 0)),
        pl.BlockSpec((pl.Squeezed(), St, D), lambda b: (b, 0, 0)),
        pl.BlockSpec((pl.Squeezed(), 1, Ss), lambda b: (b, 0, 0)),
        pl.BlockSpec((pl.Squeezed(), 1, St), lambda b: (b, 0, 0)),
    ] + [_weight_spec(p) for p in flat]

    logits_p = pl.pallas_call(
        kernel,
        out_shape=jax.ShapeDtypeStruct((B, St, Vp), jnp.float32),
        grid=(B,),
        in_specs=in_specs,
        out_specs=pl.BlockSpec((pl.Squeezed(), St, Vp), lambda b: (b, 0, 0)),
        compiler_params=pltpu.CompilerParams(dimension_semantics=("parallel",)),
    )(src, tgt, src_kb, tgt_kb, *flat)

    return logits_p[:, :, :V]


# ------------------------------- parameter init -------------------------------

def positional_encoding_table(max_len, d_model):
    position = jnp.arange(max_len, dtype=jnp.float32)[:, None]
    div_term = jnp.exp(jnp.arange(0, d_model, 2, dtype=jnp.float32)
                       * (-math.log(10000.0) / d_model))
    pe = jnp.zeros((max_len, d_model), dtype=jnp.float32)
    pe = pe.at[:, 0::2].set(jnp.sin(position * div_term))
    pe = pe.at[:, 1::2].set(jnp.cos(position * div_term))
    return pe[:, None, :]          # (max_len, 1, d_model) == unsqueeze(0).transpose(0,1)


def _w(key, shape, scale=0.02):
    return scale * jax.random.normal(key, shape, jnp.float32)


def _self_attn_params(key, d_model, num_heads, prefix=""):
    dh = d_model // num_heads
    inv = 1.0 / math.sqrt(dh)
    kqkv, ko = jax.random.split(key)
    wqkv = _w(kqkv, (d_model, 3 * d_model))
    wqkv = wqkv.at[:, :d_model].multiply(inv)   # fold 1/sqrt(dh) into Wq
    wo = _w(ko, (num_heads, dh, d_model))       # stacked per-head out-proj
    return {
        prefix + "wqkv": wqkv.astype(jnp.bfloat16),
        prefix + "bqkv": jnp.zeros((1, 3 * d_model), jnp.float32),
        prefix + "wo": wo.astype(jnp.bfloat16),
        prefix + "bo": jnp.zeros((1, d_model), jnp.float32),
    }


def _cross_attn_params(key, d_model, num_heads, prefix="ca_"):
    dh = d_model // num_heads
    inv = 1.0 / math.sqrt(dh)
    kq, kkv, ko = jax.random.split(key, 3)
    wq = _w(kq, (d_model, d_model)) * inv       # fold 1/sqrt(dh) into Wq
    wkv = _w(kkv, (d_model, 2 * d_model))       # fused K/V projection of memory
    wo = _w(ko, (num_heads, dh, d_model))
    return {
        prefix + "wq": wq.astype(jnp.bfloat16),
        prefix + "bq": jnp.zeros((1, d_model), jnp.float32),
        prefix + "wkv": wkv.astype(jnp.bfloat16),
        prefix + "bkv": jnp.zeros((1, 2 * d_model), jnp.float32),
        prefix + "wo": wo.astype(jnp.bfloat16),
        prefix + "bo": jnp.zeros((1, d_model), jnp.float32),
    }


def _ffn_params(key, d_model, dim_ff):
    k1, k2 = jax.random.split(key)
    return {
        "w1": _w(k1, (d_model, dim_ff)).astype(jnp.bfloat16),
        "b1": jnp.zeros((1, dim_ff), jnp.float32),
        "w2": _w(k2, (dim_ff, d_model)).astype(jnp.bfloat16),
        "b2": jnp.zeros((1, d_model), jnp.float32),
    }


def _ln_params(d_model, prefix):
    return {prefix + "_g": jnp.ones((1, d_model), jnp.float32),
            prefix + "_b": jnp.zeros((1, d_model), jnp.float32)}


def init_params(key, vocab_size, d_model, dim_ff, n_enc, n_dec, num_heads,
                max_len=5000):
    keys = jax.random.split(key, 2 + n_enc + n_dec)
    vp = ((vocab_size + LANE - 1) // LANE) * LANE   # lane-padded vocab
    out_w = jnp.zeros((d_model, vp), jnp.float32)
    out_w = out_w.at[:, :vocab_size].set(_w(keys[1], (d_model, vocab_size)))
    params = {
        "embedding": jax.random.normal(keys[0], (vocab_size, d_model), jnp.float32),
        "pe": positional_encoding_table(max_len, d_model),
        "out_w": out_w.astype(jnp.bfloat16),
        "out_b": jnp.zeros((1, vp), jnp.float32),
    }
    enc_layers = []
    for i in range(n_enc):
        ka, kf = jax.random.split(keys[2 + i])
        lp = {}
        lp.update(_self_attn_params(ka, d_model, num_heads))
        lp.update(_ffn_params(kf, d_model, dim_ff))
        lp.update(_ln_params(d_model, "ln1"))
        lp.update(_ln_params(d_model, "ln2"))
        enc_layers.append(lp)
    dec_layers = []
    for i in range(n_dec):
        ka, kc, kf = jax.random.split(keys[2 + n_enc + i], 3)
        lp = {}
        lp.update(_self_attn_params(ka, d_model, num_heads, prefix="sa_"))
        lp.update(_cross_attn_params(kc, d_model, num_heads, prefix="ca_"))
        lp.update(_ffn_params(kf, d_model, dim_ff))
        lp.update(_ln_params(d_model, "ln1"))
        lp.update(_ln_params(d_model, "ln2"))
        lp.update(_ln_params(d_model, "ln3"))
        dec_layers.append(lp)
    params["encoder_layers"] = enc_layers
    params["decoder_layers"] = dec_layers
    params.update(_ln_params(d_model, "enc_norm"))
    params.update(_ln_params(d_model, "dec_norm"))
    return params


# ------------------------------------ main ------------------------------------

if __name__ == "__main__":
    cfg = {"vocab_size": 50, "d_model": 32, "num_heads": 4, "dim_ff": 64,
           "encoder_layers": 2, "decoder_layers": 2, "pad_id": 0}

    key = jax.random.PRNGKey(0)
    kp, ks, kt = jax.random.split(key, 3)
    params = init_params(kp, cfg["vocab_size"], cfg["d_model"], cfg["dim_ff"],
                         cfg["encoder_layers"], cfg["decoder_layers"],
                         cfg["num_heads"])

    B, Ss, St = 2, 8, 8
    # tokens in [1, vocab); add a couple of explicit pad tokens (id 0)
    src = jax.random.randint(ks, (B, Ss), 1, cfg["vocab_size"], dtype=jnp.int32)
    tgt = jax.random.randint(kt, (B, St), 1, cfg["vocab_size"], dtype=jnp.int32)
    src = src.at[0, -1].set(cfg["pad_id"])
    tgt = tgt.at[1, -2:].set(cfg["pad_id"])

    fwd = jax.jit(lambda p, s, t: transformer_forward(p, cfg, s, t))
    logits = jax.block_until_ready(fwd(params, src, tgt))

    assert logits.shape == (B, St, cfg["vocab_size"])
    assert bool(jnp.all(jnp.isfinite(logits)))
    print("KERNEL_OK")
</pallas_src>

<mosaic_0001>
module attributes {stable_mosaic.version = 11 : i64} {
  func.func @kernel(%arg0: i32, %arg1: memref<1x8x32xf32, #tpu.memory_space<vmem>>, %arg2: memref<1x8x32xf32, #tpu.memory_space<vmem>>, %arg3: memref<1x1x8xf32, #tpu.memory_space<vmem>>, %arg4: memref<1x1x8xf32, #tpu.memory_space<vmem>>, %arg5: memref<32x96xbf16, #tpu.memory_space<vmem>>, %arg6: memref<1x96xf32, #tpu.memory_space<vmem>>, %arg7: memref<4x8x32xbf16, #tpu.memory_space<vmem>>, %arg8: memref<1x32xf32, #tpu.memory_space<vmem>>, %arg9: memref<1x32xf32, #tpu.memory_space<vmem>>, %arg10: memref<1x32xf32, #tpu.memory_space<vmem>>, %arg11: memref<32x64xbf16, #tpu.memory_space<vmem>>, %arg12: memref<1x64xf32, #tpu.memory_space<vmem>>, %arg13: memref<64x32xbf16, #tpu.memory_space<vmem>>, %arg14: memref<1x32xf32, #tpu.memory_space<vmem>>, %arg15: memref<1x32xf32, #tpu.memory_space<vmem>>, %arg16: memref<1x32xf32, #tpu.memory_space<vmem>>, %arg17: memref<32x96xbf16, #tpu.memory_space<vmem>>, %arg18: memref<1x96xf32, #tpu.memory_space<vmem>>, %arg19: memref<4x8x32xbf16, #tpu.memory_space<vmem>>, %arg20: memref<1x32xf32, #tpu.memory_space<vmem>>, %arg21: memref<1x32xf32, #tpu.memory_space<vmem>>, %arg22: memref<1x32xf32, #tpu.memory_space<vmem>>, %arg23: memref<32x64xbf16, #tpu.memory_space<vmem>>, %arg24: memref<1x64xf32, #tpu.memory_space<vmem>>, %arg25: memref<64x32xbf16, #tpu.memory_space<vmem>>, %arg26: memref<1x32xf32, #tpu.memory_space<vmem>>, %arg27: memref<1x32xf32, #tpu.memory_space<vmem>>, %arg28: memref<1x32xf32, #tpu.memory_space<vmem>>, %arg29: memref<1x32xf32, #tpu.memory_space<vmem>>, %arg30: memref<1x32xf32, #tpu.memory_space<vmem>>, %arg31: memref<32x96xbf16, #tpu.memory_space<vmem>>, %arg32: memref<1x96xf32, #tpu.memory_space<vmem>>, %arg33: memref<4x8x32xbf16, #tpu.memory_space<vmem>>, %arg34: memref<1x32xf32, #tpu.memory_space<vmem>>, %arg35: memref<1x32xf32, #tpu.memory_space<vmem>>, %arg36: memref<1x32xf32, #tpu.memory_space<vmem>>, %arg37: memref<32x32xbf16, #tpu.memory_space<vmem>>, %arg38: memref<1x32xf32, #tpu.memory_space<vmem>>, %arg39: memref<32x64xbf16, #tpu.memory_space<vmem>>, %arg40: memref<1x64xf32, #tpu.memory_space<vmem>>, %arg41: memref<4x8x32xbf16, #tpu.memory_space<vmem>>, %arg42: memref<1x32xf32, #tpu.memory_space<vmem>>, %arg43: memref<1x32xf32, #tpu.memory_space<vmem>>, %arg44: memref<1x32xf32, #tpu.memory_space<vmem>>, %arg45: memref<32x64xbf16, #tpu.memory_space<vmem>>, %arg46: memref<1x64xf32, #tpu.memory_space<vmem>>, %arg47: memref<64x32xbf16, #tpu.memory_space<vmem>>, %arg48: memref<1x32xf32, #tpu.memory_space<vmem>>, %arg49: memref<1x32xf32, #tpu.memory_space<vmem>>, %arg50: memref<1x32xf32, #tpu.memory_space<vmem>>, %arg51: memref<32x96xbf16, #tpu.memory_space<vmem>>, %arg52: memref<1x96xf32, #tpu.memory_space<vmem>>, %arg53: memref<4x8x32xbf16, #tpu.memory_space<vmem>>, %arg54: memref<1x32xf32, #tpu.memory_space<vmem>>, %arg55: memref<1x32xf32, #tpu.memory_space<vmem>>, %arg56: memref<1x32xf32, #tpu.memory_space<vmem>>, %arg57: memref<32x32xbf16, #tpu.memory_space<vmem>>, %arg58: memref<1x32xf32, #tpu.memory_space<vmem>>, %arg59: memref<32x64xbf16, #tpu.memory_space<vmem>>, %arg60: memref<1x64xf32, #tpu.memory_space<vmem>>, %arg61: memref<4x8x32xbf16, #tpu.memory_space<vmem>>, %arg62: memref<1x32xf32, #tpu.memory_space<vmem>>, %arg63: memref<1x32xf32, #tpu.memory_space<vmem>>, %arg64: memref<1x32xf32, #tpu.memory_space<vmem>>, %arg65: memref<32x64xbf16, #tpu.memory_space<vmem>>, %arg66: memref<1x64xf32, #tpu.memory_space<vmem>>, %arg67: memref<64x32xbf16, #tpu.memory_space<vmem>>, %arg68: memref<1x32xf32, #tpu.memory_space<vmem>>, %arg69: memref<1x32xf32, #tpu.memory_space<vmem>>, %arg70: memref<1x32xf32, #tpu.memory_space<vmem>>, %arg71: memref<1x32xf32, #tpu.memory_space<vmem>>, %arg72: memref<1x32xf32, #tpu.memory_space<vmem>>, %arg73: memref<32x128xbf16, #tpu.memory_space<vmem>>, %arg74: memref<1x128xf32, #tpu.memory_space<vmem>>, %arg75: memref<1x8x128xf32, #tpu.memory_space<vmem>>) attributes {dimension_semantics = [#tpu.dimension_semantics<parallel>], iteration_bounds = array<i64: 2>, scalar_prefetch = 0 : i64, scratch_operands = 0 : i64, tpu.core_type = #tpu.core_type<tc>, window_params = [{transform_indices = @transform_0, window_bounds = array<i64: 1, 8, 32>}, {transform_indices = @transform_1, window_bounds = array<i64: 1, 8, 32>}, {transform_indices = @transform_2, window_bounds = array<i64: 1, 1, 8>}, {transform_indices = @transform_3, window_bounds = array<i64: 1, 1, 8>}, {pipeline_mode = #tpu.pipeline_mode<synchronous>, transform_indices = @transform_4, window_bounds = array<i64: 32, 96>}, {pipeline_mode = #tpu.pipeline_mode<synchronous>, transform_indices = @transform_5, window_bounds = array<i64: 1, 96>}, {pipeline_mode = #tpu.pipeline_mode<synchronous>, transform_indices = @transform_6, window_bounds = array<i64: 4, 8, 32>}, {pipeline_mode = #tpu.pipeline_mode<synchronous>, transform_indices = @transform_7, window_bounds = array<i64: 1, 32>}, {pipeline_mode = #tpu.pipeline_mode<synchronous>, transform_indices = @transform_8, window_bounds = array<i64: 1, 32>}, {pipeline_mode = #tpu.pipeline_mode<synchronous>, transform_indices = @transform_9, window_bounds = array<i64: 1, 32>}, {pipeline_mode = #tpu.pipeline_mode<synchronous>, transform_indices = @transform_10, window_bounds = array<i64: 32, 64>}, {pipeline_mode = #tpu.pipeline_mode<synchronous>, transform_indices = @transform_11, window_bounds = array<i64: 1, 64>}, {pipeline_mode = #tpu.pipeline_mode<synchronous>, transform_indices = @transform_12, window_bounds = array<i64: 64, 32>}, {pipeline_mode = #tpu.pipeline_mode<synchronous>, transform_indices = @transform_13, window_bounds = array<i64: 1, 32>}, {pipeline_mode = #tpu.pipeline_mode<synchronous>, transform_indices = @transform_14, window_bounds = array<i64: 1, 32>}, {pipeline_mode = #tpu.pipeline_mode<synchronous>, transform_indices = @transform_15, window_bounds = array<i64: 1, 32>}, {pipeline_mode = #tpu.pipeline_mode<synchronous>, transform_indices = @transform_16, window_bounds = array<i64: 32, 96>}, {pipeline_mode = #tpu.pipeline_mode<synchronous>, transform_indices = @transform_17, window_bounds = array<i64: 1, 96>}, {pipeline_mode = #tpu.pipeline_mode<synchronous>, transform_indices = @transform_18, window_bounds = array<i64: 4, 8, 32>}, {pipeline_mode = #tpu.pipeline_mode<synchronous>, transform_indices = @transform_19, window_bounds = array<i64: 1, 32>}, {pipeline_mode = #tpu.pipeline_mode<synchronous>, transform_indices = @transform_20, window_bounds = array<i64: 1, 32>}, {pipeline_mode = #tpu.pipeline_mode<synchronous>, transform_indices = @transform_21, window_bounds = array<i64: 1, 32>}, {pipeline_mode = #tpu.pipeline_mode<synchronous>, transform_indices = @transform_22, window_bounds = array<i64: 32, 64>}, {pipeline_mode = #tpu.pipeline_mode<synchronous>, transform_indices = @transform_23, window_bounds = array<i64: 1, 64>}, {pipeline_mode = #tpu.pipeline_mode<synchronous>, transform_indices = @transform_24, window_bounds = array<i64: 64, 32>}, {pipeline_mode = #tpu.pipeline_mode<synchronous>, transform_indices = @transform_25, window_bounds = array<i64: 1, 32>}, {pipeline_mode = #tpu.pipeline_mode<synchronous>, transform_indices = @transform_26, window_bounds = array<i64: 1, 32>}, {pipeline_mode = #tpu.pipeline_mode<synchronous>, transform_indices = @transform_27, window_bounds = array<i64: 1, 32>}, {pipeline_mode = #tpu.pipeline_mode<synchronous>, transform_indices = @transform_28, window_bounds = array<i64: 1, 32>}, {pipeline_mode = #tpu.pipeline_mode<synchronous>, transform_indices = @transform_29, window_bounds = array<i64: 1, 32>}, {pipeline_mode = #tpu.pipeline_mode<synchronous>, transform_indices = @transform_30, window_bounds = array<i64: 32, 96>}, {pipeline_mode = #tpu.pipeline_mode<synchronous>, transform_indices = @transform_31, window_bounds = array<i64: 1, 96>}, {pipeline_mode = #tpu.pipeline_mode<synchronous>, transform_indices = @transform_32, window_bounds = array<i64: 4, 8, 32>}, {pipeline_mode = #tpu.pipeline_mode<synchronous>, transform_indices = @transform_33, window_bounds = array<i64: 1, 32>}, {pipeline_mode = #tpu.pipeline_mode<synchronous>, transform_indices = @transform_34, window_bounds = array<i64: 1, 32>}, {pipeline_mode = #tpu.pipeline_mode<synchronous>, transform_indices = @transform_35, window_bounds = array<i64: 1, 32>}, {pipeline_mode = #tpu.pipeline_mode<synchronous>, transform_indices = @transform_36, window_bounds = array<i64: 32, 32>}, {pipeline_mode = #tpu.pipeline_mode<synchronous>, transform_indices = @transform_37, window_bounds = array<i64: 1, 32>}, {pipeline_mode = #tpu.pipeline_mode<synchronous>, transform_indices = @transform_38, window_bounds = array<i64: 32, 64>}, {pipeline_mode = #tpu.pipeline_mode<synchronous>, transform_indices = @transform_39, window_bounds = array<i64: 1, 64>}, {pipeline_mode = #tpu.pipeline_mode<synchronous>, transform_indices = @transform_40, window_bounds = array<i64: 4, 8, 32>}, {pipeline_mode = #tpu.pipeline_mode<synchronous>, transform_indices = @transform_41, window_bounds = array<i64: 1, 32>}, {pipeline_mode = #tpu.pipeline_mode<synchronous>, transform_indices = @transform_42, window_bounds = array<i64: 1, 32>}, {pipeline_mode = #tpu.pipeline_mode<synchronous>, transform_indices = @transform_43, window_bounds = array<i64: 1, 32>}, {pipeline_mode = #tpu.pipeline_mode<synchronous>, transform_indices = @transform_44, window_bounds = array<i64: 32, 64>}, {pipeline_mode = #tpu.pipeline_mode<synchronous>, transform_indices = @transform_45, window_bounds = array<i64: 1, 64>}, {pipeline_mode = #tpu.pipeline_mode<synchronous>, transform_indices = @transform_46, window_bounds = array<i64: 64, 32>}, {pipeline_mode = #tpu.pipeline_mode<synchronous>, transform_indices = @transform_47, window_bounds = array<i64: 1, 32>}, {pipeline_mode = #tpu.pipeline_mode<synchronous>, transform_indices = @transform_48, window_bounds = array<i64: 1, 32>}, {pipeline_mode = #tpu.pipeline_mode<synchronous>, transform_indices = @transform_49, window_bounds = array<i64: 1, 32>}, {pipeline_mode = #tpu.pipeline_mode<synchronous>, transform_indices = @transform_50, window_bounds = array<i64: 32, 96>}, {pipeline_mode = #tpu.pipeline_mode<synchronous>, transform_indices = @transform_51, window_bounds = array<i64: 1, 96>}, {pipeline_mode = #tpu.pipeline_mode<synchronous>, transform_indices = @transform_52, window_bounds = array<i64: 4, 8, 32>}, {pipeline_mode = #tpu.pipeline_mode<synchronous>, transform_indices = @transform_53, window_bounds = array<i64: 1, 32>}, {pipeline_mode = #tpu.pipeline_mode<synchronous>, transform_indices = @transform_54, window_bounds = array<i64: 1, 32>}, {pipeline_mode = #tpu.pipeline_mode<synchronous>, transform_indices = @transform_55, window_bounds = array<i64: 1, 32>}, {pipeline_mode = #tpu.pipeline_mode<synchronous>, transform_indices = @transform_56, window_bounds = array<i64: 32, 32>}, {pipeline_mode = #tpu.pipeline_mode<synchronous>, transform_indices = @transform_57, window_bounds = array<i64: 1, 32>}, {pipeline_mode = #tpu.pipeline_mode<synchronous>, transform_indices = @transform_58, window_bounds = array<i64: 32, 64>}, {pipeline_mode = #tpu.pipeline_mode<synchronous>, transform_indices = @transform_59, window_bounds = array<i64: 1, 64>}, {pipeline_mode = #tpu.pipeline_mode<synchronous>, transform_indices = @transform_60, window_bounds = array<i64: 4, 8, 32>}, {pipeline_mode = #tpu.pipeline_mode<synchronous>, transform_indices = @transform_61, window_bounds = array<i64: 1, 32>}, {pipeline_mode = #tpu.pipeline_mode<synchronous>, transform_indices = @transform_62, window_bounds = array<i64: 1, 32>}, {pipeline_mode = #tpu.pipeline_mode<synchronous>, transform_indices = @transform_63, window_bounds = array<i64: 1, 32>}, {pipeline_mode = #tpu.pipeline_mode<synchronous>, transform_indices = @transform_64, window_bounds = array<i64: 32, 64>}, {pipeline_mode = #tpu.pipeline_mode<synchronous>, transform_indices = @transform_65, window_bounds = array<i64: 1, 64>}, {pipeline_mode = #tpu.pipeline_mode<synchronous>, transform_indices = @transform_66, window_bounds = array<i64: 64, 32>}, {pipeline_mode = #tpu.pipeline_mode<synchronous>, transform_indices = @transform_67, window_bounds = array<i64: 1, 32>}, {pipeline_mode = #tpu.pipeline_mode<synchronous>, transform_indices = @transform_68, window_bounds = array<i64: 1, 32>}, {pipeline_mode = #tpu.pipeline_mode<synchronous>, transform_indices = @transform_69, window_bounds = array<i64: 1, 32>}, {pipeline_mode = #tpu.pipeline_mode<synchronous>, transform_indices = @transform_70, window_bounds = array<i64: 1, 32>}, {pipeline_mode = #tpu.pipeline_mode<synchronous>, transform_indices = @transform_71, window_bounds = array<i64: 1, 32>}, {pipeline_mode = #tpu.pipeline_mode<synchronous>, transform_indices = @transform_72, window_bounds = array<i64: 32, 128>}, {pipeline_mode = #tpu.pipeline_mode<synchronous>, transform_indices = @transform_73, window_bounds = array<i64: 1, 128>}, {transform_indices = @transform_74, window_bounds = array<i64: 1, 8, 128>}]} {
    %c0 = arith.constant 0 : index
    %c0_0 = arith.constant 0 : index
    %c0_1 = arith.constant 0 : index
    %0 = vector.load %arg1[%c0, %c0_0, %c0_1] : memref<1x8x32xf32, #tpu.memory_space<vmem>>, vector<1x8x32xf32>
    %1 = vector.shape_cast %0 : vector<1x8x32xf32> to vector<8x32xf32>
    %c0_2 = arith.constant 0 : index
    %c0_3 = arith.constant 0 : index
    %c0_4 = arith.constant 0 : index
    %2 = vector.load %arg2[%c0_2, %c0_3, %c0_4] : memref<1x8x32xf32, #tpu.memory_space<vmem>>, vector<1x8x32xf32>
    %3 = vector.shape_cast %2 : vector<1x8x32xf32> to vector<8x32xf32>
    %c0_5 = arith.constant 0 : index
    %c0_6 = arith.constant 0 : index
    %c0_7 = arith.constant 0 : index
    %4 = vector.load %arg3[%c0_5, %c0_6, %c0_7] : memref<1x1x8xf32, #tpu.memory_space<vmem>>, vector<1x1x8xf32>
    %5 = vector.shape_cast %4 : vector<1x1x8xf32> to vector<1x8xf32>
    %c0_8 = arith.constant 0 : index
    %c0_9 = arith.constant 0 : index
    %c0_10 = arith.constant 0 : index
    %6 = vector.load %arg4[%c0_8, %c0_9, %c0_10] : memref<1x1x8xf32, #tpu.memory_space<vmem>>, vector<1x1x8xf32>
    %7 = vector.shape_cast %6 : vector<1x1x8xf32> to vector<1x8xf32>
    %8 = arith.truncf %1 : vector<8x32xf32> to vector<8x32xbf16>
    %c0_11 = arith.constant 0 : index
    %c0_12 = arith.constant 0 : index
    %9 = vector.load %arg5[%c0_11, %c0_12] : memref<32x96xbf16, #tpu.memory_space<vmem>>, vector<32x96xbf16>
    %cst = arith.constant dense<0.000000e+00> : vector<8x96xf32>
    %10 = tpu.matmul %8, %9, %cst {dimension_numbers = #tpu.dot_dimension_numbers<[1], [0], [0], [1], [0, 0, 1, 1], [], []>} : vector<8x32xbf16>, vector<32x96xbf16>, vector<8x96xf32> -> vector<8x96xf32>
    %c0_13 = arith.constant 0 : index
    %c0_14 = arith.constant 0 : index
    %11 = vector.load %arg6[%c0_13, %c0_14] : memref<1x96xf32, #tpu.memory_space<vmem>>, vector<1x96xf32>
    %12 = vector.broadcast %11 : vector<1x96xf32> to vector<8x96xf32>
    %13 = arith.addf %10, %12 : vector<8x96xf32>
    %14 = vector.extract_strided_slice %13 {offsets = [0, 0], sizes = [8, 32], strides = [1, 1]} : vector<8x96xf32> to vector<8x32xf32>
    %15 = vector.extract_strided_slice %13 {offsets = [0, 32], sizes = [8, 32], strides = [1, 1]} : vector<8x96xf32> to vector<8x32xf32>
    %16 = vector.extract_strided_slice %13 {offsets = [0, 64], sizes = [8, 32], strides = [1, 1]} : vector<8x96xf32> to vector<8x32xf32>
    %cst_15 = arith.constant 0.000000e+00 : f32
    %17 = vector.broadcast %cst_15 : f32 to vector<8x32xf32>
    %18 = vector.extract_strided_slice %14 {offsets = [0, 0], sizes = [8, 8], strides = [1, 1]} : vector<8x32xf32> to vector<8x8xf32>
    %19 = arith.truncf %18 : vector<8x8xf32> to vector<8x8xbf16>
    %20 = vector.extract_strided_slice %15 {offsets = [0, 0], sizes = [8, 8], strides = [1, 1]} : vector<8x32xf32> to vector<8x8xf32>
    %21 = arith.truncf %20 : vector<8x8xf32> to vector<8x8xbf16>
    %22 = vector.extract_strided_slice %16 {offsets = [0, 0], sizes = [8, 8], strides = [1, 1]} : vector<8x32xf32> to vector<8x8xf32>
    %23 = arith.truncf %22 : vector<8x8xf32> to vector<8x8xbf16>
    %cst_16 = arith.constant dense<0.000000e+00> : vector<8x8xf32>
    %24 = tpu.matmul %19, %21, %cst_16 {dimension_numbers = #tpu.dot_dimension_numbers<[1], [1], [0], [0], [0, 0, 1, 0], [], []>} : vector<8x8xbf16>, vector<8x8xbf16>, vector<8x8xf32> -> vector<8x8xf32>
    %25 = vector.broadcast %5 : vector<1x8xf32> to vector<8x8xf32>
    %26 = arith.addf %24, %25 : vector<8x8xf32>
    %cst_17 = arith.constant dense<0xFF800000> : vector<8xf32>
    %27 = vector.multi_reduction <maximumf>, %26, %cst_17 [1] : vector<8x8xf32> to vector<8xf32>
    %28 = vector.shape_cast %27 : vector<8xf32> to vector<8x1xf32>
    %29 = vector.broadcast %28 : vector<8x1xf32> to vector<8x8xf32>
    %30 = arith.subf %26, %29 : vector<8x8xf32>
    %31 = math.exp %30 : vector<8x8xf32>
    %cst_18 = arith.constant dense<0.000000e+00> : vector<8xf32>
    %32 = vector.multi_reduction <add>, %31, %cst_18 [1] : vector<8x8xf32> to vector<8xf32>
    %33 = vector.shape_cast %32 : vector<8xf32> to vector<8x1xf32>
    %34 = tpu.reciprocal %33 {approx = true} : vector<8x1xf32> -> vector<8x1xf32>
    %35 = vector.broadcast %34 : vector<8x1xf32> to vector<8x8xf32>
    %36 = arith.mulf %31, %35 : vector<8x8xf32>
    %37 = arith.truncf %36 : vector<8x8xf32> to vector<8x8xbf16>
    %cst_19 = arith.constant dense<0.000000e+00> : vector<8x8xf32>
    %38 = tpu.matmul %37, %23, %cst_19 {dimension_numbers = #tpu.dot_dimension_numbers<[1], [0], [0], [1], [0, 0, 1, 1], [], []>} : vector<8x8xbf16>, vector<8x8xbf16>, vector<8x8xf32> -> vector<8x8xf32>
    %39 = arith.truncf %38 : vector<8x8xf32> to vector<8x8xbf16>
    %c0_20 = arith.constant 0 : index
    %c0_21 = arith.constant 0 : index
    %c0_22 = arith.constant 0 : index
    %40 = vector.load %arg7[%c0_20, %c0_21, %c0_22] : memref<4x8x32xbf16, #tpu.memory_space<vmem>>, vector<1x8x32xbf16>
    %41 = vector.shape_cast %40 : vector<1x8x32xbf16> to vector<8x32xbf16>
    %cst_23 = arith.constant dense<0.000000e+00> : vector<8x32xf32>
    %42 = tpu.matmul %39, %41, %cst_23 {dimension_numbers = #tpu.dot_dimension_numbers<[1], [0], [0], [1], [0, 0, 1, 1], [], []>} : vector<8x8xbf16>, vector<8x32xbf16>, vector<8x32xf32> -> vector<8x32xf32>
    %43 = arith.addf %17, %42 : vector<8x32xf32>
    %44 = vector.extract_strided_slice %14 {offsets = [0, 8], sizes = [8, 8], strides = [1, 1]} : vector<8x32xf32> to vector<8x8xf32>
    %45 = arith.truncf %44 : vector<8x8xf32> to vector<8x8xbf16>
    %46 = vector.extract_strided_slice %15 {offsets = [0, 8], sizes = [8, 8], strides = [1, 1]} : vector<8x32xf32> to vector<8x8xf32>
    %47 = arith.truncf %46 : vector<8x8xf32> to vector<8x8xbf16>
    %48 = vector.extract_strided_slice %16 {offsets = [0, 8], sizes = [8, 8], strides = [1, 1]} : vector<8x32xf32> to vector<8x8xf32>
    %49 = arith.truncf %48 : vector<8x8xf32> to vector<8x8xbf16>
    %cst_24 = arith.constant dense<0.000000e+00> : vector<8x8xf32>
    %50 = tpu.matmul %45, %47, %cst_24 {dimension_numbers = #tpu.dot_dimension_numbers<[1], [1], [0], [0], [0, 0, 1, 0], [], []>} : vector<8x8xbf16>, vector<8x8xbf16>, vector<8x8xf32> -> vector<8x8xf32>
    %51 = vector.broadcast %5 : vector<1x8xf32> to vector<8x8xf32>
    %52 = arith.addf %50, %51 : vector<8x8xf32>
    %cst_25 = arith.constant dense<0xFF800000> : vector<8xf32>
    %53 = vector.multi_reduction <maximumf>, %52, %cst_25 [1] : vector<8x8xf32> to vector<8xf32>
    %54 = vector.shape_cast %53 : vector<8xf32> to vector<8x1xf32>
    %55 = vector.broadcast %54 : vector<8x1xf32> to vector<8x8xf32>
    %56 = arith.subf %52, %55 : vector<8x8xf32>
    %57 = math.exp %56 : vector<8x8xf32>
    %cst_26 = arith.constant dense<0.000000e+00> : vector<8xf32>
    %58 = vector.multi_reduction <add>, %57, %cst_26 [1] : vector<8x8xf32> to vector<8xf32>
    %59 = vector.shape_cast %58 : vector<8xf32> to vector<8x1xf32>
    %60 = tpu.reciprocal %59 {approx = true} : vector<8x1xf32> -> vector<8x1xf32>
    %61 = vector.broadcast %60 : vector<8x1xf32> to vector<8x8xf32>
    %62 = arith.mulf %57, %61 : vector<8x8xf32>
    %63 = arith.truncf %62 : vector<8x8xf32> to vector<8x8xbf16>
    %cst_27 = arith.constant dense<0.000000e+00> : vector<8x8xf32>
    %64 = tpu.matmul %63, %49, %cst_27 {dimension_numbers = #tpu.dot_dimension_numbers<[1], [0], [0], [1], [0, 0, 1, 1], [], []>} : vector<8x8xbf16>, vector<8x8xbf16>, vector<8x8xf32> -> vector<8x8xf32>
    %65 = arith.truncf %64 : vector<8x8xf32> to vector<8x8xbf16>
    %c1 = arith.constant 1 : index
    %c0_28 = arith.constant 0 : index
    %c0_29 = arith.constant 0 : index
    %66 = vector.load %arg7[%c1, %c0_28, %c0_29] : memref<4x8x32xbf16, #tpu.memory_space<vmem>>, vector<1x8x32xbf16>
    %67 = vector.shape_cast %66 : vector<1x8x32xbf16> to vector<8x32xbf16>
    %cst_30 = arith.constant dense<0.000000e+00> : vector<8x32xf32>
    %68 = tpu.matmul %65, %67, %cst_30 {dimension_numbers = #tpu.dot_dimension_numbers<[1], [0], [0], [1], [0, 0, 1, 1], [], []>} : vector<8x8xbf16>, vector<8x32xbf16>, vector<8x32xf32> -> vector<8x32xf32>
    %69 = arith.addf %43, %68 : vector<8x32xf32>
    %70 = vector.extract_strided_slice %14 {offsets = [0, 16], sizes = [8, 8], strides = [1, 1]} : vector<8x32xf32> to vector<8x8xf32>
    %71 = arith.truncf %70 : vector<8x8xf32> to vector<8x8xbf16>
    %72 = vector.extract_strided_slice %15 {offsets = [0, 16], sizes = [8, 8], strides = [1, 1]} : vector<8x32xf32> to vector<8x8xf32>
    %73 = arith.truncf %72 : vector<8x8xf32> to vector<8x8xbf16>
    %74 = vector.extract_strided_slice %16 {offsets = [0, 16], sizes = [8, 8], strides = [1, 1]} : vector<8x32xf32> to vector<8x8xf32>
    %75 = arith.truncf %74 : vector<8x8xf32> to vector<8x8xbf16>
    %cst_31 = arith.constant dense<0.000000e+00> : vector<8x8xf32>
    %76 = tpu.matmul %71, %73, %cst_31 {dimension_numbers = #tpu.dot_dimension_numbers<[1], [1], [0], [0], [0, 0, 1, 0], [], []>} : vector<8x8xbf16>, vector<8x8xbf16>, vector<8x8xf32> -> vector<8x8xf32>
    %77 = vector.broadcast %5 : vector<1x8xf32> to vector<8x8xf32>
    %78 = arith.addf %76, %77 : vector<8x8xf32>
    %cst_32 = arith.constant dense<0xFF800000> : vector<8xf32>
    %79 = vector.multi_reduction <maximumf>, %78, %cst_32 [1] : vector<8x8xf32> to vector<8xf32>
    %80 = vector.shape_cast %79 : vector<8xf32> to vector<8x1xf32>
    %81 = vector.broadcast %80 : vector<8x1xf32> to vector<8x8xf32>
    %82 = arith.subf %78, %81 : vector<8x8xf32>
    %83 = math.exp %82 : vector<8x8xf32>
    %cst_33 = arith.constant dense<0.000000e+00> : vector<8xf32>
    %84 = vector.multi_reduction <add>, %83, %cst_33 [1] : vector<8x8xf32> to vector<8xf32>
    %85 = vector.shape_cast %84 : vector<8xf32> to vector<8x1xf32>
    %86 = tpu.reciprocal %85 {approx = true} : vector<8x1xf32> -> vector<8x1xf32>
    %87 = vector.broadcast %86 : vector<8x1xf32> to vector<8x8xf32>
    %88 = arith.mulf %83, %87 : vector<8x8xf32>
    %89 = arith.truncf %88 : vector<8x8xf32> to vector<8x8xbf16>
    %cst_34 = arith.constant dense<0.000000e+00> : vector<8x8xf32>
    %90 = tpu.matmul %89, %75, %cst_34 {dimension_numbers = #tpu.dot_dimension_numbers<[1], [0], [0], [1], [0, 0, 1, 1], [], []>} : vector<8x8xbf16>, vector<8x8xbf16>, vector<8x8xf32> -> vector<8x8xf32>
    %91 = arith.truncf %90 : vector<8x8xf32> to vector<8x8xbf16>
    %c2 = arith.constant 2 : index
    %c0_35 = arith.constant 0 : index
    %c0_36 = arith.constant 0 : index
    %92 = vector.load %arg7[%c2, %c0_35, %c0_36] : memref<4x8x32xbf16, #tpu.memory_space<vmem>>, vector<1x8x32xbf16>
    %93 = vector.shape_cast %92 : vector<1x8x32xbf16> to vector<8x32xbf16>
    %cst_37 = arith.constant dense<0.000000e+00> : vector<8x32xf32>
    %94 = tpu.matmul %91, %93, %cst_37 {dimension_numbers = #tpu.dot_dimension_numbers<[1], [0], [0], [1], [0, 0, 1, 1], [], []>} : vector<8x8xbf16>, vector<8x32xbf16>, vector<8x32xf32> -> vector<8x32xf32>
    %95 = arith.addf %69, %94 : vector<8x32xf32>
    %96 = vector.extract_strided_slice %14 {offsets = [0, 24], sizes = [8, 8], strides = [1, 1]} : vector<8x32xf32> to vector<8x8xf32>
    %97 = arith.truncf %96 : vector<8x8xf32> to vector<8x8xbf16>
    %98 = vector.extract_strided_slice %15 {offsets = [0, 24], sizes = [8, 8], strides = [1, 1]} : vector<8x32xf32> to vector<8x8xf32>
    %99 = arith.truncf %98 : vector<8x8xf32> to vector<8x8xbf16>
    %100 = vector.extract_strided_slice %16 {offsets = [0, 24], sizes = [8, 8], strides = [1, 1]} : vector<8x32xf32> to vector<8x8xf32>
    %101 = arith.truncf %100 : vector<8x8xf32> to vector<8x8xbf16>
    %cst_38 = arith.constant dense<0.000000e+00> : vector<8x8xf32>
    %102 = tpu.matmul %97, %99, %cst_38 {dimension_numbers = #tpu.dot_dimension_numbers<[1], [1], [0], [0], [0, 0, 1, 0], [], []>} : vector<8x8xbf16>, vector<8x8xbf16>, vector<8x8xf32> -> vector<8x8xf32>
    %103 = vector.broadcast %5 : vector<1x8xf32> to vector<8x8xf32>
    %104 = arith.addf %102, %103 : vector<8x8xf32>
    %cst_39 = arith.constant dense<0xFF800000> : vector<8xf32>
    %105 = vector.multi_reduction <maximumf>, %104, %cst_39 [1] : vector<8x8xf32> to vector<8xf32>
    %106 = vector.shape_cast %105 : vector<8xf32> to vector<8x1xf32>
    %107 = vector.broadcast %106 : vector<8x1xf32> to vector<8x8xf32>
    %108 = arith.subf %104, %107 : vector<8x8xf32>
    %109 = math.exp %108 : vector<8x8xf32>
    %cst_40 = arith.constant dense<0.000000e+00> : vector<8xf32>
    %110 = vector.multi_reduction <add>, %109, %cst_40 [1] : vector<8x8xf32> to vector<8xf32>
    %111 = vector.shape_cast %110 : vector<8xf32> to vector<8x1xf32>
    %112 = tpu.reciprocal %111 {approx = true} : vector<8x1xf32> -> vector<8x1xf32>
    %113 = vector.broadcast %112 : vector<8x1xf32> to vector<8x8xf32>
    %114 = arith.mulf %109, %113 : vector<8x8xf32>
    %115 = arith.truncf %114 : vector<8x8xf32> to vector<8x8xbf16>
    %cst_41 = arith.constant dense<0.000000e+00> : vector<8x8xf32>
    %116 = tpu.matmul %115, %101, %cst_41 {dimension_numbers = #tpu.dot_dimension_numbers<[1], [0], [0], [1], [0, 0, 1, 1], [], []>} : vector<8x8xbf16>, vector<8x8xbf16>, vector<8x8xf32> -> vector<8x8xf32>
    %117 = arith.truncf %116 : vector<8x8xf32> to vector<8x8xbf16>
    %c3 = arith.constant 3 : index
    %c0_42 = arith.constant 0 : index
    %c0_43 = arith.constant 0 : index
    %118 = vector.load %arg7[%c3, %c0_42, %c0_43] : memref<4x8x32xbf16, #tpu.memory_space<vmem>>, vector<1x8x32xbf16>
    %119 = vector.shape_cast %118 : vector<1x8x32xbf16> to vector<8x32xbf16>
    %cst_44 = arith.constant dense<0.000000e+00> : vector<8x32xf32>
    %120 = tpu.matmul %117, %119, %cst_44 {dimension_numbers = #tpu.dot_dimension_numbers<[1], [0], [0], [1], [0, 0, 1, 1], [], []>} : vector<8x8xbf16>, vector<8x32xbf16>, vector<8x32xf32> -> vector<8x32xf32>
    %121 = arith.addf %95, %120 : vector<8x32xf32>
    %c0_45 = arith.constant 0 : index
    %c0_46 = arith.constant 0 : index
    %122 = vector.load %arg8[%c0_45, %c0_46] : memref<1x32xf32, #tpu.memory_space<vmem>>, vector<1x32xf32>
    %123 = vector.broadcast %122 : vector<1x32xf32> to vector<8x32xf32>
    %124 = arith.addf %121, %123 : vector<8x32xf32>
    %125 = arith.addf %1, %124 : vector<8x32xf32>
    %c0_47 = arith.constant 0 : index
    %c0_48 = arith.constant 0 : index
    %126 = vector.load %arg9[%c0_47, %c0_48] : memref<1x32xf32, #tpu.memory_space<vmem>>, vector<1x32xf32>
    %c0_49 = arith.constant 0 : index
    %c0_50 = arith.constant 0 : index
    %127 = vector.load %arg10[%c0_49, %c0_50] : memref<1x32xf32, #tpu.memory_space<vmem>>, vector<1x32xf32>
    %cst_51 = arith.constant dense<0.000000e+00> : vector<8xf32>
    %128 = vector.multi_reduction <add>, %125, %cst_51 [1] : vector<8x32xf32> to vector<8xf32>
    %129 = vector.shape_cast %128 : vector<8xf32> to vector<8x1xf32>
    %cst_52 = arith.constant 3.200000e+01 : f32
    %130 = vector.broadcast %cst_52 : f32 to vector<8x1xf32>
    %131 = arith.divf %129, %130 : vector<8x1xf32>
    %132 = vector.broadcast %131 : vector<8x1xf32> to vector<8x32xf32>
    %133 = arith.subf %125, %132 : vector<8x32xf32>
    %134 = arith.mulf %133, %133 : vector<8x32xf32>
    %cst_53 = arith.constant dense<0.000000e+00> : vector<8xf32>
    %135 = vector.multi_reduction <add>, %134, %cst_53 [1] : vector<8x32xf32> to vector<8xf32>
    %136 = vector.shape_cast %135 : vector<8xf32> to vector<8x1xf32>
    %cst_54 = arith.constant 3.200000e+01 : f32
    %137 = vector.broadcast %cst_54 : f32 to vector<8x1xf32>
    %138 = arith.divf %136, %137 : vector<8x1xf32>
    %139 = vector.broadcast %131 : vector<8x1xf32> to vector<8x32xf32>
    %140 = arith.subf %125, %139 : vector<8x32xf32>
    %cst_55 = arith.constant 9.99999974E-6 : f32
    %141 = vector.broadcast %cst_55 : f32 to vector<8x1xf32>
    %142 = arith.addf %138, %141 : vector<8x1xf32>
    %143 = math.rsqrt %142 : vector<8x1xf32>
    %144 = vector.broadcast %143 : vector<8x1xf32> to vector<8x32xf32>
    %145 = arith.mulf %140, %144 : vector<8x32xf32>
    %146 = vector.broadcast %126 : vector<1x32xf32> to vector<8x32xf32>
    %147 = arith.mulf %145, %146 : vector<8x32xf32>
    %148 = vector.broadcast %127 : vector<1x32xf32> to vector<8x32xf32>
    %149 = arith.addf %147, %148 : vector<8x32xf32>
    %150 = arith.truncf %149 : vector<8x32xf32> to vector<8x32xbf16>
    %c0_56 = arith.constant 0 : index
    %c0_57 = arith.constant 0 : index
    %151 = vector.load %arg11[%c0_56, %c0_57] : memref<32x64xbf16, #tpu.memory_space<vmem>>, vector<32x64xbf16>
    %cst_58 = arith.constant dense<0.000000e+00> : vector<8x64xf32>
    %152 = tpu.matmul %150, %151, %cst_58 {dimension_numbers = #tpu.dot_dimension_numbers<[1], [0], [0], [1], [0, 0, 1, 1], [], []>} : vector<8x32xbf16>, vector<32x64xbf16>, vector<8x64xf32> -> vector<8x64xf32>
    %c0_59 = arith.constant 0 : index
    %c0_60 = arith.constant 0 : index
    %153 = vector.load %arg12[%c0_59, %c0_60] : memref<1x64xf32, #tpu.memory_space<vmem>>, vector<1x64xf32>
    %154 = vector.broadcast %153 : vector<1x64xf32> to vector<8x64xf32>
    %155 = arith.addf %152, %154 : vector<8x64xf32>
    %cst_61 = arith.constant 0.000000e+00 : f32
    %156 = vector.broadcast %cst_61 : f32 to vector<8x64xf32>
    %157 = arith.maximumf %155, %156 : vector<8x64xf32>
    %158 = arith.truncf %157 : vector<8x64xf32> to vector<8x64xbf16>
    %c0_62 = arith.constant 0 : index
    %c0_63 = arith.constant 0 : index
    %159 = vector.load %arg13[%c0_62, %c0_63] : memref<64x32xbf16, #tpu.memory_space<vmem>>, vector<64x32xbf16>
    %cst_64 = arith.constant dense<0.000000e+00> : vector<8x32xf32>
    %160 = tpu.matmul %158, %159, %cst_64 {dimension_numbers = #tpu.dot_dimension_numbers<[1], [0], [0], [1], [0, 0, 1, 1], [], []>} : vector<8x64xbf16>, vector<64x32xbf16>, vector<8x32xf32> -> vector<8x32xf32>
    %c0_65 = arith.constant 0 : index
    %c0_66 = arith.constant 0 : index
    %161 = vector.load %arg14[%c0_65, %c0_66] : memref<1x32xf32, #tpu.memory_space<vmem>>, vector<1x32xf32>
    %162 = vector.broadcast %161 : vector<1x32xf32> to vector<8x32xf32>
    %163 = arith.addf %160, %162 : vector<8x32xf32>
    %164 = arith.addf %149, %163 : vector<8x32xf32>
    %c0_67 = arith.constant 0 : index
    %c0_68 = arith.constant 0 : index
    %165 = vector.load %arg15[%c0_67, %c0_68] : memref<1x32xf32, #tpu.memory_space<vmem>>, vector<1x32xf32>
    %c0_69 = arith.constant 0 : index
    %c0_70 = arith.constant 0 : index
    %166 = vector.load %arg16[%c0_69, %c0_70] : memref<1x32xf32, #tpu.memory_space<vmem>>, vector<1x32xf32>
    %cst_71 = arith.constant dense<0.000000e+00> : vector<8xf32>
    %167 = vector.multi_reduction <add>, %164, %cst_71 [1] : vector<8x32xf32> to vector<8xf32>
    %168 = vector.shape_cast %167 : vector<8xf32> to vector<8x1xf32>
    %cst_72 = arith.constant 3.200000e+01 : f32
    %169 = vector.broadcast %cst_72 : f32 to vector<8x1xf32>
    %170 = arith.divf %168, %169 : vector<8x1xf32>
    %171 = vector.broadcast %170 : vector<8x1xf32> to vector<8x32xf32>
    %172 = arith.subf %164, %171 : vector<8x32xf32>
    %173 = arith.mulf %172, %172 : vector<8x32xf32>
    %cst_73 = arith.constant dense<0.000000e+00> : vector<8xf32>
    %174 = vector.multi_reduction <add>, %173, %cst_73 [1] : vector<8x32xf32> to vector<8xf32>
    %175 = vector.shape_cast %174 : vector<8xf32> to vector<8x1xf32>
    %cst_74 = arith.constant 3.200000e+01 : f32
    %176 = vector.broadcast %cst_74 : f32 to vector<8x1xf32>
    %177 = arith.divf %175, %176 : vector<8x1xf32>
    %178 = vector.broadcast %170 : vector<8x1xf32> to vector<8x32xf32>
    %179 = arith.subf %164, %178 : vector<8x32xf32>
    %cst_75 = arith.constant 9.99999974E-6 : f32
    %180 = vector.broadcast %cst_75 : f32 to vector<8x1xf32>
    %181 = arith.addf %177, %180 : vector<8x1xf32>
    %182 = math.rsqrt %181 : vector<8x1xf32>
    %183 = vector.broadcast %182 : vector<8x1xf32> to vector<8x32xf32>
    %184 = arith.mulf %179, %183 : vector<8x32xf32>
    %185 = vector.broadcast %165 : vector<1x32xf32> to vector<8x32xf32>
    %186 = arith.mulf %184, %185 : vector<8x32xf32>
    %187 = vector.broadcast %166 : vector<1x32xf32> to vector<8x32xf32>
    %188 = arith.addf %186, %187 : vector<8x32xf32>
    %189 = arith.truncf %188 : vector<8x32xf32> to vector<8x32xbf16>
    %c0_76 = arith.constant 0 : index
    %c0_77 = arith.constant 0 : index
    %190 = vector.load %arg17[%c0_76, %c0_77] : memref<32x96xbf16, #tpu.memory_space<vmem>>, vector<32x96xbf16>
    %cst_78 = arith.constant dense<0.000000e+00> : vector<8x96xf32>
    %191 = tpu.matmul %189, %190, %cst_78 {dimension_numbers = #tpu.dot_dimension_numbers<[1], [0], [0], [1], [0, 0, 1, 1], [], []>} : vector<8x32xbf16>, vector<32x96xbf16>, vector<8x96xf32> -> vector<8x96xf32>
    %c0_79 = arith.constant 0 : index
    %c0_80 = arith.constant 0 : index
    %192 = vector.load %arg18[%c0_79, %c0_80] : memref<1x96xf32, #tpu.memory_space<vmem>>, vector<1x96xf32>
    %193 = vector.broadcast %192 : vector<1x96xf32> to vector<8x96xf32>
    %194 = arith.addf %191, %193 : vector<8x96xf32>
    %195 = vector.extract_strided_slice %194 {offsets = [0, 0], sizes = [8, 32], strides = [1, 1]} : vector<8x96xf32> to vector<8x32xf32>
    %196 = vector.extract_strided_slice %194 {offsets = [0, 32], sizes = [8, 32], strides = [1, 1]} : vector<8x96xf32> to vector<8x32xf32>
    %197 = vector.extract_strided_slice %194 {offsets = [0, 64], sizes = [8, 32], strides = [1, 1]} : vector<8x96xf32> to vector<8x32xf32>
    %cst_81 = arith.constant 0.000000e+00 : f32
    %198 = vector.broadcast %cst_81 : f32 to vector<8x32xf32>
    %199 = vector.extract_strided_slice %195 {offsets = [0, 0], sizes = [8, 8], strides = [1, 1]} : vector<8x32xf32> to vector<8x8xf32>
    %200 = arith.truncf %199 : vector<8x8xf32> to vector<8x8xbf16>
    %201 = vector.extract_strided_slice %196 {offsets = [0, 0], sizes = [8, 8], strides = [1, 1]} : vector<8x32xf32> to vector<8x8xf32>
    %202 = arith.truncf %201 : vector<8x8xf32> to vector<8x8xbf16>
    %203 = vector.extract_strided_slice %197 {offsets = [0, 0], sizes = [8, 8], strides = [1, 1]} : vector<8x32xf32> to vector<8x8xf32>
    %204 = arith.truncf %203 : vector<8x8xf32> to vector<8x8xbf16>
    %cst_82 = arith.constant dense<0.000000e+00> : vector<8x8xf32>
    %205 = tpu.matmul %200, %202, %cst_82 {dimension_numbers = #tpu.dot_dimension_numbers<[1], [1], [0], [0], [0, 0, 1, 0], [], []>} : vector<8x8xbf16>, vector<8x8xbf16>, vector<8x8xf32> -> vector<8x8xf32>
    %206 = vector.broadcast %5 : vector<1x8xf32> to vector<8x8xf32>
    %207 = arith.addf %205, %206 : vector<8x8xf32>
    %cst_83 = arith.constant dense<0xFF800000> : vector<8xf32>
    %208 = vector.multi_reduction <maximumf>, %207, %cst_83 [1] : vector<8x8xf32> to vector<8xf32>
    %209 = vector.shape_cast %208 : vector<8xf32> to vector<8x1xf32>
    %210 = vector.broadcast %209 : vector<8x1xf32> to vector<8x8xf32>
    %211 = arith.subf %207, %210 : vector<8x8xf32>
    %212 = math.exp %211 : vector<8x8xf32>
    %cst_84 = arith.constant dense<0.000000e+00> : vector<8xf32>
    %213 = vector.multi_reduction <add>, %212, %cst_84 [1] : vector<8x8xf32> to vector<8xf32>
    %214 = vector.shape_cast %213 : vector<8xf32> to vector<8x1xf32>
    %215 = tpu.reciprocal %214 {approx = true} : vector<8x1xf32> -> vector<8x1xf32>
    %216 = vector.broadcast %215 : vector<8x1xf32> to vector<8x8xf32>
    %217 = arith.mulf %212, %216 : vector<8x8xf32>
    %218 = arith.truncf %217 : vector<8x8xf32> to vector<8x8xbf16>
    %cst_85 = arith.constant dense<0.000000e+00> : vector<8x8xf32>
    %219 = tpu.matmul %218, %204, %cst_85 {dimension_numbers = #tpu.dot_dimension_numbers<[1], [0], [0], [1], [0, 0, 1, 1], [], []>} : vector<8x8xbf16>, vector<8x8xbf16>, vector<8x8xf32> -> vector<8x8xf32>
    %220 = arith.truncf %219 : vector<8x8xf32> to vector<8x8xbf16>
    %c0_86 = arith.constant 0 : index
    %c0_87 = arith.constant 0 : index
    %c0_88 = arith.constant 0 : index
    %221 = vector.load %arg19[%c0_86, %c0_87, %c0_88] : memref<4x8x32xbf16, #tpu.memory_space<vmem>>, vector<1x8x32xbf16>
    %222 = vector.shape_cast %221 : vector<1x8x32xbf16> to vector<8x32xbf16>
    %cst_89 = arith.constant dense<0.000000e+00> : vector<8x32xf32>
    %223 = tpu.matmul %220, %222, %cst_89 {dimension_numbers = #tpu.dot_dimension_numbers<[1], [0], [0], [1], [0, 0, 1, 1], [], []>} : vector<8x8xbf16>, vector<8x32xbf16>, vector<8x32xf32> -> vector<8x32xf32>
    %224 = arith.addf %198, %223 : vector<8x32xf32>
    %225 = vector.extract_strided_slice %195 {offsets = [0, 8], sizes = [8, 8], strides = [1, 1]} : vector<8x32xf32> to vector<8x8xf32>
    %226 = arith.truncf %225 : vector<8x8xf32> to vector<8x8xbf16>
    %227 = vector.extract_strided_slice %196 {offsets = [0, 8], sizes = [8, 8], strides = [1, 1]} : vector<8x32xf32> to vector<8x8xf32>
    %228 = arith.truncf %227 : vector<8x8xf32> to vector<8x8xbf16>
    %229 = vector.extract_strided_slice %197 {offsets = [0, 8], sizes = [8, 8], strides = [1, 1]} : vector<8x32xf32> to vector<8x8xf32>
    %230 = arith.truncf %229 : vector<8x8xf32> to vector<8x8xbf16>
    %cst_90 = arith.constant dense<0.000000e+00> : vector<8x8xf32>
    %231 = tpu.matmul %226, %228, %cst_90 {dimension_numbers = #tpu.dot_dimension_numbers<[1], [1], [0], [0], [0, 0, 1, 0], [], []>} : vector<8x8xbf16>, vector<8x8xbf16>, vector<8x8xf32> -> vector<8x8xf32>
    %232 = vector.broadcast %5 : vector<1x8xf32> to vector<8x8xf32>
    %233 = arith.addf %231, %232 : vector<8x8xf32>
    %cst_91 = arith.constant dense<0xFF800000> : vector<8xf32>
    %234 = vector.multi_reduction <maximumf>, %233, %cst_91 [1] : vector<8x8xf32> to vector<8xf32>
    %235 = vector.shape_cast %234 : vector<8xf32> to vector<8x1xf32>
    %236 = vector.broadcast %235 : vector<8x1xf32> to vector<8x8xf32>
    %237 = arith.subf %233, %236 : vector<8x8xf32>
    %238 = math.exp %237 : vector<8x8xf32>
    %cst_92 = arith.constant dense<0.000000e+00> : vector<8xf32>
    %239 = vector.multi_reduction <add>, %238, %cst_92 [1] : vector<8x8xf32> to vector<8xf32>
    %240 = vector.shape_cast %239 : vector<8xf32> to vector<8x1xf32>
    %241 = tpu.reciprocal %240 {approx = true} : vector<8x1xf32> -> vector<8x1xf32>
    %242 = vector.broadcast %241 : vector<8x1xf32> to vector<8x8xf32>
    %243 = arith.mulf %238, %242 : vector<8x8xf32>
    %244 = arith.truncf %243 : vector<8x8xf32> to vector<8x8xbf16>
    %cst_93 = arith.constant dense<0.000000e+00> : vector<8x8xf32>
    %245 = tpu.matmul %244, %230, %cst_93 {dimension_numbers = #tpu.dot_dimension_numbers<[1], [0], [0], [1], [0, 0, 1, 1], [], []>} : vector<8x8xbf16>, vector<8x8xbf16>, vector<8x8xf32> -> vector<8x8xf32>
    %246 = arith.truncf %245 : vector<8x8xf32> to vector<8x8xbf16>
    %c1_94 = arith.constant 1 : index
    %c0_95 = arith.constant 0 : index
    %c0_96 = arith.constant 0 : index
    %247 = vector.load %arg19[%c1_94, %c0_95, %c0_96] : memref<4x8x32xbf16, #tpu.memory_space<vmem>>, vector<1x8x32xbf16>
    %248 = vector.shape_cast %247 : vector<1x8x32xbf16> to vector<8x32xbf16>
    %cst_97 = arith.constant dense<0.000000e+00> : vector<8x32xf32>
    %249 = tpu.matmul %246, %248, %cst_97 {dimension_numbers = #tpu.dot_dimension_numbers<[1], [0], [0], [1], [0, 0, 1, 1], [], []>} : vector<8x8xbf16>, vector<8x32xbf16>, vector<8x32xf32> -> vector<8x32xf32>
    %250 = arith.addf %224, %249 : vector<8x32xf32>
    %251 = vector.extract_strided_slice %195 {offsets = [0, 16], sizes = [8, 8], strides = [1, 1]} : vector<8x32xf32> to vector<8x8xf32>
    %252 = arith.truncf %251 : vector<8x8xf32> to vector<8x8xbf16>
    %253 = vector.extract_strided_slice %196 {offsets = [0, 16], sizes = [8, 8], strides = [1, 1]} : vector<8x32xf32> to vector<8x8xf32>
    %254 = arith.truncf %253 : vector<8x8xf32> to vector<8x8xbf16>
    %255 = vector.extract_strided_slice %197 {offsets = [0, 16], sizes = [8, 8], strides = [1, 1]} : vector<8x32xf32> to vector<8x8xf32>
    %256 = arith.truncf %255 : vector<8x8xf32> to vector<8x8xbf16>
    %cst_98 = arith.constant dense<0.000000e+00> : vector<8x8xf32>
    %257 = tpu.matmul %252, %254, %cst_98 {dimension_numbers = #tpu.dot_dimension_numbers<[1], [1], [0], [0], [0, 0, 1, 0], [], []>} : vector<8x8xbf16>, vector<8x8xbf16>, vector<8x8xf32> -> vector<8x8xf32>
    %258 = vector.broadcast %5 : vector<1x8xf32> to vector<8x8xf32>
    %259 = arith.addf %257, %258 : vector<8x8xf32>
    %cst_99 = arith.constant dense<0xFF800000> : vector<8xf32>
    %260 = vector.multi_reduction <maximumf>, %259, %cst_99 [1] : vector<8x8xf32> to vector<8xf32>
    %261 = vector.shape_cast %260 : vector<8xf32> to vector<8x1xf32>
    %262 = vector.broadcast %261 : vector<8x1xf32> to vector<8x8xf32>
    %263 = arith.subf %259, %262 : vector<8x8xf32>
    %264 = math.exp %263 : vector<8x8xf32>
    %cst_100 = arith.constant dense<0.000000e+00> : vector<8xf32>
    %265 = vector.multi_reduction <add>, %264, %cst_100 [1] : vector<8x8xf32> to vector<8xf32>
    %266 = vector.shape_cast %265 : vector<8xf32> to vector<8x1xf32>
    %267 = tpu.reciprocal %266 {approx = true} : vector<8x1xf32> -> vector<8x1xf32>
    %268 = vector.broadcast %267 : vector<8x1xf32> to vector<8x8xf32>
    %269 = arith.mulf %264, %268 : vector<8x8xf32>
    %270 = arith.truncf %269 : vector<8x8xf32> to vector<8x8xbf16>
    %cst_101 = arith.constant dense<0.000000e+00> : vector<8x8xf32>
    %271 = tpu.matmul %270, %256, %cst_101 {dimension_numbers = #tpu.dot_dimension_numbers<[1], [0], [0], [1], [0, 0, 1, 1], [], []>} : vector<8x8xbf16>, vector<8x8xbf16>, vector<8x8xf32> -> vector<8x8xf32>
    %272 = arith.truncf %271 : vector<8x8xf32> to vector<8x8xbf16>
    %c2_102 = arith.constant 2 : index
    %c0_103 = arith.constant 0 : index
    %c0_104 = arith.constant 0 : index
    %273 = vector.load %arg19[%c2_102, %c0_103, %c0_104] : memref<4x8x32xbf16, #tpu.memory_space<vmem>>, vector<1x8x32xbf16>
    %274 = vector.shape_cast %273 : vector<1x8x32xbf16> to vector<8x32xbf16>
    %cst_105 = arith.constant dense<0.000000e+00> : vector<8x32xf32>
    %275 = tpu.matmul %272, %274, %cst_105 {dimension_numbers = #tpu.dot_dimension_numbers<[1], [0], [0], [1], [0, 0, 1, 1], [], []>} : vector<8x8xbf16>, vector<8x32xbf16>, vector<8x32xf32> -> vector<8x32xf32>
    %276 = arith.addf %250, %275 : vector<8x32xf32>
    %277 = vector.extract_strided_slice %195 {offsets = [0, 24], sizes = [8, 8], strides = [1, 1]} : vector<8x32xf32> to vector<8x8xf32>
    %278 = arith.truncf %277 : vector<8x8xf32> to vector<8x8xbf16>
    %279 = vector.extract_strided_slice %196 {offsets = [0, 24], sizes = [8, 8], strides = [1, 1]} : vector<8x32xf32> to vector<8x8xf32>
    %280 = arith.truncf %279 : vector<8x8xf32> to vector<8x8xbf16>
    %281 = vector.extract_strided_slice %197 {offsets = [0, 24], sizes = [8, 8], strides = [1, 1]} : vector<8x32xf32> to vector<8x8xf32>
    %282 = arith.truncf %281 : vector<8x8xf32> to vector<8x8xbf16>
    %cst_106 = arith.constant dense<0.000000e+00> : vector<8x8xf32>
    %283 = tpu.matmul %278, %280, %cst_106 {dimension_numbers = #tpu.dot_dimension_numbers<[1], [1], [0], [0], [0, 0, 1, 0], [], []>} : vector<8x8xbf16>, vector<8x8xbf16>, vector<8x8xf32> -> vector<8x8xf32>
    %284 = vector.broadcast %5 : vector<1x8xf32> to vector<8x8xf32>
    %285 = arith.addf %283, %284 : vector<8x8xf32>
    %cst_107 = arith.constant dense<0xFF800000> : vector<8xf32>
    %286 = vector.multi_reduction <maximumf>, %285, %cst_107 [1] : vector<8x8xf32> to vector<8xf32>
    %287 = vector.shape_cast %286 : vector<8xf32> to vector<8x1xf32>
    %288 = vector.broadcast %287 : vector<8x1xf32> to vector<8x8xf32>
    %289 = arith.subf %285, %288 : vector<8x8xf32>
    %290 = math.exp %289 : vector<8x8xf32>
    %cst_108 = arith.constant dense<0.000000e+00> : vector<8xf32>
    %291 = vector.multi_reduction <add>, %290, %cst_108 [1] : vector<8x8xf32> to vector<8xf32>
    %292 = vector.shape_cast %291 : vector<8xf32> to vector<8x1xf32>
    %293 = tpu.reciprocal %292 {approx = true} : vector<8x1xf32> -> vector<8x1xf32>
    %294 = vector.broadcast %293 : vector<8x1xf32> to vector<8x8xf32>
    %295 = arith.mulf %290, %294 : vector<8x8xf32>
    %296 = arith.truncf %295 : vector<8x8xf32> to vector<8x8xbf16>
    %cst_109 = arith.constant dense<0.000000e+00> : vector<8x8xf32>
    %297 = tpu.matmul %296, %282, %cst_109 {dimension_numbers = #tpu.dot_dimension_numbers<[1], [0], [0], [1], [0, 0, 1, 1], [], []>} : vector<8x8xbf16>, vector<8x8xbf16>, vector<8x8xf32> -> vector<8x8xf32>
    %298 = arith.truncf %297 : vector<8x8xf32> to vector<8x8xbf16>
    %c3_110 = arith.constant 3 : index
    %c0_111 = arith.constant 0 : index
    %c0_112 = arith.constant 0 : index
    %299 = vector.load %arg19[%c3_110, %c0_111, %c0_112] : memref<4x8x32xbf16, #tpu.memory_space<vmem>>, vector<1x8x32xbf16>
    %300 = vector.shape_cast %299 : vector<1x8x32xbf16> to vector<8x32xbf16>
    %cst_113 = arith.constant dense<0.000000e+00> : vector<8x32xf32>
    %301 = tpu.matmul %298, %300, %cst_113 {dimension_numbers = #tpu.dot_dimension_numbers<[1], [0], [0], [1], [0, 0, 1, 1], [], []>} : vector<8x8xbf16>, vector<8x32xbf16>, vector<8x32xf32> -> vector<8x32xf32>
    %302 = arith.addf %276, %301 : vector<8x32xf32>
    %c0_114 = arith.constant 0 : index
    %c0_115 = arith.constant 0 : index
    %303 = vector.load %arg20[%c0_114, %c0_115] : memref<1x32xf32, #tpu.memory_space<vmem>>, vector<1x32xf32>
    %304 = vector.broadcast %303 : vector<1x32xf32> to vector<8x32xf32>
    %305 = arith.addf %302, %304 : vector<8x32xf32>
    %306 = arith.addf %188, %305 : vector<8x32xf32>
    %c0_116 = arith.constant 0 : index
    %c0_117 = arith.constant 0 : index
    %307 = vector.load %arg21[%c0_116, %c0_117] : memref<1x32xf32, #tpu.memory_space<vmem>>, vector<1x32xf32>
    %c0_118 = arith.constant 0 : index
    %c0_119 = arith.constant 0 : index
    %308 = vector.load %arg22[%c0_118, %c0_119] : memref<1x32xf32, #tpu.memory_space<vmem>>, vector<1x32xf32>
    %cst_120 = arith.constant dense<0.000000e+00> : vector<8xf32>
    %309 = vector.multi_reduction <add>, %306, %cst_120 [1] : vector<8x32xf32> to vector<8xf32>
    %310 = vector.shape_cast %309 : vector<8xf32> to vector<8x1xf32>
    %cst_121 = arith.constant 3.200000e+01 : f32
    %311 = vector.broadcast %cst_121 : f32 to vector<8x1xf32>
    %312 = arith.divf %310, %311 : vector<8x1xf32>
    %313 = vector.broadcast %312 : vector<8x1xf32> to vector<8x32xf32>
    %314 = arith.subf %306, %313 : vector<8x32xf32>
    %315 = arith.mulf %314, %314 : vector<8x32xf32>
    %cst_122 = arith.constant dense<0.000000e+00> : vector<8xf32>
    %316 = vector.multi_reduction <add>, %315, %cst_122 [1] : vector<8x32xf32> to vector<8xf32>
    %317 = vector.shape_cast %316 : vector<8xf32> to vector<8x1xf32>
    %cst_123 = arith.constant 3.200000e+01 : f32
    %318 = vector.broadcast %cst_123 : f32 to vector<8x1xf32>
    %319 = arith.divf %317, %318 : vector<8x1xf32>
    %320 = vector.broadcast %312 : vector<8x1xf32> to vector<8x32xf32>
    %321 = arith.subf %306, %320 : vector<8x32xf32>
    %cst_124 = arith.constant 9.99999974E-6 : f32
    %322 = vector.broadcast %cst_124 : f32 to vector<8x1xf32>
    %323 = arith.addf %319, %322 : vector<8x1xf32>
    %324 = math.rsqrt %323 : vector<8x1xf32>
    %325 = vector.broadcast %324 : vector<8x1xf32> to vector<8x32xf32>
    %326 = arith.mulf %321, %325 : vector<8x32xf32>
    %327 = vector.broadcast %307 : vector<1x32xf32> to vector<8x32xf32>
    %328 = arith.mulf %326, %327 : vector<8x32xf32>
    %329 = vector.broadcast %308 : vector<1x32xf32> to vector<8x32xf32>
    %330 = arith.addf %328, %329 : vector<8x32xf32>
    %331 = arith.truncf %330 : vector<8x32xf32> to vector<8x32xbf16>
    %c0_125 = arith.constant 0 : index
    %c0_126 = arith.constant 0 : index
    %332 = vector.load %arg23[%c0_125, %c0_126] : memref<32x64xbf16, #tpu.memory_space<vmem>>, vector<32x64xbf16>
    %cst_127 = arith.constant dense<0.000000e+00> : vector<8x64xf32>
    %333 = tpu.matmul %331, %332, %cst_127 {dimension_numbers = #tpu.dot_dimension_numbers<[1], [0], [0], [1], [0, 0, 1, 1], [], []>} : vector<8x32xbf16>, vector<32x64xbf16>, vector<8x64xf32> -> vector<8x64xf32>
    %c0_128 = arith.constant 0 : index
    %c0_129 = arith.constant 0 : index
    %334 = vector.load %arg24[%c0_128, %c0_129] : memref<1x64xf32, #tpu.memory_space<vmem>>, vector<1x64xf32>
    %335 = vector.broadcast %334 : vector<1x64xf32> to vector<8x64xf32>
    %336 = arith.addf %333, %335 : vector<8x64xf32>
    %cst_130 = arith.constant 0.000000e+00 : f32
    %337 = vector.broadcast %cst_130 : f32 to vector<8x64xf32>
    %338 = arith.maximumf %336, %337 : vector<8x64xf32>
    %339 = arith.truncf %338 : vector<8x64xf32> to vector<8x64xbf16>
    %c0_131 = arith.constant 0 : index
    %c0_132 = arith.constant 0 : index
    %340 = vector.load %arg25[%c0_131, %c0_132] : memref<64x32xbf16, #tpu.memory_space<vmem>>, vector<64x32xbf16>
    %cst_133 = arith.constant dense<0.000000e+00> : vector<8x32xf32>
    %341 = tpu.matmul %339, %340, %cst_133 {dimension_numbers = #tpu.dot_dimension_numbers<[1], [0], [0], [1], [0, 0, 1, 1], [], []>} : vector<8x64xbf16>, vector<64x32xbf16>, vector<8x32xf32> -> vector<8x32xf32>
    %c0_134 = arith.constant 0 : index
    %c0_135 = arith.constant 0 : index
    %342 = vector.load %arg26[%c0_134, %c0_135] : memref<1x32xf32, #tpu.memory_space<vmem>>, vector<1x32xf32>
    %343 = vector.broadcast %342 : vector<1x32xf32> to vector<8x32xf32>
    %344 = arith.addf %341, %343 : vector<8x32xf32>
    %345 = arith.addf %330, %344 : vector<8x32xf32>
    %c0_136 = arith.constant 0 : index
    %c0_137 = arith.constant 0 : index
    %346 = vector.load %arg27[%c0_136, %c0_137] : memref<1x32xf32, #tpu.memory_space<vmem>>, vector<1x32xf32>
    %c0_138 = arith.constant 0 : index
    %c0_139 = arith.constant 0 : index
    %347 = vector.load %arg28[%c0_138, %c0_139] : memref<1x32xf32, #tpu.memory_space<vmem>>, vector<1x32xf32>
    %cst_140 = arith.constant dense<0.000000e+00> : vector<8xf32>
    %348 = vector.multi_reduction <add>, %345, %cst_140 [1] : vector<8x32xf32> to vector<8xf32>
    %349 = vector.shape_cast %348 : vector<8xf32> to vector<8x1xf32>
    %cst_141 = arith.constant 3.200000e+01 : f32
    %350 = vector.broadcast %cst_141 : f32 to vector<8x1xf32>
    %351 = arith.divf %349, %350 : vector<8x1xf32>
    %352 = vector.broadcast %351 : vector<8x1xf32> to vector<8x32xf32>
    %353 = arith.subf %345, %352 : vector<8x32xf32>
    %354 = arith.mulf %353, %353 : vector<8x32xf32>
    %cst_142 = arith.constant dense<0.000000e+00> : vector<8xf32>
    %355 = vector.multi_reduction <add>, %354, %cst_142 [1] : vector<8x32xf32> to vector<8xf32>
    %356 = vector.shape_cast %355 : vector<8xf32> to vector<8x1xf32>
    %cst_143 = arith.constant 3.200000e+01 : f32
    %357 = vector.broadcast %cst_143 : f32 to vector<8x1xf32>
    %358 = arith.divf %356, %357 : vector<8x1xf32>
    %359 = vector.broadcast %351 : vector<8x1xf32> to vector<8x32xf32>
    %360 = arith.subf %345, %359 : vector<8x32xf32>
    %cst_144 = arith.constant 9.99999974E-6 : f32
    %361 = vector.broadcast %cst_144 : f32 to vector<8x1xf32>
    %362 = arith.addf %358, %361 : vector<8x1xf32>
    %363 = math.rsqrt %362 : vector<8x1xf32>
    %364 = vector.broadcast %363 : vector<8x1xf32> to vector<8x32xf32>
    %365 = arith.mulf %360, %364 : vector<8x32xf32>
    %366 = vector.broadcast %346 : vector<1x32xf32> to vector<8x32xf32>
    %367 = arith.mulf %365, %366 : vector<8x32xf32>
    %368 = vector.broadcast %347 : vector<1x32xf32> to vector<8x32xf32>
    %369 = arith.addf %367, %368 : vector<8x32xf32>
    %c0_145 = arith.constant 0 : index
    %c0_146 = arith.constant 0 : index
    %370 = vector.load %arg29[%c0_145, %c0_146] : memref<1x32xf32, #tpu.memory_space<vmem>>, vector<1x32xf32>
    %c0_147 = arith.constant 0 : index
    %c0_148 = arith.constant 0 : index
    %371 = vector.load %arg30[%c0_147, %c0_148] : memref<1x32xf32, #tpu.memory_space<vmem>>, vector<1x32xf32>
    %cst_149 = arith.constant dense<0.000000e+00> : vector<8xf32>
    %372 = vector.multi_reduction <add>, %369, %cst_149 [1] : vector<8x32xf32> to vector<8xf32>
    %373 = vector.shape_cast %372 : vector<8xf32> to vector<8x1xf32>
    %cst_150 = arith.constant 3.200000e+01 : f32
    %374 = vector.broadcast %cst_150 : f32 to vector<8x1xf32>
    %375 = arith.divf %373, %374 : vector<8x1xf32>
    %376 = vector.broadcast %375 : vector<8x1xf32> to vector<8x32xf32>
    %377 = arith.subf %369, %376 : vector<8x32xf32>
    %378 = arith.mulf %377, %377 : vector<8x32xf32>
    %cst_151 = arith.constant dense<0.000000e+00> : vector<8xf32>
    %379 = vector.multi_reduction <add>, %378, %cst_151 [1] : vector<8x32xf32> to vector<8xf32>
    %380 = vector.shape_cast %379 : vector<8xf32> to vector<8x1xf32>
    %cst_152 = arith.constant 3.200000e+01 : f32
    %381 = vector.broadcast %cst_152 : f32 to vector<8x1xf32>
    %382 = arith.divf %380, %381 : vector<8x1xf32>
    %383 = vector.broadcast %375 : vector<8x1xf32> to vector<8x32xf32>
    %384 = arith.subf %369, %383 : vector<8x32xf32>
    %cst_153 = arith.constant 9.99999974E-6 : f32
    %385 = vector.broadcast %cst_153 : f32 to vector<8x1xf32>
    %386 = arith.addf %382, %385 : vector<8x1xf32>
    %387 = math.rsqrt %386 : vector<8x1xf32>
    %388 = vector.broadcast %387 : vector<8x1xf32> to vector<8x32xf32>
    %389 = arith.mulf %384, %388 : vector<8x32xf32>
    %390 = vector.broadcast %370 : vector<1x32xf32> to vector<8x32xf32>
    %391 = arith.mulf %389, %390 : vector<8x32xf32>
    %392 = vector.broadcast %371 : vector<1x32xf32> to vector<8x32xf32>
    %393 = arith.addf %391, %392 : vector<8x32xf32>
    %394 = arith.truncf %393 : vector<8x32xf32> to vector<8x32xbf16>
    %395 = tpu.iota {dimensions = array<i32: 0>} : vector<8x8xi32>
    %396 = tpu.iota {dimensions = array<i32: 1>} : vector<8x8xi32>
    %397 = arith.cmpi sgt, %396, %395 : vector<8x8xi32>
    %cst_154 = arith.constant -1.000000e+30 : f32
    %cst_155 = arith.constant 0.000000e+00 : f32
    %398 = vector.broadcast %cst_154 : f32 to vector<8x8xf32>
    %399 = vector.broadcast %cst_155 : f32 to vector<8x8xf32>
    %400 = arith.select %397, %398, %399 : vector<8x8xi1>, vector<8x8xf32>
    %401 = vector.broadcast %7 : vector<1x8xf32> to vector<8x8xf32>
    %402 = arith.addf %400, %401 : vector<8x8xf32>
    %403 = arith.truncf %3 : vector<8x32xf32> to vector<8x32xbf16>
    %c0_156 = arith.constant 0 : index
    %c0_157 = arith.constant 0 : index
    %404 = vector.load %arg31[%c0_156, %c0_157] : memref<32x96xbf16, #tpu.memory_space<vmem>>, vector<32x96xbf16>
    %cst_158 = arith.constant dense<0.000000e+00> : vector<8x96xf32>
    %405 = tpu.matmul %403, %404, %cst_158 {dimension_numbers = #tpu.dot_dimension_numbers<[1], [0], [0], [1], [0, 0, 1, 1], [], []>} : vector<8x32xbf16>, vector<32x96xbf16>, vector<8x96xf32> -> vector<8x96xf32>
    %c0_159 = arith.constant 0 : index
    %c0_160 = arith.constant 0 : index
    %406 = vector.load %arg32[%c0_159, %c0_160] : memref<1x96xf32, #tpu.memory_space<vmem>>, vector<1x96xf32>
    %407 = vector.broadcast %406 : vector<1x96xf32> to vector<8x96xf32>
    %408 = arith.addf %405, %407 : vector<8x96xf32>
    %409 = vector.extract_strided_slice %408 {offsets = [0, 0], sizes = [8, 32], strides = [1, 1]} : vector<8x96xf32> to vector<8x32xf32>
    %410 = vector.extract_strided_slice %408 {offsets = [0, 32], sizes = [8, 32], strides = [1, 1]} : vector<8x96xf32> to vector<8x32xf32>
    %411 = vector.extract_strided_slice %408 {offsets = [0, 64], sizes = [8, 32], strides = [1, 1]} : vector<8x96xf32> to vector<8x32xf32>
    %cst_161 = arith.constant 0.000000e+00 : f32
    %412 = vector.broadcast %cst_161 : f32 to vector<8x32xf32>
    %413 = vector.extract_strided_slice %409 {offsets = [0, 0], sizes = [8, 8], strides = [1, 1]} : vector<8x32xf32> to vector<8x8xf32>
    %414 = arith.truncf %413 : vector<8x8xf32> to vector<8x8xbf16>
    %415 = vector.extract_strided_slice %410 {offsets = [0, 0], sizes = [8, 8], strides = [1, 1]} : vector<8x32xf32> to vector<8x8xf32>
    %416 = arith.truncf %415 : vector<8x8xf32> to vector<8x8xbf16>
    %417 = vector.extract_strided_slice %411 {offsets = [0, 0], sizes = [8, 8], strides = [1, 1]} : vector<8x32xf32> to vector<8x8xf32>
    %418 = arith.truncf %417 : vector<8x8xf32> to vector<8x8xbf16>
    %cst_162 = arith.constant dense<0.000000e+00> : vector<8x8xf32>
    %419 = tpu.matmul %414, %416, %cst_162 {dimension_numbers = #tpu.dot_dimension_numbers<[1], [1], [0], [0], [0, 0, 1, 0], [], []>} : vector<8x8xbf16>, vector<8x8xbf16>, vector<8x8xf32> -> vector<8x8xf32>
    %420 = arith.addf %419, %402 : vector<8x8xf32>
    %cst_163 = arith.constant dense<0xFF800000> : vector<8xf32>
    %421 = vector.multi_reduction <maximumf>, %420, %cst_163 [1] : vector<8x8xf32> to vector<8xf32>
    %422 = vector.shape_cast %421 : vector<8xf32> to vector<8x1xf32>
    %423 = vector.broadcast %422 : vector<8x1xf32> to vector<8x8xf32>
    %424 = arith.subf %420, %423 : vector<8x8xf32>
    %425 = math.exp %424 : vector<8x8xf32>
    %cst_164 = arith.constant dense<0.000000e+00> : vector<8xf32>
    %426 = vector.multi_reduction <add>, %425, %cst_164 [1] : vector<8x8xf32> to vector<8xf32>
    %427 = vector.shape_cast %426 : vector<8xf32> to vector<8x1xf32>
    %428 = tpu.reciprocal %427 {approx = true} : vector<8x1xf32> -> vector<8x1xf32>
    %429 = vector.broadcast %428 : vector<8x1xf32> to vector<8x8xf32>
    %430 = arith.mulf %425, %429 : vector<8x8xf32>
    %431 = arith.truncf %430 : vector<8x8xf32> to vector<8x8xbf16>
    %cst_165 = arith.constant dense<0.000000e+00> : vector<8x8xf32>
    %432 = tpu.matmul %431, %418, %cst_165 {dimension_numbers = #tpu.dot_dimension_numbers<[1], [0], [0], [1], [0, 0, 1, 1], [], []>} : vector<8x8xbf16>, vector<8x8xbf16>, vector<8x8xf32> -> vector<8x8xf32>
    %433 = arith.truncf %432 : vector<8x8xf32> to vector<8x8xbf16>
    %c0_166 = arith.constant 0 : index
    %c0_167 = arith.constant 0 : index
    %c0_168 = arith.constant 0 : index
    %434 = vector.load %arg33[%c0_166, %c0_167, %c0_168] : memref<4x8x32xbf16, #tpu.memory_space<vmem>>, vector<1x8x32xbf16>
    %435 = vector.shape_cast %434 : vector<1x8x32xbf16> to vector<8x32xbf16>
    %cst_169 = arith.constant dense<0.000000e+00> : vector<8x32xf32>
    %436 = tpu.matmul %433, %435, %cst_169 {dimension_numbers = #tpu.dot_dimension_numbers<[1], [0], [0], [1], [0, 0, 1, 1], [], []>} : vector<8x8xbf16>, vector<8x32xbf16>, vector<8x32xf32> -> vector<8x32xf32>
    %437 = arith.addf %412, %436 : vector<8x32xf32>
    %438 = vector.extract_strided_slice %409 {offsets = [0, 8], sizes = [8, 8], strides = [1, 1]} : vector<8x32xf32> to vector<8x8xf32>
    %439 = arith.truncf %438 : vector<8x8xf32> to vector<8x8xbf16>
    %440 = vector.extract_strided_slice %410 {offsets = [0, 8], sizes = [8, 8], strides = [1, 1]} : vector<8x32xf32> to vector<8x8xf32>
    %441 = arith.truncf %440 : vector<8x8xf32> to vector<8x8xbf16>
    %442 = vector.extract_strided_slice %411 {offsets = [0, 8], sizes = [8, 8], strides = [1, 1]} : vector<8x32xf32> to vector<8x8xf32>
    %443 = arith.truncf %442 : vector<8x8xf32> to vector<8x8xbf16>
    %cst_170 = arith.constant dense<0.000000e+00> : vector<8x8xf32>
    %444 = tpu.matmul %439, %441, %cst_170 {dimension_numbers = #tpu.dot_dimension_numbers<[1], [1], [0], [0], [0, 0, 1, 0], [], []>} : vector<8x8xbf16>, vector<8x8xbf16>, vector<8x8xf32> -> vector<8x8xf32>
    %445 = arith.addf %444, %402 : vector<8x8xf32>
    %cst_171 = arith.constant dense<0xFF800000> : vector<8xf32>
    %446 = vector.multi_reduction <maximumf>, %445, %cst_171 [1] : vector<8x8xf32> to vector<8xf32>
    %447 = vector.shape_cast %446 : vector<8xf32> to vector<8x1xf32>
    %448 = vector.broadcast %447 : vector<8x1xf32> to vector<8x8xf32>
    %449 = arith.subf %445, %448 : vector<8x8xf32>
    %450 = math.exp %449 : vector<8x8xf32>
    %cst_172 = arith.constant dense<0.000000e+00> : vector<8xf32>
    %451 = vector.multi_reduction <add>, %450, %cst_172 [1] : vector<8x8xf32> to vector<8xf32>
    %452 = vector.shape_cast %451 : vector<8xf32> to vector<8x1xf32>
    %453 = tpu.reciprocal %452 {approx = true} : vector<8x1xf32> -> vector<8x1xf32>
    %454 = vector.broadcast %453 : vector<8x1xf32> to vector<8x8xf32>
    %455 = arith.mulf %450, %454 : vector<8x8xf32>
    %456 = arith.truncf %455 : vector<8x8xf32> to vector<8x8xbf16>
    %cst_173 = arith.constant dense<0.000000e+00> : vector<8x8xf32>
    %457 = tpu.matmul %456, %443, %cst_173 {dimension_numbers = #tpu.dot_dimension_numbers<[1], [0], [0], [1], [0, 0, 1, 1], [], []>} : vector<8x8xbf16>, vector<8x8xbf16>, vector<8x8xf32> -> vector<8x8xf32>
    %458 = arith.truncf %457 : vector<8x8xf32> to vector<8x8xbf16>
    %c1_174 = arith.constant 1 : index
    %c0_175 = arith.constant 0 : index
    %c0_176 = arith.constant 0 : index
    %459 = vector.load %arg33[%c1_174, %c0_175, %c0_176] : memref<4x8x32xbf16, #tpu.memory_space<vmem>>, vector<1x8x32xbf16>
    %460 = vector.shape_cast %459 : vector<1x8x32xbf16> to vector<8x32xbf16>
    %cst_177 = arith.constant dense<0.000000e+00> : vector<8x32xf32>
    %461 = tpu.matmul %458, %460, %cst_177 {dimension_numbers = #tpu.dot_dimension_numbers<[1], [0], [0], [1], [0, 0, 1, 1], [], []>} : vector<8x8xbf16>, vector<8x32xbf16>, vector<8x32xf32> -> vector<8x32xf32>
    %462 = arith.addf %437, %461 : vector<8x32xf32>
    %463 = vector.extract_strided_slice %409 {offsets = [0, 16], sizes = [8, 8], strides = [1, 1]} : vector<8x32xf32> to vector<8x8xf32>
    %464 = arith.truncf %463 : vector<8x8xf32> to vector<8x8xbf16>
    %465 = vector.extract_strided_slice %410 {offsets = [0, 16], sizes = [8, 8], strides = [1, 1]} : vector<8x32xf32> to vector<8x8xf32>
    %466 = arith.truncf %465 : vector<8x8xf32> to vector<8x8xbf16>
    %467 = vector.extract_strided_slice %411 {offsets = [0, 16], sizes = [8, 8], strides = [1, 1]} : vector<8x32xf32> to vector<8x8xf32>
    %468 = arith.truncf %467 : vector<8x8xf32> to vector<8x8xbf16>
    %cst_178 = arith.constant dense<0.000000e+00> : vector<8x8xf32>
    %469 = tpu.matmul %464, %466, %cst_178 {dimension_numbers = #tpu.dot_dimension_numbers<[1], [1], [0], [0], [0, 0, 1, 0], [], []>} : vector<8x8xbf16>, vector<8x8xbf16>, vector<8x8xf32> -> vector<8x8xf32>
    %470 = arith.addf %469, %402 : vector<8x8xf32>
    %cst_179 = arith.constant dense<0xFF800000> : vector<8xf32>
    %471 = vector.multi_reduction <maximumf>, %470, %cst_179 [1] : vector<8x8xf32> to vector<8xf32>
    %472 = vector.shape_cast %471 : vector<8xf32> to vector<8x1xf32>
    %473 = vector.broadcast %472 : vector<8x1xf32> to vector<8x8xf32>
    %474 = arith.subf %470, %473 : vector<8x8xf32>
    %475 = math.exp %474 : vector<8x8xf32>
    %cst_180 = arith.constant dense<0.000000e+00> : vector<8xf32>
    %476 = vector.multi_reduction <add>, %475, %cst_180 [1] : vector<8x8xf32> to vector<8xf32>
    %477 = vector.shape_cast %476 : vector<8xf32> to vector<8x1xf32>
    %478 = tpu.reciprocal %477 {approx = true} : vector<8x1xf32> -> vector<8x1xf32>
    %479 = vector.broadcast %478 : vector<8x1xf32> to vector<8x8xf32>
    %480 = arith.mulf %475, %479 : vector<8x8xf32>
    %481 = arith.truncf %480 : vector<8x8xf32> to vector<8x8xbf16>
    %cst_181 = arith.constant dense<0.000000e+00> : vector<8x8xf32>
    %482 = tpu.matmul %481, %468, %cst_181 {dimension_numbers = #tpu.dot_dimension_numbers<[1], [0], [0], [1], [0, 0, 1, 1], [], []>} : vector<8x8xbf16>, vector<8x8xbf16>, vector<8x8xf32> -> vector<8x8xf32>
    %483 = arith.truncf %482 : vector<8x8xf32> to vector<8x8xbf16>
    %c2_182 = arith.constant 2 : index
    %c0_183 = arith.constant 0 : index
    %c0_184 = arith.constant 0 : index
    %484 = vector.load %arg33[%c2_182, %c0_183, %c0_184] : memref<4x8x32xbf16, #tpu.memory_space<vmem>>, vector<1x8x32xbf16>
    %485 = vector.shape_cast %484 : vector<1x8x32xbf16> to vector<8x32xbf16>
    %cst_185 = arith.constant dense<0.000000e+00> : vector<8x32xf32>
    %486 = tpu.matmul %483, %485, %cst_185 {dimension_numbers = #tpu.dot_dimension_numbers<[1], [0], [0], [1], [0, 0, 1, 1], [], []>} : vector<8x8xbf16>, vector<8x32xbf16>, vector<8x32xf32> -> vector<8x32xf32>
    %487 = arith.addf %462, %486 : vector<8x32xf32>
    %488 = vector.extract_strided_slice %409 {offsets = [0, 24], sizes = [8, 8], strides = [1, 1]} : vector<8x32xf32> to vector<8x8xf32>
    %489 = arith.truncf %488 : vector<8x8xf32> to vector<8x8xbf16>
    %490 = vector.extract_strided_slice %410 {offsets = [0, 24], sizes = [8, 8], strides = [1, 1]} : vector<8x32xf32> to vector<8x8xf32>
    %491 = arith.truncf %490 : vector<8x8xf32> to vector<8x8xbf16>
    %492 = vector.extract_strided_slice %411 {offsets = [0, 24], sizes = [8, 8], strides = [1, 1]} : vector<8x32xf32> to vector<8x8xf32>
    %493 = arith.truncf %492 : vector<8x8xf32> to vector<8x8xbf16>
    %cst_186 = arith.constant dense<0.000000e+00> : vector<8x8xf32>
    %494 = tpu.matmul %489, %491, %cst_186 {dimension_numbers = #tpu.dot_dimension_numbers<[1], [1], [0], [0], [0, 0, 1, 0], [], []>} : vector<8x8xbf16>, vector<8x8xbf16>, vector<8x8xf32> -> vector<8x8xf32>
    %495 = arith.addf %494, %402 : vector<8x8xf32>
    %cst_187 = arith.constant dense<0xFF800000> : vector<8xf32>
    %496 = vector.multi_reduction <maximumf>, %495, %cst_187 [1] : vector<8x8xf32> to vector<8xf32>
    %497 = vector.shape_cast %496 : vector<8xf32> to vector<8x1xf32>
    %498 = vector.broadcast %497 : vector<8x1xf32> to vector<8x8xf32>
    %499 = arith.subf %495, %498 : vector<8x8xf32>
    %500 = math.exp %499 : vector<8x8xf32>
    %cst_188 = arith.constant dense<0.000000e+00> : vector<8xf32>
    %501 = vector.multi_reduction <add>, %500, %cst_188 [1] : vector<8x8xf32> to vector<8xf32>
    %502 = vector.shape_cast %501 : vector<8xf32> to vector<8x1xf32>
    %503 = tpu.reciprocal %502 {approx = true} : vector<8x1xf32> -> vector<8x1xf32>
    %504 = vector.broadcast %503 : vector<8x1xf32> to vector<8x8xf32>
    %505 = arith.mulf %500, %504 : vector<8x8xf32>
    %506 = arith.truncf %505 : vector<8x8xf32> to vector<8x8xbf16>
    %cst_189 = arith.constant dense<0.000000e+00> : vector<8x8xf32>
    %507 = tpu.matmul %506, %493, %cst_189 {dimension_numbers = #tpu.dot_dimension_numbers<[1], [0], [0], [1], [0, 0, 1, 1], [], []>} : vector<8x8xbf16>, vector<8x8xbf16>, vector<8x8xf32> -> vector<8x8xf32>
    %508 = arith.truncf %507 : vector<8x8xf32> to vector<8x8xbf16>
    %c3_190 = arith.constant 3 : index
    %c0_191 = arith.constant 0 : index
    %c0_192 = arith.constant 0 : index
    %509 = vector.load %arg33[%c3_190, %c0_191, %c0_192] : memref<4x8x32xbf16, #tpu.memory_space<vmem>>, vector<1x8x32xbf16>
    %510 = vector.shape_cast %509 : vector<1x8x32xbf16> to vector<8x32xbf16>
    %cst_193 = arith.constant dense<0.000000e+00> : vector<8x32xf32>
    %511 = tpu.matmul %508, %510, %cst_193 {dimension_numbers = #tpu.dot_dimension_numbers<[1], [0], [0], [1], [0, 0, 1, 1], [], []>} : vector<8x8xbf16>, vector<8x32xbf16>, vector<8x32xf32> -> vector<8x32xf32>
    %512 = arith.addf %487, %511 : vector<8x32xf32>
    %c0_194 = arith.constant 0 : index
    %c0_195 = arith.constant 0 : index
    %513 = vector.load %arg34[%c0_194, %c0_195] : memref<1x32xf32, #tpu.memory_space<vmem>>, vector<1x32xf32>
    %514 = vector.broadcast %513 : vector<1x32xf32> to vector<8x32xf32>
    %515 = arith.addf %512, %514 : vector<8x32xf32>
    %516 = arith.addf %3, %515 : vector<8x32xf32>
    %c0_196 = arith.constant 0 : index
    %c0_197 = arith.constant 0 : index
    %517 = vector.load %arg35[%c0_196, %c0_197] : memref<1x32xf32, #tpu.memory_space<vmem>>, vector<1x32xf32>
    %c0_198 = arith.constant 0 : index
    %c0_199 = arith.constant 0 : index
    %518 = vector.load %arg36[%c0_198, %c0_199] : memref<1x32xf32, #tpu.memory_space<vmem>>, vector<1x32xf32>
    %cst_200 = arith.constant dense<0.000000e+00> : vector<8xf32>
    %519 = vector.multi_reduction <add>, %516, %cst_200 [1] : vector<8x32xf32> to vector<8xf32>
    %520 = vector.shape_cast %519 : vector<8xf32> to vector<8x1xf32>
    %cst_201 = arith.constant 3.200000e+01 : f32
    %521 = vector.broadcast %cst_201 : f32 to vector<8x1xf32>
    %522 = arith.divf %520, %521 : vector<8x1xf32>
    %523 = vector.broadcast %522 : vector<8x1xf32> to vector<8x32xf32>
    %524 = arith.subf %516, %523 : vector<8x32xf32>
    %525 = arith.mulf %524, %524 : vector<8x32xf32>
    %cst_202 = arith.constant dense<0.000000e+00> : vector<8xf32>
    %526 = vector.multi_reduction <add>, %525, %cst_202 [1] : vector<8x32xf32> to vector<8xf32>
    %527 = vector.shape_cast %526 : vector<8xf32> to vector<8x1xf32>
    %cst_203 = arith.constant 3.200000e+01 : f32
    %528 = vector.broadcast %cst_203 : f32 to vector<8x1xf32>
    %529 = arith.divf %527, %528 : vector<8x1xf32>
    %530 = vector.broadcast %522 : vector<8x1xf32> to vector<8x32xf32>
    %531 = arith.subf %516, %530 : vector<8x32xf32>
    %cst_204 = arith.constant 9.99999974E-6 : f32
    %532 = vector.broadcast %cst_204 : f32 to vector<8x1xf32>
    %533 = arith.addf %529, %532 : vector<8x1xf32>
    %534 = math.rsqrt %533 : vector<8x1xf32>
    %535 = vector.broadcast %534 : vector<8x1xf32> to vector<8x32xf32>
    %536 = arith.mulf %531, %535 : vector<8x32xf32>
    %537 = vector.broadcast %517 : vector<1x32xf32> to vector<8x32xf32>
    %538 = arith.mulf %536, %537 : vector<8x32xf32>
    %539 = vector.broadcast %518 : vector<1x32xf32> to vector<8x32xf32>
    %540 = arith.addf %538, %539 : vector<8x32xf32>
    %541 = arith.truncf %540 : vector<8x32xf32> to vector<8x32xbf16>
    %c0_205 = arith.constant 0 : index
    %c0_206 = arith.constant 0 : index
    %542 = vector.load %arg37[%c0_205, %c0_206] : memref<32x32xbf16, #tpu.memory_space<vmem>>, vector<32x32xbf16>
    %cst_207 = arith.constant dense<0.000000e+00> : vector<8x32xf32>
    %543 = tpu.matmul %541, %542, %cst_207 {dimension_numbers = #tpu.dot_dimension_numbers<[1], [0], [0], [1], [0, 0, 1, 1], [], []>} : vector<8x32xbf16>, vector<32x32xbf16>, vector<8x32xf32> -> vector<8x32xf32>
    %c0_208 = arith.constant 0 : index
    %c0_209 = arith.constant 0 : index
    %544 = vector.load %arg38[%c0_208, %c0_209] : memref<1x32xf32, #tpu.memory_space<vmem>>, vector<1x32xf32>
    %545 = vector.broadcast %544 : vector<1x32xf32> to vector<8x32xf32>
    %546 = arith.addf %543, %545 : vector<8x32xf32>
    %c0_210 = arith.constant 0 : index
    %c0_211 = arith.constant 0 : index
    %547 = vector.load %arg39[%c0_210, %c0_211] : memref<32x64xbf16, #tpu.memory_space<vmem>>, vector<32x64xbf16>
    %cst_212 = arith.constant dense<0.000000e+00> : vector<8x64xf32>
    %548 = tpu.matmul %394, %547, %cst_212 {dimension_numbers = #tpu.dot_dimension_numbers<[1], [0], [0], [1], [0, 0, 1, 1], [], []>} : vector<8x32xbf16>, vector<32x64xbf16>, vector<8x64xf32> -> vector<8x64xf32>
    %c0_213 = arith.constant 0 : index
    %c0_214 = arith.constant 0 : index
    %549 = vector.load %arg40[%c0_213, %c0_214] : memref<1x64xf32, #tpu.memory_space<vmem>>, vector<1x64xf32>
    %550 = vector.broadcast %549 : vector<1x64xf32> to vector<8x64xf32>
    %551 = arith.addf %548, %550 : vector<8x64xf32>
    %552 = vector.extract_strided_slice %551 {offsets = [0, 0], sizes = [8, 32], strides = [1, 1]} : vector<8x64xf32> to vector<8x32xf32>
    %553 = vector.extract_strided_slice %551 {offsets = [0, 32], sizes = [8, 32], strides = [1, 1]} : vector<8x64xf32> to vector<8x32xf32>
    %cst_215 = arith.constant 0.000000e+00 : f32
    %554 = vector.broadcast %cst_215 : f32 to vector<8x32xf32>
    %555 = vector.extract_strided_slice %546 {offsets = [0, 0], sizes = [8, 8], strides = [1, 1]} : vector<8x32xf32> to vector<8x8xf32>
    %556 = arith.truncf %555 : vector<8x8xf32> to vector<8x8xbf16>
    %557 = vector.extract_strided_slice %552 {offsets = [0, 0], sizes = [8, 8], strides = [1, 1]} : vector<8x32xf32> to vector<8x8xf32>
    %558 = arith.truncf %557 : vector<8x8xf32> to vector<8x8xbf16>
    %559 = vector.extract_strided_slice %553 {offsets = [0, 0], sizes = [8, 8], strides = [1, 1]} : vector<8x32xf32> to vector<8x8xf32>
    %560 = arith.truncf %559 : vector<8x8xf32> to vector<8x8xbf16>
    %cst_216 = arith.constant dense<0.000000e+00> : vector<8x8xf32>
    %561 = tpu.matmul %556, %558, %cst_216 {dimension_numbers = #tpu.dot_dimension_numbers<[1], [1], [0], [0], [0, 0, 1, 0], [], []>} : vector<8x8xbf16>, vector<8x8xbf16>, vector<8x8xf32> -> vector<8x8xf32>
    %562 = vector.broadcast %5 : vector<1x8xf32> to vector<8x8xf32>
    %563 = arith.addf %561, %562 : vector<8x8xf32>
    %cst_217 = arith.constant dense<0xFF800000> : vector<8xf32>
    %564 = vector.multi_reduction <maximumf>, %563, %cst_217 [1] : vector<8x8xf32> to vector<8xf32>
    %565 = vector.shape_cast %564 : vector<8xf32> to vector<8x1xf32>
    %566 = vector.broadcast %565 : vector<8x1xf32> to vector<8x8xf32>
    %567 = arith.subf %563, %566 : vector<8x8xf32>
    %568 = math.exp %567 : vector<8x8xf32>
    %cst_218 = arith.constant dense<0.000000e+00> : vector<8xf32>
    %569 = vector.multi_reduction <add>, %568, %cst_218 [1] : vector<8x8xf32> to vector<8xf32>
    %570 = vector.shape_cast %569 : vector<8xf32> to vector<8x1xf32>
    %571 = tpu.reciprocal %570 {approx = true} : vector<8x1xf32> -> vector<8x1xf32>
    %572 = vector.broadcast %571 : vector<8x1xf32> to vector<8x8xf32>
    %573 = arith.mulf %568, %572 : vector<8x8xf32>
    %574 = arith.truncf %573 : vector<8x8xf32> to vector<8x8xbf16>
    %cst_219 = arith.constant dense<0.000000e+00> : vector<8x8xf32>
    %575 = tpu.matmul %574, %560, %cst_219 {dimension_numbers = #tpu.dot_dimension_numbers<[1], [0], [0], [1], [0, 0, 1, 1], [], []>} : vector<8x8xbf16>, vector<8x8xbf16>, vector<8x8xf32> -> vector<8x8xf32>
    %576 = arith.truncf %575 : vector<8x8xf32> to vector<8x8xbf16>
    %c0_220 = arith.constant 0 : index
    %c0_221 = arith.constant 0 : index
    %c0_222 = arith.constant 0 : index
    %577 = vector.load %arg41[%c0_220, %c0_221, %c0_222] : memref<4x8x32xbf16, #tpu.memory_space<vmem>>, vector<1x8x32xbf16>
    %578 = vector.shape_cast %577 : vector<1x8x32xbf16> to vector<8x32xbf16>
    %cst_223 = arith.constant dense<0.000000e+00> : vector<8x32xf32>
    %579 = tpu.matmul %576, %578, %cst_223 {dimension_numbers = #tpu.dot_dimension_numbers<[1], [0], [0], [1], [0, 0, 1, 1], [], []>} : vector<8x8xbf16>, vector<8x32xbf16>, vector<8x32xf32> -> vector<8x32xf32>
    %580 = arith.addf %554, %579 : vector<8x32xf32>
    %581 = vector.extract_strided_slice %546 {offsets = [0, 8], sizes = [8, 8], strides = [1, 1]} : vector<8x32xf32> to vector<8x8xf32>
    %582 = arith.truncf %581 : vector<8x8xf32> to vector<8x8xbf16>
    %583 = vector.extract_strided_slice %552 {offsets = [0, 8], sizes = [8, 8], strides = [1, 1]} : vector<8x32xf32> to vector<8x8xf32>
    %584 = arith.truncf %583 : vector<8x8xf32> to vector<8x8xbf16>
    %585 = vector.extract_strided_slice %553 {offsets = [0, 8], sizes = [8, 8], strides = [1, 1]} : vector<8x32xf32> to vector<8x8xf32>
    %586 = arith.truncf %585 : vector<8x8xf32> to vector<8x8xbf16>
    %cst_224 = arith.constant dense<0.000000e+00> : vector<8x8xf32>
    %587 = tpu.matmul %582, %584, %cst_224 {dimension_numbers = #tpu.dot_dimension_numbers<[1], [1], [0], [0], [0, 0, 1, 0], [], []>} : vector<8x8xbf16>, vector<8x8xbf16>, vector<8x8xf32> -> vector<8x8xf32>
    %588 = vector.broadcast %5 : vector<1x8xf32> to vector<8x8xf32>
    %589 = arith.addf %587, %588 : vector<8x8xf32>
    %cst_225 = arith.constant dense<0xFF800000> : vector<8xf32>
    %590 = vector.multi_reduction <maximumf>, %589, %cst_225 [1] : vector<8x8xf32> to vector<8xf32>
    %591 = vector.shape_cast %590 : vector<8xf32> to vector<8x1xf32>
    %592 = vector.broadcast %591 : vector<8x1xf32> to vector<8x8xf32>
    %593 = arith.subf %589, %592 : vector<8x8xf32>
    %594 = math.exp %593 : vector<8x8xf32>
    %cst_226 = arith.constant dense<0.000000e+00> : vector<8xf32>
    %595 = vector.multi_reduction <add>, %594, %cst_226 [1] : vector<8x8xf32> to vector<8xf32>
    %596 = vector.shape_cast %595 : vector<8xf32> to vector<8x1xf32>
    %597 = tpu.reciprocal %596 {approx = true} : vector<8x1xf32> -> vector<8x1xf32>
    %598 = vector.broadcast %597 : vector<8x1xf32> to vector<8x8xf32>
    %599 = arith.mulf %594, %598 : vector<8x8xf32>
    %600 = arith.truncf %599 : vector<8x8xf32> to vector<8x8xbf16>
    %cst_227 = arith.constant dense<0.000000e+00> : vector<8x8xf32>
    %601 = tpu.matmul %600, %586, %cst_227 {dimension_numbers = #tpu.dot_dimension_numbers<[1], [0], [0], [1], [0, 0, 1, 1], [], []>} : vector<8x8xbf16>, vector<8x8xbf16>, vector<8x8xf32> -> vector<8x8xf32>
    %602 = arith.truncf %601 : vector<8x8xf32> to vector<8x8xbf16>
    %c1_228 = arith.constant 1 : index
    %c0_229 = arith.constant 0 : index
    %c0_230 = arith.constant 0 : index
    %603 = vector.load %arg41[%c1_228, %c0_229, %c0_230] : memref<4x8x32xbf16, #tpu.memory_space<vmem>>, vector<1x8x32xbf16>
    %604 = vector.shape_cast %603 : vector<1x8x32xbf16> to vector<8x32xbf16>
    %cst_231 = arith.constant dense<0.000000e+00> : vector<8x32xf32>
    %605 = tpu.matmul %602, %604, %cst_231 {dimension_numbers = #tpu.dot_dimension_numbers<[1], [0], [0], [1], [0, 0, 1, 1], [], []>} : vector<8x8xbf16>, vector<8x32xbf16>, vector<8x32xf32> -> vector<8x32xf32>
    %606 = arith.addf %580, %605 : vector<8x32xf32>
    %607 = vector.extract_strided_slice %546 {offsets = [0, 16], sizes = [8, 8], strides = [1, 1]} : vector<8x32xf32> to vector<8x8xf32>
    %608 = arith.truncf %607 : vector<8x8xf32> to vector<8x8xbf16>
    %609 = vector.extract_strided_slice %552 {offsets = [0, 16], sizes = [8, 8], strides = [1, 1]} : vector<8x32xf32> to vector<8x8xf32>
    %610 = arith.truncf %609 : vector<8x8xf32> to vector<8x8xbf16>
    %611 = vector.extract_strided_slice %553 {offsets = [0, 16], sizes = [8, 8], strides = [1, 1]} : vector<8x32xf32> to vector<8x8xf32>
    %612 = arith.truncf %611 : vector<8x8xf32> to vector<8x8xbf16>
    %cst_232 = arith.constant dense<0.000000e+00> : vector<8x8xf32>
    %613 = tpu.matmul %608, %610, %cst_232 {dimension_numbers = #tpu.dot_dimension_numbers<[1], [1], [0], [0], [0, 0, 1, 0], [], []>} : vector<8x8xbf16>, vector<8x8xbf16>, vector<8x8xf32> -> vector<8x8xf32>
    %614 = vector.broadcast %5 : vector<1x8xf32> to vector<8x8xf32>
    %615 = arith.addf %613, %614 : vector<8x8xf32>
    %cst_233 = arith.constant dense<0xFF800000> : vector<8xf32>
    %616 = vector.multi_reduction <maximumf>, %615, %cst_233 [1] : vector<8x8xf32> to vector<8xf32>
    %617 = vector.shape_cast %616 : vector<8xf32> to vector<8x1xf32>
    %618 = vector.broadcast %617 : vector<8x1xf32> to vector<8x8xf32>
    %619 = arith.subf %615, %618 : vector<8x8xf32>
    %620 = math.exp %619 : vector<8x8xf32>
    %cst_234 = arith.constant dense<0.000000e+00> : vector<8xf32>
    %621 = vector.multi_reduction <add>, %620, %cst_234 [1] : vector<8x8xf32> to vector<8xf32>
    %622 = vector.shape_cast %621 : vector<8xf32> to vector<8x1xf32>
    %623 = tpu.reciprocal %622 {approx = true} : vector<8x1xf32> -> vector<8x1xf32>
    %624 = vector.broadcast %623 : vector<8x1xf32> to vector<8x8xf32>
    %625 = arith.mulf %620, %624 : vector<8x8xf32>
    %626 = arith.truncf %625 : vector<8x8xf32> to vector<8x8xbf16>
    %cst_235 = arith.constant dense<0.000000e+00> : vector<8x8xf32>
    %627 = tpu.matmul %626, %612, %cst_235 {dimension_numbers = #tpu.dot_dimension_numbers<[1], [0], [0], [1], [0, 0, 1, 1], [], []>} : vector<8x8xbf16>, vector<8x8xbf16>, vector<8x8xf32> -> vector<8x8xf32>
    %628 = arith.truncf %627 : vector<8x8xf32> to vector<8x8xbf16>
    %c2_236 = arith.constant 2 : index
    %c0_237 = arith.constant 0 : index
    %c0_238 = arith.constant 0 : index
    %629 = vector.load %arg41[%c2_236, %c0_237, %c0_238] : memref<4x8x32xbf16, #tpu.memory_space<vmem>>, vector<1x8x32xbf16>
    %630 = vector.shape_cast %629 : vector<1x8x32xbf16> to vector<8x32xbf16>
    %cst_239 = arith.constant dense<0.000000e+00> : vector<8x32xf32>
    %631 = tpu.matmul %628, %630, %cst_239 {dimension_numbers = #tpu.dot_dimension_numbers<[1], [0], [0], [1], [0, 0, 1, 1], [], []>} : vector<8x8xbf16>, vector<8x32xbf16>, vector<8x32xf32> -> vector<8x32xf32>
    %632 = arith.addf %606, %631 : vector<8x32xf32>
    %633 = vector.extract_strided_slice %546 {offsets = [0, 24], sizes = [8, 8], strides = [1, 1]} : vector<8x32xf32> to vector<8x8xf32>
    %634 = arith.truncf %633 : vector<8x8xf32> to vector<8x8xbf16>
    %635 = vector.extract_strided_slice %552 {offsets = [0, 24], sizes = [8, 8], strides = [1, 1]} : vector<8x32xf32> to vector<8x8xf32>
    %636 = arith.truncf %635 : vector<8x8xf32> to vector<8x8xbf16>
    %637 = vector.extract_strided_slice %553 {offsets = [0, 24], sizes = [8, 8], strides = [1, 1]} : vector<8x32xf32> to vector<8x8xf32>
    %638 = arith.truncf %637 : vector<8x8xf32> to vector<8x8xbf16>
    %cst_240 = arith.constant dense<0.000000e+00> : vector<8x8xf32>
    %639 = tpu.matmul %634, %636, %cst_240 {dimension_numbers = #tpu.dot_dimension_numbers<[1], [1], [0], [0], [0, 0, 1, 0], [], []>} : vector<8x8xbf16>, vector<8x8xbf16>, vector<8x8xf32> -> vector<8x8xf32>
    %640 = vector.broadcast %5 : vector<1x8xf32> to vector<8x8xf32>
    %641 = arith.addf %639, %640 : vector<8x8xf32>
    %cst_241 = arith.constant dense<0xFF800000> : vector<8xf32>
    %642 = vector.multi_reduction <maximumf>, %641, %cst_241 [1] : vector<8x8xf32> to vector<8xf32>
    %643 = vector.shape_cast %642 : vector<8xf32> to vector<8x1xf32>
    %644 = vector.broadcast %643 : vector<8x1xf32> to vector<8x8xf32>
    %645 = arith.subf %641, %644 : vector<8x8xf32>
    %646 = math.exp %645 : vector<8x8xf32>
    %cst_242 = arith.constant dense<0.000000e+00> : vector<8xf32>
    %647 = vector.multi_reduction <add>, %646, %cst_242 [1] : vector<8x8xf32> to vector<8xf32>
    %648 = vector.shape_cast %647 : vector<8xf32> to vector<8x1xf32>
    %649 = tpu.reciprocal %648 {approx = true} : vector<8x1xf32> -> vector<8x1xf32>
    %650 = vector.broadcast %649 : vector<8x1xf32> to vector<8x8xf32>
    %651 = arith.mulf %646, %650 : vector<8x8xf32>
    %652 = arith.truncf %651 : vector<8x8xf32> to vector<8x8xbf16>
    %cst_243 = arith.constant dense<0.000000e+00> : vector<8x8xf32>
    %653 = tpu.matmul %652, %638, %cst_243 {dimension_numbers = #tpu.dot_dimension_numbers<[1], [0], [0], [1], [0, 0, 1, 1], [], []>} : vector<8x8xbf16>, vector<8x8xbf16>, vector<8x8xf32> -> vector<8x8xf32>
    %654 = arith.truncf %653 : vector<8x8xf32> to vector<8x8xbf16>
    %c3_244 = arith.constant 3 : index
    %c0_245 = arith.constant 0 : index
    %c0_246 = arith.constant 0 : index
    %655 = vector.load %arg41[%c3_244, %c0_245, %c0_246] : memref<4x8x32xbf16, #tpu.memory_space<vmem>>, vector<1x8x32xbf16>
    %656 = vector.shape_cast %655 : vector<1x8x32xbf16> to vector<8x32xbf16>
    %cst_247 = arith.constant dense<0.000000e+00> : vector<8x32xf32>
    %657 = tpu.matmul %654, %656, %cst_247 {dimension_numbers = #tpu.dot_dimension_numbers<[1], [0], [0], [1], [0, 0, 1, 1], [], []>} : vector<8x8xbf16>, vector<8x32xbf16>, vector<8x32xf32> -> vector<8x32xf32>
    %658 = arith.addf %632, %657 : vector<8x32xf32>
    %c0_248 = arith.constant 0 : index
    %c0_249 = arith.constant 0 : index
    %659 = vector.load %arg42[%c0_248, %c0_249] : memref<1x32xf32, #tpu.memory_space<vmem>>, vector<1x32xf32>
    %660 = vector.broadcast %659 : vector<1x32xf32> to vector<8x32xf32>
    %661 = arith.addf %658, %660 : vector<8x32xf32>
    %662 = arith.addf %540, %661 : vector<8x32xf32>
    %c0_250 = arith.constant 0 : index
    %c0_251 = arith.constant 0 : index
    %663 = vector.load %arg43[%c0_250, %c0_251] : memref<1x32xf32, #tpu.memory_space<vmem>>, vector<1x32xf32>
    %c0_252 = arith.constant 0 : index
    %c0_253 = arith.constant 0 : index
    %664 = vector.load %arg44[%c0_252, %c0_253] : memref<1x32xf32, #tpu.memory_space<vmem>>, vector<1x32xf32>
    %cst_254 = arith.constant dense<0.000000e+00> : vector<8xf32>
    %665 = vector.multi_reduction <add>, %662, %cst_254 [1] : vector<8x32xf32> to vector<8xf32>
    %666 = vector.shape_cast %665 : vector<8xf32> to vector<8x1xf32>
    %cst_255 = arith.constant 3.200000e+01 : f32
    %667 = vector.broadcast %cst_255 : f32 to vector<8x1xf32>
    %668 = arith.divf %666, %667 : vector<8x1xf32>
    %669 = vector.broadcast %668 : vector<8x1xf32> to vector<8x32xf32>
    %670 = arith.subf %662, %669 : vector<8x32xf32>
    %671 = arith.mulf %670, %670 : vector<8x32xf32>
    %cst_256 = arith.constant dense<0.000000e+00> : vector<8xf32>
    %672 = vector.multi_reduction <add>, %671, %cst_256 [1] : vector<8x32xf32> to vector<8xf32>
    %673 = vector.shape_cast %672 : vector<8xf32> to vector<8x1xf32>
    %cst_257 = arith.constant 3.200000e+01 : f32
    %674 = vector.broadcast %cst_257 : f32 to vector<8x1xf32>
    %675 = arith.divf %673, %674 : vector<8x1xf32>
    %676 = vector.broadcast %668 : vector<8x1xf32> to vector<8x32xf32>
    %677 = arith.subf %662, %676 : vector<8x32xf32>
    %cst_258 = arith.constant 9.99999974E-6 : f32
    %678 = vector.broadcast %cst_258 : f32 to vector<8x1xf32>
    %679 = arith.addf %675, %678 : vector<8x1xf32>
    %680 = math.rsqrt %679 : vector<8x1xf32>
    %681 = vector.broadcast %680 : vector<8x1xf32> to vector<8x32xf32>
    %682 = arith.mulf %677, %681 : vector<8x32xf32>
    %683 = vector.broadcast %663 : vector<1x32xf32> to vector<8x32xf32>
    %684 = arith.mulf %682, %683 : vector<8x32xf32>
    %685 = vector.broadcast %664 : vector<1x32xf32> to vector<8x32xf32>
    %686 = arith.addf %684, %685 : vector<8x32xf32>
    %687 = arith.truncf %686 : vector<8x32xf32> to vector<8x32xbf16>
    %c0_259 = arith.constant 0 : index
    %c0_260 = arith.constant 0 : index
    %688 = vector.load %arg45[%c0_259, %c0_260] : memref<32x64xbf16, #tpu.memory_space<vmem>>, vector<32x64xbf16>
    %cst_261 = arith.constant dense<0.000000e+00> : vector<8x64xf32>
    %689 = tpu.matmul %687, %688, %cst_261 {dimension_numbers = #tpu.dot_dimension_numbers<[1], [0], [0], [1], [0, 0, 1, 1], [], []>} : vector<8x32xbf16>, vector<32x64xbf16>, vector<8x64xf32> -> vector<8x64xf32>
    %c0_262 = arith.constant 0 : index
    %c0_263 = arith.constant 0 : index
    %690 = vector.load %arg46[%c0_262, %c0_263] : memref<1x64xf32, #tpu.memory_space<vmem>>, vector<1x64xf32>
    %691 = vector.broadcast %690 : vector<1x64xf32> to vector<8x64xf32>
    %692 = arith.addf %689, %691 : vector<8x64xf32>
    %cst_264 = arith.constant 0.000000e+00 : f32
    %693 = vector.broadcast %cst_264 : f32 to vector<8x64xf32>
    %694 = arith.maximumf %692, %693 : vector<8x64xf32>
    %695 = arith.truncf %694 : vector<8x64xf32> to vector<8x64xbf16>
    %c0_265 = arith.constant 0 : index
    %c0_266 = arith.constant 0 : index
    %696 = vector.load %arg47[%c0_265, %c0_266] : memref<64x32xbf16, #tpu.memory_space<vmem>>, vector<64x32xbf16>
    %cst_267 = arith.constant dense<0.000000e+00> : vector<8x32xf32>
    %697 = tpu.matmul %695, %696, %cst_267 {dimension_numbers = #tpu.dot_dimension_numbers<[1], [0], [0], [1], [0, 0, 1, 1], [], []>} : vector<8x64xbf16>, vector<64x32xbf16>, vector<8x32xf32> -> vector<8x32xf32>
    %c0_268 = arith.constant 0 : index
    %c0_269 = arith.constant 0 : index
    %698 = vector.load %arg48[%c0_268, %c0_269] : memref<1x32xf32, #tpu.memory_space<vmem>>, vector<1x32xf32>
    %699 = vector.broadcast %698 : vector<1x32xf32> to vector<8x32xf32>
    %700 = arith.addf %697, %699 : vector<8x32xf32>
    %701 = arith.addf %686, %700 : vector<8x32xf32>
    %c0_270 = arith.constant 0 : index
    %c0_271 = arith.constant 0 : index
    %702 = vector.load %arg49[%c0_270, %c0_271] : memref<1x32xf32, #tpu.memory_space<vmem>>, vector<1x32xf32>
    %c0_272 = arith.constant 0 : index
    %c0_273 = arith.constant 0 : index
    %703 = vector.load %arg50[%c0_272, %c0_273] : memref<1x32xf32, #tpu.memory_space<vmem>>, vector<1x32xf32>
    %cst_274 = arith.constant dense<0.000000e+00> : vector<8xf32>
    %704 = vector.multi_reduction <add>, %701, %cst_274 [1] : vector<8x32xf32> to vector<8xf32>
    %705 = vector.shape_cast %704 : vector<8xf32> to vector<8x1xf32>
    %cst_275 = arith.constant 3.200000e+01 : f32
    %706 = vector.broadcast %cst_275 : f32 to vector<8x1xf32>
    %707 = arith.divf %705, %706 : vector<8x1xf32>
    %708 = vector.broadcast %707 : vector<8x1xf32> to vector<8x32xf32>
    %709 = arith.subf %701, %708 : vector<8x32xf32>
    %710 = arith.mulf %709, %709 : vector<8x32xf32>
    %cst_276 = arith.constant dense<0.000000e+00> : vector<8xf32>
    %711 = vector.multi_reduction <add>, %710, %cst_276 [1] : vector<8x32xf32> to vector<8xf32>
    %712 = vector.shape_cast %711 : vector<8xf32> to vector<8x1xf32>
    %cst_277 = arith.constant 3.200000e+01 : f32
    %713 = vector.broadcast %cst_277 : f32 to vector<8x1xf32>
    %714 = arith.divf %712, %713 : vector<8x1xf32>
    %715 = vector.broadcast %707 : vector<8x1xf32> to vector<8x32xf32>
    %716 = arith.subf %701, %715 : vector<8x32xf32>
    %cst_278 = arith.constant 9.99999974E-6 : f32
    %717 = vector.broadcast %cst_278 : f32 to vector<8x1xf32>
    %718 = arith.addf %714, %717 : vector<8x1xf32>
    %719 = math.rsqrt %718 : vector<8x1xf32>
    %720 = vector.broadcast %719 : vector<8x1xf32> to vector<8x32xf32>
    %721 = arith.mulf %716, %720 : vector<8x32xf32>
    %722 = vector.broadcast %702 : vector<1x32xf32> to vector<8x32xf32>
    %723 = arith.mulf %721, %722 : vector<8x32xf32>
    %724 = vector.broadcast %703 : vector<1x32xf32> to vector<8x32xf32>
    %725 = arith.addf %723, %724 : vector<8x32xf32>
    %726 = arith.truncf %725 : vector<8x32xf32> to vector<8x32xbf16>
    %c0_279 = arith.constant 0 : index
    %c0_280 = arith.constant 0 : index
    %727 = vector.load %arg51[%c0_279, %c0_280] : memref<32x96xbf16, #tpu.memory_space<vmem>>, vector<32x96xbf16>
    %cst_281 = arith.constant dense<0.000000e+00> : vector<8x96xf32>
    %728 = tpu.matmul %726, %727, %cst_281 {dimension_numbers = #tpu.dot_dimension_numbers<[1], [0], [0], [1], [0, 0, 1, 1], [], []>} : vector<8x32xbf16>, vector<32x96xbf16>, vector<8x96xf32> -> vector<8x96xf32>
    %c0_282 = arith.constant 0 : index
    %c0_283 = arith.constant 0 : index
    %729 = vector.load %arg52[%c0_282, %c0_283] : memref<1x96xf32, #tpu.memory_space<vmem>>, vector<1x96xf32>
    %730 = vector.broadcast %729 : vector<1x96xf32> to vector<8x96xf32>
    %731 = arith.addf %728, %730 : vector<8x96xf32>
    %732 = vector.extract_strided_slice %731 {offsets = [0, 0], sizes = [8, 32], strides = [1, 1]} : vector<8x96xf32> to vector<8x32xf32>
    %733 = vector.extract_strided_slice %731 {offsets = [0, 32], sizes = [8, 32], strides = [1, 1]} : vector<8x96xf32> to vector<8x32xf32>
    %734 = vector.extract_strided_slice %731 {offsets = [0, 64], sizes = [8, 32], strides = [1, 1]} : vector<8x96xf32> to vector<8x32xf32>
    %cst_284 = arith.constant 0.000000e+00 : f32
    %735 = vector.broadcast %cst_284 : f32 to vector<8x32xf32>
    %736 = vector.extract_strided_slice %732 {offsets = [0, 0], sizes = [8, 8], strides = [1, 1]} : vector<8x32xf32> to vector<8x8xf32>
    %737 = arith.truncf %736 : vector<8x8xf32> to vector<8x8xbf16>
    %738 = vector.extract_strided_slice %733 {offsets = [0, 0], sizes = [8, 8], strides = [1, 1]} : vector<8x32xf32> to vector<8x8xf32>
    %739 = arith.truncf %738 : vector<8x8xf32> to vector<8x8xbf16>
    %740 = vector.extract_strided_slice %734 {offsets = [0, 0], sizes = [8, 8], strides = [1, 1]} : vector<8x32xf32> to vector<8x8xf32>
    %741 = arith.truncf %740 : vector<8x8xf32> to vector<8x8xbf16>
    %cst_285 = arith.constant dense<0.000000e+00> : vector<8x8xf32>
    %742 = tpu.matmul %737, %739, %cst_285 {dimension_numbers = #tpu.dot_dimension_numbers<[1], [1], [0], [0], [0, 0, 1, 0], [], []>} : vector<8x8xbf16>, vector<8x8xbf16>, vector<8x8xf32> -> vector<8x8xf32>
    %743 = arith.addf %742, %402 : vector<8x8xf32>
    %cst_286 = arith.constant dense<0xFF800000> : vector<8xf32>
    %744 = vector.multi_reduction <maximumf>, %743, %cst_286 [1] : vector<8x8xf32> to vector<8xf32>
    %745 = vector.shape_cast %744 : vector<8xf32> to vector<8x1xf32>
    %746 = vector.broadcast %745 : vector<8x1xf32> to vector<8x8xf32>
    %747 = arith.subf %743, %746 : vector<8x8xf32>
    %748 = math.exp %747 : vector<8x8xf32>
    %cst_287 = arith.constant dense<0.000000e+00> : vector<8xf32>
    %749 = vector.multi_reduction <add>, %748, %cst_287 [1] : vector<8x8xf32> to vector<8xf32>
    %750 = vector.shape_cast %749 : vector<8xf32> to vector<8x1xf32>
    %751 = tpu.reciprocal %750 {approx = true} : vector<8x1xf32> -> vector<8x1xf32>
    %752 = vector.broadcast %751 : vector<8x1xf32> to vector<8x8xf32>
    %753 = arith.mulf %748, %752 : vector<8x8xf32>
    %754 = arith.truncf %753 : vector<8x8xf32> to vector<8x8xbf16>
    %cst_288 = arith.constant dense<0.000000e+00> : vector<8x8xf32>
    %755 = tpu.matmul %754, %741, %cst_288 {dimension_numbers = #tpu.dot_dimension_numbers<[1], [0], [0], [1], [0, 0, 1, 1], [], []>} : vector<8x8xbf16>, vector<8x8xbf16>, vector<8x8xf32> -> vector<8x8xf32>
    %756 = arith.truncf %755 : vector<8x8xf32> to vector<8x8xbf16>
    %c0_289 = arith.constant 0 : index
    %c0_290 = arith.constant 0 : index
    %c0_291 = arith.constant 0 : index
    %757 = vector.load %arg53[%c0_289, %c0_290, %c0_291] : memref<4x8x32xbf16, #tpu.memory_space<vmem>>, vector<1x8x32xbf16>
    %758 = vector.shape_cast %757 : vector<1x8x32xbf16> to vector<8x32xbf16>
    %cst_292 = arith.constant dense<0.000000e+00> : vector<8x32xf32>
    %759 = tpu.matmul %756, %758, %cst_292 {dimension_numbers = #tpu.dot_dimension_numbers<[1], [0], [0], [1], [0, 0, 1, 1], [], []>} : vector<8x8xbf16>, vector<8x32xbf16>, vector<8x32xf32> -> vector<8x32xf32>
    %760 = arith.addf %735, %759 : vector<8x32xf32>
    %761 = vector.extract_strided_slice %732 {offsets = [0, 8], sizes = [8, 8], strides = [1, 1]} : vector<8x32xf32> to vector<8x8xf32>
    %762 = arith.truncf %761 : vector<8x8xf32> to vector<8x8xbf16>
    %763 = vector.extract_strided_slice %733 {offsets = [0, 8], sizes = [8, 8], strides = [1, 1]} : vector<8x32xf32> to vector<8x8xf32>
    %764 = arith.truncf %763 : vector<8x8xf32> to vector<8x8xbf16>
    %765 = vector.extract_strided_slice %734 {offsets = [0, 8], sizes = [8, 8], strides = [1, 1]} : vector<8x32xf32> to vector<8x8xf32>
    %766 = arith.truncf %765 : vector<8x8xf32> to vector<8x8xbf16>
    %cst_293 = arith.constant dense<0.000000e+00> : vector<8x8xf32>
    %767 = tpu.matmul %762, %764, %cst_293 {dimension_numbers = #tpu.dot_dimension_numbers<[1], [1], [0], [0], [0, 0, 1, 0], [], []>} : vector<8x8xbf16>, vector<8x8xbf16>, vector<8x8xf32> -> vector<8x8xf32>
    %768 = arith.addf %767, %402 : vector<8x8xf32>
    %cst_294 = arith.constant dense<0xFF800000> : vector<8xf32>
    %769 = vector.multi_reduction <maximumf>, %768, %cst_294 [1] : vector<8x8xf32> to vector<8xf32>
    %770 = vector.shape_cast %769 : vector<8xf32> to vector<8x1xf32>
    %771 = vector.broadcast %770 : vector<8x1xf32> to vector<8x8xf32>
    %772 = arith.subf %768, %771 : vector<8x8xf32>
    %773 = math.exp %772 : vector<8x8xf32>
    %cst_295 = arith.constant dense<0.000000e+00> : vector<8xf32>
    %774 = vector.multi_reduction <add>, %773, %cst_295 [1] : vector<8x8xf32> to vector<8xf32>
    %775 = vector.shape_cast %774 : vector<8xf32> to vector<8x1xf32>
    %776 = tpu.reciprocal %775 {approx = true} : vector<8x1xf32> -> vector<8x1xf32>
    %777 = vector.broadcast %776 : vector<8x1xf32> to vector<8x8xf32>
    %778 = arith.mulf %773, %777 : vector<8x8xf32>
    %779 = arith.truncf %778 : vector<8x8xf32> to vector<8x8xbf16>
    %cst_296 = arith.constant dense<0.000000e+00> : vector<8x8xf32>
    %780 = tpu.matmul %779, %766, %cst_296 {dimension_numbers = #tpu.dot_dimension_numbers<[1], [0], [0], [1], [0, 0, 1, 1], [], []>} : vector<8x8xbf16>, vector<8x8xbf16>, vector<8x8xf32> -> vector<8x8xf32>
    %781 = arith.truncf %780 : vector<8x8xf32> to vector<8x8xbf16>
    %c1_297 = arith.constant 1 : index
    %c0_298 = arith.constant 0 : index
    %c0_299 = arith.constant 0 : index
    %782 = vector.load %arg53[%c1_297, %c0_298, %c0_299] : memref<4x8x32xbf16, #tpu.memory_space<vmem>>, vector<1x8x32xbf16>
    %783 = vector.shape_cast %782 : vector<1x8x32xbf16> to vector<8x32xbf16>
    %cst_300 = arith.constant dense<0.000000e+00> : vector<8x32xf32>
    %784 = tpu.matmul %781, %783, %cst_300 {dimension_numbers = #tpu.dot_dimension_numbers<[1], [0], [0], [1], [0, 0, 1, 1], [], []>} : vector<8x8xbf16>, vector<8x32xbf16>, vector<8x32xf32> -> vector<8x32xf32>
    %785 = arith.addf %760, %784 : vector<8x32xf32>
    %786 = vector.extract_strided_slice %732 {offsets = [0, 16], sizes = [8, 8], strides = [1, 1]} : vector<8x32xf32> to vector<8x8xf32>
    %787 = arith.truncf %786 : vector<8x8xf32> to vector<8x8xbf16>
    %788 = vector.extract_strided_slice %733 {offsets = [0, 16], sizes = [8, 8], strides = [1, 1]} : vector<8x32xf32> to vector<8x8xf32>
    %789 = arith.truncf %788 : vector<8x8xf32> to vector<8x8xbf16>
    %790 = vector.extract_strided_slice %734 {offsets = [0, 16], sizes = [8, 8], strides = [1, 1]} : vector<8x32xf32> to vector<8x8xf32>
    %791 = arith.truncf %790 : vector<8x8xf32> to vector<8x8xbf16>
    %cst_301 = arith.constant dense<0.000000e+00> : vector<8x8xf32>
    %792 = tpu.matmul %787, %789, %cst_301 {dimension_numbers = #tpu.dot_dimension_numbers<[1], [1], [0], [0], [0, 0, 1, 0], [], []>} : vector<8x8xbf16>, vector<8x8xbf16>, vector<8x8xf32> -> vector<8x8xf32>
    %793 = arith.addf %792, %402 : vector<8x8xf32>
    %cst_302 = arith.constant dense<0xFF800000> : vector<8xf32>
    %794 = vector.multi_reduction <maximumf>, %793, %cst_302 [1] : vector<8x8xf32> to vector<8xf32>
    %795 = vector.shape_cast %794 : vector<8xf32> to vector<8x1xf32>
    %796 = vector.broadcast %795 : vector<8x1xf32> to vector<8x8xf32>
    %797 = arith.subf %793, %796 : vector<8x8xf32>
    %798 = math.exp %797 : vector<8x8xf32>
    %cst_303 = arith.constant dense<0.000000e+00> : vector<8xf32>
    %799 = vector.multi_reduction <add>, %798, %cst_303 [1] : vector<8x8xf32> to vector<8xf32>
    %800 = vector.shape_cast %799 : vector<8xf32> to vector<8x1xf32>
    %801 = tpu.reciprocal %800 {approx = true} : vector<8x1xf32> -> vector<8x1xf32>
    %802 = vector.broadcast %801 : vector<8x1xf32> to vector<8x8xf32>
    %803 = arith.mulf %798, %802 : vector<8x8xf32>
    %804 = arith.truncf %803 : vector<8x8xf32> to vector<8x8xbf16>
    %cst_304 = arith.constant dense<0.000000e+00> : vector<8x8xf32>
    %805 = tpu.matmul %804, %791, %cst_304 {dimension_numbers = #tpu.dot_dimension_numbers<[1], [0], [0], [1], [0, 0, 1, 1], [], []>} : vector<8x8xbf16>, vector<8x8xbf16>, vector<8x8xf32> -> vector<8x8xf32>
    %806 = arith.truncf %805 : vector<8x8xf32> to vector<8x8xbf16>
    %c2_305 = arith.constant 2 : index
    %c0_306 = arith.constant 0 : index
    %c0_307 = arith.constant 0 : index
    %807 = vector.load %arg53[%c2_305, %c0_306, %c0_307] : memref<4x8x32xbf16, #tpu.memory_space<vmem>>, vector<1x8x32xbf16>
    %808 = vector.shape_cast %807 : vector<1x8x32xbf16> to vector<8x32xbf16>
    %cst_308 = arith.constant dense<0.000000e+00> : vector<8x32xf32>
    %809 = tpu.matmul %806, %808, %cst_308 {dimension_numbers = #tpu.dot_dimension_numbers<[1], [0], [0], [1], [0, 0, 1, 1], [], []>} : vector<8x8xbf16>, vector<8x32xbf16>, vector<8x32xf32> -> vector<8x32xf32>
    %810 = arith.addf %785, %809 : vector<8x32xf32>
    %811 = vector.extract_strided_slice %732 {offsets = [0, 24], sizes = [8, 8], strides = [1, 1]} : vector<8x32xf32> to vector<8x8xf32>
    %812 = arith.truncf %811 : vector<8x8xf32> to vector<8x8xbf16>
    %813 = vector.extract_strided_slice %733 {offsets = [0, 24], sizes = [8, 8], strides = [1, 1]} : vector<8x32xf32> to vector<8x8xf32>
    %814 = arith.truncf %813 : vector<8x8xf32> to vector<8x8xbf16>
    %815 = vector.extract_strided_slice %734 {offsets = [0, 24], sizes = [8, 8], strides = [1, 1]} : vector<8x32xf32> to vector<8x8xf32>
    %816 = arith.truncf %815 : vector<8x8xf32> to vector<8x8xbf16>
    %cst_309 = arith.constant dense<0.000000e+00> : vector<8x8xf32>
    %817 = tpu.matmul %812, %814, %cst_309 {dimension_numbers = #tpu.dot_dimension_numbers<[1], [1], [0], [0], [0, 0, 1, 0], [], []>} : vector<8x8xbf16>, vector<8x8xbf16>, vector<8x8xf32> -> vector<8x8xf32>
    %818 = arith.addf %817, %402 : vector<8x8xf32>
    %cst_310 = arith.constant dense<0xFF800000> : vector<8xf32>
    %819 = vector.multi_reduction <maximumf>, %818, %cst_310 [1] : vector<8x8xf32> to vector<8xf32>
    %820 = vector.shape_cast %819 : vector<8xf32> to vector<8x1xf32>
    %821 = vector.broadcast %820 : vector<8x1xf32> to vector<8x8xf32>
    %822 = arith.subf %818, %821 : vector<8x8xf32>
    %823 = math.exp %822 : vector<8x8xf32>
    %cst_311 = arith.constant dense<0.000000e+00> : vector<8xf32>
    %824 = vector.multi_reduction <add>, %823, %cst_311 [1] : vector<8x8xf32> to vector<8xf32>
    %825 = vector.shape_cast %824 : vector<8xf32> to vector<8x1xf32>
    %826 = tpu.reciprocal %825 {approx = true} : vector<8x1xf32> -> vector<8x1xf32>
    %827 = vector.broadcast %826 : vector<8x1xf32> to vector<8x8xf32>
    %828 = arith.mulf %823, %827 : vector<8x8xf32>
    %829 = arith.truncf %828 : vector<8x8xf32> to vector<8x8xbf16>
    %cst_312 = arith.constant dense<0.000000e+00> : vector<8x8xf32>
    %830 = tpu.matmul %829, %816, %cst_312 {dimension_numbers = #tpu.dot_dimension_numbers<[1], [0], [0], [1], [0, 0, 1, 1], [], []>} : vector<8x8xbf16>, vector<8x8xbf16>, vector<8x8xf32> -> vector<8x8xf32>
    %831 = arith.truncf %830 : vector<8x8xf32> to vector<8x8xbf16>
    %c3_313 = arith.constant 3 : index
    %c0_314 = arith.constant 0 : index
    %c0_315 = arith.constant 0 : index
    %832 = vector.load %arg53[%c3_313, %c0_314, %c0_315] : memref<4x8x32xbf16, #tpu.memory_space<vmem>>, vector<1x8x32xbf16>
    %833 = vector.shape_cast %832 : vector<1x8x32xbf16> to vector<8x32xbf16>
    %cst_316 = arith.constant dense<0.000000e+00> : vector<8x32xf32>
    %834 = tpu.matmul %831, %833, %cst_316 {dimension_numbers = #tpu.dot_dimension_numbers<[1], [0], [0], [1], [0, 0, 1, 1], [], []>} : vector<8x8xbf16>, vector<8x32xbf16>, vector<8x32xf32> -> vector<8x32xf32>
    %835 = arith.addf %810, %834 : vector<8x32xf32>
    %c0_317 = arith.constant 0 : index
    %c0_318 = arith.constant 0 : index
    %836 = vector.load %arg54[%c0_317, %c0_318] : memref<1x32xf32, #tpu.memory_space<vmem>>, vector<1x32xf32>
    %837 = vector.broadcast %836 : vector<1x32xf32> to vector<8x32xf32>
    %838 = arith.addf %835, %837 : vector<8x32xf32>
    %839 = arith.addf %725, %838 : vector<8x32xf32>
    %c0_319 = arith.constant 0 : index
    %c0_320 = arith.constant 0 : index
    %840 = vector.load %arg55[%c0_319, %c0_320] : memref<1x32xf32, #tpu.memory_space<vmem>>, vector<1x32xf32>
    %c0_321 = arith.constant 0 : index
    %c0_322 = arith.constant 0 : index
    %841 = vector.load %arg56[%c0_321, %c0_322] : memref<1x32xf32, #tpu.memory_space<vmem>>, vector<1x32xf32>
    %cst_323 = arith.constant dense<0.000000e+00> : vector<8xf32>
    %842 = vector.multi_reduction <add>, %839, %cst_323 [1] : vector<8x32xf32> to vector<8xf32>
    %843 = vector.shape_cast %842 : vector<8xf32> to vector<8x1xf32>
    %cst_324 = arith.constant 3.200000e+01 : f32
    %844 = vector.broadcast %cst_324 : f32 to vector<8x1xf32>
    %845 = arith.divf %843, %844 : vector<8x1xf32>
    %846 = vector.broadcast %845 : vector<8x1xf32> to vector<8x32xf32>
    %847 = arith.subf %839, %846 : vector<8x32xf32>
    %848 = arith.mulf %847, %847 : vector<8x32xf32>
    %cst_325 = arith.constant dense<0.000000e+00> : vector<8xf32>
    %849 = vector.multi_reduction <add>, %848, %cst_325 [1] : vector<8x32xf32> to vector<8xf32>
    %850 = vector.shape_cast %849 : vector<8xf32> to vector<8x1xf32>
    %cst_326 = arith.constant 3.200000e+01 : f32
    %851 = vector.broadcast %cst_326 : f32 to vector<8x1xf32>
    %852 = arith.divf %850, %851 : vector<8x1xf32>
    %853 = vector.broadcast %845 : vector<8x1xf32> to vector<8x32xf32>
    %854 = arith.subf %839, %853 : vector<8x32xf32>
    %cst_327 = arith.constant 9.99999974E-6 : f32
    %855 = vector.broadcast %cst_327 : f32 to vector<8x1xf32>
    %856 = arith.addf %852, %855 : vector<8x1xf32>
    %857 = math.rsqrt %856 : vector<8x1xf32>
    %858 = vector.broadcast %857 : vector<8x1xf32> to vector<8x32xf32>
    %859 = arith.mulf %854, %858 : vector<8x32xf32>
    %860 = vector.broadcast %840 : vector<1x32xf32> to vector<8x32xf32>
    %861 = arith.mulf %859, %860 : vector<8x32xf32>
    %862 = vector.broadcast %841 : vector<1x32xf32> to vector<8x32xf32>
    %863 = arith.addf %861, %862 : vector<8x32xf32>
    %864 = arith.truncf %863 : vector<8x32xf32> to vector<8x32xbf16>
    %c0_328 = arith.constant 0 : index
    %c0_329 = arith.constant 0 : index
    %865 = vector.load %arg57[%c0_328, %c0_329] : memref<32x32xbf16, #tpu.memory_space<vmem>>, vector<32x32xbf16>
    %cst_330 = arith.constant dense<0.000000e+00> : vector<8x32xf32>
    %866 = tpu.matmul %864, %865, %cst_330 {dimension_numbers = #tpu.dot_dimension_numbers<[1], [0], [0], [1], [0, 0, 1, 1], [], []>} : vector<8x32xbf16>, vector<32x32xbf16>, vector<8x32xf32> -> vector<8x32xf32>
    %c0_331 = arith.constant 0 : index
    %c0_332 = arith.constant 0 : index
    %867 = vector.load %arg58[%c0_331, %c0_332] : memref<1x32xf32, #tpu.memory_space<vmem>>, vector<1x32xf32>
    %868 = vector.broadcast %867 : vector<1x32xf32> to vector<8x32xf32>
    %869 = arith.addf %866, %868 : vector<8x32xf32>
    %c0_333 = arith.constant 0 : index
    %c0_334 = arith.constant 0 : index
    %870 = vector.load %arg59[%c0_333, %c0_334] : memref<32x64xbf16, #tpu.memory_space<vmem>>, vector<32x64xbf16>
    %cst_335 = arith.constant dense<0.000000e+00> : vector<8x64xf32>
    %871 = tpu.matmul %394, %870, %cst_335 {dimension_numbers = #tpu.dot_dimension_numbers<[1], [0], [0], [1], [0, 0, 1, 1], [], []>} : vector<8x32xbf16>, vector<32x64xbf16>, vector<8x64xf32> -> vector<8x64xf32>
    %c0_336 = arith.constant 0 : index
    %c0_337 = arith.constant 0 : index
    %872 = vector.load %arg60[%c0_336, %c0_337] : memref<1x64xf32, #tpu.memory_space<vmem>>, vector<1x64xf32>
    %873 = vector.broadcast %872 : vector<1x64xf32> to vector<8x64xf32>
    %874 = arith.addf %871, %873 : vector<8x64xf32>
    %875 = vector.extract_strided_slice %874 {offsets = [0, 0], sizes = [8, 32], strides = [1, 1]} : vector<8x64xf32> to vector<8x32xf32>
    %876 = vector.extract_strided_slice %874 {offsets = [0, 32], sizes = [8, 32], strides = [1, 1]} : vector<8x64xf32> to vector<8x32xf32>
    %cst_338 = arith.constant 0.000000e+00 : f32
    %877 = vector.broadcast %cst_338 : f32 to vector<8x32xf32>
    %878 = vector.extract_strided_slice %869 {offsets = [0, 0], sizes = [8, 8], strides = [1, 1]} : vector<8x32xf32> to vector<8x8xf32>
    %879 = arith.truncf %878 : vector<8x8xf32> to vector<8x8xbf16>
    %880 = vector.extract_strided_slice %875 {offsets = [0, 0], sizes = [8, 8], strides = [1, 1]} : vector<8x32xf32> to vector<8x8xf32>
    %881 = arith.truncf %880 : vector<8x8xf32> to vector<8x8xbf16>
    %882 = vector.extract_strided_slice %876 {offsets = [0, 0], sizes = [8, 8], strides = [1, 1]} : vector<8x32xf32> to vector<8x8xf32>
    %883 = arith.truncf %882 : vector<8x8xf32> to vector<8x8xbf16>
    %cst_339 = arith.constant dense<0.000000e+00> : vector<8x8xf32>
    %884 = tpu.matmul %879, %881, %cst_339 {dimension_numbers = #tpu.dot_dimension_numbers<[1], [1], [0], [0], [0, 0, 1, 0], [], []>} : vector<8x8xbf16>, vector<8x8xbf16>, vector<8x8xf32> -> vector<8x8xf32>
    %885 = vector.broadcast %5 : vector<1x8xf32> to vector<8x8xf32>
    %886 = arith.addf %884, %885 : vector<8x8xf32>
    %cst_340 = arith.constant dense<0xFF800000> : vector<8xf32>
    %887 = vector.multi_reduction <maximumf>, %886, %cst_340 [1] : vector<8x8xf32> to vector<8xf32>
    %888 = vector.shape_cast %887 : vector<8xf32> to vector<8x1xf32>
    %889 = vector.broadcast %888 : vector<8x1xf32> to vector<8x8xf32>
    %890 = arith.subf %886, %889 : vector<8x8xf32>
    %891 = math.exp %890 : vector<8x8xf32>
    %cst_341 = arith.constant dense<0.000000e+00> : vector<8xf32>
    %892 = vector.multi_reduction <add>, %891, %cst_341 [1] : vector<8x8xf32> to vector<8xf32>
    %893 = vector.shape_cast %892 : vector<8xf32> to vector<8x1xf32>
    %894 = tpu.reciprocal %893 {approx = true} : vector<8x1xf32> -> vector<8x1xf32>
    %895 = vector.broadcast %894 : vector<8x1xf32> to vector<8x8xf32>
    %896 = arith.mulf %891, %895 : vector<8x8xf32>
    %897 = arith.truncf %896 : vector<8x8xf32> to vector<8x8xbf16>
    %cst_342 = arith.constant dense<0.000000e+00> : vector<8x8xf32>
    %898 = tpu.matmul %897, %883, %cst_342 {dimension_numbers = #tpu.dot_dimension_numbers<[1], [0], [0], [1], [0, 0, 1, 1], [], []>} : vector<8x8xbf16>, vector<8x8xbf16>, vector<8x8xf32> -> vector<8x8xf32>
    %899 = arith.truncf %898 : vector<8x8xf32> to vector<8x8xbf16>
    %c0_343 = arith.constant 0 : index
    %c0_344 = arith.constant 0 : index
    %c0_345 = arith.constant 0 : index
    %900 = vector.load %arg61[%c0_343, %c0_344, %c0_345] : memref<4x8x32xbf16, #tpu.memory_space<vmem>>, vector<1x8x32xbf16>
    %901 = vector.shape_cast %900 : vector<1x8x32xbf16> to vector<8x32xbf16>
    %cst_346 = arith.constant dense<0.000000e+00> : vector<8x32xf32>
    %902 = tpu.matmul %899, %901, %cst_346 {dimension_numbers = #tpu.dot_dimension_numbers<[1], [0], [0], [1], [0, 0, 1, 1], [], []>} : vector<8x8xbf16>, vector<8x32xbf16>, vector<8x32xf32> -> vector<8x32xf32>
    %903 = arith.addf %877, %902 : vector<8x32xf32>
    %904 = vector.extract_strided_slice %869 {offsets = [0, 8], sizes = [8, 8], strides = [1, 1]} : vector<8x32xf32> to vector<8x8xf32>
    %905 = arith.truncf %904 : vector<8x8xf32> to vector<8x8xbf16>
    %906 = vector.extract_strided_slice %875 {offsets = [0, 8], sizes = [8, 8], strides = [1, 1]} : vector<8x32xf32> to vector<8x8xf32>
    %907 = arith.truncf %906 : vector<8x8xf32> to vector<8x8xbf16>
    %908 = vector.extract_strided_slice %876 {offsets = [0, 8], sizes = [8, 8], strides = [1, 1]} : vector<8x32xf32> to vector<8x8xf32>
    %909 = arith.truncf %908 : vector<8x8xf32> to vector<8x8xbf16>
    %cst_347 = arith.constant dense<0.000000e+00> : vector<8x8xf32>
    %910 = tpu.matmul %905, %907, %cst_347 {dimension_numbers = #tpu.dot_dimension_numbers<[1], [1], [0], [0], [0, 0, 1, 0], [], []>} : vector<8x8xbf16>, vector<8x8xbf16>, vector<8x8xf32> -> vector<8x8xf32>
    %911 = vector.broadcast %5 : vector<1x8xf32> to vector<8x8xf32>
    %912 = arith.addf %910, %911 : vector<8x8xf32>
    %cst_348 = arith.constant dense<0xFF800000> : vector<8xf32>
    %913 = vector.multi_reduction <maximumf>, %912, %cst_348 [1] : vector<8x8xf32> to vector<8xf32>
    %914 = vector.shape_cast %913 : vector<8xf32> to vector<8x1xf32>
    %915 = vector.broadcast %914 : vector<8x1xf32> to vector<8x8xf32>
    %916 = arith.subf %912, %915 : vector<8x8xf32>
    %917 = math.exp %916 : vector<8x8xf32>
    %cst_349 = arith.constant dense<0.000000e+00> : vector<8xf32>
    %918 = vector.multi_reduction <add>, %917, %cst_349 [1] : vector<8x8xf32> to vector<8xf32>
    %919 = vector.shape_cast %918 : vector<8xf32> to vector<8x1xf32>
    %920 = tpu.reciprocal %919 {approx = true} : vector<8x1xf32> -> vector<8x1xf32>
    %921 = vector.broadcast %920 : vector<8x1xf32> to vector<8x8xf32>
    %922 = arith.mulf %917, %921 : vector<8x8xf32>
    %923 = arith.truncf %922 : vector<8x8xf32> to vector<8x8xbf16>
    %cst_350 = arith.constant dense<0.000000e+00> : vector<8x8xf32>
    %924 = tpu.matmul %923, %909, %cst_350 {dimension_numbers = #tpu.dot_dimension_numbers<[1], [0], [0], [1], [0, 0, 1, 1], [], []>} : vector<8x8xbf16>, vector<8x8xbf16>, vector<8x8xf32> -> vector<8x8xf32>
    %925 = arith.truncf %924 : vector<8x8xf32> to vector<8x8xbf16>
    %c1_351 = arith.constant 1 : index
    %c0_352 = arith.constant 0 : index
    %c0_353 = arith.constant 0 : index
    %926 = vector.load %arg61[%c1_351, %c0_352, %c0_353] : memref<4x8x32xbf16, #tpu.memory_space<vmem>>, vector<1x8x32xbf16>
    %927 = vector.shape_cast %926 : vector<1x8x32xbf16> to vector<8x32xbf16>
    %cst_354 = arith.constant dense<0.000000e+00> : vector<8x32xf32>
    %928 = tpu.matmul %925, %927, %cst_354 {dimension_numbers = #tpu.dot_dimension_numbers<[1], [0], [0], [1], [0, 0, 1, 1], [], []>} : vector<8x8xbf16>, vector<8x32xbf16>, vector<8x32xf32> -> vector<8x32xf32>
    %929 = arith.addf %903, %928 : vector<8x32xf32>
    %930 = vector.extract_strided_slice %869 {offsets = [0, 16], sizes = [8, 8], strides = [1, 1]} : vector<8x32xf32> to vector<8x8xf32>
    %931 = arith.truncf %930 : vector<8x8xf32> to vector<8x8xbf16>
    %932 = vector.extract_strided_slice %875 {offsets = [0, 16], sizes = [8, 8], strides = [1, 1]} : vector<8x32xf32> to vector<8x8xf32>
    %933 = arith.truncf %932 : vector<8x8xf32> to vector<8x8xbf16>
    %934 = vector.extract_strided_slice %876 {offsets = [0, 16], sizes = [8, 8], strides = [1, 1]} : vector<8x32xf32> to vector<8x8xf32>
    %935 = arith.truncf %934 : vector<8x8xf32> to vector<8x8xbf16>
    %cst_355 = arith.constant dense<0.000000e+00> : vector<8x8xf32>
    %936 = tpu.matmul %931, %933, %cst_355 {dimension_numbers = #tpu.dot_dimension_numbers<[1], [1], [0], [0], [0, 0, 1, 0], [], []>} : vector<8x8xbf16>, vector<8x8xbf16>, vector<8x8xf32> -> vector<8x8xf32>
    %937 = vector.broadcast %5 : vector<1x8xf32> to vector<8x8xf32>
    %938 = arith.addf %936, %937 : vector<8x8xf32>
    %cst_356 = arith.constant dense<0xFF800000> : vector<8xf32>
    %939 = vector.multi_reduction <maximumf>, %938, %cst_356 [1] : vector<8x8xf32> to vector<8xf32>
    %940 = vector.shape_cast %939 : vector<8xf32> to vector<8x1xf32>
    %941 = vector.broadcast %940 : vector<8x1xf32> to vector<8x8xf32>
    %942 = arith.subf %938, %941 : vector<8x8xf32>
    %943 = math.exp %942 : vector<8x8xf32>
    %cst_357 = arith.constant dense<0.000000e+00> : vector<8xf32>
    %944 = vector.multi_reduction <add>, %943, %cst_357 [1] : vector<8x8xf32> to vector<8xf32>
    %945 = vector.shape_cast %944 : vector<8xf32> to vector<8x1xf32>
    %946 = tpu.reciprocal %945 {approx = true} : vector<8x1xf32> -> vector<8x1xf32>
    %947 = vector.broadcast %946 : vector<8x1xf32> to vector<8x8xf32>
    %948 = arith.mulf %943, %947 : vector<8x8xf32>
    %949 = arith.truncf %948 : vector<8x8xf32> to vector<8x8xbf16>
    %cst_358 = arith.constant dense<0.000000e+00> : vector<8x8xf32>
    %950 = tpu.matmul %949, %935, %cst_358 {dimension_numbers = #tpu.dot_dimension_numbers<[1], [0], [0], [1], [0, 0, 1, 1], [], []>} : vector<8x8xbf16>, vector<8x8xbf16>, vector<8x8xf32> -> vector<8x8xf32>
    %951 = arith.truncf %950 : vector<8x8xf32> to vector<8x8xbf16>
    %c2_359 = arith.constant 2 : index
    %c0_360 = arith.constant 0 : index
    %c0_361 = arith.constant 0 : index
    %952 = vector.load %arg61[%c2_359, %c0_360, %c0_361] : memref<4x8x32xbf16, #tpu.memory_space<vmem>>, vector<1x8x32xbf16>
    %953 = vector.shape_cast %952 : vector<1x8x32xbf16> to vector<8x32xbf16>
    %cst_362 = arith.constant dense<0.000000e+00> : vector<8x32xf32>
    %954 = tpu.matmul %951, %953, %cst_362 {dimension_numbers = #tpu.dot_dimension_numbers<[1], [0], [0], [1], [0, 0, 1, 1], [], []>} : vector<8x8xbf16>, vector<8x32xbf16>, vector<8x32xf32> -> vector<8x32xf32>
    %955 = arith.addf %929, %954 : vector<8x32xf32>
    %956 = vector.extract_strided_slice %869 {offsets = [0, 24], sizes = [8, 8], strides = [1, 1]} : vector<8x32xf32> to vector<8x8xf32>
    %957 = arith.truncf %956 : vector<8x8xf32> to vector<8x8xbf16>
    %958 = vector.extract_strided_slice %875 {offsets = [0, 24], sizes = [8, 8], strides = [1, 1]} : vector<8x32xf32> to vector<8x8xf32>
    %959 = arith.truncf %958 : vector<8x8xf32> to vector<8x8xbf16>
    %960 = vector.extract_strided_slice %876 {offsets = [0, 24], sizes = [8, 8], strides = [1, 1]} : vector<8x32xf32> to vector<8x8xf32>
    %961 = arith.truncf %960 : vector<8x8xf32> to vector<8x8xbf16>
    %cst_363 = arith.constant dense<0.000000e+00> : vector<8x8xf32>
    %962 = tpu.matmul %957, %959, %cst_363 {dimension_numbers = #tpu.dot_dimension_numbers<[1], [1], [0], [0], [0, 0, 1, 0], [], []>} : vector<8x8xbf16>, vector<8x8xbf16>, vector<8x8xf32> -> vector<8x8xf32>
    %963 = vector.broadcast %5 : vector<1x8xf32> to vector<8x8xf32>
    %964 = arith.addf %962, %963 : vector<8x8xf32>
    %cst_364 = arith.constant dense<0xFF800000> : vector<8xf32>
    %965 = vector.multi_reduction <maximumf>, %964, %cst_364 [1] : vector<8x8xf32> to vector<8xf32>
    %966 = vector.shape_cast %965 : vector<8xf32> to vector<8x1xf32>
    %967 = vector.broadcast %966 : vector<8x1xf32> to vector<8x8xf32>
    %968 = arith.subf %964, %967 : vector<8x8xf32>
    %969 = math.exp %968 : vector<8x8xf32>
    %cst_365 = arith.constant dense<0.000000e+00> : vector<8xf32>
    %970 = vector.multi_reduction <add>, %969, %cst_365 [1] : vector<8x8xf32> to vector<8xf32>
    %971 = vector.shape_cast %970 : vector<8xf32> to vector<8x1xf32>
    %972 = tpu.reciprocal %971 {approx = true} : vector<8x1xf32> -> vector<8x1xf32>
    %973 = vector.broadcast %972 : vector<8x1xf32> to vector<8x8xf32>
    %974 = arith.mulf %969, %973 : vector<8x8xf32>
    %975 = arith.truncf %974 : vector<8x8xf32> to vector<8x8xbf16>
    %cst_366 = arith.constant dense<0.000000e+00> : vector<8x8xf32>
    %976 = tpu.matmul %975, %961, %cst_366 {dimension_numbers = #tpu.dot_dimension_numbers<[1], [0], [0], [1], [0, 0, 1, 1], [], []>} : vector<8x8xbf16>, vector<8x8xbf16>, vector<8x8xf32> -> vector<8x8xf32>
    %977 = arith.truncf %976 : vector<8x8xf32> to vector<8x8xbf16>
    %c3_367 = arith.constant 3 : index
    %c0_368 = arith.constant 0 : index
    %c0_369 = arith.constant 0 : index
    %978 = vector.load %arg61[%c3_367, %c0_368, %c0_369] : memref<4x8x32xbf16, #tpu.memory_space<vmem>>, vector<1x8x32xbf16>
    %979 = vector.shape_cast %978 : vector<1x8x32xbf16> to vector<8x32xbf16>
    %cst_370 = arith.constant dense<0.000000e+00> : vector<8x32xf32>
    %980 = tpu.matmul %977, %979, %cst_370 {dimension_numbers = #tpu.dot_dimension_numbers<[1], [0], [0], [1], [0, 0, 1, 1], [], []>} : vector<8x8xbf16>, vector<8x32xbf16>, vector<8x32xf32> -> vector<8x32xf32>
    %981 = arith.addf %955, %980 : vector<8x32xf32>
    %c0_371 = arith.constant 0 : index
    %c0_372 = arith.constant 0 : index
    %982 = vector.load %arg62[%c0_371, %c0_372] : memref<1x32xf32, #tpu.memory_space<vmem>>, vector<1x32xf32>
    %983 = vector.broadcast %982 : vector<1x32xf32> to vector<8x32xf32>
    %984 = arith.addf %981, %983 : vector<8x32xf32>
    %985 = arith.addf %863, %984 : vector<8x32xf32>
    %c0_373 = arith.constant 0 : index
    %c0_374 = arith.constant 0 : index
    %986 = vector.load %arg63[%c0_373, %c0_374] : memref<1x32xf32, #tpu.memory_space<vmem>>, vector<1x32xf32>
    %c0_375 = arith.constant 0 : index
    %c0_376 = arith.constant 0 : index
    %987 = vector.load %arg64[%c0_375, %c0_376] : memref<1x32xf32, #tpu.memory_space<vmem>>, vector<1x32xf32>
    %cst_377 = arith.constant dense<0.000000e+00> : vector<8xf32>
    %988 = vector.multi_reduction <add>, %985, %cst_377 [1] : vector<8x32xf32> to vector<8xf32>
    %989 = vector.shape_cast %988 : vector<8xf32> to vector<8x1xf32>
    %cst_378 = arith.constant 3.200000e+01 : f32
    %990 = vector.broadcast %cst_378 : f32 to vector<8x1xf32>
    %991 = arith.divf %989, %990 : vector<8x1xf32>
    %992 = vector.broadcast %991 : vector<8x1xf32> to vector<8x32xf32>
    %993 = arith.subf %985, %992 : vector<8x32xf32>
    %994 = arith.mulf %993, %993 : vector<8x32xf32>
    %cst_379 = arith.constant dense<0.000000e+00> : vector<8xf32>
    %995 = vector.multi_reduction <add>, %994, %cst_379 [1] : vector<8x32xf32> to vector<8xf32>
    %996 = vector.shape_cast %995 : vector<8xf32> to vector<8x1xf32>
    %cst_380 = arith.constant 3.200000e+01 : f32
    %997 = vector.broadcast %cst_380 : f32 to vector<8x1xf32>
    %998 = arith.divf %996, %997 : vector<8x1xf32>
    %999 = vector.broadcast %991 : vector<8x1xf32> to vector<8x32xf32>
    %1000 = arith.subf %985, %999 : vector<8x32xf32>
    %cst_381 = arith.constant 9.99999974E-6 : f32
    %1001 = vector.broadcast %cst_381 : f32 to vector<8x1xf32>
    %1002 = arith.addf %998, %1001 : vector<8x1xf32>
    %1003 = math.rsqrt %1002 : vector<8x1xf32>
    %1004 = vector.broadcast %1003 : vector<8x1xf32> to vector<8x32xf32>
    %1005 = arith.mulf %1000, %1004 : vector<8x32xf32>
    %1006 = vector.broadcast %986 : vector<1x32xf32> to vector<8x32xf32>
    %1007 = arith.mulf %1005, %1006 : vector<8x32xf32>
    %1008 = vector.broadcast %987 : vector<1x32xf32> to vector<8x32xf32>
    %1009 = arith.addf %1007, %1008 : vector<8x32xf32>
    %1010 = arith.truncf %1009 : vector<8x32xf32> to vector<8x32xbf16>
    %c0_382 = arith.constant 0 : index
    %c0_383 = arith.constant 0 : index
    %1011 = vector.load %arg65[%c0_382, %c0_383] : memref<32x64xbf16, #tpu.memory_space<vmem>>, vector<32x64xbf16>
    %cst_384 = arith.constant dense<0.000000e+00> : vector<8x64xf32>
    %1012 = tpu.matmul %1010, %1011, %cst_384 {dimension_numbers = #tpu.dot_dimension_numbers<[1], [0], [0], [1], [0, 0, 1, 1], [], []>} : vector<8x32xbf16>, vector<32x64xbf16>, vector<8x64xf32> -> vector<8x64xf32>
    %c0_385 = arith.constant 0 : index
    %c0_386 = arith.constant 0 : index
    %1013 = vector.load %arg66[%c0_385, %c0_386] : memref<1x64xf32, #tpu.memory_space<vmem>>, vector<1x64xf32>
    %1014 = vector.broadcast %1013 : vector<1x64xf32> to vector<8x64xf32>
    %1015 = arith.addf %1012, %1014 : vector<8x64xf32>
    %cst_387 = arith.constant 0.000000e+00 : f32
    %1016 = vector.broadcast %cst_387 : f32 to vector<8x64xf32>
    %1017 = arith.maximumf %1015, %1016 : vector<8x64xf32>
    %1018 = arith.truncf %1017 : vector<8x64xf32> to vector<8x64xbf16>
    %c0_388 = arith.constant 0 : index
    %c0_389 = arith.constant 0 : index
    %1019 = vector.load %arg67[%c0_388, %c0_389] : memref<64x32xbf16, #tpu.memory_space<vmem>>, vector<64x32xbf16>
    %cst_390 = arith.constant dense<0.000000e+00> : vector<8x32xf32>
    %1020 = tpu.matmul %1018, %1019, %cst_390 {dimension_numbers = #tpu.dot_dimension_numbers<[1], [0], [0], [1], [0, 0, 1, 1], [], []>} : vector<8x64xbf16>, vector<64x32xbf16>, vector<8x32xf32> -> vector<8x32xf32>
    %c0_391 = arith.constant 0 : index
    %c0_392 = arith.constant 0 : index
    %1021 = vector.load %arg68[%c0_391, %c0_392] : memref<1x32xf32, #tpu.memory_space<vmem>>, vector<1x32xf32>
    %1022 = vector.broadcast %1021 : vector<1x32xf32> to vector<8x32xf32>
    %1023 = arith.addf %1020, %1022 : vector<8x32xf32>
    %1024 = arith.addf %1009, %1023 : vector<8x32xf32>
    %c0_393 = arith.constant 0 : index
    %c0_394 = arith.constant 0 : index
    %1025 = vector.load %arg69[%c0_393, %c0_394] : memref<1x32xf32, #tpu.memory_space<vmem>>, vector<1x32xf32>
    %c0_395 = arith.constant 0 : index
    %c0_396 = arith.constant 0 : index
    %1026 = vector.load %arg70[%c0_395, %c0_396] : memref<1x32xf32, #tpu.memory_space<vmem>>, vector<1x32xf32>
    %cst_397 = arith.constant dense<0.000000e+00> : vector<8xf32>
    %1027 = vector.multi_reduction <add>, %1024, %cst_397 [1] : vector<8x32xf32> to vector<8xf32>
    %1028 = vector.shape_cast %1027 : vector<8xf32> to vector<8x1xf32>
    %cst_398 = arith.constant 3.200000e+01 : f32
    %1029 = vector.broadcast %cst_398 : f32 to vector<8x1xf32>
    %1030 = arith.divf %1028, %1029 : vector<8x1xf32>
    %1031 = vector.broadcast %1030 : vector<8x1xf32> to vector<8x32xf32>
    %1032 = arith.subf %1024, %1031 : vector<8x32xf32>
    %1033 = arith.mulf %1032, %1032 : vector<8x32xf32>
    %cst_399 = arith.constant dense<0.000000e+00> : vector<8xf32>
    %1034 = vector.multi_reduction <add>, %1033, %cst_399 [1] : vector<8x32xf32> to vector<8xf32>
    %1035 = vector.shape_cast %1034 : vector<8xf32> to vector<8x1xf32>
    %cst_400 = arith.constant 3.200000e+01 : f32
    %1036 = vector.broadcast %cst_400 : f32 to vector<8x1xf32>
    %1037 = arith.divf %1035, %1036 : vector<8x1xf32>
    %1038 = vector.broadcast %1030 : vector<8x1xf32> to vector<8x32xf32>
    %1039 = arith.subf %1024, %1038 : vector<8x32xf32>
    %cst_401 = arith.constant 9.99999974E-6 : f32
    %1040 = vector.broadcast %cst_401 : f32 to vector<8x1xf32>
    %1041 = arith.addf %1037, %1040 : vector<8x1xf32>
    %1042 = math.rsqrt %1041 : vector<8x1xf32>
    %1043 = vector.broadcast %1042 : vector<8x1xf32> to vector<8x32xf32>
    %1044 = arith.mulf %1039, %1043 : vector<8x32xf32>
    %1045 = vector.broadcast %1025 : vector<1x32xf32> to vector<8x32xf32>
    %1046 = arith.mulf %1044, %1045 : vector<8x32xf32>
    %1047 = vector.broadcast %1026 : vector<1x32xf32> to vector<8x32xf32>
    %1048 = arith.addf %1046, %1047 : vector<8x32xf32>
    %c0_402 = arith.constant 0 : index
    %c0_403 = arith.constant 0 : index
    %1049 = vector.load %arg71[%c0_402, %c0_403] : memref<1x32xf32, #tpu.memory_space<vmem>>, vector<1x32xf32>
    %c0_404 = arith.constant 0 : index
    %c0_405 = arith.constant 0 : index
    %1050 = vector.load %arg72[%c0_404, %c0_405] : memref<1x32xf32, #tpu.memory_space<vmem>>, vector<1x32xf32>
    %cst_406 = arith.constant dense<0.000000e+00> : vector<8xf32>
    %1051 = vector.multi_reduction <add>, %1048, %cst_406 [1] : vector<8x32xf32> to vector<8xf32>
    %1052 = vector.shape_cast %1051 : vector<8xf32> to vector<8x1xf32>
    %cst_407 = arith.constant 3.200000e+01 : f32
    %1053 = vector.broadcast %cst_407 : f32 to vector<8x1xf32>
    %1054 = arith.divf %1052, %1053 : vector<8x1xf32>
    %1055 = vector.broadcast %1054 : vector<8x1xf32> to vector<8x32xf32>
    %1056 = arith.subf %1048, %1055 : vector<8x32xf32>
    %1057 = arith.mulf %1056, %1056 : vector<8x32xf32>
    %cst_408 = arith.constant dense<0.000000e+00> : vector<8xf32>
    %1058 = vector.multi_reduction <add>, %1057, %cst_408 [1] : vector<8x32xf32> to vector<8xf32>
    %1059 = vector.shape_cast %1058 : vector<8xf32> to vector<8x1xf32>
    %cst_409 = arith.constant 3.200000e+01 : f32
    %1060 = vector.broadcast %cst_409 : f32 to vector<8x1xf32>
    %1061 = arith.divf %1059, %1060 : vector<8x1xf32>
    %1062 = vector.broadcast %1054 : vector<8x1xf32> to vector<8x32xf32>
    %1063 = arith.subf %1048, %1062 : vector<8x32xf32>
    %cst_410 = arith.constant 9.99999974E-6 : f32
    %1064 = vector.broadcast %cst_410 : f32 to vector<8x1xf32>
    %1065 = arith.addf %1061, %1064 : vector<8x1xf32>
    %1066 = math.rsqrt %1065 : vector<8x1xf32>
    %1067 = vector.broadcast %1066 : vector<8x1xf32> to vector<8x32xf32>
    %1068 = arith.mulf %1063, %1067 : vector<8x32xf32>
    %1069 = vector.broadcast %1049 : vector<1x32xf32> to vector<8x32xf32>
    %1070 = arith.mulf %1068, %1069 : vector<8x32xf32>
    %1071 = vector.broadcast %1050 : vector<1x32xf32> to vector<8x32xf32>
    %1072 = arith.addf %1070, %1071 : vector<8x32xf32>
    %1073 = arith.truncf %1072 : vector<8x32xf32> to vector<8x32xbf16>
    %c0_411 = arith.constant 0 : index
    %c0_412 = arith.constant 0 : index
    %1074 = vector.load %arg73[%c0_411, %c0_412] : memref<32x128xbf16, #tpu.memory_space<vmem>>, vector<32x128xbf16>
    %cst_413 = arith.constant dense<0.000000e+00> : vector<8x128xf32>
    %1075 = tpu.matmul %1073, %1074, %cst_413 {dimension_numbers = #tpu.dot_dimension_numbers<[1], [0], [0], [1], [0, 0, 1, 1], [], []>} : vector<8x32xbf16>, vector<32x128xbf16>, vector<8x128xf32> -> vector<8x128xf32>
    %c0_414 = arith.constant 0 : index
    %c0_415 = arith.constant 0 : index
    %1076 = vector.load %arg74[%c0_414, %c0_415] : memref<1x128xf32, #tpu.memory_space<vmem>>, vector<1x128xf32>
    %1077 = vector.broadcast %1076 : vector<1x128xf32> to vector<8x128xf32>
    %1078 = arith.addf %1075, %1077 : vector<8x128xf32>
    %c0_416 = arith.constant 0 : index
    %c0_417 = arith.constant 0 : index
    %c0_418 = arith.constant 0 : index
    %1079 = vector.load %arg75[%c0_416, %c0_417, %c0_418] : memref<1x8x128xf32, #tpu.memory_space<vmem>>, vector<1x8x128xf32>
    %1080 = vector.shape_cast %1079 : vector<1x8x128xf32> to vector<8x128xf32>
    %1081 = vector.shape_cast %1078 : vector<8x128xf32> to vector<1x8x128xf32>
    tpu.vector_store %arg75[%c0_416, %c0_417, %c0_418], %1081 {strides = array<i32>} : memref<1x8x128xf32, #tpu.memory_space<vmem>>, vector<1x8x128xf32>,
    return
  }
  func.func @transform_0(%arg0: i32) -> (i32, i32, i32) {
    %c0_i32 = arith.constant 0 : i32
    %c0_i32_0 = arith.constant 0 : i32
    %c0_i32_1 = arith.constant 0 : i32
    return %arg0, %c0_i32, %c0_i32_0 : i32, i32, i32
  }
  func.func @transform_1(%arg0: i32) -> (i32, i32, i32) {
    %c0_i32 = arith.constant 0 : i32
    %c0_i32_0 = arith.constant 0 : i32
    %c0_i32_1 = arith.constant 0 : i32
    return %arg0, %c0_i32, %c0_i32_0 : i32, i32, i32
  }
  func.func @transform_2(%arg0: i32) -> (i32, i32, i32) {
    %c0_i32 = arith.constant 0 : i32
    %c0_i32_0 = arith.constant 0 : i32
    %c0_i32_1 = arith.constant 0 : i32
    return %arg0, %c0_i32, %c0_i32_0 : i32, i32, i32
  }
  func.func @transform_3(%arg0: i32) -> (i32, i32, i32) {
    %c0_i32 = arith.constant 0 : i32
    %c0_i32_0 = arith.constant 0 : i32
    %c0_i32_1 = arith.constant 0 : i32
    return %arg0, %c0_i32, %c0_i32_0 : i32, i32, i32
  }
  func.func @transform_4(%arg0: i32) -> (i32, i32) {
    %c0_i32 = arith.constant 0 : i32
    %c0_i32_0 = arith.constant 0 : i32
    %c0_i32_1 = arith.constant 0 : i32
    return %c0_i32, %c0_i32_0 : i32, i32
  }
  func.func @transform_5(%arg0: i32) -> (i32, i32) {
    %c0_i32 = arith.constant 0 : i32
    %c0_i32_0 = arith.constant 0 : i32
    %c0_i32_1 = arith.constant 0 : i32
    return %c0_i32, %c0_i32_0 : i32, i32
  }
  func.func @transform_6(%arg0: i32) -> (i32, i32, i32) {
    %c0_i32 = arith.constant 0 : i32
    %c0_i32_0 = arith.constant 0 : i32
    %c0_i32_1 = arith.constant 0 : i32
    %c0_i32_2 = arith.constant 0 : i32
    return %c0_i32, %c0_i32_0, %c0_i32_1 : i32, i32, i32
  }
  func.func @transform_7(%arg0: i32) -> (i32, i32) {
    %c0_i32 = arith.constant 0 : i32
    %c0_i32_0 = arith.constant 0 : i32
    %c0_i32_1 = arith.constant 0 : i32
    return %c0_i32, %c0_i32_0 : i32, i32
  }
  func.func @transform_8(%arg0: i32) -> (i32, i32) {
    %c0_i32 = arith.constant 0 : i32
    %c0_i32_0 = arith.constant 0 : i32
    %c0_i32_1 = arith.constant 0 : i32
    return %c0_i32, %c0_i32_0 : i32, i32
  }
  func.func @transform_9(%arg0: i32) -> (i32, i32) {
    %c0_i32 = arith.constant 0 : i32
    %c0_i32_0 = arith.constant 0 : i32
    %c0_i32_1 = arith.constant 0 : i32
    return %c0_i32, %c0_i32_0 : i32, i32
  }
  func.func @transform_10(%arg0: i32) -> (i32, i32) {
    %c0_i32 = arith.constant 0 : i32
    %c0_i32_0 = arith.constant 0 : i32
    %c0_i32_1 = arith.constant 0 : i32
    return %c0_i32, %c0_i32_0 : i32, i32
  }
  func.func @transform_11(%arg0: i32) -> (i32, i32) {
    %c0_i32 = arith.constant 0 : i32
    %c0_i32_0 = arith.constant 0 : i32
    %c0_i32_1 = arith.constant 0 : i32
    return %c0_i32, %c0_i32_0 : i32, i32
  }
  func.func @transform_12(%arg0: i32) -> (i32, i32) {
    %c0_i32 = arith.constant 0 : i32
    %c0_i32_0 = arith.constant 0 : i32
    %c0_i32_1 = arith.constant 0 : i32
    return %c0_i32, %c0_i32_0 : i32, i32
  }
  func.func @transform_13(%arg0: i32) -> (i32, i32) {
    %c0_i32 = arith.constant 0 : i32
    %c0_i32_0 = arith.constant 0 : i32
    %c0_i32_1 = arith.constant 0 : i32
    return %c0_i32, %c0_i32_0 : i32, i32
  }
  func.func @transform_14(%arg0: i32) -> (i32, i32) {
    %c0_i32 = arith.constant 0 : i32
    %c0_i32_0 = arith.constant 0 : i32
    %c0_i32_1 = arith.constant 0 : i32
    return %c0_i32, %c0_i32_0 : i32, i32
  }
  func.func @transform_15(%arg0: i32) -> (i32, i32) {
    %c0_i32 = arith.constant 0 : i32
    %c0_i32_0 = arith.constant 0 : i32
    %c0_i32_1 = arith.constant 0 : i32
    return %c0_i32, %c0_i32_0 : i32, i32
  }
  func.func @transform_16(%arg0: i32) -> (i32, i32) {
    %c0_i32 = arith.constant 0 : i32
    %c0_i32_0 = arith.constant 0 : i32
    %c0_i32_1 = arith.constant 0 : i32
    return %c0_i32, %c0_i32_0 : i32, i32
  }
  func.func @transform_17(%arg0: i32) -> (i32, i32) {
    %c0_i32 = arith.constant 0 : i32
    %c0_i32_0 = arith.constant 0 : i32
    %c0_i32_1 = arith.constant 0 : i32
    return %c0_i32, %c0_i32_0 : i32, i32
  }
  func.func @transform_18(%arg0: i32) -> (i32, i32, i32) {
    %c0_i32 = arith.constant 0 : i32
    %c0_i32_0 = arith.constant 0 : i32
    %c0_i32_1 = arith.constant 0 : i32
    %c0_i32_2 = arith.constant 0 : i32
    return %c0_i32, %c0_i32_0, %c0_i32_1 : i32, i32, i32
  }
  func.func @transform_19(%arg0: i32) -> (i32, i32) {
    %c0_i32 = arith.constant 0 : i32
    %c0_i32_0 = arith.constant 0 : i32
    %c0_i32_1 = arith.constant 0 : i32
    return %c0_i32, %c0_i32_0 : i32, i32
  }
  func.func @transform_20(%arg0: i32) -> (i32, i32) {
    %c0_i32 = arith.constant 0 : i32
    %c0_i32_0 = arith.constant 0 : i32
    %c0_i32_1 = arith.constant 0 : i32
    return %c0_i32, %c0_i32_0 : i32, i32
  }
  func.func @transform_21(%arg0: i32) -> (i32, i32) {
    %c0_i32 = arith.constant 0 : i32
    %c0_i32_0 = arith.constant 0 : i32
    %c0_i32_1 = arith.constant 0 : i32
    return %c0_i32, %c0_i32_0 : i32, i32
  }
  func.func @transform_22(%arg0: i32) -> (i32, i32) {
    %c0_i32 = arith.constant 0 : i32
    %c0_i32_0 = arith.constant 0 : i32
    %c0_i32_1 = arith.constant 0 : i32
    return %c0_i32, %c0_i32_0 : i32, i32
  }
  func.func @transform_23(%arg0: i32) -> (i32, i32) {
    %c0_i32 = arith.constant 0 : i32
    %c0_i32_0 = arith.constant 0 : i32
    %c0_i32_1 = arith.constant 0 : i32
    return %c0_i32, %c0_i32_0 : i32, i32
  }
  func.func @transform_24(%arg0: i32) -> (i32, i32) {
    %c0_i32 = arith.constant 0 : i32
    %c0_i32_0 = arith.constant 0 : i32
    %c0_i32_1 = arith.constant 0 : i32
    return %c0_i32, %c0_i32_0 : i32, i32
  }
  func.func @transform_25(%arg0: i32) -> (i32, i32) {
    %c0_i32 = arith.constant 0 : i32
    %c0_i32_0 = arith.constant 0 : i32
    %c0_i32_1 = arith.constant 0 : i32
    return %c0_i32, %c0_i32_0 : i32, i32
  }
  func.func @transform_26(%arg0: i32) -> (i32, i32) {
    %c0_i32 = arith.constant 0 : i32
    %c0_i32_0 = arith.constant 0 : i32
    %c0_i32_1 = arith.constant 0 : i32
    return %c0_i32, %c0_i32_0 : i32, i32
  }
  func.func @transform_27(%arg0: i32) -> (i32, i32) {
    %c0_i32 = arith.constant 0 : i32
    %c0_i32_0 = arith.constant 0 : i32
    %c0_i32_1 = arith.constant 0 : i32
    return %c0_i32, %c0_i32_0 : i32, i32
  }
  func.func @transform_28(%arg0: i32) -> (i32, i32) {
    %c0_i32 = arith.constant 0 : i32
    %c0_i32_0 = arith.constant 0 : i32
    %c0_i32_1 = arith.constant 0 : i32
    return %c0_i32, %c0_i32_0 : i32, i32
  }
  func.func @transform_29(%arg0: i32) -> (i32, i32) {
    %c0_i32 = arith.constant 0 : i32
    %c0_i32_0 = arith.constant 0 : i32
    %c0_i32_1 = arith.constant 0 : i32
    return %c0_i32, %c0_i32_0 : i32, i32
  }
  func.func @transform_30(%arg0: i32) -> (i32, i32) {
    %c0_i32 = arith.constant 0 : i32
    %c0_i32_0 = arith.constant 0 : i32
    %c0_i32_1 = arith.constant 0 : i32
    return %c0_i32, %c0_i32_0 : i32, i32
  }
  func.func @transform_31(%arg0: i32) -> (i32, i32) {
    %c0_i32 = arith.constant 0 : i32
    %c0_i32_0 = arith.constant 0 : i32
    %c0_i32_1 = arith.constant 0 : i32
    return %c0_i32, %c0_i32_0 : i32, i32
  }
  func.func @transform_32(%arg0: i32) -> (i32, i32, i32) {
    %c0_i32 = arith.constant 0 : i32
    %c0_i32_0 = arith.constant 0 : i32
    %c0_i32_1 = arith.constant 0 : i32
    %c0_i32_2 = arith.constant 0 : i32
    return %c0_i32, %c0_i32_0, %c0_i32_1 : i32, i32, i32
  }
  func.func @transform_33(%arg0: i32) -> (i32, i32) {
    %c0_i32 = arith.constant 0 : i32
    %c0_i32_0 = arith.constant 0 : i32
    %c0_i32_1 = arith.constant 0 : i32
    return %c0_i32, %c0_i32_0 : i32, i32
  }
  func.func @transform_34(%arg0: i32) -> (i32, i32) {
    %c0_i32 = arith.constant 0 : i32
    %c0_i32_0 = arith.constant 0 : i32
    %c0_i32_1 = arith.constant 0 : i32
    return %c0_i32, %c0_i32_0 : i32, i32
  }
  func.func @transform_35(%arg0: i32) -> (i32, i32) {
    %c0_i32 = arith.constant 0 : i32
    %c0_i32_0 = arith.constant 0 : i32
    %c0_i32_1 = arith.constant 0 : i32
    return %c0_i32, %c0_i32_0 : i32, i32
  }
  func.func @transform_36(%arg0: i32) -> (i32, i32) {
    %c0_i32 = arith.constant 0 : i32
    %c0_i32_0 = arith.constant 0 : i32
    %c0_i32_1 = arith.constant 0 : i32
    return %c0_i32, %c0_i32_0 : i32, i32
  }
  func.func @transform_37(%arg0: i32) -> (i32, i32) {
    %c0_i32 = arith.constant 0 : i32
    %c0_i32_0 = arith.constant 0 : i32
    %c0_i32_1 = arith.constant 0 : i32
    return %c0_i32, %c0_i32_0 : i32, i32
  }
  func.func @transform_38(%arg0: i32) -> (i32, i32) {
    %c0_i32 = arith.constant 0 : i32
    %c0_i32_0 = arith.constant 0 : i32
    %c0_i32_1 = arith.constant 0 : i32
    return %c0_i32, %c0_i32_0 : i32, i32
  }
  func.func @transform_39(%arg0: i32) -> (i32, i32) {
    %c0_i32 = arith.constant 0 : i32
    %c0_i32_0 = arith.constant 0 : i32
    %c0_i32_1 = arith.constant 0 : i32
    return %c0_i32, %c0_i32_0 : i32, i32
  }
  func.func @transform_40(%arg0: i32) -> (i32, i32, i32) {
    %c0_i32 = arith.constant 0 : i32
    %c0_i32_0 = arith.constant 0 : i32
    %c0_i32_1 = arith.constant 0 : i32
    %c0_i32_2 = arith.constant 0 : i32
    return %c0_i32, %c0_i32_0, %c0_i32_1 : i32, i32, i32
  }
  func.func @transform_41(%arg0: i32) -> (i32, i32) {
    %c0_i32 = arith.constant 0 : i32
    %c0_i32_0 = arith.constant 0 : i32
    %c0_i32_1 = arith.constant 0 : i32
    return %c0_i32, %c0_i32_0 : i32, i32
  }
  func.func @transform_42(%arg0: i32) -> (i32, i32) {
    %c0_i32 = arith.constant 0 : i32
    %c0_i32_0 = arith.constant 0 : i32
    %c0_i32_1 = arith.constant 0 : i32
    return %c0_i32, %c0_i32_0 : i32, i32
  }
  func.func @transform_43(%arg0: i32) -> (i32, i32) {
    %c0_i32 = arith.constant 0 : i32
    %c0_i32_0 = arith.constant 0 : i32
    %c0_i32_1 = arith.constant 0 : i32
    return %c0_i32, %c0_i32_0 : i32, i32
  }
  func.func @transform_44(%arg0: i32) -> (i32, i32) {
    %c0_i32 = arith.constant 0 : i32
    %c0_i32_0 = arith.constant 0 : i32
    %c0_i32_1 = arith.constant 0 : i32
    return %c0_i32, %c0_i32_0 : i32, i32
  }
  func.func @transform_45(%arg0: i32) -> (i32, i32) {
    %c0_i32 = arith.constant 0 : i32
    %c0_i32_0 = arith.constant 0 : i32
    %c0_i32_1 = arith.constant 0 : i32
    return %c0_i32, %c0_i32_0 : i32, i32
  }
  func.func @transform_46(%arg0: i32) -> (i32, i32) {
    %c0_i32 = arith.constant 0 : i32
    %c0_i32_0 = arith.constant 0 : i32
    %c0_i32_1 = arith.constant 0 : i32
    return %c0_i32, %c0_i32_0 : i32, i32
  }
  func.func @transform_47(%arg0: i32) -> (i32, i32) {
    %c0_i32 = arith.constant 0 : i32
    %c0_i32_0 = arith.constant 0 : i32
    %c0_i32_1 = arith.constant 0 : i32
    return %c0_i32, %c0_i32_0 : i32, i32
  }
  func.func @transform_48(%arg0: i32) -> (i32, i32) {
    %c0_i32 = arith.constant 0 : i32
    %c0_i32_0 = arith.constant 0 : i32
    %c0_i32_1 = arith.constant 0 : i32
    return %c0_i32, %c0_i32_0 : i32, i32
  }
  func.func @transform_49(%arg0: i32) -> (i32, i32) {
    %c0_i32 = arith.constant 0 : i32
    %c0_i32_0 = arith.constant 0 : i32
    %c0_i32_1 = arith.constant 0 : i32
    return %c0_i32, %c0_i32_0 : i32, i32
  }
  func.func @transform_50(%arg0: i32) -> (i32, i32) {
    %c0_i32 = arith.constant 0 : i32
    %c0_i32_0 = arith.constant 0 : i32
    %c0_i32_1 = arith.constant 0 : i32
    return %c0_i32, %c0_i32_0 : i32, i32
  }
  func.func @transform_51(%arg0: i32) -> (i32, i32) {
    %c0_i32 = arith.constant 0 : i32
    %c0_i32_0 = arith.constant 0 : i32
    %c0_i32_1 = arith.constant 0 : i32
    return %c0_i32, %c0_i32_0 : i32, i32
  }
  func.func @transform_52(%arg0: i32) -> (i32, i32, i32) {
    %c0_i32 = arith.constant 0 : i32
    %c0_i32_0 = arith.constant 0 : i32
    %c0_i32_1 = arith.constant 0 : i32
    %c0_i32_2 = arith.constant 0 : i32
    return %c0_i32, %c0_i32_0, %c0_i32_1 : i32, i32, i32
  }
  func.func @transform_53(%arg0: i32) -> (i32, i32) {
    %c0_i32 = arith.constant 0 : i32
    %c0_i32_0 = arith.constant 0 : i32
    %c0_i32_1 = arith.constant 0 : i32
    return %c0_i32, %c0_i32_0 : i32, i32
  }
  func.func @transform_54(%arg0: i32) -> (i32, i32) {
    %c0_i32 = arith.constant 0 : i32
    %c0_i32_0 = arith.constant 0 : i32
    %c0_i32_1 = arith.constant 0 : i32
    return %c0_i32, %c0_i32_0 : i32, i32
  }
  func.func @transform_55(%arg0: i32) -> (i32, i32) {
    %c0_i32 = arith.constant 0 : i32
    %c0_i32_0 = arith.constant 0 : i32
    %c0_i32_1 = arith.constant 0 : i32
    return %c0_i32, %c0_i32_0 : i32, i32
  }
  func.func @transform_56(%arg0: i32) -> (i32, i32) {
    %c0_i32 = arith.constant 0 : i32
    %c0_i32_0 = arith.constant 0 : i32
    %c0_i32_1 = arith.constant 0 : i32
    return %c0_i32, %c0_i32_0 : i32, i32
  }
  func.func @transform_57(%arg0: i32) -> (i32, i32) {
    %c0_i32 = arith.constant 0 : i32
    %c0_i32_0 = arith.constant 0 : i32
    %c0_i32_1 = arith.constant 0 : i32
    return %c0_i32, %c0_i32_0 : i32, i32
  }
  func.func @transform_58(%arg0: i32) -> (i32, i32) {
    %c0_i32 = arith.constant 0 : i32
    %c0_i32_0 = arith.constant 0 : i32
    %c0_i32_1 = arith.constant 0 : i32
    return %c0_i32, %c0_i32_0 : i32, i32
  }
  func.func @transform_59(%arg0: i32) -> (i32, i32) {
    %c0_i32 = arith.constant 0 : i32
    %c0_i32_0 = arith.constant 0 : i32
    %c0_i32_1 = arith.constant 0 : i32
    return %c0_i32, %c0_i32_0 : i32, i32
  }
  func.func @transform_60(%arg0: i32) -> (i32, i32, i32) {
    %c0_i32 = arith.constant 0 : i32
    %c0_i32_0 = arith.constant 0 : i32
    %c0_i32_1 = arith.constant 0 : i32
    %c0_i32_2 = arith.constant 0 : i32
    return %c0_i32, %c0_i32_0, %c0_i32_1 : i32, i32, i32
  }
  func.func @transform_61(%arg0: i32) -> (i32, i32) {
    %c0_i32 = arith.constant 0 : i32
    %c0_i32_0 = arith.constant 0 : i32
    %c0_i32_1 = arith.constant 0 : i32
    return %c0_i32, %c0_i32_0 : i32, i32
  }
  func.func @transform_62(%arg0: i32) -> (i32, i32) {
    %c0_i32 = arith.constant 0 : i32
    %c0_i32_0 = arith.constant 0 : i32
    %c0_i32_1 = arith.constant 0 : i32
    return %c0_i32, %c0_i32_0 : i32, i32
  }
  func.func @transform_63(%arg0: i32) -> (i32, i32) {
    %c0_i32 = arith.constant 0 : i32
    %c0_i32_0 = arith.constant 0 : i32
    %c0_i32_1 = arith.constant 0 : i32
    return %c0_i32, %c0_i32_0 : i32, i32
  }
  func.func @transform_64(%arg0: i32) -> (i32, i32) {
    %c0_i32 = arith.constant 0 : i32
    %c0_i32_0 = arith.constant 0 : i32
    %c0_i32_1 = arith.constant 0 : i32
    return %c0_i32, %c0_i32_0 : i32, i32
  }
  func.func @transform_65(%arg0: i32) -> (i32, i32) {
    %c0_i32 = arith.constant 0 : i32
    %c0_i32_0 = arith.constant 0 : i32
    %c0_i32_1 = arith.constant 0 : i32
    return %c0_i32, %c0_i32_0 : i32, i32
  }
  func.func @transform_66(%arg0: i32) -> (i32, i32) {
    %c0_i32 = arith.constant 0 : i32
    %c0_i32_0 = arith.constant 0 : i32
    %c0_i32_1 = arith.constant 0 : i32
    return %c0_i32, %c0_i32_0 : i32, i32
  }
  func.func @transform_67(%arg0: i32) -> (i32, i32) {
    %c0_i32 = arith.constant 0 : i32
    %c0_i32_0 = arith.constant 0 : i32
    %c0_i32_1 = arith.constant 0 : i32
    return %c0_i32, %c0_i32_0 : i32, i32
  }
  func.func @transform_68(%arg0: i32) -> (i32, i32) {
    %c0_i32 = arith.constant 0 : i32
    %c0_i32_0 = arith.constant 0 : i32
    %c0_i32_1 = arith.constant 0 : i32
    return %c0_i32, %c0_i32_0 : i32, i32
  }
  func.func @transform_69(%arg0: i32) -> (i32, i32) {
    %c0_i32 = arith.constant 0 : i32
    %c0_i32_0 = arith.constant 0 : i32
    %c0_i32_1 = arith.constant 0 : i32
    return %c0_i32, %c0_i32_0 : i32, i32
  }
  func.func @transform_70(%arg0: i32) -> (i32, i32) {
    %c0_i32 = arith.constant 0 : i32
    %c0_i32_0 = arith.constant 0 : i32
    %c0_i32_1 = arith.constant 0 : i32
    return %c0_i32, %c0_i32_0 : i32, i32
  }
  func.func @transform_71(%arg0: i32) -> (i32, i32) {
    %c0_i32 = arith.constant 0 : i32
    %c0_i32_0 = arith.constant 0 : i32
    %c0_i32_1 = arith.constant 0 : i32
    return %c0_i32, %c0_i32_0 : i32, i32
  }
  func.func @transform_72(%arg0: i32) -> (i32, i32) {
    %c0_i32 = arith.constant 0 : i32
    %c0_i32_0 = arith.constant 0 : i32
    %c0_i32_1 = arith.constant 0 : i32
    return %c0_i32, %c0_i32_0 : i32, i32
  }
  func.func @transform_73(%arg0: i32) -> (i32, i32) {
    %c0_i32 = arith.constant 0 : i32
    %c0_i32_0 = arith.constant 0 : i32
    %c0_i32_1 = arith.constant 0 : i32
    return %c0_i32, %c0_i32_0 : i32, i32
  }
  func.func @transform_74(%arg0: i32) -> (i32, i32, i32) {
    %c0_i32 = arith.constant 0 : i32
    %c0_i32_0 = arith.constant 0 : i32
    %c0_i32_1 = arith.constant 0 : i32
    return %arg0, %c0_i32, %c0_i32_0 : i32, i32, i32
  }
}

</mosaic_0001>

<bundles_post_ra>
// kernel: _lambda_.1
= control target key start
LH: loop header
LB: loop body
LE: loop exit
PB: predicated region body
PF: predicated region fallthrough
CT: control target
= control target key end

     0   :  { %s11181_s6 = smov 1   ;;  %s11182_s10 = smov 2   ;;  %s13103_s0 = inlined_call_operand.smem [shape: u32[75], index: -1, kind: input, shape index: {}] }
   0x1   :  { %s11308_s5 = sld [smem:[%s13103_s0]]   ;;  %s11183_s14 = smov 3  }
   0x2   :  { %s11313_s9 = sld [smem:[%s13103_s0 + %s11181_s6]]   ;;  %s11184_s18 = smov 4  }
   0x3   :  { %s11318_s13 = sld [smem:[%s13103_s0 + %s11182_s10]]   ;;  %s11185_s22 = smov 5  }
   0x4   :  { %s11323_s17 = sld [smem:[%s13103_s0 + %s11183_s14]]   ;;  %s11186_s26 = smov 6  }
   0x5   :  { %s11328_s21 = sld [smem:[%s13103_s0 + %s11184_s18]]   ;;  %s11187_s30 = smov 7  }
   0x6   :  { %s11333_s25 = sld [smem:[%s13103_s0 + %s11185_s22]]   ;;  %s11188_s4 = smov 8  }
   0x7   :  { %13209 = sst [smem:[#allocation68_spill]] %s11308_s5  ;;  %s11189_s10 = smov 9  }
   0x8   :  { %13210 = sst [smem:[#allocation69_spill]] %s11313_s9  ;;  %s11190_s15 = smov 10  }
   0x9   :  { %13211 = sst [smem:[#allocation70_spill]] %s11318_s13  ;;  %s11191_s20 = smov 11  }
   0xa   :  { %13212 = sst [smem:[#allocation71_spill]] %s11323_s17  ;;  %s11193_s1 = smov 13  }
   0xb   :  { %13213 = sst [smem:[#allocation72_spill]] %s11328_s21  ;;  %s11194_s7 = smov 14  }
   0xc   :  { %13214 = sst [smem:[#allocation73_spill]] %s11333_s25  ;;  %s11196_s22 = smov 16  }
   0xd   :  { %s11338_s29 = sld [smem:[%s13103_s0 + %s11186_s26]]   ;;  %s11192_s26 = smov 12  }
   0xe   :  { %s11343_s3 = sld [smem:[%s13103_s0 + %s11187_s30]]   ;;  %s11197_s28 = smov 17  }
   0xf   :  { %s11348_s8 = sld [smem:[%s13103_s0 + %s11188_s4]]  }
  0x10   :  { %s11353_s14 = sld [smem:[%s13103_s0 + %s11189_s10]]  }
  0x11   :  { %s11358_s19 = sld [smem:[%s13103_s0 + %s11190_s15]]   ;;  %s11195_s15 = smov 15  }
  0x12   :  { %s11363_s24 = sld [smem:[%s13103_s0 + %s11191_s20]]  }
  0x13   :  { %13215 = sst [smem:[#allocation74_spill]] %s11338_s29 }
  0x14   :  { %13216 = sst [smem:[#allocation75_spill]] %s11343_s3 }
  0x15   :  { %13217 = sst [smem:[#allocation76_spill]] %s11348_s8 }
  0x16   :  { %13218 = sst [smem:[#allocation77_spill]] %s11353_s14 }
  0x17   :  { %13219 = sst [smem:[#allocation78_spill]] %s11358_s19 }
  0x18   :  { %13220 = sst [smem:[#allocation79_spill]] %s11363_s24 }
  0x19   :  { %s11368_s30 = sld [smem:[%s13103_s0 + %s11192_s26]]  }
  0x1a   :  { %s11373_s6 = sld [smem:[%s13103_s0 + %s11193_s1]]  }
  0x1b   :  { %s11378_s12 = sld [smem:[%s13103_s0 + %s11194_s7]]   ;;  %s11198_s7 = smov 18  }
  0x1c   :  { %s11383_s20 = sld [smem:[%s13103_s0 + %s11195_s15]]   ;;  %s11199_s15 = smov 19  }
  0x1d   :  { %s11388_s27 = sld [smem:[%s13103_s0 + %s11196_s22]]   ;;  %s11200_s22 = smov 20  }
  0x1e   :  { %s11393_s4 = sld [smem:[%s13103_s0 + %s11197_s28]]   ;;  %s11201_s28 = smov 21  }
  0x1f   :  { %13221 = sst [smem:[#allocation80_spill]] %s11368_s30 }
  0x20   :  { %13222 = sst [smem:[#allocation81_spill]] %s11373_s6 }
  0x21   :  { %13223 = sst [smem:[#allocation82_spill]] %s11378_s12 }
  0x22   :  { %13224 = sst [smem:[#allocation83_spill]] %s11383_s20 }
  0x23   :  { %13225 = sst [smem:[#allocation84_spill]] %s11388_s27 }
  0x24   :  { %13226 = sst [smem:[#allocation85_spill]] %s11393_s4 }
  0x25   :  { %s11398_s17 = sld [smem:[%s13103_s0 + %s11198_s7]]   ;;  %s11202_s7 = smov 22  }
  0x26   :  { %s11403_s9 = sld [smem:[%s13103_s0 + %s11199_s15]]   ;;  %s11203_s15 = smov 23  }
  0x27   :  { %s11408_s20 = sld [smem:[%s13103_s0 + %s11200_s22]]   ;;  %s11204_s22 = smov 24  }
  0x28   :  { %s11413_s4 = sld [smem:[%s13103_s0 + %s11201_s28]]   ;;  %s11205_s28 = smov 25  }
  0x2b   :  { %13227 = sst [smem:[#allocation86_spill]] %s11398_s17 }
  0x2c   :  { %13228 = sst [smem:[#allocation87_spill]] %s11403_s9 }
  0x2d   :  { %13229 = sst [smem:[#allocation88_spill]] %s11408_s20 }
  0x2e   :  { %13230 = sst [smem:[#allocation89_spill]] %s11413_s4 }
  0x2f   :  { %s11418_s17 = sld [smem:[%s13103_s0 + %s11202_s7]]   ;;  %s11206_s7 = smov 26  }
  0x30   :  { %s11423_s9 = sld [smem:[%s13103_s0 + %s11203_s15]]   ;;  %s11207_s15 = smov 27  }
  0x31   :  { %s11428_s20 = sld [smem:[%s13103_s0 + %s11204_s22]]   ;;  %s11208_s22 = smov 28  }
  0x32   :  { %s11433_s4 = sld [smem:[%s13103_s0 + %s11205_s28]]   ;;  %s11209_s28 = smov 29  }
  0x35   :  { %13231 = sst [smem:[#allocation90_spill]] %s11418_s17 }
  0x36   :  { %13232 = sst [smem:[#allocation91_spill]] %s11423_s9 }
  0x37   :  { %13233 = sst [smem:[#allocation92_spill]] %s11428_s20 }
  0x38   :  { %13234 = sst [smem:[#allocation93_spill]] %s11433_s4 }
  0x39   :  { %s11438_s17 = sld [smem:[%s13103_s0 + %s11206_s7]]   ;;  %s11210_s7 = smov 30  }
  0x3a   :  { %s11443_s9 = sld [smem:[%s13103_s0 + %s11207_s15]]   ;;  %s11211_s15 = smov 31  }
  0x3b   :  { %s11448_s20 = sld [smem:[%s13103_s0 + %s11208_s22]]   ;;  %s11212_s22 = smov 32  }
  0x3c   :  { %s11453_s4 = sld [smem:[%s13103_s0 + %s11209_s28]]   ;;  %s11213_s28 = smov 33  }
  0x3d   :  { %s11468_s12 = sld [smem:[%s13103_s0 + %s11212_s22]]   ;;  %s11216_s22 = smov 36  }
  0x3e   :  { %s11473_s27 = sld [smem:[%s13103_s0 + %s11213_s28]]   ;;  %s11217_s28 = smov 37  }
  0x3f   :  { %13235 = sst [smem:[#allocation94_spill]] %s11438_s17 }
  0x40   :  { %13236 = sst [smem:[#allocation95_spill]] %s11443_s9 }
  0x41   :  { %13237 = sst [smem:[#allocation96_spill]] %s11448_s20 }
  0x42   :  { %13238 = sst [smem:[#allocation97_spill]] %s11453_s4 }
  0x43   :  { %s11458_s17 = sld [smem:[%s13103_s0 + %s11210_s7]]   ;;  %s11214_s7 = smov 34  }
  0x44   :  { %s11463_s9 = sld [smem:[%s13103_s0 + %s11211_s15]]   ;;  %s11215_s15 = smov 35  }
  0x45   :  { %13241 = sst [smem:[#allocation100_spill]] %s11468_s12 }
  0x46   :  { %s11483_s6 = sld [smem:[%s13103_s0 + %s11215_s15]]   ;;  %s11219_s15 = smov 39  }
  0x47   :  { %s11488_s12 = sld [smem:[%s13103_s0 + %s11216_s22]]   ;;  %s11220_s22 = smov 40  }
  0x48   :  { %s11493_s24 = sld [smem:[%s13103_s0 + %s11217_s28]]   ;;  %s11221_s28 = smov 41  }
  0x49   :  { %13239 = sst [smem:[#allocation98_spill]] %s11458_s17 }
  0x4a   :  { %13240 = sst [smem:[#allocation99_spill]] %s11463_s9 }
  0x4b   :  { %s11478_s17 = sld [smem:[%s13103_s0 + %s11214_s7]]   ;;  %s11218_s7 = smov 38  }
  0x4c   :  { %13243 = sst [smem:[#allocation102_spill]] %s11483_s6 }
  0x4d   :  { %13244 = sst [smem:[#allocation103_spill]] %s11488_s12 }
  0x4e   :  { %13245 = sst [smem:[#allocation104_spill]] %s11493_s24 }
  0x4f   :  { %s11498_s14 = sld [smem:[%s13103_s0 + %s11218_s7]]   ;;  %s11222_s7 = smov 42  }
  0x50   :  { %s11503_s8 = sld [smem:[%s13103_s0 + %s11219_s15]]   ;;  %s11223_s15 = smov 43  }
  0x51   :  { %13242 = sst [smem:[#allocation101_spill]] %s11478_s17 }
  0x52   :  { %s11508_s12 = sld [smem:[%s13103_s0 + %s11220_s22]]   ;;  %s11224_s22 = smov 44  }
  0x53   :  { %s11513_s30 = sld [smem:[%s13103_s0 + %s11221_s28]]   ;;  %s11225_s28 = smov 45  }
  0x54   :  { %s11523_s19 = sld [smem:[%s13103_s0 + %s11223_s15]]   ;;  %s11227_s15 = smov 47  }
  0x55   :  { %13246 = sst [smem:[#allocation105_spill]] %s11498_s14 }
  0x56   :  { %13247 = sst [smem:[#allocation106_spill]] %s11503_s8 }
  0x57   :  { %s11518_s14 = sld [smem:[%s13103_s0 + %s11222_s7]]   ;;  %s11226_s7 = smov 46  }
  0x58   :  { %13248 = sst [smem:[#allocation107_spill]] %s11508_s12 }
  0x59   :  { %13249 = sst [smem:[#allocation108_spill]] %s11513_s30 }
  0x5a   :  { %13251 = sst [smem:[#allocation110_spill]] %s11523_s19 }
  0x5b   :  { %s11528_s12 = sld [smem:[%s13103_s0 + %s11224_s22]]   ;;  %s11228_s22 = smov 48  }
  0x5c   :  { %s11533_s3 = sld [smem:[%s13103_s0 + %s11225_s28]]   ;;  %s11229_s28 = smov 49  }
  0x5d   :  { %13250 = sst [smem:[#allocation109_spill]] %s11518_s14 }
  0x5e   :  { %s11538_s29 = sld [smem:[%s13103_s0 + %s11226_s7]]   ;;  %s11230_s7 = smov 50  }
  0x5f   :  { %s11543_s13 = sld [smem:[%s13103_s0 + %s11227_s15]]   ;;  %s11231_s15 = smov 51  }
  0x60   :  { %s11553_s25 = sld [smem:[%s13103_s0 + %s11229_s28]]   ;;  %s11233_s28 = smov 53  }
  0x61   :  { %13252 = sst [smem:[#allocation111_spill]] %s11528_s12 }
  0x62   :  { %13253 = sst [smem:[#allocation112_spill]] %s11533_s3 }
  0x63   :  { %s11548_s12 = sld [smem:[%s13103_s0 + %s11228_s22]]   ;;  %s11232_s22 = smov 52  }
  0x64   :  { %13254 = sst [smem:[#allocation113_spill]] %s11538_s29 }
  0x65   :  { %13255 = sst [smem:[#allocation114_spill]] %s11543_s13 }
  0x66   :  { %13257 = sst [smem:[#allocation116_spill]] %s11553_s25 }
  0x67   :  { %s11558_s29 = sld [smem:[%s13103_s0 + %s11230_s7]]   ;;  %s11234_s7 = smov 54  }
  0x68   :  { %s11563_s21 = sld [smem:[%s13103_s0 + %s11231_s15]]   ;;  %s11235_s15 = smov 55  }
  0x69   :  { %13256 = sst [smem:[#allocation115_spill]] %s11548_s12 }
  0x6a   :  { %s11568_s5 = sld [smem:[%s13103_s0 + %s11232_s22]]   ;;  %s11236_s22 = smov 56  }
  0x6b   :  { %s11573_s25 = sld [smem:[%s13103_s0 + %s11233_s28]]   ;;  %s11237_s28 = smov 57  }
  0x6c   :  { %s11583_s13 = sld [smem:[%s13103_s0 + %s11235_s15]]   ;;  %s11239_s15 = smov 59  }
  0x6d   :  { %13258 = sst [smem:[#allocation117_spill]] %s11558_s29 }
  0x6e   :  { %13259 = sst [smem:[#allocation118_spill]] %s11563_s21 }
  0x6f   :  { %s11578_s29 = sld [smem:[%s13103_s0 + %s11234_s7]]   ;;  %s11238_s7 = smov 58  }
  0x70   :  { %13260 = sst [smem:[#allocation119_spill]] %s11568_s5 }
  0x71   :  { %13261 = sst [smem:[#allocation120_spill]] %s11573_s25 }
  0x72   :  { %13262 = sst [smem:[#allocation121_spill]] %s11583_s13 }
  0x73   :  { %s11588_s5 = sld [smem:[%s13103_s0 + %s11236_s22]]   ;;  %s11240_s22 = smov 60  }
  0x74   :  { %s11593_s25 = sld [smem:[%s13103_s0 + %s11237_s28]]   ;;  %s11241_s28 = smov 61  }
  0x75   :  { %s11598_s19 = sld [smem:[%s13103_s0 + %s11238_s7]]   ;;  %s11242_s7 = smov 62  }
  0x76   :  { %s11603_s13 = sld [smem:[%s13103_s0 + %s11239_s15]]   ;;  %s11243_s15 = smov 63  }
  0x77   :  { %s11613_s30 = sld [smem:[%s13103_s0 + %s11241_s28]]   ;;  %s11245_s28 = smov 65  }
  0x78   :  { %s11633_s24 = sld [smem:[%s13103_s0 + %s11245_s28]]   ;;  %s11249_s28 = smov 69  }
  0x79   :  { %13263 = sst [smem:[#allocation122_spill]] %s11588_s5 }
  0x7a   :  { %13264 = sst [smem:[#allocation123_spill]] %s11593_s25 }
  0x7b   :  { %13265 = sst [smem:[#allocation124_spill]] %s11598_s19 }
  0x7c   :  { %13266 = sst [smem:[#allocation125_spill]] %s11603_s13 }
  0x7d   :  { %s11608_s5 = sld [smem:[%s13103_s0 + %s11240_s22]]   ;;  %s11244_s22 = smov 64  }
  0x7e   :  { %s11618_s19 = sld [smem:[%s13103_s0 + %s11242_s7]]   ;;  %s11246_s7 = smov 66  }
  0x7f   :  { %s11623_s13 = sld [smem:[%s13103_s0 + %s11243_s15]]   ;;  %s11247_s15 = smov 67  }
  0x80   :  { %13271 = sst [smem:[#allocation130_spill]] %s11633_s24 }
  0x81   :  { %s11643_s17 = sld [smem:[%s13103_s0 + %s11247_s15]]   ;;  %s11251_s15 = smov 71  }
  0x82   :  { %s11653_s24 = sld [smem:[%s13103_s0 + %s11249_s28]]   ;;  %s11253_s28 = smov 73  }
  0x83   :  { %13267 = sst [smem:[#allocation126_spill]] %s11608_s5 }
  0x84   :  { %13268 = sst [smem:[#allocation127_spill]] %s11618_s19 }
  0x85   :  { %13269 = sst [smem:[#allocation128_spill]] %s11623_s13 }
  0x86   :  { %s11628_s5 = sld [smem:[%s13103_s0 + %s11244_s22]]   ;;  %s11248_s22 = smov 68  }
  0x87   :  { %s11638_s19 = sld [smem:[%s13103_s0 + %s11246_s7]]   ;;  %s11250_s7 = smov 70  }
  0x88   :  { %13273 = sst [smem:[#allocation132_spill]] %s11643_s17 }
  0x89   :  { %13275 = sst [smem:[#allocation134_spill]] %s11653_s24 }
  0x8a   :  { %s11663_s9 = sld [smem:[%s13103_s0 + %s11251_s15]]  }
  0x8b   :  { %s11673_s20 = sld [smem:[%s13103_s0 + %s11253_s28]]  }
  0x8c   :  { %13270 = sst [smem:[#allocation129_spill]] %s11628_s5 }
  0x8d   :  { %13272 = sst [smem:[#allocation131_spill]] %s11638_s19 }
  0x8e   :  { %s11648_s5 = sld [smem:[%s13103_s0 + %s11248_s22]]   ;;  %s11252_s22 = smov 72  }
  0x8f   :  { %s11658_s19 = sld [smem:[%s13103_s0 + %s11250_s7]]   ;;  %s11254_s7 = smov 74  }
  0x90   :  { %13277 = sst [smem:[#allocation136_spill]] %s11663_s9 }
  0x91   :  { %13279 = sst [smem:[#allocation138_spill]] %s11673_s20 }
  0x94   :  { %13274 = sst [smem:[#allocation133_spill]] %s11648_s5 }
  0x95   :  { %13276 = sst [smem:[#allocation135_spill]] %s11658_s19 }
  0x96   :  { %s11668_s5 = sld [smem:[%s13103_s0 + %s11252_s22]]  }
  0x97   :  { %s11678_s19 = sld [smem:[%s13103_s0 + %s11254_s7]]  }
  0x9c   :  { %13278 = sst [smem:[#allocation137_spill]] %s11668_s5 }
  0x9d   :  { %154 = vsyncpa [#allocation3], 0 }
  0x9e   :  { %155 = vsyncpa [#allocation6], 0 }
  0x9f   :  { %156 = vsyncpa [#allocation9], 0 }
  0xa0   :  { %157 = vsyncpa [#allocation12], 0 }
  0xa1   :  { %158 = vsyncpa [#allocation15], 0 }
  0xa2   :  { %159 = vsyncpa [#allocation18], 0 }
  0xa3   :  { %160 = vsyncpa [#allocation21], 0 }
  0xa4   :  { %161 = vsyncpa [#allocation24], 0 }
  0xa5   :  { %162 = vsyncpa [#allocation27], 0 }
  0xa6   :  { %163 = vsyncpa [#allocation30], 0 }
  0xa7   :  { %164 = vsyncpa [#allocation33], 0 }
  0xa8   :  { %165 = vsyncpa [#allocation36], 0 }
  0xa9   :  { %166 = vsyncpa [#allocation39], 0 }
  0xaa   :  { %167 = vsyncpa [#allocation42], 0 }
  0xab   :  { %168 = vsyncpa [#allocation45], 0 }
  0xac   :  { %169 = vsyncpa [#allocation48], 0 }
  0xad   :  { %170 = vsyncpa [#allocation4], 0 }
  0xae   :  { %172 = vsyncpa [#allocation4 + $0x1], 0  ;;  %s11680_s0 = smov 0   ;;  %s11682_s15 = smov 0  }
  0xaf   :  { %s11684_s16 = smov 0   ;;  %s11686_s18 = smov 0  }
  0xb0 LB: > { %s13280_s5 = sld [smem:[#allocation137_spill]]  ;;  %s13281_s25 = sld [smem:[#allocation123_spill]]  ;;  %s11171_s15 = sphi %s11682_s15, %s13416_s15   ;;  %s11167_s0 = sphi %s11680_s0, %s13415_s0   ;;  %s11179_s18 = sphi %s11686_s18, %s13412_s18   ;;  %s11175_s16 = sphi %s11684_s16, %s13414_s16  }
  0xb1   : > { %s13282_s24 = sld [smem:[#allocation134_spill]]  ;;  %s13284_s20 = sld [smem:[#allocation138_spill]] }
  0xb2   : > { %s13283_s21 = sld [smem:[#allocation118_spill]]  ;;  %s13285_s17 = sld [smem:[#allocation132_spill]] }
  0xb3   : > { %s13286_s14 = sld [smem:[#allocation109_spill]]  ;;  %s13287_s13 = sld [smem:[#allocation128_spill]] }
  0xb4   : > { %s13288_s12 = sld [smem:[#allocation115_spill]]  ;;  %s13289_s9 = sld [smem:[#allocation136_spill]] }
  0xb5   : > { %s13290_s8 = sld [smem:[#allocation106_spill]]  ;;  %s13291_s3 = sld [smem:[#allocation112_spill]] }
  0xb6   : > { %s13292_s6 = sld [smem:[#allocation102_spill]]  ;;  %s13293_s4 = sld [smem:[#allocation97_spill]] }
  0xb7   : > { %13294 = sst [smem:[#allocation139_spill]] %s11167_s0  ;;  %s11701_s22 = sadd.s32 4294967295, %s11179_s18  }
  0xb8   : > { %13295 = sst [smem:[#allocation140_spill]] %s11175_s16  ;;  %s8526_s23 = sadd.s32 4294967294, %s11179_s18  }
  0xb9   : > { %s11705_s26 = sadd.s32 1, %s11179_s18   ;;  %s1759_s28 = sadd.s32 1, %s11175_s16 }
  0xba   : > { %13296 = sst [smem:[#allocation141_spill]] %s11705_s26  ;;  %s1756_s1 = ssub.s32 %s11179_s18, %s11705_s26 }
  0xbb   : > { %p1769_p0 = scmp.ne.s32.totalorder %s11175_s16, %s11171_s15  ;;  %p1757_p1 = scmp.eq.s32.totalorder %s1756_s1, 0 }
  0xbc   : > { %p1770_p2 = scmp.eq.s32.totalorder %s11701_s22, 1  ;;  %p1775_p3 = scmp.ne.s32.totalorder %s11171_s15, %s11167_s0 }
  0xbd   : > { %p1776_p4 = scmp.eq.s32.totalorder %s8526_s23, 1  ;;  %p8527_p7 = scmp.ge.s32.totalorder %s11179_s18, 1 }
  0xbe   : > { %s11716_s2 = scalar_select %p1757_p1, %s11175_s16, %s1759_s28  }
  0xbf   : > { %p11718_p5 = por %p1770_p2, %p1769_p0  ;;  %p11722_p6 = por %p1776_p4, %p1775_p3 }
  0xc0   : > { %13297 = sst [smem:[#allocation142_spill]] %s11716_s2  ;;  %p1783_p8 = scmp.lt.s32.totalorder %s11179_s18, 3 }
  0xc1   : > { %s13298_s7 = scalar_select %p11718_p5, 1, 0 }
  0xc2   : > { %s13299_s10 = scalar_select %p11722_p6, 1, 0 }
  0xc3   : > { %p13146_p9 = scmp.eq.s32.totalorder %s11701_s22, 0  ;;  %p11729_p10 = pnand %p8527_p7, %p1783_p8 }
  0xc4   : > { %13300 = sst [smem:[#allocation143_spill]] %s13299_s10  ;;  %s11255_s23 = smov [#allocation5]  }
  0xc5   : > { %s13301_s11 = scalar_select %p11729_p10, 1, 0 }
  0xc6   : > { %s1879_s28 = sshll.u32 %s11255_s23, 4  ;;  %p9710_p11 = pneg %p11729_p10  ;;  %s1880_s28 = int_to_ptr.vmem [resolvable:$true] %s1879_s28 }
  0xc7   : > { %s11256_s1 = smov [#allocation8]   ;;  %s11257_s26 = smov [#allocation11]  }
  0xc8   : > { %s1907_s2 = sshll.u32 %s11256_s1, 4  ;;  %p11737_p12 = pnand %p13146_p9, %p9710_p11  ;;  %s11741_s2 = int_to_ptr.vmem [resolvable:$true] %s1907_s2 }
  0xc9   : > { %s11743_s10 = sshll.u32 %s11257_s26, 4  ;;  %s10185_s0 = scalar_lea.hbm %s13293_s4, 16  ;;  %s1930_s10 = int_to_ptr.vmem [resolvable:$true] %s11743_s10 }
  0xca   : > { %p10186_p13 = scmp.ne.s32.totalorder %s13293_s4, %s10185_s0  ;;  %p11749_p0 = pneg %p11737_p12 }
  0xcb   : > { %p10192_p3 = scmp.lt.u32.totalorder %s10185_s0, %s13293_s4 }
  0xcc   : > { %p10188_p1 = pnand %p11749_p0, %p10186_p13 }
  0xce   : > { %p10189_p2 = pneg %p10188_p1 }
  0xd0   : > { %p10194_p4 = pnand %p10192_p3, %p10189_p2 }
  0xd2   : > { %10197 = shalt.err (!%p10194_p4)
}
  0xd3   : > { %s10198_s1 = scalar_lea.vmem %s1880_s28, 16  ;;  %s10205_s26 = scalar_lea.vmem %s1880_s28, 32 }
  0xd4   : > { %p10199_p7 = scmp.ne.s32.totalorder %s1880_s28, %s10198_s1  ;;  %p10206_p9 = scmp.lt.s32.totalorder %s1880_s28, %s1880_s28 }
  0xd5   : > { %p10207_p6 = scmp.lt.s32.totalorder %s10205_s26, %s10198_s1 }
  0xd6   : > { %p10201_p8 = pnand %p10199_p7, %p11749_p0 }
  0xd7   : > { %p10208_p5 = por %p10207_p6, %p10206_p9 }
  0xd8   : > { %p10202_p11 = pneg %p10201_p8 }
  0xda   : > { %p10209_p10 = pnand %p10208_p5, %p10202_p11 }
  0xdc   : > { %10212 = shalt.err (!%p10209_p10)
}
  0xdd   : > { %9716 = dma.hbm_to_vmem [thread:$0]  (!%p11737_p12), %s13293_s4, 16, %s1880_s28, [#allocation6]  }
  0xde   : > { %s10213_s0 = scalar_lea.hbm %s11473_s27, 16 }
  0xdf   : > { %p10214_p13 = scmp.ne.s32.totalorder %s11473_s27, %s10213_s0  ;;  %p10220_p3 = scmp.lt.u32.totalorder %s10213_s0, %s11473_s27 }
  0xe1   : > { %p10216_p1 = pnand %p10214_p13, %p11749_p0 }
  0xe3   : > { %p10217_p2 = pneg %p10216_p1 }
  0xe5   : > { %p10222_p4 = pnand %p10220_p3, %p10217_p2 }
  0xe7   : > { %10225 = shalt.err (!%p10222_p4)
}
  0xe8   : > { %s10226_s1 = scalar_lea.vmem %s11741_s2, 16  ;;  %s10233_s26 = scalar_lea.vmem %s11741_s2, 32 }
  0xe9   : > { %p10227_p5 = scmp.ne.s32.totalorder %s11741_s2, %s10226_s1  ;;  %p10234_p10 = scmp.lt.s32.totalorder %s11741_s2, %s11741_s2 }
  0xea   : > { %p10235_p7 = scmp.lt.s32.totalorder %s10233_s26, %s10226_s1 }
  0xeb   : > { %p10229_p6 = pnand %p10227_p5, %p11749_p0 }
  0xec   : > { %p10236_p8 = por %p10235_p7, %p10234_p10 }
  0xed   : > { %p10230_p9 = pneg %p10229_p6 }
  0xef   : > { %p10237_p11 = pnand %p10236_p8, %p10230_p9 }
  0xf1   : > { %10240 = shalt.err (!%p10237_p11)
}
  0xf2   : > { %9722 = dma.hbm_to_vmem [thread:$0]  (!%p11737_p12), %s11473_s27, 16, %s11741_s2, [#allocation9]  }
  0xf3   : > { %s11258_s28 = smov [#allocation14]   ;;  %s10241_s4 = scalar_lea.hbm %s13292_s6, 16 }
  0xf4   : > { %s1957_s0 = sshll.u32 %s11258_s28, 4  ;;  %p10242_p13 = scmp.ne.s32.totalorder %s13292_s6, %s10241_s4  ;;  %s1958_s0 = int_to_ptr.vmem [resolvable:$true] %s1957_s0 }
  0xf5   : > { %p10248_p3 = scmp.lt.u32.totalorder %s10241_s4, %s13292_s6 }
  0xf6   : > { %p10244_p1 = pnand %p10242_p13, %p11749_p0 }
  0xf8   : > { %p10245_p2 = pneg %p10244_p1 }
  0xfa   : > { %p10250_p4 = pnand %p10248_p3, %p10245_p2 }
  0xfc   : > { %10253 = shalt.err (!%p10250_p4)
}
  0xfd   : > { %s10254_s1 = scalar_lea.vmem %s1930_s10, 16  ;;  %s10261_s26 = scalar_lea.vmem %s1930_s10, 32 }
  0xfe   : > { %p10255_p5 = scmp.ne.s32.totalorder %s1930_s10, %s10254_s1  ;;  %p10262_p10 = scmp.lt.s32.totalorder %s1930_s10, %s1930_s10 }
  0xff   : > { %p10263_p7 = scmp.lt.s32.totalorder %s10261_s26, %s10254_s1 }
 0x100   : > { %p10257_p6 = pnand %p10255_p5, %p11749_p0 }
 0x101   : > { %p10264_p8 = por %p10263_p7, %p10262_p10 }
 0x102   : > { %p10258_p9 = pneg %p10257_p6 }
 0x104   : > { %p10265_p11 = pnand %p10264_p8, %p10258_p9 }
 0x106   : > { %10268 = shalt.err (!%p10265_p11)
}
 0x107   : > { %9728 = dma.hbm_to_vmem [thread:$0]  (!%p11737_p12), %s13292_s6, 16, %s1930_s10, [#allocation12]  }
 0x108   : > { %s10269_s4 = scalar_lea.hbm %s13290_s8, 16 }
 0x109   : > { %p10270_p13 = scmp.ne.s32.totalorder %s13290_s8, %s10269_s4  ;;  %p10276_p3 = scmp.lt.u32.totalorder %s10269_s4, %s13290_s8 }
 0x10b   : > { %p10272_p1 = pnand %p10270_p13, %p11749_p0 }
 0x10d   : > { %p10273_p2 = pneg %p10272_p1 }
 0x10f   : > { %p10278_p4 = pnand %p10276_p3, %p10273_p2 }
 0x111   : > { %10281 = shalt.err (!%p10278_p4)
}
 0x112   : > { %s10282_s2 = scalar_lea.vmem %s1958_s0, 16  ;;  %s10289_s28 = scalar_lea.vmem %s1958_s0, 32 }
 0x113   : > { %p10283_p5 = scmp.ne.s32.totalorder %s1958_s0, %s10282_s2  ;;  %p10290_p10 = scmp.lt.s32.totalorder %s1958_s0, %s1958_s0 }
 0x114   : > { %p10291_p7 = scmp.lt.s32.totalorder %s10289_s28, %s10282_s2 }
 0x115   : > { %p10285_p6 = pnand %p10283_p5, %p11749_p0 }
 0x116   : > { %p10292_p8 = por %p10291_p7, %p10290_p10 }
 0x117   : > { %p10286_p9 = pneg %p10285_p6 }
 0x119   : > { %p10293_p11 = pnand %p10292_p8, %p10286_p9 }
 0x11b   : > { %10296 = shalt.err (!%p10293_p11)
}
 0x11c   : > { %9734 = dma.hbm_to_vmem [thread:$0]  (!%p11737_p12), %s13290_s8, 16, %s1958_s0, [#allocation15]  }
 0x11d   : > { %s11259_s10 = smov [#allocation17]   ;;  %s11260_s26 = smov [#allocation20]  }
 0x11e   : > { %s1982_s1 = sshll.u32 %s11259_s10, 4  ;;  %s2007_s4 = sshll.u32 %s11260_s26, 4  ;;  %s1983_s1 = int_to_ptr.vmem [resolvable:$true] %s1982_s1  ;;  %s2008_s4 = int_to_ptr.vmem [resolvable:$true] %s2007_s4 }
 0x11f   : > { %s10297_s6 = scalar_lea.hbm %s13286_s14, 16 }
 0x120   : > { %p10298_p13 = scmp.ne.s32.totalorder %s13286_s14, %s10297_s6  ;;  %p10304_p3 = scmp.lt.u32.totalorder %s10297_s6, %s13286_s14 }
 0x122   : > { %p10300_p1 = pnand %p10298_p13, %p11749_p0 }
 0x124   : > { %p10301_p2 = pneg %p10300_p1 }
 0x126   : > { %p10306_p4 = pnand %p10304_p3, %p10301_p2 }
 0x128   : > { %10309 = shalt.err (!%p10306_p4)
}
 0x129   : > { %s10310_s2 = scalar_lea.vmem %s1983_s1, 16  ;;  %s10317_s0 = scalar_lea.vmem %s1983_s1, 32 }
 0x12a   : > { %p10311_p5 = scmp.ne.s32.totalorder %s1983_s1, %s10310_s2  ;;  %p10318_p10 = scmp.lt.s32.totalorder %s1983_s1, %s1983_s1 }
 0x12b   : > { %p10319_p7 = scmp.lt.s32.totalorder %s10317_s0, %s10310_s2 }
 0x12c   : > { %p10313_p6 = pnand %p10311_p5, %p11749_p0 }
 0x12d   : > { %p10320_p8 = por %p10319_p7, %p10318_p10 }
 0x12e   : > { %p10314_p9 = pneg %p10313_p6 }
 0x130   : > { %p10321_p11 = pnand %p10320_p8, %p10314_p9 }
 0x132   : > { %10324 = shalt.err (!%p10321_p11)
}
 0x133   : > { %9740 = dma.hbm_to_vmem [thread:$0]  (!%p11737_p12), %s13286_s14, 16, %s1983_s1, [#allocation18]  }
 0x134   : > { %s10325_s6 = scalar_lea.hbm %s13291_s3, 16 }
 0x135   : > { %p10326_p13 = scmp.ne.s32.totalorder %s13291_s3, %s10325_s6  ;;  %p10332_p3 = scmp.lt.u32.totalorder %s10325_s6, %s13291_s3 }
 0x137   : > { %p10328_p1 = pnand %p10326_p13, %p11749_p0 }
 0x139   : > { %p10329_p2 = pneg %p10328_p1 }
 0x13b   : > { %p10334_p4 = pnand %p10332_p3, %p10329_p2 }
 0x13d   : > { %10337 = shalt.err (!%p10334_p4)
}
 0x13e   : > { %s10338_s28 = scalar_lea.vmem %s2008_s4, 16  ;;  %s10345_s10 = scalar_lea.vmem %s2008_s4, 32 }
 0x13f   : > { %p10339_p5 = scmp.ne.s32.totalorder %s2008_s4, %s10338_s28  ;;  %p10346_p10 = scmp.lt.s32.totalorder %s2008_s4, %s2008_s4 }
 0x140   : > { %p10347_p7 = scmp.lt.s32.totalorder %s10345_s10, %s10338_s28 }
 0x141   : > { %p10341_p6 = pnand %p10339_p5, %p11749_p0 }
 0x142   : > { %p10348_p8 = por %p10347_p7, %p10346_p10 }
 0x143   : > { %p10342_p9 = pneg %p10341_p6 }
 0x145   : > { %p10349_p11 = pnand %p10348_p8, %p10342_p9 }
 0x147   : > { %10352 = shalt.err (!%p10349_p11)
}
 0x148   : > { %9746 = dma.hbm_to_vmem [thread:$0]  (!%p11737_p12), %s13291_s3, 16, %s2008_s4, [#allocation21]  }
 0x149   : > { %s11261_s1 = smov [#allocation23]   ;;  %s11262_s2 = smov [#allocation26]  }
 0x14a   : > { %s2032_s26 = sshll.u32 %s11261_s1, 4  ;;  %s2057_s0 = sshll.u32 %s11262_s2, 4  ;;  %s2033_s26 = int_to_ptr.vmem [resolvable:$true] %s2032_s26  ;;  %s2058_s0 = int_to_ptr.vmem [resolvable:$true] %s2057_s0 }
 0x14b   : > { %s10353_s6 = scalar_lea.hbm %s13288_s12, 16 }
 0x14c   : > { %p10354_p13 = scmp.ne.s32.totalorder %s13288_s12, %s10353_s6  ;;  %p10360_p3 = scmp.lt.u32.totalorder %s10353_s6, %s13288_s12 }
 0x14e   : > { %p10356_p1 = pnand %p10354_p13, %p11749_p0 }
 0x150   : > { %p10357_p2 = pneg %p10356_p1 }
 0x152   : > { %p10362_p4 = pnand %p10360_p3, %p10357_p2 }
 0x154   : > { %10365 = shalt.err (!%p10362_p4)
}
 0x155   : > { %s10366_s28 = scalar_lea.vmem %s2033_s26, 16  ;;  %s10373_s4 = scalar_lea.vmem %s2033_s26, 32 }
 0x156   : > { %p10367_p5 = scmp.ne.s32.totalorder %s2033_s26, %s10366_s28  ;;  %p10374_p10 = scmp.lt.s32.totalorder %s2033_s26, %s2033_s26 }
 0x157   : > { %p10375_p7 = scmp.lt.s32.totalorder %s10373_s4, %s10366_s28 }
 0x158   : > { %p10369_p6 = pnand %p10367_p5, %p11749_p0 }
 0x159   : > { %p10376_p8 = por %p10375_p7, %p10374_p10 }
 0x15a   : > { %p10370_p9 = pneg %p10369_p6 }
 0x15c   : > { %p10377_p11 = pnand %p10376_p8, %p10370_p9 }
 0x15e   : > { %10380 = shalt.err (!%p10377_p11)
}
 0x15f   : > { %9752 = dma.hbm_to_vmem [thread:$0]  (!%p11737_p12), %s13288_s12, 16, %s2033_s26, [#allocation24]  }
 0x160   : > { %s10381_s10 = scalar_lea.hbm %s13283_s21, 16 }
 0x161   : > { %p10382_p13 = scmp.ne.s32.totalorder %s13283_s21, %s10381_s10  ;;  %p10388_p3 = scmp.lt.u32.totalorder %s10381_s10, %s13283_s21 }
 0x163   : > { %p10384_p1 = pnand %p10382_p13, %p11749_p0 }
 0x165   : > { %p10385_p2 = pneg %p10384_p1 }
 0x167   : > { %p10390_p4 = pnand %p10388_p3, %p10385_p2 }
 0x169   : > { %10393 = shalt.err (!%p10390_p4)
}
 0x16a   : > { %s10394_s1 = scalar_lea.vmem %s2058_s0, 16  ;;  %s10401_s2 = scalar_lea.vmem %s2058_s0, 32 }
 0x16b   : > { %p10395_p5 = scmp.ne.s32.totalorder %s2058_s0, %s10394_s1  ;;  %p10402_p10 = scmp.lt.s32.totalorder %s2058_s0, %s2058_s0 }
 0x16c   : > { %p10403_p7 = scmp.lt.s32.totalorder %s10401_s2, %s10394_s1 }
 0x16d   : > { %p10397_p6 = pnand %p10395_p5, %p11749_p0 }
 0x16e   : > { %p10404_p8 = por %p10403_p7, %p10402_p10 }
 0x16f   : > { %p10398_p9 = pneg %p10397_p6 }
 0x171   : > { %p10405_p11 = pnand %p10404_p8, %p10398_p9 }
 0x173   : > { %10408 = shalt.err (!%p10405_p11)
}
 0x174   : > { %9758 = dma.hbm_to_vmem [thread:$0]  (!%p11737_p12), %s13283_s21, 16, %s2058_s0, [#allocation27]  }
 0x175   : > { %s11263_s26 = smov [#allocation29]   ;;  %s11264_s28 = smov [#allocation32]  }
 0x176   : > { %s2082_s6 = sshll.u32 %s11263_s26, 4  ;;  %s2107_s4 = sshll.u32 %s11264_s28, 4  ;;  %s2083_s6 = int_to_ptr.vmem [resolvable:$true] %s2082_s6  ;;  %s2108_s4 = int_to_ptr.vmem [resolvable:$true] %s2107_s4 }
 0x177   : > { %s10409_s10 = scalar_lea.hbm %s11578_s29, 16 }
 0x178   : > { %p10410_p13 = scmp.ne.s32.totalorder %s11578_s29, %s10409_s10  ;;  %p10416_p3 = scmp.lt.u32.totalorder %s10409_s10, %s11578_s29 }
 0x17a   : > { %p10412_p1 = pnand %p10410_p13, %p11749_p0 }
 0x17c   : > { %p10413_p2 = pneg %p10412_p1 }
 0x17e   : > { %p10418_p4 = pnand %p10416_p3, %p10413_p2 }
 0x180   : > { %10421 = shalt.err (!%p10418_p4)
}
 0x181   : > { %s10422_s1 = scalar_lea.vmem %s2083_s6, 16  ;;  %s10429_s0 = scalar_lea.vmem %s2083_s6, 32 }
 0x182   : > { %p10423_p5 = scmp.ne.s32.totalorder %s2083_s6, %s10422_s1  ;;  %p10430_p10 = scmp.lt.s32.totalorder %s2083_s6, %s2083_s6 }
 0x183   : > { %p10431_p7 = scmp.lt.s32.totalorder %s10429_s0, %s10422_s1 }
 0x184   : > { %p10425_p6 = pnand %p10423_p5, %p11749_p0 }
 0x185   : > { %p10432_p8 = por %p10431_p7, %p10430_p10 }
 0x186   : > { %p10426_p9 = pneg %p10425_p6 }
 0x188   : > { %p10433_p11 = pnand %p10432_p8, %p10426_p9 }
 0x18a   : > { %10436 = shalt.err (!%p10433_p11)
}
 0x18b   : > { %9764 = dma.hbm_to_vmem [thread:$0]  (!%p11737_p12), %s11578_s29, 16, %s2083_s6, [#allocation30]  }
 0x18c   : > { %s10437_s2 = scalar_lea.hbm %s13281_s25, 16 }
 0x18d   : > { %p10438_p13 = scmp.ne.s32.totalorder %s13281_s25, %s10437_s2  ;;  %p10444_p3 = scmp.lt.u32.totalorder %s10437_s2, %s13281_s25 }
 0x18f   : > { %p10440_p1 = pnand %p10438_p13, %p11749_p0 }
 0x191   : > { %p10441_p2 = pneg %p10440_p1 }
 0x193   : > { %p10446_p4 = pnand %p10444_p3, %p10441_p2 }
 0x195   : > { %10449 = shalt.err (!%p10446_p4)
}
 0x196   : > { %s10450_s26 = scalar_lea.vmem %s2108_s4, 16  ;;  %s10457_s28 = scalar_lea.vmem %s2108_s4, 32 }
 0x197   : > { %p10451_p5 = scmp.ne.s32.totalorder %s2108_s4, %s10450_s26  ;;  %p10458_p10 = scmp.lt.s32.totalorder %s2108_s4, %s2108_s4 }
 0x198   : > { %p10459_p7 = scmp.lt.s32.totalorder %s10457_s28, %s10450_s26 }
 0x199   : > { %p10453_p6 = pnand %p10451_p5, %p11749_p0 }
 0x19a   : > { %p10460_p8 = por %p10459_p7, %p10458_p10 }
 0x19b   : > { %p10454_p9 = pneg %p10453_p6 }
 0x19d   : > { %p10461_p11 = pnand %p10460_p8, %p10454_p9 }
 0x19f   : > { %10464 = shalt.err (!%p10461_p11)
}
 0x1a0   : > { %9770 = dma.hbm_to_vmem [thread:$0]  (!%p11737_p12), %s13281_s25, 16, %s2108_s4, [#allocation33]  }
 0x1a1   : > { %s11265_s6 = smov [#allocation35]   ;;  %s11266_s1 = smov [#allocation38]  }
 0x1a2   : > { %s2135_s10 = sshll.u32 %s11265_s6, 4  ;;  %s2157_s0 = sshll.u32 %s11266_s1, 4  ;;  %s2136_s10 = int_to_ptr.vmem [resolvable:$true] %s2135_s10  ;;  %s2158_s0 = int_to_ptr.vmem [resolvable:$true] %s2157_s0 }
 0x1a3   : > { %s10465_s2 = scalar_lea.hbm %s11613_s30, 16 }
 0x1a4   : > { %p10466_p13 = scmp.ne.s32.totalorder %s11613_s30, %s10465_s2  ;;  %p10472_p3 = scmp.lt.u32.totalorder %s10465_s2, %s11613_s30 }
 0x1a6   : > { %p10468_p1 = pnand %p10466_p13, %p11749_p0 }
 0x1a8   : > { %p10469_p2 = pneg %p10468_p1 }
 0x1aa   : > { %p10474_p4 = pnand %p10472_p3, %p10469_p2 }
 0x1ac   : > { %10477 = shalt.err (!%p10474_p4)
}
 0x1ad   : > { %s10478_s26 = scalar_lea.vmem %s2136_s10, 16  ;;  %s10485_s4 = scalar_lea.vmem %s2136_s10, 32 }
 0x1ae   : > { %p10479_p5 = scmp.ne.s32.totalorder %s2136_s10, %s10478_s26  ;;  %p10486_p10 = scmp.lt.s32.totalorder %s2136_s10, %s2136_s10 }
 0x1af   : > { %p10487_p7 = scmp.lt.s32.totalorder %s10485_s4, %s10478_s26 }
 0x1b0   : > { %p10481_p6 = pnand %p10479_p5, %p11749_p0 }
 0x1b1   : > { %p10488_p8 = por %p10487_p7, %p10486_p10 }
 0x1b2   : > { %p10482_p9 = pneg %p10481_p6 }
 0x1b4   : > { %p10489_p11 = pnand %p10488_p8, %p10482_p9 }
 0x1b6   : > { %10492 = shalt.err (!%p10489_p11)
}
 0x1b7   : > { %9776 = dma.hbm_to_vmem [thread:$0]  (!%p11737_p12), %s11613_s30, 16, %s2136_s10, [#allocation36]  }
 0x1b8   : > { %s10493_s28 = scalar_lea.hbm %s13287_s13, 16 }
 0x1b9   : > { %p10494_p13 = scmp.ne.s32.totalorder %s13287_s13, %s10493_s28  ;;  %p10500_p3 = scmp.lt.u32.totalorder %s10493_s28, %s13287_s13 }
 0x1bb   : > { %p10496_p1 = pnand %p10494_p13, %p11749_p0 }
 0x1bd   : > { %p10497_p2 = pneg %p10496_p1 }
 0x1bf   : > { %p10502_p4 = pnand %p10500_p3, %p10497_p2 }
 0x1c1   : > { %10505 = shalt.err (!%p10502_p4)
}
 0x1c2   : > { %s10506_s6 = scalar_lea.vmem %s2158_s0, 16  ;;  %s10513_s1 = scalar_lea.vmem %s2158_s0, 32 }
 0x1c3   : > { %p10507_p5 = scmp.ne.s32.totalorder %s2158_s0, %s10506_s6  ;;  %p10514_p10 = scmp.lt.s32.totalorder %s2158_s0, %s2158_s0 }
 0x1c4   : > { %p10515_p7 = scmp.lt.s32.totalorder %s10513_s1, %s10506_s6 }
 0x1c5   : > { %p10509_p6 = pnand %p10507_p5, %p11749_p0 }
 0x1c6   : > { %p10516_p8 = por %p10515_p7, %p10514_p10 }
 0x1c7   : > { %p10510_p9 = pneg %p10509_p6 }
 0x1c9   : > { %p10517_p11 = pnand %p10516_p8, %p10510_p9 }
 0x1cb   : > { %10520 = shalt.err (!%p10517_p11)
}
 0x1cc   : > { %9782 = dma.hbm_to_vmem [thread:$0]  (!%p11737_p12), %s13287_s13, 16, %s2158_s0, [#allocation39]  }
 0x1cd   : > { %s11267_s10 = smov [#allocation41]   ;;  %s11268_s26 = smov [#allocation44]  }
 0x1ce   : > { %s2185_s2 = sshll.u32 %s11267_s10, 4  ;;  %s2207_s4 = sshll.u32 %s11268_s26, 4  ;;  %s2186_s2 = int_to_ptr.vmem [resolvable:$true] %s2185_s2  ;;  %s2208_s4 = int_to_ptr.vmem [resolvable:$true] %s2207_s4 }
 0x1cf   : > { %s10521_s28 = scalar_lea.hbm %s13285_s17, 16 }
 0x1d0   : > { %p10522_p13 = scmp.ne.s32.totalorder %s13285_s17, %s10521_s28  ;;  %p10528_p3 = scmp.lt.u32.totalorder %s10521_s28, %s13285_s17 }
 0x1d2   : > { %p10524_p1 = pnand %p10522_p13, %p11749_p0 }
 0x1d4   : > { %p10525_p2 = pneg %p10524_p1 }
 0x1d6   : > { %p10530_p4 = pnand %p10528_p3, %p10525_p2 }
 0x1d8   : > { %10533 = shalt.err (!%p10530_p4)
}
 0x1d9   : > { %s10534_s6 = scalar_lea.vmem %s2186_s2, 16  ;;  %s10541_s0 = scalar_lea.vmem %s2186_s2, 32 }
 0x1da   : > { %p10535_p5 = scmp.ne.s32.totalorder %s2186_s2, %s10534_s6  ;;  %p10542_p10 = scmp.lt.s32.totalorder %s2186_s2, %s2186_s2 }
 0x1db   : > { %p10543_p7 = scmp.lt.s32.totalorder %s10541_s0, %s10534_s6 }
 0x1dc   : > { %p10537_p6 = pnand %p10535_p5, %p11749_p0 }
 0x1dd   : > { %p10544_p8 = por %p10543_p7, %p10542_p10 }
 0x1de   : > { %p10538_p9 = pneg %p10537_p6 }
 0x1e0   : > { %p10545_p11 = pnand %p10544_p8, %p10538_p9 }
 0x1e2   : > { %10548 = shalt.err (!%p10545_p11)
}
 0x1e3   : > { %9788 = dma.hbm_to_vmem [thread:$0]  (!%p11737_p12), %s13285_s17, 16, %s2186_s2, [#allocation42]  }
 0x1e4   : > { %s10549_s1 = scalar_lea.hbm %s13282_s24, 16 }
 0x1e5   : > { %p10550_p13 = scmp.ne.s32.totalorder %s13282_s24, %s10549_s1  ;;  %p10556_p3 = scmp.lt.u32.totalorder %s10549_s1, %s13282_s24 }
 0x1e7   : > { %p10552_p1 = pnand %p10550_p13, %p11749_p0 }
 0x1e9   : > { %p10553_p2 = pneg %p10552_p1 }
 0x1eb   : > { %p10558_p4 = pnand %p10556_p3, %p10553_p2 }
 0x1ed   : > { %10561 = shalt.err (!%p10558_p4)
}
 0x1ee   : > { %s10562_s10 = scalar_lea.vmem %s2208_s4, 16  ;;  %s10569_s26 = scalar_lea.vmem %s2208_s4, 32 }
 0x1ef   : > { %p10563_p5 = scmp.ne.s32.totalorder %s2208_s4, %s10562_s10  ;;  %p10570_p10 = scmp.lt.s32.totalorder %s2208_s4, %s2208_s4 }
 0x1f0   : > { %p10571_p7 = scmp.lt.s32.totalorder %s10569_s26, %s10562_s10 }
 0x1f1   : > { %p10565_p6 = pnand %p10563_p5, %p11749_p0 }
 0x1f2   : > { %p10572_p8 = por %p10571_p7, %p10570_p10 }
 0x1f3   : > { %p10566_p9 = pneg %p10565_p6 }
 0x1f5   : > { %p10573_p11 = pnand %p10572_p8, %p10566_p9 }
 0x1f7   : > { %10576 = shalt.err (!%p10573_p11)
}
 0x1f8   : > { %9794 = dma.hbm_to_vmem [thread:$0]  (!%p11737_p12), %s13282_s24, 16, %s2208_s4, [#allocation45]  }
 0x1f9   : > { %s11269_s2 = smov [#allocation47]   ;;  %s11270_s6 = smov [#allocation2]  }
 0x1fa   : > { %s2229_s28 = sshll.u32 %s11269_s2, 4  ;;  %s1868_s0 = sshll.u32 %s11270_s6, 4  ;;  %s2230_s28 = int_to_ptr.vmem [resolvable:$true] %s2229_s28  ;;  %s1869_s0 = int_to_ptr.vmem [resolvable:$true] %s1868_s0 }
 0x1fb   : > { %s10577_s1 = scalar_lea.hbm %s13289_s9, 16 }
 0x1fc   : > { %p10578_p13 = scmp.ne.s32.totalorder %s13289_s9, %s10577_s1  ;;  %p10584_p3 = scmp.lt.u32.totalorder %s10577_s1, %s13289_s9 }
 0x1fe   : > { %p10580_p1 = pnand %p10578_p13, %p11749_p0 }
 0x200   : > { %p10581_p2 = pneg %p10580_p1 }
 0x202   : > { %p10586_p4 = pnand %p10584_p3, %p10581_p2 }
 0x204   : > { %10589 = shalt.err (!%p10586_p4)
}
 0x205   : > { %s10590_s10 = scalar_lea.vmem %s2230_s28, 16  ;;  %s10597_s4 = scalar_lea.vmem %s2230_s28, 32 }
 0x206   : > { %p10591_p5 = scmp.ne.s32.totalorder %s2230_s28, %s10590_s10  ;;  %p10598_p10 = scmp.lt.s32.totalorder %s2230_s28, %s2230_s28 }
 0x207   : > { %p10599_p7 = scmp.lt.s32.totalorder %s10597_s4, %s10590_s10 }
 0x208   : > { %p10593_p6 = pnand %p10591_p5, %p11749_p0 }
 0x209   : > { %p10600_p8 = por %p10599_p7, %p10598_p10 }
 0x20a   : > { %p10594_p9 = pneg %p10593_p6 }
 0x20c   : > { %p10601_p11 = pnand %p10600_p8, %p10594_p9 }
 0x20e   : > { %10604 = shalt.err (!%p10601_p11)
}
 0x20f   : > { %s13304_s26 = sld [smem:[#allocation96_spill]] }
 0x210   : > { %9800 = dma.hbm_to_vmem [thread:$0]  (!%p11737_p12), %s13289_s9, 16, %s2230_s28, [#allocation48]  }
 0x215   : > { %s10605_s2 = scalar_lea.hbm %s13304_s26, 16 }
 0x216   : > { %p10606_p13 = scmp.ne.s32.totalorder %s13304_s26, %s10605_s2  ;;  %p10612_p3 = scmp.lt.u32.totalorder %s10605_s2, %s13304_s26 }
 0x218   : > { %p10608_p1 = pnand %p10606_p13, %p11749_p0 }
 0x21a   : > { %p10609_p2 = pneg %p10608_p1 }
 0x21c   : > { %p10614_p4 = pnand %p10612_p3, %p10609_p2 }
 0x21e   : > { %10617 = shalt.err (!%p10614_p4)
}
 0x21f   : > { %s10618_s6 = scalar_lea.vmem %s1869_s0, 16  ;;  %s10625_s1 = scalar_lea.vmem %s1869_s0, 32 }
 0x220   : > { %p10619_p5 = scmp.ne.s32.totalorder %s1869_s0, %s10618_s6  ;;  %p10626_p10 = scmp.lt.s32.totalorder %s1869_s0, %s1869_s0 }
 0x221   : > { %p10627_p7 = scmp.lt.s32.totalorder %s10625_s1, %s10618_s6 }
 0x222   : > { %p10621_p6 = pnand %p10619_p5, %p11749_p0 }
 0x223   : > { %p10628_p8 = por %p10627_p7, %p10626_p10 }
 0x224   : > { %p10622_p9 = pneg %p10621_p6 }
 0x226   : > { %p10629_p11 = pnand %p10628_p8, %p10622_p9 }
 0x228   : > { %10632 = shalt.err (!%p10629_p11)
}
 0x229   : > { %s13305_s28 = sld [smem:[#allocation99_spill]]  ;;  %s11271_s10 = smov [#allocation7]  }
 0x22a   : > { %9713 = dma.hbm_to_vmem [thread:$0]  (!%p11737_p12), %s13304_s26, 16, %s1869_s0, [#allocation3]  }
 0x22b   : > { %s1893_s4 = sshll.u32 %s11271_s10, 4  ;;  %s11272_s2 = smov [#allocation10]   ;;  %s1894_s4 = int_to_ptr.vmem [resolvable:$true] %s1893_s4 }
 0x22c   : > { %s1918_s3 = sshll.u32 %s11272_s2, 4  ;;  %s11918_s3 = int_to_ptr.vmem [resolvable:$true] %s1918_s3 }
 0x22f   : > { %s10633_s8 = scalar_lea.hbm %s13305_s28, 16 }
 0x230   : > { %p10634_p13 = scmp.ne.s32.totalorder %s13305_s28, %s10633_s8  ;;  %p10640_p3 = scmp.lt.u32.totalorder %s10633_s8, %s13305_s28 }
 0x232   : > { %p10636_p1 = pnand %p10634_p13, %p11749_p0 }
 0x234   : > { %p10637_p2 = pneg %p10636_p1 }
 0x236   : > { %p10642_p4 = pnand %p10640_p3, %p10637_p2 }
 0x238   : > { %10645 = shalt.err (!%p10642_p4)
}
 0x239   : > { %s10646_s6 = scalar_lea.vmem %s1894_s4, 16  ;;  %s10653_s0 = scalar_lea.vmem %s1894_s4, 32 }
 0x23a   : > { %p10647_p5 = scmp.ne.s32.totalorder %s1894_s4, %s10646_s6  ;;  %p10654_p10 = scmp.lt.s32.totalorder %s1894_s4, %s1894_s4 }
 0x23b   : > { %p10655_p7 = scmp.lt.s32.totalorder %s10653_s0, %s10646_s6 }
 0x23c   : > { %p10649_p6 = pnand %p10647_p5, %p11749_p0 }
 0x23d   : > { %p10656_p8 = por %p10655_p7, %p10654_p10 }
 0x23e   : > { %p10650_p9 = pneg %p10649_p6 }
 0x240   : > { %p10657_p11 = pnand %p10656_p8, %p10650_p9 }
 0x242   : > { %10660 = shalt.err (!%p10657_p11)
}
 0x243   : > { %s13306_s1 = sld [smem:[#allocation101_spill]] }
 0x244   : > { %9719 = dma.hbm_to_vmem [thread:$0]  (!%p11737_p12), %s13305_s28, 16, %s1894_s4, [#allocation6]  }
 0x249   : > { %s10661_s8 = scalar_lea.hbm %s13306_s1, 16 }
 0x24a   : > { %p10662_p13 = scmp.ne.s32.totalorder %s13306_s1, %s10661_s8  ;;  %p10668_p3 = scmp.lt.u32.totalorder %s10661_s8, %s13306_s1 }
 0x24c   : > { %p10664_p1 = pnand %p10662_p13, %p11749_p0 }
 0x24e   : > { %p10665_p2 = pneg %p10664_p1 }
 0x250   : > { %p10670_p4 = pnand %p10668_p3, %p10665_p2 }
 0x252   : > { %10673 = shalt.err (!%p10670_p4)
}
 0x253   : > { %s10674_s10 = scalar_lea.vmem %s11918_s3, 16  ;;  %s10681_s2 = scalar_lea.vmem %s11918_s3, 32 }
 0x254   : > { %p10675_p5 = scmp.ne.s32.totalorder %s11918_s3, %s10674_s10  ;;  %p10682_p10 = scmp.lt.s32.totalorder %s11918_s3, %s11918_s3 }
 0x255   : > { %p10683_p7 = scmp.lt.s32.totalorder %s10681_s2, %s10674_s10 }
 0x256   : > { %p10677_p6 = pnand %p10675_p5, %p11749_p0 }
 0x257   : > { %p10684_p8 = por %p10683_p7, %p10682_p10 }
 0x258   : > { %p10678_p9 = pneg %p10677_p6 }
 0x25a   : > { %p10685_p11 = pnand %p10684_p8, %p10678_p9 }
 0x25c   : > { %10688 = shalt.err (!%p10685_p11)
}
 0x25d   : > { %s13307_s4 = sld [smem:[#allocation104_spill]]  ;;  %s11273_s6 = smov [#allocation13]  }
 0x25e   : > { %9725 = dma.hbm_to_vmem [thread:$0]  (!%p11737_p12), %s13306_s1, 16, %s11918_s3, [#allocation9]  }
 0x25f   : > { %s1943_s0 = sshll.u32 %s11273_s6, 4  ;;  %s11274_s8 = smov [#allocation16]   ;;  %s1944_s0 = int_to_ptr.vmem [resolvable:$true] %s1943_s0 }
 0x260   : > { %s1971_s9 = sshll.u32 %s11274_s8, 4  ;;  %s11946_s9 = int_to_ptr.vmem [resolvable:$true] %s1971_s9 }
 0x263   : > { %s10689_s10 = scalar_lea.hbm %s13307_s4, 16 }
 0x264   : > { %p10690_p13 = scmp.ne.s32.totalorder %s13307_s4, %s10689_s10  ;;  %p10696_p3 = scmp.lt.u32.totalorder %s10689_s10, %s13307_s4 }
 0x266   : > { %p10692_p1 = pnand %p10690_p13, %p11749_p0 }
 0x268   : > { %p10693_p2 = pneg %p10692_p1 }
 0x26a   : > { %p10698_p4 = pnand %p10696_p3, %p10693_p2 }
 0x26c   : > { %10701 = shalt.err (!%p10698_p4)
}
 0x26d   : > { %s10702_s2 = scalar_lea.vmem %s1944_s0, 16  ;;  %s10709_s3 = scalar_lea.vmem %s1944_s0, 32 }
 0x26e   : > { %p10703_p5 = scmp.ne.s32.totalorder %s1944_s0, %s10702_s2  ;;  %p10710_p10 = scmp.lt.s32.totalorder %s1944_s0, %s1944_s0 }
 0x26f   : > { %p10711_p7 = scmp.lt.s32.totalorder %s10709_s3, %s10702_s2 }
 0x270   : > { %p10705_p6 = pnand %p10703_p5, %p11749_p0 }
 0x271   : > { %p10712_p8 = por %p10711_p7, %p10710_p10 }
 0x272   : > { %p10706_p9 = pneg %p10705_p6 }
 0x274   : > { %p10713_p11 = pnand %p10712_p8, %p10706_p9 }
 0x276   : > { %10716 = shalt.err (!%p10713_p11)
}
 0x277   : > { %s13308_s6 = sld [smem:[#allocation108_spill]] }
 0x278   : > { %9731 = dma.hbm_to_vmem [thread:$0]  (!%p11737_p12), %s13307_s4, 16, %s1944_s0, [#allocation12]  }
 0x27d   : > { %s10717_s8 = scalar_lea.hbm %s13308_s6, 16 }
 0x27e   : > { %p10718_p13 = scmp.ne.s32.totalorder %s13308_s6, %s10717_s8  ;;  %p10724_p3 = scmp.lt.u32.totalorder %s10717_s8, %s13308_s6 }
 0x280   : > { %p10720_p1 = pnand %p10718_p13, %p11749_p0 }
 0x282   : > { %p10721_p2 = pneg %p10720_p1 }
 0x284   : > { %p10726_p4 = pnand %p10724_p3, %p10721_p2 }
 0x286   : > { %10729 = shalt.err (!%p10726_p4)
}
 0x287   : > { %s10730_s10 = scalar_lea.vmem %s11946_s9, 16  ;;  %s10737_s2 = scalar_lea.vmem %s11946_s9, 32 }
 0x288   : > { %p10731_p5 = scmp.ne.s32.totalorder %s11946_s9, %s10730_s10  ;;  %p10738_p10 = scmp.lt.s32.totalorder %s11946_s9, %s11946_s9 }
 0x289   : > { %p10739_p7 = scmp.lt.s32.totalorder %s10737_s2, %s10730_s10 }
 0x28a   : > { %p10733_p6 = pnand %p10731_p5, %p11749_p0 }
 0x28b   : > { %p10740_p8 = por %p10739_p7, %p10738_p10 }
 0x28c   : > { %p10734_p9 = pneg %p10733_p6 }
 0x28e   : > { %p10741_p11 = pnand %p10740_p8, %p10734_p9 }
 0x290   : > { %10744 = shalt.err (!%p10741_p11)
}
 0x291   : > { %s13309_s0 = sld [smem:[#allocation110_spill]]  ;;  %s11275_s8 = smov [#allocation19]  }
 0x292   : > { %9737 = dma.hbm_to_vmem [thread:$0]  (!%p11737_p12), %s13308_s6, 16, %s11946_s9, [#allocation15]  }
 0x293   : > { %s1993_s1 = sshll.u32 %s11275_s8, 4  ;;  %s11276_s4 = smov [#allocation22]   ;;  %s1994_s1 = int_to_ptr.vmem [resolvable:$true] %s1993_s1 }
 0x294   : > { %s2021_s12 = sshll.u32 %s11276_s4, 4  ;;  %s11974_s12 = int_to_ptr.vmem [resolvable:$true] %s2021_s12 }
 0x297   : > { %s13310_s3 = smov %s13309_s0  ;;  %s10745_s10 = scalar_lea.hbm %s13309_s0, 16 }
 0x298   : > { %p10746_p13 = scmp.ne.s32.totalorder %s13310_s3, %s10745_s10  ;;  %p10752_p3 = scmp.lt.u32.totalorder %s10745_s10, %s13310_s3 }
 0x29a   : > { %p10748_p1 = pnand %p10746_p13, %p11749_p0 }
 0x29c   : > { %p10749_p2 = pneg %p10748_p1 }
 0x29e   : > { %p10754_p4 = pnand %p10752_p3, %p10749_p2 }
 0x2a0   : > { %10757 = shalt.err (!%p10754_p4)
}
 0x2a1   : > { %s10758_s2 = scalar_lea.vmem %s1994_s1, 16  ;;  %s10765_s9 = scalar_lea.vmem %s1994_s1, 32 }
 0x2a2   : > { %p10759_p5 = scmp.ne.s32.totalorder %s1994_s1, %s10758_s2  ;;  %p10766_p10 = scmp.lt.s32.totalorder %s1994_s1, %s1994_s1 }
 0x2a3   : > { %p10767_p7 = scmp.lt.s32.totalorder %s10765_s9, %s10758_s2 }
 0x2a4   : > { %p10761_p6 = pnand %p10759_p5, %p11749_p0 }
 0x2a5   : > { %p10768_p8 = por %p10767_p7, %p10766_p10 }
 0x2a6   : > { %p10762_p9 = pneg %p10761_p6 }
 0x2a8   : > { %p10769_p11 = pnand %p10768_p8, %p10762_p9 }
 0x2aa   : > { %10772 = shalt.err (!%p10769_p11)
}
 0x2ab   : > { %s13311_s4 = sld [smem:[#allocation114_spill]] }
 0x2ac   : > { %9743 = dma.hbm_to_vmem [thread:$0]  (!%p11737_p12), %s13310_s3, 16, %s1994_s1, [#allocation18]  }
 0x2b1   : > { %s10773_s0 = scalar_lea.hbm %s13311_s4, 16 }
 0x2b2   : > { %p10774_p13 = scmp.ne.s32.totalorder %s13311_s4, %s10773_s0  ;;  %p10780_p3 = scmp.lt.u32.totalorder %s10773_s0, %s13311_s4 }
 0x2b4   : > { %p10776_p1 = pnand %p10774_p13, %p11749_p0 }
 0x2b6   : > { %p10777_p2 = pneg %p10776_p1 }
 0x2b8   : > { %p10782_p4 = pnand %p10780_p3, %p10777_p2 }
 0x2ba   : > { %10785 = shalt.err (!%p10782_p4)
}
 0x2bb   : > { %s10786_s8 = scalar_lea.vmem %s11974_s12, 16  ;;  %s10793_s10 = scalar_lea.vmem %s11974_s12, 32 }
 0x2bc   : > { %p10787_p5 = scmp.ne.s32.totalorder %s11974_s12, %s10786_s8  ;;  %p10794_p10 = scmp.lt.s32.totalorder %s11974_s12, %s11974_s12 }
 0x2bd   : > { %p10795_p7 = scmp.lt.s32.totalorder %s10793_s10, %s10786_s8 }
 0x2be   : > { %p10789_p6 = pnand %p10787_p5, %p11749_p0 }
 0x2bf   : > { %p10796_p8 = por %p10795_p7, %p10794_p10 }
 0x2c0   : > { %p10790_p9 = pneg %p10789_p6 }
 0x2c2   : > { %p10797_p11 = pnand %p10796_p8, %p10790_p9 }
 0x2c4   : > { %10800 = shalt.err (!%p10797_p11)
}
 0x2c5   : > { %s13312_s1 = sld [smem:[#allocation116_spill]]  ;;  %s11277_s2 = smov [#allocation25]  }
 0x2c6   : > { %9749 = dma.hbm_to_vmem [thread:$0]  (!%p11737_p12), %s13311_s4, 16, %s11974_s12, [#allocation21]  }
 0x2c7   : > { %s2043_s9 = sshll.u32 %s11277_s2, 4  ;;  %s11278_s0 = smov [#allocation28]   ;;  %s2044_s9 = int_to_ptr.vmem [resolvable:$true] %s2043_s9 }
 0x2c8   : > { %s2071_s3 = sshll.u32 %s11278_s0, 4  ;;  %s12002_s3 = int_to_ptr.vmem [resolvable:$true] %s2071_s3 }
 0x2cb   : > { %s10801_s8 = scalar_lea.hbm %s13312_s1, 16 }
 0x2cc   : > { %p10802_p13 = scmp.ne.s32.totalorder %s13312_s1, %s10801_s8  ;;  %p10808_p3 = scmp.lt.u32.totalorder %s10801_s8, %s13312_s1 }
 0x2ce   : > { %p10804_p1 = pnand %p10802_p13, %p11749_p0 }
 0x2d0   : > { %p10805_p2 = pneg %p10804_p1 }
 0x2d2   : > { %p10810_p4 = pnand %p10808_p3, %p10805_p2 }
 0x2d4   : > { %10813 = shalt.err (!%p10810_p4)
}
 0x2d5   : > { %s10814_s10 = scalar_lea.vmem %s2044_s9, 16  ;;  %s10821_s12 = scalar_lea.vmem %s2044_s9, 32 }
 0x2d6   : > { %p10815_p5 = scmp.ne.s32.totalorder %s2044_s9, %s10814_s10  ;;  %p10822_p10 = scmp.lt.s32.totalorder %s2044_s9, %s2044_s9 }
 0x2d7   : > { %p10823_p7 = scmp.lt.s32.totalorder %s10821_s12, %s10814_s10 }
 0x2d8   : > { %p10817_p6 = pnand %p10815_p5, %p11749_p0 }
 0x2d9   : > { %p10824_p8 = por %p10823_p7, %p10822_p10 }
 0x2da   : > { %p10818_p9 = pneg %p10817_p6 }
 0x2dc   : > { %p10825_p11 = pnand %p10824_p8, %p10818_p9 }
 0x2de   : > { %10828 = shalt.err (!%p10825_p11)
}
 0x2df   : > { %s13313_s2 = sld [smem:[#allocation120_spill]] }
 0x2e0   : > { %9755 = dma.hbm_to_vmem [thread:$0]  (!%p11737_p12), %s13312_s1, 16, %s2044_s9, [#allocation24]  }
 0x2e5   : > { %s10829_s0 = scalar_lea.hbm %s13313_s2, 16 }
 0x2e6   : > { %p10830_p13 = scmp.ne.s32.totalorder %s13313_s2, %s10829_s0  ;;  %p10836_p3 = scmp.lt.u32.totalorder %s10829_s0, %s13313_s2 }
 0x2e8   : > { %p10832_p1 = pnand %p10830_p13, %p11749_p0 }
 0x2ea   : > { %p10833_p2 = pneg %p10832_p1 }
 0x2ec   : > { %p10838_p4 = pnand %p10836_p3, %p10833_p2 }
 0x2ee   : > { %10841 = shalt.err (!%p10838_p4)
}
 0x2ef   : > { %s10842_s8 = scalar_lea.vmem %s12002_s3, 16  ;;  %s10849_s10 = scalar_lea.vmem %s12002_s3, 32 }
 0x2f0   : > { %p10843_p5 = scmp.ne.s32.totalorder %s12002_s3, %s10842_s8  ;;  %p10850_p10 = scmp.lt.s32.totalorder %s12002_s3, %s12002_s3 }
 0x2f1   : > { %p10851_p7 = scmp.lt.s32.totalorder %s10849_s10, %s10842_s8 }
 0x2f2   : > { %p10845_p6 = pnand %p10843_p5, %p11749_p0 }
 0x2f3   : > { %p10852_p8 = por %p10851_p7, %p10850_p10 }
 0x2f4   : > { %p10846_p9 = pneg %p10845_p6 }
 0x2f6   : > { %p10853_p11 = pnand %p10852_p8, %p10846_p9 }
 0x2f8   : > { %10856 = shalt.err (!%p10853_p11)
}
 0x2f9   : > { %s13314_s9 = sld [smem:[#allocation121_spill]]  ;;  %s11279_s12 = smov [#allocation31]  }
 0x2fa   : > { %9761 = dma.hbm_to_vmem [thread:$0]  (!%p11737_p12), %s13313_s2, 16, %s12002_s3, [#allocation27]  }
 0x2fb   : > { %s2093_s0 = sshll.u32 %s11279_s12, 4  ;;  %s11280_s1 = smov [#allocation34]   ;;  %s2094_s0 = int_to_ptr.vmem [resolvable:$true] %s2093_s0 }
 0x2fc   : > { %s2121_s4 = sshll.u32 %s11280_s1, 4  ;;  %s12030_s4 = int_to_ptr.vmem [resolvable:$true] %s2121_s4 }
 0x2ff   : > { %s10857_s8 = scalar_lea.hbm %s13314_s9, 16 }
 0x300   : > { %p10858_p13 = scmp.ne.s32.totalorder %s13314_s9, %s10857_s8  ;;  %p10864_p3 = scmp.lt.u32.totalorder %s10857_s8, %s13314_s9 }
 0x302   : > { %p10860_p1 = pnand %p10858_p13, %p11749_p0 }
 0x304   : > { %p10861_p2 = pneg %p10860_p1 }
 0x306   : > { %p10866_p4 = pnand %p10864_p3, %p10861_p2 }
 0x308   : > { %10869 = shalt.err (!%p10866_p4)
}
 0x309   : > { %s10870_s10 = scalar_lea.vmem %s2094_s0, 16  ;;  %s10877_s3 = scalar_lea.vmem %s2094_s0, 32 }
 0x30a   : > { %p10871_p5 = scmp.ne.s32.totalorder %s2094_s0, %s10870_s10  ;;  %p10878_p10 = scmp.lt.s32.totalorder %s2094_s0, %s2094_s0 }
 0x30b   : > { %p10879_p7 = scmp.lt.s32.totalorder %s10877_s3, %s10870_s10 }
 0x30c   : > { %p10873_p6 = pnand %p10871_p5, %p11749_p0 }
 0x30d   : > { %p10880_p8 = por %p10879_p7, %p10878_p10 }
 0x30e   : > { %p10874_p9 = pneg %p10873_p6 }
 0x310   : > { %p10881_p11 = pnand %p10880_p8, %p10874_p9 }
 0x312   : > { %10884 = shalt.err (!%p10881_p11)
}
 0x313   : > { %s13315_s1 = sld [smem:[#allocation125_spill]] }
 0x314   : > { %9767 = dma.hbm_to_vmem [thread:$0]  (!%p11737_p12), %s13314_s9, 16, %s2094_s0, [#allocation30]  }
 0x319   : > { %s10885_s12 = scalar_lea.hbm %s13315_s1, 16 }
 0x31a   : > { %p10886_p13 = scmp.ne.s32.totalorder %s13315_s1, %s10885_s12  ;;  %p10892_p3 = scmp.lt.u32.totalorder %s10885_s12, %s13315_s1 }
 0x31c   : > { %p10888_p1 = pnand %p10886_p13, %p11749_p0 }
 0x31e   : > { %p10889_p2 = pneg %p10888_p1 }
 0x320   : > { %p10894_p4 = pnand %p10892_p3, %p10889_p2 }
 0x322   : > { %10897 = shalt.err (!%p10894_p4)
}
 0x323   : > { %s10898_s8 = scalar_lea.vmem %s12030_s4, 16  ;;  %s10905_s10 = scalar_lea.vmem %s12030_s4, 32 }
 0x324   : > { %p10899_p5 = scmp.ne.s32.totalorder %s12030_s4, %s10898_s8  ;;  %p10906_p10 = scmp.lt.s32.totalorder %s12030_s4, %s12030_s4 }
 0x325   : > { %p10907_p7 = scmp.lt.s32.totalorder %s10905_s10, %s10898_s8 }
 0x326   : > { %p10901_p6 = pnand %p10899_p5, %p11749_p0 }
 0x327   : > { %p10908_p8 = por %p10907_p7, %p10906_p10 }
 0x328   : > { %p10902_p9 = pneg %p10901_p6 }
 0x32a   : > { %p10909_p11 = pnand %p10908_p8, %p10902_p9 }
 0x32c   : > { %10912 = shalt.err (!%p10909_p11)
}
 0x32d   : > { %s13316_s0 = sld [smem:[#allocation127_spill]]  ;;  %s11281_s12 = smov [#allocation37]  }
 0x32e   : > { %9773 = dma.hbm_to_vmem [thread:$0]  (!%p11737_p12), %s13315_s1, 16, %s12030_s4, [#allocation33]  }
 0x32f   : > { %s2146_s2 = sshll.u32 %s11281_s12, 4  ;;  %s11282_s6 = smov [#allocation40]   ;;  %s2147_s2 = int_to_ptr.vmem [resolvable:$true] %s2146_s2 }
 0x330   : > { %s2171_s9 = sshll.u32 %s11282_s6, 4  ;;  %s12058_s9 = int_to_ptr.vmem [resolvable:$true] %s2171_s9 }
 0x333   : > { %s13317_s3 = smov %s13316_s0  ;;  %s10913_s8 = scalar_lea.hbm %s13316_s0, 16 }
 0x334   : > { %p10914_p13 = scmp.ne.s32.totalorder %s13317_s3, %s10913_s8  ;;  %p10920_p3 = scmp.lt.u32.totalorder %s10913_s8, %s13317_s3 }
 0x336   : > { %p10916_p1 = pnand %p10914_p13, %p11749_p0 }
 0x338   : > { %p10917_p2 = pneg %p10916_p1 }
 0x33a   : > { %p10922_p4 = pnand %p10920_p3, %p10917_p2 }
 0x33c   : > { %10925 = shalt.err (!%p10922_p4)
}
 0x33d   : > { %s10926_s10 = scalar_lea.vmem %s2147_s2, 16  ;;  %s10933_s4 = scalar_lea.vmem %s2147_s2, 32 }
 0x33e   : > { %p10927_p5 = scmp.ne.s32.totalorder %s2147_s2, %s10926_s10  ;;  %p10934_p10 = scmp.lt.s32.totalorder %s2147_s2, %s2147_s2 }
 0x33f   : > { %p10935_p7 = scmp.lt.s32.totalorder %s10933_s4, %s10926_s10 }
 0x340   : > { %p10929_p6 = pnand %p10927_p5, %p11749_p0 }
 0x341   : > { %p10936_p8 = por %p10935_p7, %p10934_p10 }
 0x342   : > { %p10930_p9 = pneg %p10929_p6 }
 0x344   : > { %p10937_p11 = pnand %p10936_p8, %p10930_p9 }
 0x346   : > { %10940 = shalt.err (!%p10937_p11)
}
 0x347   : > { %s13318_s6 = sld [smem:[#allocation130_spill]] }
 0x348   : > { %9779 = dma.hbm_to_vmem [thread:$0]  (!%p11737_p12), %s13317_s3, 16, %s2147_s2, [#allocation36]  }
 0x34d   : > { %s10941_s0 = scalar_lea.hbm %s13318_s6, 16 }
 0x34e   : > { %p10942_p13 = scmp.ne.s32.totalorder %s13318_s6, %s10941_s0  ;;  %p10948_p3 = scmp.lt.u32.totalorder %s10941_s0, %s13318_s6 }
 0x350   : > { %p10944_p1 = pnand %p10942_p13, %p11749_p0 }
 0x352   : > { %p10945_p2 = pneg %p10944_p1 }
 0x354   : > { %p10950_p4 = pnand %p10948_p3, %p10945_p2 }
 0x356   : > { %10953 = shalt.err (!%p10950_p4)
}
 0x357   : > { %s10954_s12 = scalar_lea.vmem %s12058_s9, 16  ;;  %s10961_s8 = scalar_lea.vmem %s12058_s9, 32 }
 0x358   : > { %p10955_p5 = scmp.ne.s32.totalorder %s12058_s9, %s10954_s12  ;;  %p10962_p10 = scmp.lt.s32.totalorder %s12058_s9, %s12058_s9 }
 0x359   : > { %p10963_p7 = scmp.lt.s32.totalorder %s10961_s8, %s10954_s12 }
 0x35a   : > { %p10957_p6 = pnand %p10955_p5, %p11749_p0 }
 0x35b   : > { %p10964_p8 = por %p10963_p7, %p10962_p10 }
 0x35c   : > { %p10958_p9 = pneg %p10957_p6 }
 0x35e   : > { %p10965_p11 = pnand %p10964_p8, %p10958_p9 }
 0x360   : > { %10968 = shalt.err (!%p10965_p11)
}
 0x361   : > { %s13319_s2 = sld [smem:[#allocation133_spill]]  ;;  %s11283_s10 = smov [#allocation43]  }
 0x362   : > { %9785 = dma.hbm_to_vmem [thread:$0]  (!%p11737_p12), %s13318_s6, 16, %s12058_s9, [#allocation39]  }
 0x363   : > { %s2196_s4 = sshll.u32 %s11283_s10, 4  ;;  %s11284_s0 = smov [#allocation46]   ;;  %s2197_s4 = int_to_ptr.vmem [resolvable:$true] %s2196_s4 }
 0x364   : > { %s2218_s1 = sshll.u32 %s11284_s0, 4  ;;  %s12086_s1 = int_to_ptr.vmem [resolvable:$true] %s2218_s1 }
 0x367   : > { %s10969_s12 = scalar_lea.hbm %s13319_s2, 16 }
 0x368   : > { %p10970_p13 = scmp.ne.s32.totalorder %s13319_s2, %s10969_s12  ;;  %p10976_p3 = scmp.lt.u32.totalorder %s10969_s12, %s13319_s2 }
 0x36a   : > { %p10972_p1 = pnand %p10970_p13, %p11749_p0 }
 0x36c   : > { %p10973_p2 = pneg %p10972_p1 }
 0x36e   : > { %p10978_p4 = pnand %p10976_p3, %p10973_p2 }
 0x370   : > { %10981 = shalt.err (!%p10978_p4)
}
 0x371   : > { %s10982_s8 = scalar_lea.vmem %s2197_s4, 16  ;;  %s10989_s9 = scalar_lea.vmem %s2197_s4, 32 }
 0x372   : > { %p10983_p5 = scmp.ne.s32.totalorder %s2197_s4, %s10982_s8  ;;  %p10990_p10 = scmp.lt.s32.totalorder %s2197_s4, %s2197_s4 }
 0x373   : > { %p10991_p7 = scmp.lt.s32.totalorder %s10989_s9, %s10982_s8 }
 0x374   : > { %p10985_p6 = pnand %p10983_p5, %p11749_p0 }
 0x375   : > { %p10992_p8 = por %p10991_p7, %p10990_p10 }
 0x376   : > { %p10986_p9 = pneg %p10985_p6 }
 0x378   : > { %p10993_p11 = pnand %p10992_p8, %p10986_p9 }
 0x37a   : > { %10996 = shalt.err (!%p10993_p11)
}
 0x37b   : > { %s13320_s10 = sld [smem:[#allocation135_spill]] }
 0x37c   : > { %9791 = dma.hbm_to_vmem [thread:$0]  (!%p11737_p12), %s13319_s2, 16, %s2197_s4, [#allocation42]  }
 0x381   : > { %s10997_s0 = scalar_lea.hbm %s13320_s10, 16 }
 0x382   : > { %p10998_p13 = scmp.ne.s32.totalorder %s13320_s10, %s10997_s0  ;;  %p11004_p3 = scmp.lt.u32.totalorder %s10997_s0, %s13320_s10 }
 0x384   : > { %p11000_p1 = pnand %p10998_p13, %p11749_p0 }
 0x386   : > { %p11001_p2 = pneg %p11000_p1 }
 0x388   : > { %p11006_p4 = pnand %p11004_p3, %p11001_p2 }
 0x38a   : > { %11009 = shalt.err (!%p11006_p4)
}
 0x38b   : > { %s11010_s12 = scalar_lea.vmem %s12086_s1, 16  ;;  %s11017_s8 = scalar_lea.vmem %s12086_s1, 32 }
 0x38c   : > { %p11011_p5 = scmp.ne.s32.totalorder %s12086_s1, %s11010_s12  ;;  %p11018_p10 = scmp.lt.s32.totalorder %s12086_s1, %s12086_s1 }
 0x38d   : > { %p11019_p7 = scmp.lt.s32.totalorder %s11017_s8, %s11010_s12 }
 0x38e   : > { %p11013_p6 = pnand %p11011_p5, %p11749_p0 }
 0x38f   : > { %p11020_p8 = por %p11019_p7, %p11018_p10 }
 0x390   : > { %p11014_p9 = pneg %p11013_p6 }
 0x392   : > { %p11021_p11 = pnand %p11020_p8, %p11014_p9 }
 0x394   : > { %11024 = shalt.err (!%p11021_p11)
}
 0x395   : > { %9797 = dma.hbm_to_vmem [thread:$0]  (!%p11737_p12), %s13320_s10, 16, %s12086_s1, [#allocation45]  }
 0x396   : > { %s11285_s4 = smov [#allocation49]   ;;  %s11025_s0 = scalar_lea.hbm %s13284_s20, 16 }
 0x397   : > { %s2243_s9 = sshll.u32 %s11285_s4, 4  ;;  %p11026_p13 = scmp.ne.s32.totalorder %s13284_s20, %s11025_s0  ;;  %s2244_s9 = int_to_ptr.vmem [resolvable:$true] %s2243_s9 }
 0x398   : > { %p11032_p3 = scmp.lt.u32.totalorder %s11025_s0, %s13284_s20 }
 0x399   : > { %p11028_p1 = pnand %p11026_p13, %p11749_p0 }
 0x39b   : > { %p11029_p2 = pneg %p11028_p1 }
 0x39d   : > { %p11034_p4 = pnand %p11032_p3, %p11029_p2 }
 0x39f   : > { %11037 = shalt.err (!%p11034_p4)
}
 0x3a0   : > { %s11038_s12 = scalar_lea.vmem %s2244_s9, 16  ;;  %s11045_s8 = scalar_lea.vmem %s2244_s9, 32 }
 0x3a1   : > { %p11039_p5 = scmp.ne.s32.totalorder %s2244_s9, %s11038_s12  ;;  %p11046_p10 = scmp.lt.s32.totalorder %s2244_s9, %s2244_s9 }
 0x3a2   : > { %p11047_p7 = scmp.lt.s32.totalorder %s11045_s8, %s11038_s12 }
 0x3a3   : > { %p11041_p6 = pnand %p11039_p5, %p11749_p0 }
 0x3a4   : > { %p11048_p8 = por %p11047_p7, %p11046_p10 }
 0x3a5   : > { %p11042_p9 = pneg %p11041_p6 }
 0x3a7   : > { %p11049_p11 = pnand %p11048_p8, %p11042_p9 }
 0x3a9   : > { %11052 = shalt.err (!%p11049_p11)
}
 0x3aa   : > { %9803 = dma.hbm_to_vmem [thread:$0]  (!%p11737_p12), %s13284_s20, 16, %s2244_s9, [#allocation48]  }
 0x3ab   : > { %p13321_p13 = scmp.ne.s32.totalorder %s13301_s11, 0 }
 0x3ac   : > { %p13322_p1 = scmp.eq.s32.totalorder (!%p13321_p13), %s11701_s22, 0 }
 0x3ad   : > { %2282 = sbr.rel (%p13321_p13) target bundleno = 21259 (0x530b), region = 316 }
 0x3b4   : > { %11098 = dma.done.wait (%p13322_p1), [#allocation3], 16   ;;  %p13323_p2 = pmov %p13322_p1 }
 0x3b5   : > { %p13324_p0 = pmov %p13322_p1 }
 0x3b6   : > { %11100 = vsyncadd (%p13323_p2), [#allocation3], 4294967280 }
 0x3b7   : > { %11102 = dma.done.wait (%p13324_p0), [#allocation6], 32   ;;  %p13325_p3 = pmov %p13324_p0 }
 0x3b8   : > { %p13326_p4 = pmov %p13324_p0 }
 0x3b9   : > { %11104 = vsyncadd (%p13325_p3), [#allocation6], 4294967264 }
 0x3ba   : > { %11106 = dma.done.wait (%p13326_p4), [#allocation9], 32   ;;  %p13327_p12 = pmov %p13324_p0 }
 0x3bb   : > { %p13328_p5 = pmov %p13324_p0 }
 0x3bc   : > { %11108 = vsyncadd (%p13327_p12), [#allocation9], 4294967264 }
 0x3bd   : > { %11110 = dma.done.wait (%p13328_p5), [#allocation12], 32   ;;  %p13329_p6 = pmov %p13324_p0 }
 0x3be   : > { %p13330_p9 = pmov %p13324_p0 }
 0x3bf   : > { %11112 = vsyncadd (%p13329_p6), [#allocation12], 4294967264 }
 0x3c0   : > { %11114 = dma.done.wait (%p13330_p9), [#allocation15], 32   ;;  %p13331_p10 = pmov %p13324_p0 }
 0x3c1   : > { %p13332_p7 = pmov %p13324_p0 }
 0x3c2   : > { %11116 = vsyncadd (%p13331_p10), [#allocation15], 4294967264 }
 0x3c3   : > { %11118 = dma.done.wait (%p13332_p7), [#allocation18], 32   ;;  %p13333_p8 = pmov %p13324_p0 }
 0x3c4   : > { %p13334_p11 = pmov %p13324_p0 }
 0x3c5   : > { %11120 = vsyncadd (%p13333_p8), [#allocation18], 4294967264 }
 0x3c6   : > { %11122 = dma.done.wait (%p13334_p11), [#allocation21], 32   ;;  %p13335_p13 = pmov %p13324_p0 }
 0x3c7   : > { %p13336_p1 = pmov %p13324_p0 }
 0x3c8   : > { %11124 = vsyncadd (%p13335_p13), [#allocation21], 4294967264 }
 0x3c9   : > { %11126 = dma.done.wait (%p13336_p1), [#allocation24], 32   ;;  %p13337_p2 = pmov %p13324_p0 }
 0x3cb   : > { %11128 = vsyncadd (%p13337_p2), [#allocation24], 4294967264 }
 0x3cc   : > { %11130 = dma.done.wait (%p13324_p0), [#allocation27], 32   ;;  %p13338_p3 = pmov %p13324_p0 }
 0x3cd   : > { %p13339_p4 = pmov %p13324_p0 }
 0x3ce   : > { %11132 = vsyncadd (%p13338_p3), [#allocation27], 4294967264 }
 0x3cf   : > { %11134 = dma.done.wait (%p13339_p4), [#allocation30], 32   ;;  %p13340_p12 = pmov %p13324_p0 }
 0x3d0   : > { %p13341_p5 = pmov %p13324_p0 }
 0x3d1   : > { %11136 = vsyncadd (%p13340_p12), [#allocation30], 4294967264 }
 0x3d2   : > { %11138 = dma.done.wait (%p13341_p5), [#allocation33], 32   ;;  %p13342_p6 = pmov %p13324_p0 }
 0x3d3   : > { %p13343_p9 = pmov %p13324_p0 }
 0x3d4   : > { %11140 = vsyncadd (%p13342_p6), [#allocation33], 4294967264 }
 0x3d5   : > { %11142 = dma.done.wait (%p13343_p9), [#allocation36], 32   ;;  %p13344_p10 = pmov %p13324_p0 }
 0x3d6   : > { %p13345_p7 = pmov %p13324_p0 }
 0x3d7   : > { %11144 = vsyncadd (%p13344_p10), [#allocation36], 4294967264 }
 0x3d8   : > { %11146 = dma.done.wait (%p13345_p7), [#allocation39], 32   ;;  %p13346_p8 = pmov %p13324_p0 }
 0x3d9   : > { %p13347_p11 = pmov %p13324_p0 }
 0x3da   : > { %11148 = vsyncadd (%p13346_p8), [#allocation39], 4294967264 }
 0x3db   : > { %11150 = dma.done.wait (%p13347_p11), [#allocation42], 32   ;;  %p13348_p13 = pmov %p13324_p0 }
 0x3dc   : > { %p13349_p1 = pmov %p13324_p0 }
 0x3dd   : > { %11152 = vsyncadd (%p13348_p13), [#allocation42], 4294967264 }
 0x3de   : > { %11154 = dma.done.wait (%p13349_p1), [#allocation45], 32   ;;  %p13350_p2 = pmov %p13324_p0 }
 0x3e0   : > { %11156 = vsyncadd (%p13350_p2), [#allocation45], 4294967264 }
 0x3e1   : > { %11158 = dma.done.wait (%p13324_p0), [#allocation48], 32   ;;  %p13351_p3 = pmov %p13324_p0 }
 0x3e2   : > { %s13352_s16 = sld [smem:[#allocation68_spill]]  ;;  %s13353_s11 = sld [smem:[#allocation72_spill]]  ;;  %v11286_v0 = vmov 0.0   ;;  %vm11287_vm0 = vmmov 0   ;;  %vm2620_vm1 = vcmask 261120   ;;  %vm2674_vm2 = vcmask 64512  }
 0x3e3   : > { %11160 = vsyncadd (%p13351_p3), [#allocation48], 4294967264  ;;  %p2577_p4 = scmp.lt.s32.totalorder %s11701_s22, 1  ;;  %9000 = vmatprep.subr.bf16.mxu0 %v11286_v0  ;;  %9004 = vmatprep.mubr.msk.bf16.mxu0 %vm11287_vm0, %v11286_v0  ;;  %s13354_s1 = sld [smem:[#allocation73_spill]]  ;;  %vm2738_vm3 = vcmask 1043456   ;;  %vm3456_vm4 = vcmask 523264  }
 0x3e4   : > { %9008 = vmatprep.subr.bf16.mxu1 %v11286_v0  ;;  %9010 = vmatprep.mubr.msk.bf16.mxu1 %vm11287_vm0, %v11286_v0  ;;  %s13165_s0 = smov 120   ;;  %s13183_s12 = smov 96  }
 0x3e5   : > { %s12195_s23 = scalar_select %p2577_p4, %s11701_s22, 1 }
 0x3e6   : > { %s13185_s8 = smov 88   ;;  %s13363_s2 = sld [smem:[#allocation79_spill]] }
 0x3e7   : > { %s13164_s4 = sshll.u32 %s12195_s23, 3  ;;  %s13371_s3 = smov 120  }
 0x3e8   : > { %s2580_s9 = scalar_lea.vmem %s13352_s16, %s13164_s4  ;;  %v10021_v1 = vld [vmem:[%s13353_s11] sm:$0xff]   ;;  %v10022_v2 = vld [vmem:[%s13353_s11 + $0x8] sm:$0xff]   ;;  %s13355_s16 = sld [smem:[#allocation70_spill]] }
 0x3e9   : > { %9001 = vmatpush3.bf16.msra.mxu0 %v10021_v1  ;;  %v12206_v3 = vld [vmem:[%s2580_s9] sm:$0xff]  ;;  %s13167_s9 = smov 64   ;;  %s13171_s4 = smov 112  }
 0x3ea   : > { %9002 = vmatprep.subr.bf16.mxu0 %v11286_v0  ;;  %v2596_v4 = vpack.c.bf16 %v12206_v3, %v12206_v3  ;;  %v8595_v5 = vld [vmem:[%s13354_s1] ss:$0 sm:$0xff]  ;;  %s13374_s6 = smov 64   ;;  %s13377_s10 = smov 48  }
 0x3eb   : > { %s13378_s11 = smov 104   ;;  %s13380_s13 = smov 40  }
 0x3ec   : > { %s13381_s14 = sld [smem:[#allocation87_spill]]  ;;  %s13382_s17 = sld [smem:[#allocation90_spill]] }
 0x3ed   : > { %9003 = vmatpush3.bf16.msra.mxu0 %v10022_v2  ;;  %s13385_s20 = sld [smem:[#allocation89_spill]]  ;;  %s13386_s21 = sld [smem:[#allocation98_spill]] }
 0x3ee   : > { %9014 = vmatprep.subr.bf16.mxu0 %v11286_v0  ;;  %s12237_s1 = scalar_lea.vmem %s13355_s16, %s12195_s23  ;;  %s13173_s16 = smov 56  }
 0x3ef   : > { %v12240_v17 = vld [vmem:[%s12237_s1] ss:$0 sm:$0xff]  ;;  %s13387_s24 = sld [smem:[#allocation69_spill]]  ;;  %s13389_s26 = sld [smem:[#allocation91_spill]] }
 0x3f0   : > { %9005 = vmatmul.mubr.msk.bf16.vlgmr.msra.gmra.mrb[0].mxu0 %vm2620_vm1, %v2596_v4  ;;  %p13408_p5 = scmp.ne.s32.totalorder %s13298_s7, 0 }
 0x3f1   : > { %9016 = vmatprep.mubr.msk.bf16.mxu0 %vm11287_vm0, %v11286_v0 }
 0x4c3   : > { %v2658_v6 = vpop.f32.mrb[0].mxu0 }
 0x4c4   : > { %v2659_v7 = vadd.f32 %v8595_v5, %v2658_v6  ;;  %v9006_v8 = vpop.f32.mrb[1].mxu0 }
 0x4c5   : > { %v2661_v9 = vpop.f32.mrb[2].mxu0 }
 0x4c6   : > { %v12216_v10 = vpack.c.bf16 %v2659_v7, %v2659_v7  ;;  %v9007_v11 = vpop.f32.mrb[3].mxu0 }
 0x4c8   : > { %2784 = vrot.lane.b32.xlu1 %v12216_v10, %s13165_s0  ;;  %2672 = vrot.lane.b32.xlu0 %v12216_v10, %s13183_s12  ;;  %s13169_s0 = smov 80  }
 0x4cc   : > { %2786 = vrot.lane.b32.xlu0 %v12216_v10, %s13185_s8  ;;  %s13362_s8 = sld [smem:[#allocation77_spill]] }
 0x53a   : > { %v2673_v12 = vpop.permute.xlu0 %2672  ;;  %v2785_v16 = vpop.permute.xlu1 %2784 }
 0x53b   : > { %v2679_v13 = vsel %vm2674_vm2, %v2673_v12, 0 }
 0x53c   : > { %9009 = vmatpush3.bf16.xpose.msra.mxu1 %v2679_v13 }
 0x53d   : > { %9020 = vmatprep.subr.bf16.mxu1 %v11286_v0 }
 0x53e   : > { %v2787_v14 = vpop.permute.xlu0 %2786 }
 0x53f   : > { %v2792_v15 = vsel %vm2674_vm2, %v2787_v14, 0 }
 0x543   : > { %9011 = vmatmul.mubr.msk.bf16.vlgmr.msra.gmra.mrb[0].mxu1 %vm2674_vm2, %v12216_v10 }
 0x544   : > { %9021 = vmatpush3.bf16.xpose.msra.mxu1 %v2792_v15  ;;  %9022 = vmatprep.mubr.msk.bf16.mxu1 %vm11287_vm0, %v11286_v0 }
 0x545   : > { %9032 = vmatprep.subr.bf16.mxu1 %v11286_v0 }
 0x54b   : > { %9023 = vmatmul.mubr.msk.bf16.vlgmr.msra.gmra.mrb[4].mxu1 %vm2674_vm2, %v2785_v16 }
 0x54c   : > { %9034 = vmatprep.mubr.msk.bf16.mxu1 %vm11287_vm0, %v11286_v0 }
 0x616   : > { %v2715_v18 = vpop.f32.mrb[0].mxu1 }
 0x617   : > { %v2716_v19 = vadd.f32 %v12240_v17, %v2715_v18  ;;  %v9012_v20 = vpop.f32.mrb[1].mxu1 }
 0x618   : > { %v2718_v21 = vpop.f32.mrb[2].mxu1 }
 0x619   : > { %v9013_v22 = vpop.f32.mrb[3].mxu1  ;;  %v2721_v23 = vsel %vm2674_vm2, %v2716_v19, -inf }
 0x61a   : > { %2722 = vmax.xlane.f32.xlu1 %v2721_v23 }
 0x61e   : > { %v2828_v24 = vpop.f32.mrb[4].mxu1 }
 0x61f   : > { %v2829_v25 = vadd.f32 %v12240_v17, %v2828_v24  ;;  %v9024_v26 = vpop.f32.mrb[5].mxu1 }
 0x620   : > { %v2831_v27 = vpop.f32.mrb[6].mxu1 }
 0x621   : > { %v9025_v28 = vpop.f32.mrb[7].mxu1  ;;  %v2834_v29 = vsel %vm2674_vm2, %v2829_v25, -inf }
 0x622   : > { %2835 = vmax.xlane.f32.xlu0 %v2834_v29 }
 0x6a7   : > { %v2723_v30 = vpop.xlane.xlu1 %2722 }
 0x6a8   : > { %v2724_v31 = vsub.f32 %v2716_v19, %v2723_v30 }
 0x6aa   : > { %v2725_v32 = vmul.f32 1.442695, %v2724_v31 }
 0x6ac   : > { %10063 = vpow2.f32 %v2725_v32 }
 0x6af   : > { %v2836_v33 = vpop.xlane.xlu0 %2835 }
 0x6b0   : > { %v2837_v34 = vsub.f32 %v2829_v25, %v2836_v33 }
 0x6b2   : > { %v2838_v35 = vmul.f32 1.442695, %v2837_v34 }
 0x6b4   : > { %10065 = vpow2.f32 %v2838_v35 }
 0x6b6   : > { %v10064_v36 = vpop.eup %10063 }
 0x6b7   : > { %v2727_v37 = vsel %vm2674_vm2, %v10064_v36, 0.0 }
 0x6b8   : > { %2728 = vadd.xlane.f32.xlu0 %v2727_v37 }
 0x6be   : > { %v10066_v38 = vpop.eup %10065 }
 0x6bf   : > { %v2840_v39 = vsel %vm2674_vm2, %v10066_v38, 0.0 }
 0x6c0   : > { %2841 = vadd.xlane.f32.xlu1 %v2840_v39 }
 0x6ce   : > { %2733 = vrot.lane.b32.xlu0 %v12216_v10, %s13167_s9  ;;  %s13356_s9 = sld [smem:[#allocation74_spill]] }
 0x6d1   : > { %2846 = vrot.lane.b32.xlu1 %v12216_v10, %s13173_s16  ;;  %s13181_s16 = smov 48  }
 0x6d2   : > { %2989 = vrot.lane.b32.xlu0 %v12216_v10, %s13171_s4  ;;  %s13179_s4 = smov 104  }
 0x6d4   : > { %v2783_v52 = vld [vmem:[%s13356_s9] sm:$0xf]  ;;  %v8604_v54 = vld [vmem:[%s13356_s9 + $0x4] sm:$0xf] }
 0x6d5   : > { %2991 = vrot.lane.b32.xlu1 %v12216_v10, %s13169_s0  ;;  %v2947_v53 = vsel %vm2738_vm3, %v2783_v52, 0  ;;  %v2901_v55 = vsel %vm2738_vm3, %v8604_v54, 0  ;;  %s13175_s0 = smov 72  }
 0x6d6   : > { %9033 = vmatpush3.bf16.msra.mxu1 %v2901_v55 }
 0x6d7   : > { %9044 = vmatprep.subr.bf16.mxu1 %v11286_v0 }
 0x745   : > { %v2729_v40 = vpop.xlane.xlu0 %2728 }
 0x746   : > { %10067 = vrcp.f32 %v2729_v40 }
 0x749   : > { %v2734_v41 = vpop.permute.xlu0 %2733 }
 0x74a   : > { %v2740_v42 = vsel %vm2738_vm3, %v2734_v41, 0 }
 0x74b   : > { %9015 = vmatpush3.bf16.msra.mxu0 %v2740_v42 }
 0x74c   : > { %9026 = vmatprep.subr.bf16.mxu0 %v11286_v0 }
 0x74d   : > { %v2842_v43 = vpop.xlane.xlu1 %2841  ;;  %v2990_v6 = vpop.permute.xlu0 %2989 }
 0x74e   : > { %10069 = vrcp.f32 %v2842_v43 }
 0x750   : > { %v10068_v44 = vpop.eup %10067 }
 0x751   : > { %v2731_v45 = vmul.f32 %v10068_v44, %v10064_v36  ;;  %v2847_v46 = vpop.permute.xlu1 %2846 }
 0x752   : > { %v2852_v48 = vsel %vm2738_vm3, %v2847_v46, 0 }
 0x753   : > { %v2732_v47 = vpack.c.bf16 %v2731_v45, %v2731_v45 }
 0x755   : > { %9017 = vmatmul.mubr.msk.bf16.vlgmr.msra.gmra.mrb[4].mxu0 %vm2674_vm2, %v2732_v47  ;;  %v2992_v61 = vpop.permute.xlu1 %2991 }
 0x756   : > { %9027 = vmatpush3.bf16.msra.mxu0 %v2852_v48  ;;  %9028 = vmatprep.mubr.msk.bf16.mxu0 %vm11287_vm0, %v11286_v0  ;;  %v2997_v4 = vsel %vm2674_vm2, %v2992_v61, 0 }
 0x757   : > { %9038 = vmatprep.subr.bf16.mxu0 %v11286_v0 }
 0x758   : > { %v10070_v49 = vpop.eup %10069 }
 0x759   : > { %v2844_v50 = vmul.f32 %v10070_v49, %v10066_v38  ;;  %v8609_v38 = vld [vmem:[%s13356_s9 + $0x8] sm:$0xf] }
 0x75a   : > { %v3106_v39 = vsel %vm2738_vm3, %v8609_v38, 0 }
 0x75b   : > { %v2845_v51 = vpack.c.bf16 %v2844_v50, %v2844_v50 }
 0x75d   : > { %9029 = vmatmul.mubr.msk.bf16.vlgmr.msra.gmra.mrb[8].mxu0 %vm2674_vm2, %v2845_v51 }
 0x75e   : > { %9040 = vmatprep.mubr.msk.bf16.mxu0 %vm11287_vm0, %v11286_v0  ;;  %9039 = vmatpush3.bf16.msra.mxu0 %v2947_v53 }
 0x75f   : > { %9050 = vmatprep.subr.bf16.mxu0 %v11286_v0 }
 0x828   : > { %v2776_v56 = vpop.f32.mrb[4].mxu0 }
 0x829   : > { %v2782_v57 = vpack.c.bf16 %v2776_v56, %v2776_v56  ;;  %v9018_v58 = vpop.f32.mrb[5].mxu0 }
 0x82a   : > { %v2779_v59 = vpop.f32.mrb[6].mxu0 }
 0x82b   : > { %v9019_v60 = vpop.f32.mrb[7].mxu0  ;;  %9041 = vmatmul.mubr.msk.bf16.vlgmr.msra.gmra.mrb[12].mxu0 %vm2674_vm2, %v2782_v57 }
 0x82c   : > { %9052 = vmatprep.mubr.msk.bf16.mxu0 %vm11287_vm0, %v11286_v0 }
 0x830   : > { %v2888_v62 = vpop.f32.mrb[8].mxu0 }
 0x831   : > { %v2894_v63 = vpack.c.bf16 %v2888_v62, %v2888_v62  ;;  %v9030_v1 = vpop.f32.mrb[9].mxu0 }
 0x832   : > { %v2891_v2 = vpop.f32.mrb[10].mxu0 }
 0x833   : > { %v9031_v5 = vpop.f32.mrb[11].mxu0  ;;  %9035 = vmatmul.mubr.msk.bf16.vlgmr.msra.gmra.mrb[8].mxu1 %vm2674_vm2, %v2894_v63 }
 0x834   : > { %9045 = vmatpush3.bf16.xpose.msra.mxu1 %v2997_v4  ;;  %9046 = vmatprep.mubr.msk.bf16.mxu1 %vm11287_vm0, %v11286_v0  ;;  %v8613_v4 = vld [vmem:[%s13356_s9 + $0xc] sm:$0xf]  ;;  %s13376_s9 = sld [smem:[#allocation86_spill]] }
 0x835   : > { %9056 = vmatprep.subr.bf16.mxu1 %v11286_v0  ;;  %v3266_v5 = vsel %vm2738_vm3, %v8613_v4, 0 }
 0x83b   : > { %9047 = vmatmul.mubr.msk.bf16.vlgmr.msra.gmra.mrb[12].mxu1 %vm2674_vm2, %v2990_v6 }
 0x83c   : > { %9058 = vmatprep.mubr.msk.bf16.mxu1 %vm11287_vm0, %v11286_v0  ;;  %9057 = vmatpush3.bf16.msra.mxu1 %v3106_v39 }
 0x83d   : > { %9068 = vmatprep.subr.bf16.mxu1 %v11286_v0 }
 0x8fe   : > { %v2983_v7 = vpop.f32.mrb[12].mxu0 }
 0x8ff   : > { %v9042_v8 = vpop.f32.mrb[13].mxu0 }
 0x900   : > { %v2986_v9 = vpop.f32.mrb[14].mxu0 }
 0x901   : > { %v9043_v11 = vpop.f32.mrb[15].mxu0 }
 0x906   : > { %v2937_v12 = vpop.f32.mrb[8].mxu1 }
 0x907   : > { %v12283_v13 = vadd.f32 %v2983_v7, %v2937_v12  ;;  %v9036_v14 = vpop.f32.mrb[9].mxu1 }
 0x908   : > { %v2940_v15 = vpop.f32.mrb[10].mxu1 }
 0x909   : > { %v9037_v16 = vpop.f32.mrb[11].mxu1 }
 0x90e   : > { %v3033_v18 = vpop.f32.mrb[12].mxu1 }
 0x90f   : > { %v3034_v19 = vadd.f32 %v12240_v17, %v3033_v18  ;;  %v9048_v20 = vpop.f32.mrb[13].mxu1 }
 0x910   : > { %v3036_v21 = vpop.f32.mrb[14].mxu1 }
 0x911   : > { %v9049_v22 = vpop.f32.mrb[15].mxu1  ;;  %v3039_v23 = vsel %vm2674_vm2, %v3034_v19, -inf }
 0x912   : > { %3040 = vmax.xlane.f32.xlu1 %v3039_v23 }
 0x923   : > { %3151 = vrot.lane.b32.xlu1 %v12216_v10, %s13175_s0  ;;  %s13177_s0 = smov 40  }
 0x927   : > { %3149 = vrot.lane.b32.xlu1 %v12216_v10, %s13179_s4  ;;  %s13358_s4 = sld [smem:[#allocation78_spill]] }
 0x99f   : > { %v3041_v24 = vpop.xlane.xlu1 %3040 }
 0x9a0   : > { %v3042_v25 = vsub.f32 %v3034_v19, %v3041_v24 }
 0x9a2   : > { %v3043_v26 = vmul.f32 1.442695, %v3042_v25 }
 0x9a3   : > { %v3152_v34 = vpop.permute.xlu1 %3151 }
 0x9a4   : > { %10071 = vpow2.f32 %v3043_v26  ;;  %v3157_v36 = vsel %vm2674_vm2, %v3152_v34, 0 }
 0x9a7   : > { %v3150_v37 = vpop.permute.xlu1 %3149 }
 0x9ae   : > { %v10072_v27 = vpop.eup %10071 }
 0x9af   : > { %v3045_v28 = vsel %vm2674_vm2, %v10072_v27, 0.0 }
 0x9b0   : > { %3046 = vadd.xlane.f32.xlu0 %v3045_v28  ;;  %v10024_v28 = vld [vmem:[%s13358_s4 + $0x8] sm:$0xff]  }
 0x9c6   : > { %3051 = vrot.lane.b32.xlu0 %v12216_v10, %s13181_s16  ;;  %s13359_s16 = sld [smem:[#allocation80_spill]] }
 0x9cc   : > { %s13360_s12 = smov %s13359_s16 }
 0xa3d   : > { %v3047_v29 = vpop.xlane.xlu0 %3046 }
 0xa3e   : > { %10073 = vrcp.f32 %v3047_v29  ;;  %v10026_v29 = vld [vmem:[%s13360_s12 + $0x8] sm:$0xff]  }
 0xa41   : > { %v3052_v30 = vpop.permute.xlu0 %3051 }
 0xa42   : > { %v3057_v31 = vsel %vm2738_vm3, %v3052_v30, 0 }
 0xa43   : > { %9051 = vmatpush3.bf16.msra.mxu0 %v3057_v31 }
 0xa44   : > { %9062 = vmatprep.subr.bf16.mxu0 %v11286_v0 }
 0xa48   : > { %v10074_v32 = vpop.eup %10073 }
 0xa49   : > { %v3049_v33 = vmul.f32 %v10074_v32, %v10072_v27  ;;  %v10023_v27 = vld [vmem:[%s13358_s4] sm:$0xff]   ;;  %s13373_s4 = smov 112  }
 0xa4b   : > { %v3050_v35 = vpack.c.bf16 %v3049_v33, %v3049_v33 }
 0xa4d   : > { %9053 = vmatmul.mubr.msk.bf16.vlgmr.msra.gmra.mrb[16].mxu0 %vm2674_vm2, %v3050_v35 }
 0xa4e   : > { %9063 = vmatpush3.bf16.xpose.msra.mxu0 %v3157_v36  ;;  %9064 = vmatprep.mubr.msk.bf16.mxu0 %vm11287_vm0, %v11286_v0  ;;  %v8617_v36 = vld [vmem:[%s13362_s8] ss:$0 sm:$0xff]  ;;  %s13365_s8 = sld [smem:[#allocation84_spill]] }
 0xa4f   : > { %9074 = vmatprep.subr.bf16.mxu0 %v11286_v0 }
 0xa55   : > { %9065 = vmatmul.mubr.msk.bf16.vlgmr.msra.gmra.mrb[20].mxu0 %vm2674_vm2, %v3150_v37 }
 0xa56   : > { %9076 = vmatprep.mubr.msk.bf16.mxu0 %vm11287_vm0, %v11286_v0  ;;  %9075 = vmatpush3.bf16.msra.mxu0 %v3266_v5 }
 0xa57   : > { %9088 = vmatprep.subr.bf16.mxu0 %v11286_v0 }
 0xb20   : > { %v3093_v40 = vpop.f32.mrb[16].mxu0 }
 0xb21   : > { %v3099_v41 = vpack.c.bf16 %v3093_v40, %v3093_v40  ;;  %v9054_v42 = vpop.f32.mrb[17].mxu0  ;;  %v10027_v40 = vld [vmem:[%s13360_s12 + $0x10] sm:$0xff]  }
 0xb22   : > { %v3096_v43 = vpop.f32.mrb[18].mxu0  ;;  %v8618_v42 = vld [vmem:[%s13363_s2] ss:$0 sm:$0xff]  ;;  %s13366_s2 = sld [smem:[#allocation82_spill]] }
 0xb23   : > { %v9055_v44 = vpop.f32.mrb[19].mxu0  ;;  %9059 = vmatmul.mubr.msk.bf16.vlgmr.msra.gmra.mrb[16].mxu1 %vm2674_vm2, %v3099_v41  ;;  %v10028_v41 = vld [vmem:[%s13360_s12 + $0x18] sm:$0xff]   ;;  %s13379_s12 = smov 72  }
 0xb24   : > { %9070 = vmatprep.mubr.msk.bf16.mxu1 %vm11287_vm0, %v11286_v0 }
 0xb28   : > { %v3193_v45 = vpop.f32.mrb[20].mxu0 }
 0xb29   : > { %v3194_v46 = vadd.f32 %v12240_v17, %v3193_v45  ;;  %v9066_v47 = vpop.f32.mrb[21].mxu0 }
 0xb2a   : > { %v3196_v48 = vpop.f32.mrb[22].mxu0 }
 0xb2b   : > { %v9067_v49 = vpop.f32.mrb[23].mxu0  ;;  %v3199_v50 = vsel %vm2674_vm2, %v3194_v46, -inf }
 0xb2c   : > { %3200 = vmax.xlane.f32.xlu0 %v3199_v50 }
 0xb42   : > { %3211 = vrot.lane.b32.xlu0 %v12216_v10, %s13177_s0  ;;  %s13357_s0 = sld [smem:[#allocation75_spill]] }
 0xbb9   : > { %v3201_v51 = vpop.xlane.xlu0 %3200 }
 0xbba   : > { %v3202_v52 = vsub.f32 %v3194_v46, %v3201_v51 }
 0xbbc   : > { %v3203_v53 = vmul.f32 1.442695, %v3202_v52 }
 0xbbd   : > { %v3212_v54 = vpop.permute.xlu0 %3211 }
 0xbbe   : > { %10075 = vpow2.f32 %v3203_v53  ;;  %v3217_v55 = vsel %vm2738_vm3, %v3212_v54, 0 }
 0xbbf   : > { %9069 = vmatpush3.bf16.msra.mxu1 %v3217_v55 }
 0xbc0   : > { %9080 = vmatprep.subr.bf16.mxu1 %v11286_v0 }
 0xbc8   : > { %v10076_v56 = vpop.eup %10075 }
 0xbc9   : > { %v3205_v57 = vsel %vm2674_vm2, %v10076_v56, 0.0 }
 0xbca   : > { %3206 = vadd.xlane.f32.xlu1 %v3205_v57 }
 0xbf6   : > { %v3142_v58 = vpop.f32.mrb[16].mxu1 }
 0xbf7   : > { %v3148_v59 = vadd.f32 %v3142_v58, %v12283_v13  ;;  %v9060_v60 = vpop.f32.mrb[17].mxu1  ;;  %v8615_v13 = vld [vmem:[%s13357_s0] ss:$0 sm:$0xff]  ;;  %s13361_s0 = sld [smem:[#allocation76_spill]] }
 0xbf8   : > { %v3145_v10 = vpop.f32.mrb[18].mxu1 }
 0xbf9   : > { %v9061_v61 = vpop.f32.mrb[19].mxu1 }
 0xbfd   : > { %v8616_v34 = vld [vmem:[%s13361_s0] ss:$0 sm:$0xff]  ;;  %s13367_s0 = sld [smem:[#allocation83_spill]] }
 0xc57   : > { %v3207_v62 = vpop.xlane.xlu1 %3206 }
 0xc58   : > { %10077 = vrcp.f32 %v3207_v62  ;;  %v10029_v62 = vld [vmem:[%s13365_s8] sm:$0xff]  }
 0xc62   : > { %v10078_v63 = vpop.eup %10077 }
 0xc63   : > { %v3209_v1 = vmul.f32 %v10078_v63, %v10076_v56  ;;  %v10030_v63 = vld [vmem:[%s13365_s8 + $0x8] sm:$0xff]   ;;  %s13375_s8 = smov 80  }
 0xc65   : > { %v3210_v2 = vpack.c.bf16 %v3209_v1, %v3209_v1 }
 0xc67   : > { %9071 = vmatmul.mubr.msk.bf16.vlgmr.msra.gmra.mrb[20].mxu1 %vm2674_vm2, %v3210_v2 }
 0xc68   : > { %9084 = vmatprep.mubr.msk.bf16.mxu1 %vm11287_vm0, %v11286_v0  ;;  %9081 = vmatpush3.bf16.msra.mxu1 %v10023_v27 }
 0xc69   : > { %9082 = vmatprep.subr.bf16.mxu1 %v11286_v0 }
 0xc6c   : > { %9083 = vmatpush3.bf16.msra.mxu1 %v10024_v28 }
 0xc6d   : > { %9100 = vmatprep.subr.bf16.mxu1 %v11286_v0 }
 0xd3a   : > { %v3253_v6 = vpop.f32.mrb[20].mxu1 }
 0xd3b   : > { %v3259_v7 = vpack.c.bf16 %v3253_v6, %v3253_v6  ;;  %v9072_v8 = vpop.f32.mrb[21].mxu1  ;;  %v8628_v6 = vld [vmem:[%s13366_s2] ss:$0 sm:$0xff]  ;;  %s13369_s2 = smov 88  }
 0xd3c   : > { %v3256_v9 = vpop.f32.mrb[22].mxu1  ;;  %v8629_v8 = vld [vmem:[%s13367_s0] ss:$0 sm:$0xff]  ;;  %s13370_s0 = smov 96  }
 0xd3d   : > { %v9073_v11 = vpop.f32.mrb[23].mxu1  ;;  %9077 = vmatmul.mubr.msk.bf16.vlgmr.msra.gmra.mrb[24].mxu0 %vm2674_vm2, %v3259_v7 }
 0xd3e   : > { %9096 = vmatprep.mubr.msk.bf16.mxu0 %vm11287_vm0, %v11286_v0 }
 0xe10   : > { %v3302_v12 = vpop.f32.mrb[24].mxu0 }
 0xe11   : > { %v3308_v14 = vadd.f32 %v3302_v12, %v3148_v59  ;;  %v9078_v15 = vpop.f32.mrb[25].mxu0 }
 0xe12   : > { %v3305_v16 = vpop.f32.mrb[26].mxu0 }
 0xe13   : > { %v3316_v18 = vadd.f32 %v8615_v13, %v3308_v14  ;;  %v9079_v19 = vpop.f32.mrb[27].mxu0 }
 0xe15   : > { %v3317_v20 = vadd.f32 %v3316_v18, %v12206_v3  ;;  %v10025_v3 = vld [vmem:[%s13359_s16] sm:$0xff]   ;;  %s13364_s16 = sld [smem:[#allocation81_spill]] }
 0xe16   : > { %9089 = vmatpush3.bf16.msra.mxu0 %v10025_v3 }
 0xe17   : > { %v3320_v21 = vsel %vm2620_vm1, %v3317_v20, 0.0  ;;  %9090 = vmatprep.subr.bf16.mxu0 %v11286_v0 }
 0xe18   : > { %3321 = vadd.xlane.f32.xlu1 %v3320_v21 }
 0xe1a   : > { %9091 = vmatpush3.bf16.msra.mxu0 %v10026_v29 }
 0xe1b   : > { %9092 = vmatprep.subr.bf16.mxu0 %v11286_v0  ;;  %v8622_v50 = vld [vmem:[%s13364_s16] ss:$0 sm:$0xff]  ;;  %s13368_s16 = sld [smem:[#allocation85_spill]] }
 0xe1e   : > { %9093 = vmatpush3.bf16.msra.mxu0 %v10027_v40 }
 0xe1f   : > { %9094 = vmatprep.subr.bf16.mxu0 %v11286_v0 }
 0xe21   : > { %v8630_v13 = vld [vmem:[%s13368_s16] ss:$0 sm:$0xff]  ;;  %s13372_s16 = smov 56  }
 0xe22   : > { %9095 = vmatpush3.bf16.msra.mxu0 %v10028_v41 }
 0xe23   : > { %9114 = vmatprep.subr.bf16.mxu0 %v11286_v0 }
 0xea5   : > { %v3322_v22 = vpop.xlane.xlu1 %3321 }
 0xea6   : > { %v3324_v23 = vmul.f32 0.03125, %v3322_v22 }
 0xea8   : > { %v3325_v24 = vsub.f32 %v3317_v20, %v3324_v23 }
 0xeaa   : > { %v3326_v25 = vmul.f32 %v3325_v24, %v3325_v24 }
 0xeac   : > { %v3327_v26 = vsel %vm2620_vm1, %v3326_v25, 0.0 }
 0xead   : > { %3328 = vadd.xlane.f32.xlu1 %v3327_v26 }
 0xf3a   : > { %v3329_v30 = vpop.xlane.xlu1 %3328 }
 0xf3b   : > { %v3330_v31 = vmul.f32 0.03125, %v3329_v30 }
 0xf3d   : > { %v3331_v32 = vadd.f32 1e-05, %v3330_v31 }
 0xf3f   : > { %10079 = vrsqrt.f32 %v3331_v32 }
 0xf49   : > { %v10080_v33 = vpop.eup %10079 }
 0xf4a   : > { %v3333_v35 = vmul.f32 %v10080_v33, %v3325_v24 }
 0xf4c   : > { %v3340_v37 = vmul.f32 %v8616_v34, %v3333_v35 }
 0xf4e   : > { %v3347_v38 = vadd.f32 %v8617_v36, %v3340_v37 }
 0xf50   : > { %v3348_v39 = vpack.c.bf16 %v3347_v38, %v3347_v38 }
 0xf52   : > { %9085 = vmatmul.mubr.msk.bf16.vlgmr.msra.gmra.mrb[24].mxu1 %vm2620_vm1, %v3348_v39 }
 0xf53   : > { %9104 = vmatprep.mubr.msk.bf16.mxu1 %vm11287_vm0, %v11286_v0  ;;  %9101 = vmatpush3.bf16.msra.mxu1 %v10029_v62 }
 0xf54   : > { %9102 = vmatprep.subr.bf16.mxu1 %v11286_v0 }
 0xf57   : > { %9103 = vmatpush3.bf16.msra.mxu1 %v10030_v63 }
 0xf58   : > { %9108 = vmatprep.subr.bf16.mxu1 %v11286_v0 }
0x1025   : > { %v3409_v43 = vpop.f32.mrb[24].mxu1 }
0x1026   : > { %v3410_v44 = vadd.f32 %v8618_v42, %v3409_v43  ;;  %v9086_v45 = vpop.f32.mrb[25].mxu1 }
0x1027   : > { %v3412_v46 = vpop.f32.mrb[26].mxu1 }
0x1028   : > { %v3415_v47 = vmax.f32 %v3410_v44, 0.0  ;;  %v9087_v48 = vpop.f32.mrb[27].mxu1 }
0x102a   : > { %v3416_v49 = vpack.c.bf16 %v3415_v47, %v3415_v47 }
0x102c   : > { %9097 = vmatmul.mubr.msk.bf16.vlgmr.msra.gmra.mrb[28].mxu0 %vm3456_vm4, %v3416_v49 }
0x102d   : > { %9116 = vmatprep.mubr.msk.bf16.mxu0 %vm11287_vm0, %v11286_v0 }
0x10ff   : > { %v3494_v51 = vpop.f32.mrb[28].mxu0 }
0x1100   : > { %v3495_v52 = vadd.f32 %v8622_v50, %v3494_v51  ;;  %v9098_v53 = vpop.f32.mrb[29].mxu0 }
0x1101   : > { %v3497_v54 = vpop.f32.mrb[30].mxu0 }
0x1102   : > { %v9099_v55 = vpop.f32.mrb[31].mxu0  ;;  %v3500_v56 = vadd.f32 %v3495_v52, %v3347_v38 }
0x1104   : > { %v3503_v57 = vsel %vm2620_vm1, %v3500_v56, 0.0 }
0x1105   : > { %3504 = vadd.xlane.f32.xlu1 %v3503_v57 }
0x1192   : > { %v3505_v58 = vpop.xlane.xlu1 %3504 }
0x1193   : > { %v3506_v59 = vmul.f32 0.03125, %v3505_v58 }
0x1195   : > { %v3507_v60 = vsub.f32 %v3500_v56, %v3506_v59  ;;  %v3708_v59 = vld [vmem:[%s13376_s9] sm:$0xf] }
0x1197   : > { %v3508_v10 = vmul.f32 %v3507_v60, %v3507_v60 }
0x1199   : > { %v3509_v61 = vsel %vm2620_vm1, %v3508_v10, 0.0  ;;  %v8638_v10 = vld [vmem:[%s13376_s9 + $0x4] sm:$0xf] }
0x119a   : > { %3510 = vadd.xlane.f32.xlu1 %v3509_v61  ;;  %v3826_v61 = vsel %vm2738_vm3, %v8638_v10, 0 }
0x1227   : > { %v3511_v1 = vpop.xlane.xlu1 %3510 }
0x1228   : > { %v3512_v2 = vmul.f32 0.03125, %v3511_v1 }
0x122a   : > { %v3513_v4 = vadd.f32 1e-05, %v3512_v2 }
0x122c   : > { %10081 = vrsqrt.f32 %v3513_v4 }
0x1236   : > { %v10082_v5 = vpop.eup %10081 }
0x1237   : > { %v3515_v7 = vmul.f32 %v10082_v5, %v3507_v60  ;;  %v3872_v60 = vsel %vm2738_vm3, %v3708_v59, 0 }
0x1239   : > { %v3522_v9 = vmul.f32 %v8628_v6, %v3515_v7 }
0x123b   : > { %v12361_v11 = vadd.f32 %v8629_v8, %v3522_v9 }
0x123d   : > { %v3530_v12 = vpack.c.bf16 %v12361_v11, %v12361_v11 }
0x123f   : > { %9105 = vmatmul.mubr.msk.bf16.vlgmr.msra.gmra.mrb[28].mxu1 %vm2620_vm1, %v3530_v12 }
0x1240   : > { %9110 = vmatprep.mubr.msk.bf16.mxu1 %vm11287_vm0, %v11286_v0 }
0x1312   : > { %v3591_v14 = vpop.f32.mrb[28].mxu1 }
0x1313   : > { %v3592_v15 = vadd.f32 %v8630_v13, %v3591_v14  ;;  %v9106_v16 = vpop.f32.mrb[29].mxu1 }
0x1314   : > { %v3594_v18 = vpop.f32.mrb[30].mxu1 }
0x1315   : > { %v12369_v19 = vpack.c.bf16 %v3592_v15, %v3592_v15  ;;  %v9107_v20 = vpop.f32.mrb[31].mxu1 }
0x1317   : > { %3711 = vrot.lane.b32.xlu0 %v12369_v19, %s13369_s2  ;;  %3599 = vrot.lane.b32.xlu1 %v12369_v19, %s13370_s0 }
0x131b   : > { %3709 = vrot.lane.b32.xlu0 %v12369_v19, %s13371_s3 }
0x1389   : > { %v3600_v21 = vpop.permute.xlu1 %3599  ;;  %v3712_v23 = vpop.permute.xlu0 %3711 }
0x138a   : > { %v3605_v22 = vsel %vm2674_vm2, %v3600_v21, 0  ;;  %v3717_v24 = vsel %vm2674_vm2, %v3712_v23, 0 }
0x138b   : > { %9109 = vmatpush3.bf16.xpose.msra.mxu1 %v3605_v22 }
0x138c   : > { %9120 = vmatprep.subr.bf16.mxu1 %v11286_v0 }
0x138d   : > { %v3710_v25 = vpop.permute.xlu0 %3709 }
0x1392   : > { %9111 = vmatmul.mubr.msk.bf16.vlgmr.msra.gmra.mrb[32].mxu1 %vm2674_vm2, %v12369_v19 }
0x1393   : > { %9121 = vmatpush3.bf16.xpose.msra.mxu1 %v3717_v24  ;;  %9122 = vmatprep.mubr.msk.bf16.mxu1 %vm11287_vm0, %v11286_v0 }
0x1394   : > { %9132 = vmatprep.subr.bf16.mxu1 %v11286_v0 }
0x139a   : > { %9123 = vmatmul.mubr.msk.bf16.vlgmr.msra.gmra.mrb[36].mxu1 %vm2674_vm2, %v3710_v25 }
0x139b   : > { %9134 = vmatprep.mubr.msk.bf16.mxu1 %vm11287_vm0, %v11286_v0  ;;  %9133 = vmatpush3.bf16.msra.mxu1 %v3826_v61 }
0x139c   : > { %9144 = vmatprep.subr.bf16.mxu1 %v11286_v0 }
0x1465   : > { %v3641_v26 = vpop.f32.mrb[32].mxu1 }
0x1466   : > { %v3642_v27 = vadd.f32 %v12240_v17, %v3641_v26  ;;  %v9112_v28 = vpop.f32.mrb[33].mxu1 }
0x1467   : > { %v3644_v3 = vpop.f32.mrb[34].mxu1 }
0x1468   : > { %v9113_v29 = vpop.f32.mrb[35].mxu1  ;;  %v3647_v30 = vsel %vm2674_vm2, %v3642_v27, -inf }
0x1469   : > { %3648 = vmax.xlane.f32.xlu0 %v3647_v30 }
0x146d   : > { %v3753_v31 = vpop.f32.mrb[36].mxu1 }
0x146e   : > { %v3754_v32 = vadd.f32 %v12240_v17, %v3753_v31  ;;  %v9124_v33 = vpop.f32.mrb[37].mxu1 }
0x146f   : > { %v3756_v34 = vpop.f32.mrb[38].mxu1 }
0x1470   : > { %v9125_v35 = vpop.f32.mrb[39].mxu1  ;;  %v3759_v36 = vsel %vm2674_vm2, %v3754_v32, -inf }
0x1471   : > { %3760 = vmax.xlane.f32.xlu1 %v3759_v36 }
0x1482   : > { %3771 = vrot.lane.b32.xlu1 %v12369_v19, %s13372_s16 }
0x1486   : > { %3914 = vrot.lane.b32.xlu1 %v12369_v19, %s13373_s4 }
0x14f6   : > { %v3649_v37 = vpop.xlane.xlu0 %3648 }
0x14f7   : > { %v3650_v38 = vsub.f32 %v3642_v27, %v3649_v37 }
0x14f9   : > { %v3651_v39 = vmul.f32 1.442695, %v3650_v38 }
0x14fb   : > { %10083 = vpow2.f32 %v3651_v39 }
0x14fe   : > { %v3761_v40 = vpop.xlane.xlu1 %3760 }
0x14ff   : > { %v3762_v41 = vsub.f32 %v3754_v32, %v3761_v40 }
0x1501   : > { %v3763_v42 = vmul.f32 1.442695, %v3762_v41 }
0x1502   : > { %v3772_v53 = vpop.permute.xlu1 %3771 }
0x1503   : > { %10085 = vpow2.f32 %v3763_v42  ;;  %v3777_v55 = vsel %vm2738_vm3, %v3772_v53, 0 }
0x1505   : > { %v10084_v43 = vpop.eup %10083 }
0x1506   : > { %v3653_v44 = vsel %vm2674_vm2, %v10084_v43, 0.0  ;;  %v3915_v14 = vpop.permute.xlu1 %3914 }
0x1507   : > { %3654 = vadd.xlane.f32.xlu0 %v3653_v44 }
0x150d   : > { %v10086_v45 = vpop.eup %10085 }
0x150e   : > { %v3765_v46 = vsel %vm2674_vm2, %v10086_v45, 0.0 }
0x150f   : > { %3766 = vadd.xlane.f32.xlu0 %v3765_v46 }
0x1525   : > { %3659 = vrot.lane.b32.xlu0 %v12369_v19, %s13374_s6 }
0x1529   : > { %3916 = vrot.lane.b32.xlu0 %v12369_v19, %s13375_s8 }
0x1594   : > { %v3655_v47 = vpop.xlane.xlu0 %3654 }
0x1595   : > { %10087 = vrcp.f32 %v3655_v47 }
0x159c   : > { %v3767_v48 = vpop.xlane.xlu0 %3766 }
0x159d   : > { %10089 = vrcp.f32 %v3767_v48 }
0x159f   : > { %v10088_v49 = vpop.eup %10087 }
0x15a0   : > { %v3660_v50 = vpop.permute.xlu0 %3659  ;;  %v3657_v51 = vmul.f32 %v10088_v49, %v10084_v43 }
0x15a1   : > { %v3665_v52 = vsel %vm2738_vm3, %v3660_v50, 0 }
0x15a2   : > { %9115 = vmatpush3.bf16.msra.mxu0 %v3665_v52  ;;  %v3658_v54 = vpack.c.bf16 %v3657_v51, %v3657_v51 }
0x15a3   : > { %9126 = vmatprep.subr.bf16.mxu0 %v11286_v0 }
0x15a4   : > { %v3917_v5 = vpop.permute.xlu0 %3916 }
0x15a5   : > { %9117 = vmatmul.mubr.msk.bf16.vlgmr.msra.gmra.mrb[32].mxu0 %vm2674_vm2, %v3658_v54  ;;  %v3922_v12 = vsel %vm2674_vm2, %v3917_v5, 0 }
0x15a6   : > { %9127 = vmatpush3.bf16.msra.mxu0 %v3777_v55  ;;  %9128 = vmatprep.mubr.msk.bf16.mxu0 %vm11287_vm0, %v11286_v0 }
0x15a7   : > { %v10090_v56 = vpop.eup %10089  ;;  %9138 = vmatprep.subr.bf16.mxu0 %v11286_v0 }
0x15a8   : > { %v3769_v57 = vmul.f32 %v10090_v56, %v10086_v45  ;;  %v8643_v45 = vld [vmem:[%s13376_s9 + $0x8] sm:$0xf] }
0x15a9   : > { %v4031_v46 = vsel %vm2738_vm3, %v8643_v45, 0  ;;  %v10033_v45 = vld [vmem:[%s13386_s21] sm:$0xff]  }
0x15aa   : > { %v3770_v58 = vpack.c.bf16 %v3769_v57, %v3769_v57 }
0x15ad   : > { %9129 = vmatmul.mubr.msk.bf16.vlgmr.msra.gmra.mrb[36].mxu0 %vm2674_vm2, %v3770_v58 }
0x15ae   : > { %9140 = vmatprep.mubr.msk.bf16.mxu0 %vm11287_vm0, %v11286_v0  ;;  %9139 = vmatpush3.bf16.msra.mxu0 %v3872_v60 }
0x15af   : > { %9150 = vmatprep.subr.bf16.mxu0 %v11286_v0 }
0x1678   : > { %v3701_v62 = vpop.f32.mrb[32].mxu0 }
0x1679   : > { %v3707_v63 = vpack.c.bf16 %v3701_v62, %v3701_v62  ;;  %v9118_v1 = vpop.f32.mrb[33].mxu0 }
0x167a   : > { %v3704_v2 = vpop.f32.mrb[34].mxu0 }
0x167b   : > { %v9119_v4 = vpop.f32.mrb[35].mxu0  ;;  %9141 = vmatmul.mubr.msk.bf16.vlgmr.msra.gmra.mrb[40].mxu0 %vm2674_vm2, %v3707_v63 }
0x167c   : > { %9152 = vmatprep.mubr.msk.bf16.mxu0 %vm11287_vm0, %v11286_v0 }
0x1680   : > { %v3813_v6 = vpop.f32.mrb[36].mxu0 }
0x1681   : > { %v3819_v7 = vpack.c.bf16 %v3813_v6, %v3813_v6  ;;  %v9130_v8 = vpop.f32.mrb[37].mxu0 }
0x1682   : > { %v3816_v9 = vpop.f32.mrb[38].mxu0 }
0x1683   : > { %v9131_v13 = vpop.f32.mrb[39].mxu0  ;;  %9135 = vmatmul.mubr.msk.bf16.vlgmr.msra.gmra.mrb[40].mxu1 %vm2674_vm2, %v3819_v7 }
0x1684   : > { %9145 = vmatpush3.bf16.xpose.msra.mxu1 %v3922_v12  ;;  %9146 = vmatprep.mubr.msk.bf16.mxu1 %vm11287_vm0, %v11286_v0 }
0x1685   : > { %9156 = vmatprep.subr.bf16.mxu1 %v11286_v0 }
0x168b   : > { %9147 = vmatmul.mubr.msk.bf16.vlgmr.msra.gmra.mrb[44].mxu1 %vm2674_vm2, %v3915_v14 }
0x168c   : > { %9158 = vmatprep.mubr.msk.bf16.mxu1 %vm11287_vm0, %v11286_v0  ;;  %9157 = vmatpush3.bf16.msra.mxu1 %v4031_v46 }
0x168d   : > { %9168 = vmatprep.subr.bf16.mxu1 %v11286_v0 }
0x174e   : > { %v3908_v15 = vpop.f32.mrb[40].mxu0 }
0x174f   : > { %v9142_v16 = vpop.f32.mrb[41].mxu0 }
0x1750   : > { %v3911_v18 = vpop.f32.mrb[42].mxu0 }
0x1751   : > { %v9143_v20 = vpop.f32.mrb[43].mxu0 }
0x1756   : > { %v3862_v21 = vpop.f32.mrb[40].mxu1 }
0x1757   : > { %v12429_v22 = vadd.f32 %v3908_v15, %v3862_v21  ;;  %v9136_v23 = vpop.f32.mrb[41].mxu1  ;;  %v8649_v21 = vld [vmem:[%s13381_s14] ss:$0 sm:$0xff]  ;;  %s13384_s14 = sld [smem:[#allocation88_spill]] }
0x1758   : > { %v3865_v24 = vpop.f32.mrb[42].mxu1 }
0x1759   : > { %v9137_v25 = vpop.f32.mrb[43].mxu1 }
0x175e   : > { %v3958_v26 = vpop.f32.mrb[44].mxu1 }
0x175f   : > { %v3959_v27 = vadd.f32 %v12240_v17, %v3958_v26  ;;  %v9148_v28 = vpop.f32.mrb[45].mxu1 }
0x1760   : > { %v3961_v3 = vpop.f32.mrb[46].mxu1 }
0x1761   : > { %v9149_v29 = vpop.f32.mrb[47].mxu1  ;;  %v3964_v30 = vsel %vm2674_vm2, %v3959_v27, -inf }
0x1762   : > { %3965 = vmax.xlane.f32.xlu0 %v3964_v30 }
0x1778   : > { %3976 = vrot.lane.b32.xlu0 %v12369_v19, %s13377_s10 }
0x177c   : > { %4074 = vrot.lane.b32.xlu0 %v12369_v19, %s13378_s11 }
0x17ef   : > { %v3966_v31 = vpop.xlane.xlu0 %3965 }
0x17f0   : > { %v3967_v32 = vsub.f32 %v3959_v27, %v3966_v31 }
0x17f2   : > { %v3968_v33 = vmul.f32 1.442695, %v3967_v32 }
0x17f3   : > { %v3977_v34 = vpop.permute.xlu0 %3976 }
0x17f4   : > { %10091 = vpow2.f32 %v3968_v33  ;;  %v3982_v35 = vsel %vm2738_vm3, %v3977_v34, 0  ;;  %v10031_v33 = vld [vmem:[%s13382_s17] sm:$0xff]   ;;  %v10032_v34 = vld [vmem:[%s13382_s17 + $0x8] sm:$0xff]   ;;  %s13388_s17 = sshll.u32 %s12195_s23, 3 }
0x17f5   : > { %9151 = vmatpush3.bf16.msra.mxu0 %v3982_v35  ;;  %s2584_s25 = scalar_lea.vmem %s13387_s24, %s13388_s17  ;;  %s13390_s17 = sld [smem:[#allocation71_spill]] }
0x17f6   : > { %9162 = vmatprep.subr.bf16.mxu0 %v11286_v0  ;;  %s13391_s24 = sld [smem:[#allocation100_spill]] }
0x17f7   : > { %v4075_v44 = vpop.permute.xlu0 %4074 }
0x17fe   : > { %v10092_v36 = vpop.eup %10091 }
0x17ff   : > { %v3970_v37 = vsel %vm2674_vm2, %v10092_v36, 0.0 }
0x1800   : > { %3971 = vadd.xlane.f32.xlu1 %v3970_v37 }
0x1811   : > { %4076 = vrot.lane.b32.xlu1 %v12369_v19, %s13379_s12 }
0x188d   : > { %v3972_v38 = vpop.xlane.xlu1 %3971 }
0x188e   : > { %10093 = vrcp.f32 %v3972_v38 }
0x1891   : > { %v4077_v41 = vpop.permute.xlu1 %4076 }
0x1892   : > { %v4082_v43 = vsel %vm2674_vm2, %v4077_v41, 0 }
0x1898   : > { %v10094_v39 = vpop.eup %10093 }
0x1899   : > { %v3974_v40 = vmul.f32 %v10094_v39, %v10092_v36 }
0x189b   : > { %v3975_v42 = vpack.c.bf16 %v3974_v40, %v3974_v40  ;;  %v8650_v40 = vld [vmem:[%s13384_s14] ss:$0 sm:$0xff]  ;;  %s13395_s14 = sld [smem:[#allocation105_spill]] }
0x189d   : > { %9153 = vmatmul.mubr.msk.bf16.vlgmr.msra.gmra.mrb[44].mxu0 %vm2674_vm2, %v3975_v42  ;;  %v8651_v42 = vld [vmem:[%s13385_s20] ss:$0 sm:$0xff]  ;;  %s13392_s20 = sld [smem:[#allocation93_spill]] }
0x189e   : > { %9163 = vmatpush3.bf16.xpose.msra.mxu0 %v4082_v43  ;;  %9164 = vmatprep.mubr.msk.bf16.mxu0 %vm11287_vm0, %v11286_v0 }
0x189f   : > { %9174 = vmatprep.subr.bf16.mxu0 %v11286_v0 }
0x18a5   : > { %9165 = vmatmul.mubr.msk.bf16.vlgmr.msra.gmra.mrb[48].mxu0 %vm2674_vm2, %v4075_v44 }
0x18a6   : > { %9176 = vmatprep.mubr.msk.bf16.mxu0 %vm11287_vm0, %v11286_v0 }
0x1970   : > { %v4018_v47 = vpop.f32.mrb[44].mxu0 }
0x1971   : > { %v4024_v48 = vpack.c.bf16 %v4018_v47, %v4018_v47  ;;  %v9154_v49 = vpop.f32.mrb[45].mxu0  ;;  %v12496_v47 = vld [vmem:[%s2584_s25] sm:$0xff]  ;;  %s2590_s25 = scalar_lea.vmem %s13390_s17, %s12195_s23  ;;  %s13394_s23 = sld [smem:[#allocation95_spill]] }
0x1972   : > { %v4021_v50 = vpop.f32.mrb[46].mxu0  ;;  %v4496_v49 = vpack.c.bf16 %v12496_v47, %v12496_v47  ;;  %s13396_s17 = sld [smem:[#allocation103_spill]] }
0x1973   : > { %v9155_v51 = vpop.f32.mrb[47].mxu0  ;;  %9159 = vmatmul.mubr.msk.bf16.vlgmr.msra.gmra.mrb[48].mxu1 %vm2674_vm2, %v4024_v48  ;;  %v10034_v48 = vld [vmem:[%s13386_s21 + $0x8] sm:$0xff]  }
0x1974   : > { %9170 = vmatprep.mubr.msk.bf16.mxu1 %vm11287_vm0, %v11286_v0 }
0x1978   : > { %v4118_v52 = vpop.f32.mrb[48].mxu0 }
0x1979   : > { %v4119_v53 = vadd.f32 %v12240_v17, %v4118_v52  ;;  %v9166_v54 = vpop.f32.mrb[49].mxu0  ;;  %v8652_v52 = vld [vmem:[%s13389_s26] ss:$0 sm:$0xff]  ;;  %s13393_s26 = sld [smem:[#allocation94_spill]] }
0x197a   : > { %v4121_v55 = vpop.f32.mrb[50].mxu0 }
0x197b   : > { %v9167_v56 = vpop.f32.mrb[51].mxu0  ;;  %v4124_v57 = vsel %vm2674_vm2, %v4119_v53, -inf }
0x197c   : > { %4125 = vmax.xlane.f32.xlu1 %v4124_v57 }
0x1a09   : > { %v4126_v58 = vpop.xlane.xlu1 %4125 }
0x1a0a   : > { %v4127_v59 = vsub.f32 %v4119_v53, %v4126_v58 }
0x1a0c   : > { %v4128_v60 = vmul.f32 1.442695, %v4127_v59 }
0x1a0e   : > { %10095 = vpow2.f32 %v4128_v60  ;;  %v8667_v60 = vld [vmem:[#allocation7] ss:$0 sm:$0xff] }
0x1a18   : > { %v10096_v10 = vpop.eup %10095 }
0x1a19   : > { %v4130_v61 = vsel %vm2674_vm2, %v10096_v10, 0.0 }
0x1a1a   : > { %4131 = vadd.xlane.f32.xlu0 %v4130_v61 }
0x1a30   : > { %4136 = vrot.lane.b32.xlu0 %v12369_v19, %s13380_s13  ;;  %v8647_v19 = vld [vmem:[%s13376_s9 + $0xc] sm:$0xf]  ;;  %s13383_s9 = sld [smem:[#allocation92_spill]] }
0x1a31   : > { %v4191_v12 = vsel %vm2738_vm3, %v8647_v19, 0 }
0x1a32   : > { %9175 = vmatpush3.bf16.msra.mxu0 %v4191_v12 }
0x1a33   : > { %9188 = vmatprep.subr.bf16.mxu0 %v11286_v0 }
0x1a36   : > { %v10036_v35 = vld [vmem:[%s13383_s9 + $0x8] sm:$0xff]   ;;  %v10037_v50 = vld [vmem:[%s13383_s9 + $0x10] sm:$0xff]   ;;  %v10038_v51 = vld [vmem:[%s13383_s9 + $0x18] sm:$0xff]  }
0x1a46   : > { %v4067_v62 = vpop.f32.mrb[48].mxu1 }
0x1a47   : > { %v4073_v17 = vadd.f32 %v4067_v62, %v12429_v22  ;;  %v9160_v63 = vpop.f32.mrb[49].mxu1 }
0x1a48   : > { %v4070_v1 = vpop.f32.mrb[50].mxu1 }
0x1a49   : > { %v9161_v2 = vpop.f32.mrb[51].mxu1 }
0x1aa7   : > { %v4132_v4 = vpop.xlane.xlu0 %4131 }
0x1aa8   : > { %10097 = vrcp.f32 %v4132_v4 }
0x1aab   : > { %v4137_v5 = vpop.permute.xlu0 %4136 }
0x1aac   : > { %v4142_v6 = vsel %vm2738_vm3, %v4137_v5, 0 }
0x1aad   : > { %9169 = vmatpush3.bf16.msra.mxu1 %v4142_v6 }
0x1aae   : > { %9180 = vmatprep.subr.bf16.mxu1 %v11286_v0 }
0x1ab2   : > { %v10098_v7 = vpop.eup %10097 }
0x1ab3   : > { %v4134_v8 = vmul.f32 %v10098_v7, %v10096_v10 }
0x1ab5   : > { %v4135_v9 = vpack.c.bf16 %v4134_v8, %v4134_v8 }
0x1ab7   : > { %9171 = vmatmul.mubr.msk.bf16.vlgmr.msra.gmra.mrb[52].mxu1 %vm2674_vm2, %v4135_v9 }
0x1ab8   : > { %9184 = vmatprep.mubr.msk.bf16.mxu1 %vm11287_vm0, %v11286_v0  ;;  %9181 = vmatpush3.bf16.msra.mxu1 %v10031_v33 }
0x1ab9   : > { %9182 = vmatprep.subr.bf16.mxu1 %v11286_v0 }
0x1abc   : > { %9183 = vmatpush3.bf16.msra.mxu1 %v10032_v34 }
0x1abd   : > { %9200 = vmatprep.subr.bf16.mxu1 %v11286_v0 }
0x1b8a   : > { %v4178_v13 = vpop.f32.mrb[52].mxu1 }
0x1b8b   : > { %v4184_v14 = vpack.c.bf16 %v4178_v13, %v4178_v13  ;;  %v9172_v15 = vpop.f32.mrb[53].mxu1  ;;  %v4483_v13 = vlaneseq }
0x1b8c   : > { %v4181_v16 = vpop.f32.mrb[54].mxu1 }
0x1b8d   : > { %v9173_v18 = vpop.f32.mrb[55].mxu1  ;;  %9177 = vmatmul.mubr.msk.bf16.vlgmr.msra.gmra.mrb[52].mxu0 %vm2674_vm2, %v4184_v14  ;;  %v4484_v14 = vshrl.u32 %v4483_v13, 7  ;;  %v4486_v15 = vand.u32 127, %v4483_v13  ;;  %v8666_v16 = vld [vmem:[%s2590_s25] ss:$0 sm:$0xff]  ;;  %s13397_s25 = sld [smem:[#allocation107_spill]] }
0x1b8e   : > { %9196 = vmatprep.mubr.msk.bf16.mxu0 %vm11287_vm0, %v11286_v0 }
0x1b8f   : > { %vm4487_vm5 = vcmp.gt.s32.totalorder %v4486_v15, %v4484_v14 }
0x1b90   : > { %v4488_v18 = vsel %vm4487_vm5, -1e+30, %v11286_v0 }
0x1c60   : > { %v4227_v20 = vpop.f32.mrb[52].mxu0 }
0x1c61   : > { %v4233_v22 = vadd.f32 %v4227_v20, %v4073_v17  ;;  %v9178_v23 = vpop.f32.mrb[53].mxu0  ;;  %v12540_v20 = vadd.f32 %v8666_v16, %v4488_v18 }
0x1c62   : > { %v4230_v24 = vpop.f32.mrb[54].mxu0 }
0x1c63   : > { %v4241_v25 = vadd.f32 %v8649_v21, %v4233_v22  ;;  %v9179_v26 = vpop.f32.mrb[55].mxu0 }
0x1c65   : > { %v4242_v27 = vadd.f32 %v4241_v25, %v12361_v11  ;;  %v10035_v11 = vld [vmem:[%s13383_s9] sm:$0xff]  }
0x1c66   : > { %9189 = vmatpush3.bf16.msra.mxu0 %v10035_v11 }
0x1c67   : > { %v4245_v28 = vsel %vm2620_vm1, %v4242_v27, 0.0  ;;  %9190 = vmatprep.subr.bf16.mxu0 %v11286_v0 }
0x1c68   : > { %4246 = vadd.xlane.f32.xlu1 %v4245_v28 }
0x1c6a   : > { %9191 = vmatpush3.bf16.msra.mxu0 %v10036_v35 }
0x1c6b   : > { %9192 = vmatprep.subr.bf16.mxu0 %v11286_v0 }
0x1c6e   : > { %9193 = vmatpush3.bf16.msra.mxu0 %v10037_v50 }
0x1c6f   : > { %9194 = vmatprep.subr.bf16.mxu0 %v11286_v0 }
0x1c72   : > { %9195 = vmatpush3.bf16.msra.mxu0 %v10038_v51 }
0x1c73   : > { %9214 = vmatprep.subr.bf16.mxu0 %v11286_v0 }
0x1cf5   : > { %v4247_v3 = vpop.xlane.xlu1 %4246 }
0x1cf6   : > { %v4248_v29 = vmul.f32 0.03125, %v4247_v3 }
0x1cf8   : > { %v4249_v30 = vsub.f32 %v4242_v27, %v4248_v29 }
0x1cfa   : > { %v4250_v31 = vmul.f32 %v4249_v30, %v4249_v30 }
0x1cfc   : > { %v4251_v32 = vsel %vm2620_vm1, %v4250_v31, 0.0 }
0x1cfd   : > { %4252 = vadd.xlane.f32.xlu1 %v4251_v32 }
0x1d8a   : > { %v4253_v36 = vpop.xlane.xlu1 %4252 }
0x1d8b   : > { %v4254_v37 = vmul.f32 0.03125, %v4253_v36 }
0x1d8d   : > { %v4255_v38 = vadd.f32 1e-05, %v4254_v37 }
0x1d8f   : > { %10099 = vrsqrt.f32 %v4255_v38 }
0x1d99   : > { %v10100_v39 = vpop.eup %10099 }
0x1d9a   : > { %v4257_v41 = vmul.f32 %v10100_v39, %v4249_v30 }
0x1d9c   : > { %v4264_v43 = vmul.f32 %v8650_v40, %v4257_v41 }
0x1d9e   : > { %v12487_v44 = vadd.f32 %v8651_v42, %v4264_v43 }
0x1da0   : > { %v4272_v46 = vpack.c.bf16 %v12487_v44, %v12487_v44 }
0x1da2   : > { %9185 = vmatmul.mubr.msk.bf16.vlgmr.msra.gmra.mrb[56].mxu1 %vm2620_vm1, %v4272_v46 }
0x1da3   : > { %9201 = vmatpush3.bf16.msra.mxu1 %v10033_v45  ;;  %9204 = vmatprep.mubr.msk.bf16.mxu1 %vm11287_vm0, %v11286_v0 }
0x1da4   : > { %9202 = vmatprep.subr.bf16.mxu1 %v11286_v0 }
0x1da7   : > { %9203 = vmatpush3.bf16.msra.mxu1 %v10034_v48 }
0x1da8   : > { %9208 = vmatprep.subr.bf16.mxu1 %v11286_v0 }
0x1daa   : > { %9205 = vmatmul.mubr.msk.bf16.vlgmr.msra.gmra.mrb[60].mxu1 %vm2620_vm1, %v4496_v49 }
0x1dab   : > { %9210 = vmatprep.mubr.msk.bf16.mxu1 %vm11287_vm0, %v11286_v0 }
0x1e75   : > { %v4333_v53 = vpop.f32.mrb[56].mxu1 }
0x1e76   : > { %v4334_v54 = vadd.f32 %v8652_v52, %v4333_v53  ;;  %v9186_v55 = vpop.f32.mrb[57].mxu1 }
0x1e77   : > { %v4336_v56 = vpop.f32.mrb[58].mxu1  ;;  %v4674_v55 = vld [vmem:[%s13391_s24] sm:$0xf] }
0x1e78   : > { %v4339_v57 = vmax.f32 %v4334_v54, 0.0  ;;  %v9187_v58 = vpop.f32.mrb[59].mxu1  ;;  %v4838_v56 = vsel %vm2738_vm3, %v4674_v55, 0 }
0x1e7a   : > { %v4340_v59 = vpack.c.bf16 %v4339_v57, %v4339_v57  ;;  %v8675_v57 = vld [vmem:[%s13391_s24 + $0x4] sm:$0xf] }
0x1e7b   : > { %v4792_v58 = vsel %vm2738_vm3, %v8675_v57, 0 }
0x1e7c   : > { %9197 = vmatmul.mubr.msk.bf16.vlgmr.msra.gmra.mrb[56].mxu0 %vm3456_vm4, %v4340_v59 }
0x1e7d   : > { %v4557_v10 = vpop.f32.mrb[60].mxu1  ;;  %9216 = vmatprep.mubr.msk.bf16.mxu0 %vm11287_vm0, %v11286_v0 }
0x1e7e   : > { %v4558_v61 = vadd.f32 %v8667_v60, %v4557_v10  ;;  %v9206_v62 = vpop.f32.mrb[61].mxu1 }
0x1e7f   : > { %v4560_v17 = vpop.f32.mrb[62].mxu1 }
0x1e80   : > { %v12516_v63 = vpack.c.bf16 %v4558_v61, %v4558_v61  ;;  %v9207_v1 = vpop.f32.mrb[63].mxu1 }
0x1e82   : > { %4677 = vrot.lane.b32.xlu0 %v12516_v63, %s13369_s2  ;;  %4565 = vrot.lane.b32.xlu1 %v12516_v63, %s13370_s0 }
0x1e86   : > { %4675 = vrot.lane.b32.xlu0 %v12516_v63, %s13371_s3 }
0x1ef4   : > { %v4566_v2 = vpop.permute.xlu1 %4565  ;;  %v4678_v5 = vpop.permute.xlu0 %4677 }
0x1ef5   : > { %v4571_v4 = vsel %vm2674_vm2, %v4566_v2, 0  ;;  %v4683_v6 = vsel %vm2674_vm2, %v4678_v5, 0 }
0x1ef6   : > { %9209 = vmatpush3.bf16.xpose.msra.mxu1 %v4571_v4 }
0x1ef7   : > { %9220 = vmatprep.subr.bf16.mxu1 %v11286_v0 }
0x1ef8   : > { %v4676_v7 = vpop.permute.xlu0 %4675 }
0x1efd   : > { %9211 = vmatmul.mubr.msk.bf16.vlgmr.msra.gmra.mrb[64].mxu1 %vm2674_vm2, %v12516_v63 }
0x1efe   : > { %9221 = vmatpush3.bf16.xpose.msra.mxu1 %v4683_v6  ;;  %9222 = vmatprep.mubr.msk.bf16.mxu1 %vm11287_vm0, %v11286_v0 }
0x1eff   : > { %9232 = vmatprep.subr.bf16.mxu1 %v11286_v0 }
0x1f05   : > { %9223 = vmatmul.mubr.msk.bf16.vlgmr.msra.gmra.mrb[68].mxu1 %vm2674_vm2, %v4676_v7 }
0x1f06   : > { %9234 = vmatprep.mubr.msk.bf16.mxu1 %vm11287_vm0, %v11286_v0  ;;  %9233 = vmatpush3.bf16.msra.mxu1 %v4792_v58 }
0x1f07   : > { %9244 = vmatprep.subr.bf16.mxu1 %v11286_v0 }
0x1f4f   : > { %v12535_v8 = vpop.f32.mrb[56].mxu0 }
0x1f50   : > { %v9198_v9 = vpop.f32.mrb[57].mxu0 }
0x1f51   : > { %v4420_v19 = vpop.f32.mrb[58].mxu0 }
0x1f52   : > { %v9199_v12 = vpop.f32.mrb[59].mxu0 }
0x1fd0   : > { %v4607_v21 = vpop.f32.mrb[64].mxu1 }
0x1fd1   : > { %v4608_v22 = vadd.f32 %v4607_v21, %v12540_v20  ;;  %v9212_v23 = vpop.f32.mrb[65].mxu1 }
0x1fd2   : > { %v4610_v24 = vpop.f32.mrb[66].mxu1 }
0x1fd3   : > { %v9213_v25 = vpop.f32.mrb[67].mxu1  ;;  %v4613_v26 = vsel %vm2674_vm2, %v4608_v22, -inf }
0x1fd4   : > { %4614 = vmax.xlane.f32.xlu1 %v4613_v26 }
0x1fd8   : > { %v4719_v27 = vpop.f32.mrb[68].mxu1 }
0x1fd9   : > { %v4720_v28 = vadd.f32 %v4719_v27, %v12540_v20  ;;  %v9224_v3 = vpop.f32.mrb[69].mxu1 }
0x1fda   : > { %v4722_v29 = vpop.f32.mrb[70].mxu1 }
0x1fdb   : > { %v9225_v30 = vpop.f32.mrb[71].mxu1  ;;  %v4725_v31 = vsel %vm2674_vm2, %v4720_v28, -inf }
0x1fdc   : > { %4726 = vmax.xlane.f32.xlu0 %v4725_v31 }
0x2061   : > { %v4615_v32 = vpop.xlane.xlu1 %4614 }
0x2062   : > { %v4616_v33 = vsub.f32 %v4608_v22, %v4615_v32 }
0x2064   : > { %v4617_v34 = vmul.f32 1.442695, %v4616_v33 }
0x2066   : > { %10101 = vpow2.f32 %v4617_v34 }
0x2069   : > { %v4727_v11 = vpop.xlane.xlu0 %4726 }
0x206a   : > { %v4728_v35 = vsub.f32 %v4720_v28, %v4727_v11 }
0x206c   : > { %v4729_v36 = vmul.f32 1.442695, %v4728_v35 }
0x206e   : > { %10103 = vpow2.f32 %v4729_v36 }
0x2070   : > { %v10102_v37 = vpop.eup %10101 }
0x2071   : > { %v4619_v38 = vsel %vm2674_vm2, %v10102_v37, 0.0 }
0x2072   : > { %4620 = vadd.xlane.f32.xlu0 %v4619_v38 }
0x2078   : > { %v10104_v39 = vpop.eup %10103 }
0x2079   : > { %v4731_v40 = vsel %vm2674_vm2, %v10104_v39, 0.0 }
0x207a   : > { %4732 = vadd.xlane.f32.xlu1 %v4731_v40 }
0x2088   : > { %4625 = vrot.lane.b32.xlu0 %v12516_v63, %s13374_s6 }
0x208b   : > { %4737 = vrot.lane.b32.xlu1 %v12516_v63, %s13372_s16 }
0x208c   : > { %4880 = vrot.lane.b32.xlu0 %v12516_v63, %s13373_s4 }
0x208f   : > { %4882 = vrot.lane.b32.xlu1 %v12516_v63, %s13375_s8 }
0x20ff   : > { %v4621_v41 = vpop.xlane.xlu0 %4620 }
0x2100   : > { %10105 = vrcp.f32 %v4621_v41  ;;  %v8680_v41 = vld [vmem:[%s13391_s24 + $0x8] sm:$0xf] }
0x2103   : > { %v4626_v42 = vpop.permute.xlu0 %4625 }
0x2104   : > { %v4631_v43 = vsel %vm2738_vm3, %v4626_v42, 0  ;;  %v4997_v42 = vsel %vm2738_vm3, %v8680_v41, 0 }
0x2105   : > { %9215 = vmatpush3.bf16.msra.mxu0 %v4631_v43 }
0x2106   : > { %9226 = vmatprep.subr.bf16.mxu0 %v11286_v0 }
0x2107   : > { %v4733_v45 = vpop.xlane.xlu1 %4732  ;;  %v4881_v9 = vpop.permute.xlu0 %4880 }
0x2108   : > { %10107 = vrcp.f32 %v4733_v45 }
0x210a   : > { %v10106_v46 = vpop.eup %10105 }
0x210b   : > { %v4623_v48 = vmul.f32 %v10106_v46, %v10102_v37  ;;  %v4738_v49 = vpop.permute.xlu1 %4737 }
0x210c   : > { %v4743_v51 = vsel %vm2738_vm3, %v4738_v49, 0 }
0x210d   : > { %v4624_v50 = vpack.c.bf16 %v4623_v48, %v4623_v48 }
0x210f   : > { %9217 = vmatmul.mubr.msk.bf16.vlgmr.msra.gmra.mrb[60].mxu0 %vm2674_vm2, %v4624_v50  ;;  %v4883_v17 = vpop.permute.xlu1 %4882 }
0x2110   : > { %9227 = vmatpush3.bf16.msra.mxu0 %v4743_v51  ;;  %9228 = vmatprep.mubr.msk.bf16.mxu0 %vm11287_vm0, %v11286_v0  ;;  %v4888_v6 = vsel %vm2674_vm2, %v4883_v17, 0 }
0x2111   : > { %9238 = vmatprep.subr.bf16.mxu0 %v11286_v0 }
0x2112   : > { %v10108_v52 = vpop.eup %10107 }
0x2113   : > { %v4735_v53 = vmul.f32 %v10108_v52, %v10104_v39 }
0x2115   : > { %v4736_v54 = vpack.c.bf16 %v4735_v53, %v4735_v53 }
0x2117   : > { %9229 = vmatmul.mubr.msk.bf16.vlgmr.msra.gmra.mrb[64].mxu0 %vm2674_vm2, %v4736_v54 }
0x2118   : > { %9240 = vmatprep.mubr.msk.bf16.mxu0 %vm11287_vm0, %v11286_v0  ;;  %9239 = vmatpush3.bf16.msra.mxu0 %v4838_v56 }
0x2119   : > { %9250 = vmatprep.subr.bf16.mxu0 %v11286_v0 }
0x21e2   : > { %v4667_v59 = vpop.f32.mrb[60].mxu0 }
0x21e3   : > { %v4673_v60 = vpack.c.bf16 %v4667_v59, %v4667_v59  ;;  %v9218_v10 = vpop.f32.mrb[61].mxu0 }
0x21e4   : > { %v4670_v61 = vpop.f32.mrb[62].mxu0  ;;  %v8656_v10 = vld [vmem:[%s13392_s20] ss:$0 sm:$0xff]  ;;  %s13398_s20 = sld [smem:[#allocation111_spill]] }
0x21e5   : > { %v9219_v62 = vpop.f32.mrb[63].mxu0  ;;  %9241 = vmatmul.mubr.msk.bf16.vlgmr.msra.gmra.mrb[68].mxu0 %vm2674_vm2, %v4673_v60  ;;  %v4418_v61 = vadd.f32 %v8656_v10, %v12535_v8  ;;  %v8664_v10 = vld [vmem:[#allocation2] ss:$0 sm:$0xff] }
0x21e6   : > { %9252 = vmatprep.mubr.msk.bf16.mxu0 %vm11287_vm0, %v11286_v0 }
0x21ea   : > { %v4779_v1 = vpop.f32.mrb[64].mxu0 }
0x21eb   : > { %v4785_v2 = vpack.c.bf16 %v4779_v1, %v4779_v1  ;;  %v9230_v4 = vpop.f32.mrb[65].mxu0  ;;  %v4423_v1 = vadd.f32 %v4418_v61, %v12487_v44 }
0x21ec   : > { %v4782_v5 = vpop.f32.mrb[66].mxu0 }
0x21ed   : > { %v9231_v7 = vpop.f32.mrb[67].mxu0  ;;  %9235 = vmatmul.mubr.msk.bf16.vlgmr.msra.gmra.mrb[72].mxu1 %vm2674_vm2, %v4785_v2 }
0x21ee   : > { %9245 = vmatpush3.bf16.xpose.msra.mxu1 %v4888_v6  ;;  %9246 = vmatprep.mubr.msk.bf16.mxu1 %vm11287_vm0, %v11286_v0 }
0x21ef   : > { %9256 = vmatprep.subr.bf16.mxu1 %v11286_v0 }
0x21f5   : > { %9247 = vmatmul.mubr.msk.bf16.vlgmr.msra.gmra.mrb[76].mxu1 %vm2674_vm2, %v4881_v9 }
0x21f6   : > { %9258 = vmatprep.mubr.msk.bf16.mxu1 %vm11287_vm0, %v11286_v0  ;;  %9257 = vmatpush3.bf16.msra.mxu1 %v4997_v42 }
0x21f7   : > { %9268 = vmatprep.subr.bf16.mxu1 %v11286_v0 }
0x22b8   : > { %v4874_v19 = vpop.f32.mrb[68].mxu0 }
0x22b9   : > { %v9242_v12 = vpop.f32.mrb[69].mxu0 }
0x22ba   : > { %v4877_v13 = vpop.f32.mrb[70].mxu0 }
0x22bb   : > { %v9243_v14 = vpop.f32.mrb[71].mxu0 }
0x22c0   : > { %v4828_v15 = vpop.f32.mrb[72].mxu1 }
0x22c1   : > { %v12583_v16 = vadd.f32 %v4874_v19, %v4828_v15  ;;  %v9236_v18 = vpop.f32.mrb[73].mxu1 }
0x22c2   : > { %v4831_v21 = vpop.f32.mrb[74].mxu1 }
0x22c3   : > { %v9237_v22 = vpop.f32.mrb[75].mxu1 }
0x22c8   : > { %v4924_v23 = vpop.f32.mrb[76].mxu1 }
0x22c9   : > { %v4925_v24 = vadd.f32 %v4924_v23, %v12540_v20  ;;  %v9248_v25 = vpop.f32.mrb[77].mxu1 }
0x22ca   : > { %v4927_v26 = vpop.f32.mrb[78].mxu1 }
0x22cb   : > { %v9249_v27 = vpop.f32.mrb[79].mxu1  ;;  %v4930_v28 = vsel %vm2674_vm2, %v4925_v24, -inf  ;;  %v8662_v26 = vld [vmem:[%s13393_s26] ss:$0 sm:$0xff]  ;;  %s13399_s26 = sld [smem:[#allocation113_spill]] }
0x22cc   : > { %4931 = vmax.xlane.f32.xlu1 %v4930_v28  ;;  %v8663_v28 = vld [vmem:[%s13394_s23] ss:$0 sm:$0xff]  ;;  %s13400_s23 = sld [smem:[#allocation117_spill]] }
0x22dd   : > { %5042 = vrot.lane.b32.xlu1 %v12516_v63, %s13379_s12 }
0x22e1   : > { %5040 = vrot.lane.b32.xlu1 %v12516_v63, %s13378_s11 }
0x2359   : > { %v4932_v3 = vpop.xlane.xlu1 %4931 }
0x235a   : > { %v4933_v29 = vsub.f32 %v4925_v24, %v4932_v3 }
0x235c   : > { %v4934_v30 = vmul.f32 1.442695, %v4933_v29 }
0x235d   : > { %v5043_v37 = vpop.permute.xlu1 %5042 }
0x235e   : > { %10109 = vpow2.f32 %v4934_v30  ;;  %v5048_v39 = vsel %vm2674_vm2, %v5043_v37, 0 }
0x2361   : > { %v5041_v40 = vpop.permute.xlu1 %5040 }
0x2368   : > { %v10110_v31 = vpop.eup %10109 }
0x2369   : > { %v4936_v32 = vsel %vm2674_vm2, %v10110_v31, 0.0 }
0x236a   : > { %4937 = vadd.xlane.f32.xlu0 %v4936_v32 }
0x2380   : > { %4942 = vrot.lane.b32.xlu0 %v12516_v63, %s13377_s10 }
0x23f7   : > { %v4938_v33 = vpop.xlane.xlu0 %4937 }
0x23f8   : > { %10111 = vrcp.f32 %v4938_v33 }
0x23fb   : > { %v4943_v34 = vpop.permute.xlu0 %4942 }
0x23fc   : > { %v4948_v11 = vsel %vm2738_vm3, %v4943_v34, 0 }
0x23fd   : > { %9251 = vmatpush3.bf16.msra.mxu0 %v4948_v11 }
0x23fe   : > { %9262 = vmatprep.subr.bf16.mxu0 %v11286_v0 }
0x2402   : > { %v10112_v35 = vpop.eup %10111 }
0x2403   : > { %v4940_v36 = vmul.f32 %v10112_v35, %v10110_v31 }
0x2405   : > { %v4941_v38 = vpack.c.bf16 %v4940_v36, %v4940_v36 }
0x2407   : > { %9253 = vmatmul.mubr.msk.bf16.vlgmr.msra.gmra.mrb[72].mxu0 %vm2674_vm2, %v4941_v38  ;;  %v8686_v38 = vld [vmem:[#allocation8] ss:$0 sm:$0xff] }
0x2408   : > { %9263 = vmatpush3.bf16.xpose.msra.mxu0 %v5048_v39  ;;  %9264 = vmatprep.mubr.msk.bf16.mxu0 %vm11287_vm0, %v11286_v0 }
0x2409   : > { %9274 = vmatprep.subr.bf16.mxu0 %v11286_v0 }
0x240f   : > { %9265 = vmatmul.mubr.msk.bf16.vlgmr.msra.gmra.mrb[76].mxu0 %vm2674_vm2, %v5041_v40 }
0x2410   : > { %9276 = vmatprep.mubr.msk.bf16.mxu0 %vm11287_vm0, %v11286_v0 }
0x24da   : > { %v4984_v43 = vpop.f32.mrb[72].mxu0 }
0x24db   : > { %v4990_v45 = vpack.c.bf16 %v4984_v43, %v4984_v43  ;;  %v9254_v46 = vpop.f32.mrb[73].mxu0 }
0x24dc   : > { %v4987_v48 = vpop.f32.mrb[74].mxu0 }
0x24dd   : > { %v9255_v49 = vpop.f32.mrb[75].mxu0  ;;  %9259 = vmatmul.mubr.msk.bf16.vlgmr.msra.gmra.mrb[80].mxu1 %vm2674_vm2, %v4990_v45 }
0x24de   : > { %9270 = vmatprep.mubr.msk.bf16.mxu1 %vm11287_vm0, %v11286_v0 }
0x24e2   : > { %v5084_v50 = vpop.f32.mrb[76].mxu0 }
0x24e3   : > { %v5085_v51 = vadd.f32 %v5084_v50, %v12540_v20  ;;  %v9266_v52 = vpop.f32.mrb[77].mxu0 }
0x24e4   : > { %v5087_v53 = vpop.f32.mrb[78].mxu0  ;;  %v10040_v52 = vld [vmem:[%s13395_s14 + $0x8] sm:$0xff]  }
0x24e5   : > { %v9267_v54 = vpop.f32.mrb[79].mxu0  ;;  %v5090_v55 = vsel %vm2674_vm2, %v5085_v51, -inf }
0x24e6   : > { %5091 = vmax.xlane.f32.xlu0 %v5090_v55 }
0x24fc   : > { %5102 = vrot.lane.b32.xlu0 %v12516_v63, %s13380_s13  ;;  %v4426_v63 = vsel %vm2620_vm1, %v4423_v1, 0.0 }
0x2573   : > { %v5092_v56 = vpop.xlane.xlu0 %5091 }
0x2574   : > { %v5093_v57 = vsub.f32 %v5085_v51, %v5092_v56  ;;  %v10039_v51 = vld [vmem:[%s13395_s14] sm:$0xff]  }
0x2576   : > { %v5094_v58 = vmul.f32 1.442695, %v5093_v57 }
0x2577   : > { %v5103_v59 = vpop.permute.xlu0 %5102 }
0x2578   : > { %10113 = vpow2.f32 %v5094_v58  ;;  %v5108_v60 = vsel %vm2738_vm3, %v5103_v59, 0 }
0x2579   : > { %9269 = vmatpush3.bf16.msra.mxu1 %v5108_v60 }
0x257a   : > { %9280 = vmatprep.subr.bf16.mxu1 %v11286_v0 }
0x2582   : > { %v10114_v62 = vpop.eup %10113 }
0x2583   : > { %v5096_v17 = vsel %vm2674_vm2, %v10114_v62, 0.0 }
0x2584   : > { %5097 = vadd.xlane.f32.xlu1 %v5096_v17 }
0x2588   : > { %4427 = vadd.xlane.f32.xlu1 %v4426_v63 }
0x25b0   : > { %v5033_v2 = vpop.f32.mrb[80].mxu1 }
0x25b1   : > { %v5039_v4 = vadd.f32 %v5033_v2, %v12583_v16  ;;  %v9260_v5 = vpop.f32.mrb[81].mxu1  ;;  %v8684_v16 = vld [vmem:[%s13391_s24 + $0xc] sm:$0xf]  ;;  %v10041_v2 = vld [vmem:[%s13396_s17] sm:$0xff]  }
0x25b2   : > { %v5036_v6 = vpop.f32.mrb[82].mxu1  ;;  %v5157_v21 = vsel %vm2738_vm3, %v8684_v16, 0 }
0x25b3   : > { %v9261_v7 = vpop.f32.mrb[83].mxu1  ;;  %9275 = vmatpush3.bf16.msra.mxu0 %v5157_v21 }
0x25b4   : > { %9288 = vmatprep.subr.bf16.mxu0 %v11286_v0 }
0x2611   : > { %v5098_v9 = vpop.xlane.xlu1 %5097 }
0x2612   : > { %10115 = vrcp.f32 %v5098_v9 }
0x2615   : > { %v4428_v19 = vpop.xlane.xlu1 %4427 }
0x2616   : > { %v4429_v8 = vmul.f32 0.03125, %v4428_v19  ;;  %v8687_v19 = vld [vmem:[#allocation10] ss:$0 sm:$0xff] }
0x2618   : > { %v4430_v12 = vsub.f32 %v4423_v1, %v4429_v8 }
0x261a   : > { %v4431_v13 = vmul.f32 %v4430_v12, %v4430_v12 }
0x261c   : > { %v10116_v14 = vpop.eup %10115  ;;  %v4432_v44 = vsel %vm2620_vm1, %v4431_v13, 0.0 }
0x261d   : > { %v5100_v15 = vmul.f32 %v10116_v14, %v10114_v62  ;;  %4433 = vadd.xlane.f32.xlu1 %v4432_v44  ;;  %v8665_v62 = vld [vmem:[#allocation5] ss:$0 sm:$0xff] }
0x261f   : > { %v5101_v18 = vpack.c.bf16 %v5100_v15, %v5100_v15  ;;  %v8693_v15 = vld [vmem:[#allocation14] ss:$0 sm:$0xff] }
0x2621   : > { %9271 = vmatmul.mubr.msk.bf16.vlgmr.msra.gmra.mrb[84].mxu1 %vm2674_vm2, %v5101_v18 }
0x2622   : > { %9284 = vmatprep.mubr.msk.bf16.mxu1 %vm11287_vm0, %v11286_v0  ;;  %9281 = vmatpush3.bf16.msra.mxu1 %v10041_v2 }
0x2623   : > { %9282 = vmatprep.subr.bf16.mxu1 %v11286_v0 }
0x26aa   : > { %v4434_v22 = vpop.xlane.xlu1 %4433 }
0x26ab   : > { %v4435_v23 = vmul.f32 0.03125, %v4434_v22 }
0x26ad   : > { %v4436_v24 = vadd.f32 1e-05, %v4435_v23 }
0x26af   : > { %10117 = vrsqrt.f32 %v4436_v24 }
0x26b9   : > { %v10118_v25 = vpop.eup %10117 }
0x26ba   : > { %v4438_v27 = vmul.f32 %v10118_v25, %v4430_v12  ;;  %v8688_v12 = vld [vmem:[#allocation11] ss:$0 sm:$0xff] }
0x26bc   : > { %v4445_v3 = vmul.f32 %v8662_v26, %v4438_v27  ;;  %v8689_v26 = vld [vmem:[#allocation13] ss:$0 sm:$0xff] }
0x26be   : > { %v4452_v29 = vadd.f32 %v8663_v28, %v4445_v3 }
0x26c0   : > { %v4455_v30 = vsel %vm2620_vm1, %v4452_v29, 0.0 }
0x26c1   : > { %4456 = vadd.xlane.f32.xlu1 %v4455_v30 }
0x26f4   : > { %v5144_v31 = vpop.f32.mrb[84].mxu1 }
0x26f5   : > { %v5150_v32 = vpack.c.bf16 %v5144_v31, %v5144_v31  ;;  %v9272_v33 = vpop.f32.mrb[85].mxu1 }
0x26f6   : > { %v5147_v34 = vpop.f32.mrb[86].mxu1 }
0x26f7   : > { %v9273_v11 = vpop.f32.mrb[87].mxu1  ;;  %9277 = vmatmul.mubr.msk.bf16.vlgmr.msra.gmra.mrb[80].mxu0 %vm2674_vm2, %v5150_v32 }
0x26f8   : > { %9292 = vmatprep.mubr.msk.bf16.mxu0 %vm11287_vm0, %v11286_v0  ;;  %9289 = vmatpush3.bf16.msra.mxu0 %v10039_v51 }
0x26f9   : > { %9290 = vmatprep.subr.bf16.mxu0 %v11286_v0 }
0x26fc   : > { %9291 = vmatpush3.bf16.msra.mxu0 %v10040_v52 }
0x26fd   : > { %9302 = vmatprep.subr.bf16.mxu0 %v11286_v0 }
0x274e   : > { %v4457_v35 = vpop.xlane.xlu1 %4456 }
0x274f   : > { %v4458_v36 = vmul.f32 0.03125, %v4457_v35  ;;  %v12681_v35 = vld [vmem:[%s12237_s1] ss:$0 sm:$0xff] }
0x2751   : > { %v4459_v42 = vsub.f32 %v4452_v29, %v4458_v36 }
0x2753   : > { %v4460_v49 = vmul.f32 %v4459_v42, %v4459_v42 }
0x2755   : > { %v4461_v50 = vsel %vm2620_vm1, %v4460_v49, 0.0 }
0x27ca   : > { %v5193_v37 = vpop.f32.mrb[80].mxu0 }
0x27cb   : > { %v5199_v39 = vadd.f32 %v5193_v37, %v5039_v4  ;;  %v9278_v40 = vpop.f32.mrb[81].mxu0  ;;  %v10042_v4 = vld [vmem:[%s13396_s17 + $0x8] sm:$0xff]  }
0x27cc   : > { %v5196_v41 = vpop.f32.mrb[82].mxu0  ;;  %9283 = vmatpush3.bf16.msra.mxu1 %v10042_v4 }
0x27cd   : > { %v5207_v43 = vadd.f32 %v8686_v38, %v5199_v39  ;;  %v9279_v45 = vpop.f32.mrb[83].mxu0  ;;  %9296 = vmatprep.subr.bf16.mxu1 %v11286_v0 }
0x27cf   : > { %v5208_v46 = vadd.f32 %v5207_v43, %v12496_v47 }
0x27d1   : > { %v5211_v48 = vsel %vm2620_vm1, %v5208_v46, 0.0 }
0x27d2   : > { %5212 = vadd.xlane.f32.xlu1 %v5211_v48 }
0x27d6   : > { %4462 = vadd.xlane.f32.xlu1 %v4461_v50 }
0x285f   : > { %v5213_v53 = vpop.xlane.xlu1 %5212 }
0x2860   : > { %v5214_v54 = vmul.f32 0.03125, %v5213_v53 }
0x2862   : > { %v5215_v55 = vsub.f32 %v5208_v46, %v5214_v54 }
0x2863   : > { %v4463_v56 = vpop.xlane.xlu1 %4462 }
0x2864   : > { %v4464_v47 = vmul.f32 0.03125, %v4463_v56  ;;  %v5216_v57 = vmul.f32 %v5215_v55, %v5215_v55 }
0x2866   : > { %v4465_v58 = vadd.f32 1e-05, %v4464_v47  ;;  %v5217_v59 = vsel %vm2620_vm1, %v5216_v57, 0.0 }
0x2867   : > { %5218 = vadd.xlane.f32.xlu0 %v5217_v59 }
0x2868   : > { %10119 = vrsqrt.f32 %v4465_v58 }
0x2872   : > { %v10120_v60 = vpop.eup %10119 }
0x2873   : > { %v4467_v61 = vmul.f32 %v10120_v60, %v4459_v42 }
0x2875   : > { %v4474_v17 = vmul.f32 %v8664_v10, %v4467_v61 }
0x2877   : > { %v4481_v1 = vadd.f32 %v8665_v62, %v4474_v17 }
0x2879   : > { %v12643_v63 = vpack.c.bf16 %v4481_v1, %v4481_v1 }
0x287b   : > { %9293 = vmatmul.mubr.msk.bf16.vlgmr.msra.gmra.mrb[84].mxu0 %vm2620_vm1, %v12643_v63 }
0x287c   : > { %9304 = vmatprep.mubr.msk.bf16.mxu0 %vm11287_vm0, %v11286_v0 }
0x28f4   : > { %v5219_v5 = vpop.xlane.xlu0 %5218 }
0x28f5   : > { %v5220_v6 = vmul.f32 0.03125, %v5219_v5 }
0x28f7   : > { %v5221_v7 = vadd.f32 1e-05, %v5220_v6 }
0x28f9   : > { %10121 = vrsqrt.f32 %v5221_v7  ;;  %v5481_v7 = vld [vmem:[%s13397_s25] sm:$0xf] }
0x2903   : > { %v10122_v9 = vpop.eup %10121 }
0x2904   : > { %v5223_v8 = vmul.f32 %v10122_v9, %v5215_v55  ;;  %v5646_v9 = vsel %vm2738_vm3, %v5481_v7, 0 }
0x2906   : > { %v5230_v13 = vmul.f32 %v8687_v19, %v5223_v8  ;;  %v8701_v19 = vld [vmem:[%s13397_s25 + $0x4] sm:$0xf] }
0x2907   : > { %v5600_v8 = vsel %vm2738_vm3, %v8701_v19, 0 }
0x2908   : > { %v12653_v14 = vadd.f32 %v8688_v12, %v5230_v13 }
0x290a   : > { %v5238_v44 = vpack.c.bf16 %v12653_v14, %v12653_v14 }
0x290c   : > { %9285 = vmatmul.mubr.msk.bf16.vlgmr.msra.gmra.mrb[88].mxu1 %vm2620_vm1, %v5238_v44 }
0x290d   : > { %9298 = vmatprep.mubr.msk.bf16.mxu1 %vm11287_vm0, %v11286_v0 }
0x294e   : > { %v5365_v18 = vpop.f32.mrb[84].mxu0 }
0x294f   : > { %v5366_v16 = vadd.f32 %v8693_v15, %v5365_v18  ;;  %v9294_v21 = vpop.f32.mrb[85].mxu0 }
0x2950   : > { %v5368_v22 = vpop.f32.mrb[86].mxu0 }
0x2951   : > { %v12660_v23 = vpack.c.bf16 %v5366_v16, %v5366_v16  ;;  %v9295_v24 = vpop.f32.mrb[87].mxu0 }
0x2953   : > { %5485 = vrot.lane.b32.xlu1 %v12660_v23, %s13371_s3  ;;  %v5377_v25 = vsel %vm2674_vm2, %v12660_v23, 0 }
0x2954   : > { %9297 = vmatpush3.bf16.xpose.msra.mxu1 %v5377_v25 }
0x2955   : > { %9308 = vmatprep.subr.bf16.mxu1 %v11286_v0 }
0x29c5   : > { %v5486_v29 = vpop.permute.xlu1 %5485 }
0x29c6   : > { %v5491_v33 = vsel %vm2674_vm2, %v5486_v29, 0 }
0x29df   : > { %v5299_v27 = vpop.f32.mrb[88].mxu1 }
0x29e0   : > { %v5300_v28 = vadd.f32 %v8689_v26, %v5299_v27  ;;  %v9286_v3 = vpop.f32.mrb[89].mxu1 }
0x29e1   : > { %v5302_v30 = vpop.f32.mrb[90].mxu1 }
0x29e2   : > { %v12667_v31 = vpack.c.bf16 %v5300_v28, %v5300_v28  ;;  %v9287_v32 = vpop.f32.mrb[91].mxu1 }
0x29e4   : > { %5483 = vrot.lane.b32.xlu1 %v12667_v31, %s13371_s3  ;;  %9299 = vmatmul.mubr.msk.bf16.vlgmr.msra.gmra.mrb[92].mxu1 %vm2674_vm2, %v12667_v31 }
0x29e5   : > { %9309 = vmatpush3.bf16.xpose.msra.mxu1 %v5491_v33  ;;  %9310 = vmatprep.mubr.msk.bf16.mxu1 %vm11287_vm0, %v11286_v0 }
0x29e6   : > { %9320 = vmatprep.subr.bf16.mxu1 %v11286_v0 }
0x2a56   : > { %v5484_v34 = vpop.permute.xlu1 %5483 }
0x2a57   : > { %9311 = vmatmul.mubr.msk.bf16.vlgmr.msra.gmra.mrb[96].mxu1 %vm2674_vm2, %v5484_v34 }
0x2a58   : > { %9322 = vmatprep.mubr.msk.bf16.mxu1 %vm11287_vm0, %v11286_v0  ;;  %9321 = vmatpush3.bf16.msra.mxu1 %v5600_v8 }
0x2a59   : > { %9332 = vmatprep.subr.bf16.mxu1 %v11286_v0 }
0x2ab7   : > { %v5413_v11 = vpop.f32.mrb[92].mxu1 }
0x2ab8   : > { %v5414_v36 = vadd.f32 %v12681_v35, %v5413_v11  ;;  %v9300_v37 = vpop.f32.mrb[93].mxu1 }
0x2ab9   : > { %v5416_v38 = vpop.f32.mrb[94].mxu1 }
0x2aba   : > { %v9301_v39 = vpop.f32.mrb[95].mxu1  ;;  %v5419_v40 = vsel %vm2674_vm2, %v5414_v36, -inf }
0x2abb   : > { %5420 = vmax.xlane.f32.xlu1 %v5419_v40 }
0x2acc   : > { %5545 = vrot.lane.b32.xlu1 %v12660_v23, %s13369_s2 }
0x2b2a   : > { %v5527_v41 = vpop.f32.mrb[96].mxu1 }
0x2b2b   : > { %v5528_v42 = vadd.f32 %v12681_v35, %v5527_v41  ;;  %v9312_v43 = vpop.f32.mrb[97].mxu1 }
0x2b2c   : > { %v5530_v45 = vpop.f32.mrb[98].mxu1 }
0x2b2d   : > { %v9313_v46 = vpop.f32.mrb[99].mxu1  ;;  %v5533_v48 = vsel %vm2674_vm2, %v5528_v42, -inf }
0x2b2e   : > { %5534 = vmax.xlane.f32.xlu0 %v5533_v48 }
0x2b48   : > { %v5421_v49 = vpop.xlane.xlu1 %5420 }
0x2b49   : > { %v5422_v50 = vsub.f32 %v5414_v36, %v5421_v49 }
0x2b4b   : > { %v5423_v51 = vmul.f32 1.442695, %v5422_v50 }
0x2b4c   : > { %v5546_v17 = vpop.permute.xlu1 %5545 }
0x2b4d   : > { %10123 = vpow2.f32 %v5423_v51  ;;  %v5551_v2 = vsel %vm2738_vm3, %v5546_v17, 0 }
0x2b57   : > { %v10124_v52 = vpop.eup %10123 }
0x2b58   : > { %v5425_v53 = vsel %vm2674_vm2, %v10124_v52, 0.0 }
0x2b59   : > { %5426 = vadd.xlane.f32.xlu0 %v5425_v53 }
0x2bbb   : > { %v5535_v54 = vpop.xlane.xlu0 %5534 }
0x2bbc   : > { %v5536_v55 = vsub.f32 %v5528_v42, %v5535_v54 }
0x2bbe   : > { %v5537_v56 = vmul.f32 1.442695, %v5536_v55 }
0x2bc0   : > { %10125 = vpow2.f32 %v5537_v56 }
0x2bca   : > { %v10126_v47 = vpop.eup %10125 }
0x2bcb   : > { %v5539_v57 = vsel %vm2674_vm2, %v10126_v47, 0.0 }
0x2bcc   : > { %5540 = vadd.xlane.f32.xlu0 %v5539_v57 }
0x2be2   : > { %5432 = vrot.lane.b32.xlu0 %v12660_v23, %s13370_s0 }
0x2be6   : > { %5690 = vrot.lane.b32.xlu0 %v12660_v23, %s13373_s4  ;;  %v5427_v58 = vpop.xlane.xlu0 %5426 }
0x2be7   : > { %10127 = vrcp.f32 %v5427_v58  ;;  %v8706_v58 = vld [vmem:[%s13397_s25 + $0x8] sm:$0xf] }
0x2bea   : > { %5688 = vrot.lane.b32.xlu0 %v12667_v31, %s13373_s4 }
0x2bf1   : > { %v10128_v59 = vpop.eup %10127 }
0x2bf2   : > { %v5429_v10 = vmul.f32 %v10128_v59, %v10124_v52  ;;  %v5805_v59 = vsel %vm2738_vm3, %v8706_v58, 0 }
0x2bf4   : > { %v5430_v1 = vpack.c.bf16 %v5429_v10, %v5429_v10 }
0x2c59   : > { %v5541_v60 = vpop.xlane.xlu0 %5540 }
0x2c5a   : > { %10129 = vrcp.f32 %v5541_v60 }
0x2c5d   : > { %v5433_v61 = vpop.permute.xlu0 %5432 }
0x2c5e   : > { %v5438_v62 = vsel %vm2738_vm3, %v5433_v61, 0 }
0x2c5f   : > { %9303 = vmatpush3.bf16.msra.mxu0 %v5438_v62 }
0x2c60   : > { %9314 = vmatprep.subr.bf16.mxu0 %v11286_v0 }
0x2c61   : > { %v5691_v16 = vpop.permute.xlu0 %5690 }
0x2c62   : > { %9305 = vmatmul.mubr.msk.bf16.vlgmr.msra.gmra.mrb[88].mxu0 %vm2674_vm2, %v5430_v1  ;;  %v5696_v26 = vsel %vm2674_vm2, %v5691_v16, 0 }
0x2c63   : > { %9315 = vmatpush3.bf16.msra.mxu0 %v5551_v2  ;;  %9316 = vmatprep.mubr.msk.bf16.mxu0 %vm11287_vm0, %v11286_v0 }
0x2c64   : > { %v10130_v4 = vpop.eup %10129  ;;  %9326 = vmatprep.subr.bf16.mxu0 %v11286_v0 }
0x2c65   : > { %v5543_v5 = vmul.f32 %v10130_v4, %v10126_v47  ;;  %v5689_v28 = vpop.permute.xlu0 %5688 }
0x2c67   : > { %v5544_v6 = vpack.c.bf16 %v5543_v5, %v5543_v5 }
0x2c6a   : > { %9317 = vmatmul.mubr.msk.bf16.vlgmr.msra.gmra.mrb[92].mxu0 %vm2674_vm2, %v5544_v6 }
0x2c6b   : > { %9328 = vmatprep.mubr.msk.bf16.mxu0 %vm11287_vm0, %v11286_v0  ;;  %9327 = vmatpush3.bf16.msra.mxu0 %v5646_v9 }
0x2c6c   : > { %9338 = vmatprep.subr.bf16.mxu0 %v11286_v0 }
0x2d35   : > { %v5474_v12 = vpop.f32.mrb[88].mxu0 }
0x2d36   : > { %v5480_v13 = vpack.c.bf16 %v5474_v12, %v5474_v12  ;;  %v9306_v44 = vpop.f32.mrb[89].mxu0 }
0x2d37   : > { %v5477_v15 = vpop.f32.mrb[90].mxu0 }
0x2d38   : > { %v9307_v18 = vpop.f32.mrb[91].mxu0  ;;  %9329 = vmatmul.mubr.msk.bf16.vlgmr.msra.gmra.mrb[96].mxu0 %vm2674_vm2, %v5480_v13 }
0x2d39   : > { %9340 = vmatprep.mubr.msk.bf16.mxu0 %vm11287_vm0, %v11286_v0 }
0x2d3d   : > { %v5587_v21 = vpop.f32.mrb[92].mxu0 }
0x2d3e   : > { %v5593_v22 = vpack.c.bf16 %v5587_v21, %v5587_v21  ;;  %v9318_v24 = vpop.f32.mrb[93].mxu0 }
0x2d3f   : > { %v5590_v25 = vpop.f32.mrb[94].mxu0 }
0x2d40   : > { %v9319_v27 = vpop.f32.mrb[95].mxu0  ;;  %9323 = vmatmul.mubr.msk.bf16.vlgmr.msra.gmra.mrb[100].mxu1 %vm2674_vm2, %v5593_v22 }
0x2d41   : > { %9333 = vmatpush3.bf16.xpose.msra.mxu1 %v5696_v26  ;;  %9334 = vmatprep.mubr.msk.bf16.mxu1 %vm11287_vm0, %v11286_v0  ;;  %v8710_v27 = vld [vmem:[%s13397_s25 + $0xc] sm:$0xf] }
0x2d42   : > { %9344 = vmatprep.subr.bf16.mxu1 %v11286_v0 }
0x2d48   : > { %9335 = vmatmul.mubr.msk.bf16.vlgmr.msra.gmra.mrb[104].mxu1 %vm2674_vm2, %v5689_v28  ;;  %v5965_v28 = vsel %vm2738_vm3, %v8710_v27, 0 }
0x2d49   : > { %9346 = vmatprep.mubr.msk.bf16.mxu1 %vm11287_vm0, %v11286_v0  ;;  %9345 = vmatpush3.bf16.msra.mxu1 %v5805_v59 }
0x2d4a   : > { %9356 = vmatprep.subr.bf16.mxu1 %v11286_v0 }
0x2e0b   : > { %v5682_v3 = vpop.f32.mrb[96].mxu0 }
0x2e0c   : > { %v9330_v29 = vpop.f32.mrb[97].mxu0 }
0x2e0d   : > { %v5685_v30 = vpop.f32.mrb[98].mxu0 }
0x2e0e   : > { %v9331_v32 = vpop.f32.mrb[99].mxu0 }
0x2e13   : > { %v5636_v33 = vpop.f32.mrb[100].mxu1 }
0x2e14   : > { %v12724_v34 = vadd.f32 %v5682_v3, %v5636_v33  ;;  %v9324_v11 = vpop.f32.mrb[101].mxu1 }
0x2e15   : > { %v5639_v36 = vpop.f32.mrb[102].mxu1  ;;  %v8712_v11 = vld [vmem:[#allocation16] ss:$0 sm:$0xff] }
0x2e16   : > { %v9325_v37 = vpop.f32.mrb[103].mxu1 }
0x2e1b   : > { %v5732_v38 = vpop.f32.mrb[104].mxu1 }
0x2e1c   : > { %v5733_v39 = vadd.f32 %v12681_v35, %v5732_v38  ;;  %v9336_v40 = vpop.f32.mrb[105].mxu1 }
0x2e1d   : > { %v5735_v41 = vpop.f32.mrb[106].mxu1 }
0x2e1e   : > { %v9337_v42 = vpop.f32.mrb[107].mxu1  ;;  %v5738_v43 = vsel %vm2674_vm2, %v5733_v39, -inf }
0x2e1f   : > { %5739 = vmax.xlane.f32.xlu0 %v5738_v43 }
0x2e35   : > { %5750 = vrot.lane.b32.xlu0 %v12660_v23, %s13375_s8 }
0x2e39   : > { %5848 = vrot.lane.b32.xlu0 %v12667_v31, %s13378_s11 }
0x2eac   : > { %v5740_v45 = vpop.xlane.xlu0 %5739 }
0x2ead   : > { %v5741_v46 = vsub.f32 %v5733_v39, %v5740_v45 }
0x2eaf   : > { %v5742_v48 = vmul.f32 1.442695, %v5741_v46 }
0x2eb0   : > { %v5751_v49 = vpop.permute.xlu0 %5750 }
0x2eb1   : > { %10131 = vpow2.f32 %v5742_v48  ;;  %v5756_v50 = vsel %vm2738_vm3, %v5751_v49, 0 }
0x2eb2   : > { %9339 = vmatpush3.bf16.msra.mxu0 %v5756_v50  ;;  %v10043_v50 = vld [vmem:[%s13398_s20] sm:$0xff]  }
0x2eb3   : > { %9350 = vmatprep.subr.bf16.mxu0 %v11286_v0 }
0x2eb4   : > { %v5849_v57 = vpop.permute.xlu0 %5848 }
0x2ebb   : > { %v10132_v51 = vpop.eup %10131 }
0x2ebc   : > { %v5744_v52 = vsel %vm2674_vm2, %v10132_v51, 0.0 }
0x2ebd   : > { %5745 = vadd.xlane.f32.xlu1 %v5744_v52  ;;  %v10046_v52 = vld [vmem:[%s13399_s26 + $0x8] sm:$0xff]  }
0x2ece   : > { %5850 = vrot.lane.b32.xlu1 %v12660_v23, %s13378_s11 }
0x2f4a   : > { %v5746_v53 = vpop.xlane.xlu1 %5745 }
0x2f4b   : > { %10133 = vrcp.f32 %v5746_v53 }
0x2f4e   : > { %v5851_v55 = vpop.permute.xlu1 %5850 }
0x2f4f   : > { %v5856_v47 = vsel %vm2674_vm2, %v5851_v55, 0 }
0x2f55   : > { %v10134_v31 = vpop.eup %10133 }
0x2f56   : > { %v5748_v54 = vmul.f32 %v10134_v31, %v10132_v51  ;;  %v10044_v51 = vld [vmem:[%s13398_s20 + $0x8] sm:$0xff]  }
0x2f58   : > { %v5749_v56 = vpack.c.bf16 %v5748_v54, %v5748_v54 }
0x2f5a   : > { %9341 = vmatmul.mubr.msk.bf16.vlgmr.msra.gmra.mrb[100].mxu0 %vm2674_vm2, %v5749_v56  ;;  %v8713_v56 = vld [vmem:[#allocation17] ss:$0 sm:$0xff] }
0x2f5b   : > { %9351 = vmatpush3.bf16.xpose.msra.mxu0 %v5856_v47  ;;  %9352 = vmatprep.mubr.msk.bf16.mxu0 %vm11287_vm0, %v11286_v0 }
0x2f5c   : > { %9362 = vmatprep.subr.bf16.mxu0 %v11286_v0 }
0x2f62   : > { %9353 = vmatmul.mubr.msk.bf16.vlgmr.msra.gmra.mrb[104].mxu0 %vm2674_vm2, %v5849_v57  ;;  %v8714_v57 = vld [vmem:[#allocation19] ss:$0 sm:$0xff] }
0x2f63   : > { %9364 = vmatprep.mubr.msk.bf16.mxu0 %vm11287_vm0, %v11286_v0  ;;  %9363 = vmatpush3.bf16.msra.mxu0 %v5965_v28 }
0x2f64   : > { %9376 = vmatprep.subr.bf16.mxu0 %v11286_v0 }
0x302d   : > { %v5792_v60 = vpop.f32.mrb[100].mxu0 }
0x302e   : > { %v5798_v10 = vpack.c.bf16 %v5792_v60, %v5792_v60  ;;  %v9342_v61 = vpop.f32.mrb[101].mxu0 }
0x302f   : > { %v5795_v62 = vpop.f32.mrb[102].mxu0  ;;  %v10048_v61 = vld [vmem:[%s13399_s26 + $0x18] sm:$0xff]  }
0x3030   : > { %v9343_v17 = vpop.f32.mrb[103].mxu0  ;;  %9347 = vmatmul.mubr.msk.bf16.vlgmr.msra.gmra.mrb[108].mxu1 %vm2674_vm2, %v5798_v10  ;;  %v10047_v10 = vld [vmem:[%s13399_s26 + $0x10] sm:$0xff]  }
0x3031   : > { %9358 = vmatprep.mubr.msk.bf16.mxu1 %vm11287_vm0, %v11286_v0  ;;  %v8715_v62 = vld [vmem:[#allocation20] ss:$0 sm:$0xff] }
0x3035   : > { %v5892_v1 = vpop.f32.mrb[104].mxu0 }
0x3036   : > { %v5893_v2 = vadd.f32 %v12681_v35, %v5892_v1  ;;  %v9354_v4 = vpop.f32.mrb[105].mxu0 }
0x3037   : > { %v5895_v5 = vpop.f32.mrb[106].mxu0 }
0x3038   : > { %v9355_v6 = vpop.f32.mrb[107].mxu0  ;;  %v5898_v7 = vsel %vm2674_vm2, %v5893_v2, -inf }
0x3039   : > { %5899 = vmax.xlane.f32.xlu0 %v5898_v7 }
0x304f   : > { %5910 = vrot.lane.b32.xlu0 %v12660_v23, %s13379_s12 }
0x30c6   : > { %v5900_v9 = vpop.xlane.xlu0 %5899 }
0x30c7   : > { %v5901_v19 = vsub.f32 %v5893_v2, %v5900_v9  ;;  %v8719_v9 = vld [vmem:[#allocation22] ss:$0 sm:$0xff] }
0x30c9   : > { %v5902_v8 = vmul.f32 1.442695, %v5901_v19 }
0x30ca   : > { %v5911_v12 = vpop.permute.xlu0 %5910 }
0x30cb   : > { %10135 = vpow2.f32 %v5902_v8  ;;  %v5916_v13 = vsel %vm2738_vm3, %v5911_v12, 0 }
0x30cc   : > { %9357 = vmatpush3.bf16.msra.mxu1 %v5916_v13 }
0x30cd   : > { %9368 = vmatprep.subr.bf16.mxu1 %v11286_v0 }
0x30d5   : > { %v10136_v35 = vpop.eup %10135 }
0x30d6   : > { %v5904_v44 = vsel %vm2674_vm2, %v10136_v35, 0.0 }
0x30d7   : > { %5905 = vadd.xlane.f32.xlu1 %v5904_v44 }
0x3103   : > { %v5841_v15 = vpop.f32.mrb[108].mxu1 }
0x3104   : > { %v5847_v18 = vadd.f32 %v5841_v15, %v12724_v34  ;;  %v9348_v16 = vpop.f32.mrb[109].mxu1 }
0x3105   : > { %v5844_v23 = vpop.f32.mrb[110].mxu1 }
0x3106   : > { %v9349_v21 = vpop.f32.mrb[111].mxu1 }
0x3164   : > { %v5906_v22 = vpop.xlane.xlu1 %5905 }
0x3165   : > { %10137 = vrcp.f32 %v5906_v22 }
0x316f   : > { %v10138_v24 = vpop.eup %10137 }
0x3170   : > { %v5908_v25 = vmul.f32 %v10138_v24, %v10136_v35  ;;  %v10049_v24 = vld [vmem:[%s13400_s23] sm:$0xff]  }
0x3172   : > { %v5909_v26 = vpack.c.bf16 %v5908_v25, %v5908_v25  ;;  %v10050_v25 = vld [vmem:[%s13400_s23 + $0x8] sm:$0xff]  }
0x3174   : > { %9359 = vmatmul.mubr.msk.bf16.vlgmr.msra.gmra.mrb[112].mxu1 %vm2674_vm2, %v5909_v26 }
0x3175   : > { %9372 = vmatprep.mubr.msk.bf16.mxu1 %vm11287_vm0, %v11286_v0  ;;  %9369 = vmatpush3.bf16.msra.mxu1 %v10043_v50 }
0x3176   : > { %9370 = vmatprep.subr.bf16.mxu1 %v11286_v0 }
0x3179   : > { %9371 = vmatpush3.bf16.msra.mxu1 %v10044_v51 }
0x317a   : > { %9388 = vmatprep.subr.bf16.mxu1 %v11286_v0 }
0x3247   : > { %v5952_v3 = vpop.f32.mrb[112].mxu1 }
0x3248   : > { %v5958_v29 = vpack.c.bf16 %v5952_v3, %v5952_v3  ;;  %v9360_v30 = vpop.f32.mrb[113].mxu1 }
0x3249   : > { %v5955_v32 = vpop.f32.mrb[114].mxu1 }
0x324a   : > { %v9361_v33 = vpop.f32.mrb[115].mxu1  ;;  %9365 = vmatmul.mubr.msk.bf16.vlgmr.msra.gmra.mrb[108].mxu0 %vm2674_vm2, %v5958_v29  ;;  %v8725_v29 = vld [vmem:[#allocation23] ss:$0 sm:$0xff]  ;;  %v8726_v32 = vld [vmem:[#allocation25] ss:$0 sm:$0xff] }
0x324b   : > { %9384 = vmatprep.mubr.msk.bf16.mxu0 %vm11287_vm0, %v11286_v0 }
0x331d   : > { %v6001_v34 = vpop.f32.mrb[108].mxu0 }
0x331e   : > { %v6007_v36 = vadd.f32 %v6001_v34, %v5847_v18  ;;  %v9366_v37 = vpop.f32.mrb[109].mxu0 }
0x331f   : > { %v6004_v38 = vpop.f32.mrb[110].mxu0 }
0x3320   : > { %v6015_v39 = vadd.f32 %v8712_v11, %v6007_v36  ;;  %v9367_v40 = vpop.f32.mrb[111].mxu0  ;;  %v8727_v36 = vld [vmem:[#allocation26] ss:$0 sm:$0xff] }
0x3322   : > { %v6016_v41 = vadd.f32 %v6015_v39, %v12653_v14  ;;  %v10045_v14 = vld [vmem:[%s13399_s26] sm:$0xff]  }
0x3323   : > { %9377 = vmatpush3.bf16.msra.mxu0 %v10045_v14 }
0x3324   : > { %v6019_v42 = vsel %vm2620_vm1, %v6016_v41, 0.0  ;;  %9378 = vmatprep.subr.bf16.mxu0 %v11286_v0 }
0x3325   : > { %6020 = vadd.xlane.f32.xlu1 %v6019_v42 }
0x3327   : > { %9379 = vmatpush3.bf16.msra.mxu0 %v10046_v52 }
0x3328   : > { %9380 = vmatprep.subr.bf16.mxu0 %v11286_v0 }
0x332b   : > { %9381 = vmatpush3.bf16.msra.mxu0 %v10047_v10 }
0x332c   : > { %9382 = vmatprep.subr.bf16.mxu0 %v11286_v0 }
0x332f   : > { %9383 = vmatpush3.bf16.msra.mxu0 %v10048_v61 }
0x3330   : > { %9402 = vmatprep.subr.bf16.mxu0 %v11286_v0 }
0x33b2   : > { %v6021_v43 = vpop.xlane.xlu1 %6020 }
0x33b3   : > { %v6022_v45 = vmul.f32 0.03125, %v6021_v43 }
0x33b5   : > { %v6023_v46 = vsub.f32 %v6016_v41, %v6022_v45 }
0x33b7   : > { %v6024_v48 = vmul.f32 %v6023_v46, %v6023_v46 }
0x33b9   : > { %v6025_v49 = vsel %vm2620_vm1, %v6024_v48, 0.0 }
0x33ba   : > { %6026 = vadd.xlane.f32.xlu1 %v6025_v49 }
0x3447   : > { %v6027_v53 = vpop.xlane.xlu1 %6026 }
0x3448   : > { %v6028_v31 = vmul.f32 0.03125, %v6027_v53 }
0x344a   : > { %v6029_v54 = vadd.f32 1e-05, %v6028_v31 }
0x344c   : > { %10139 = vrsqrt.f32 %v6029_v54 }
0x3456   : > { %v10140_v55 = vpop.eup %10139 }
0x3457   : > { %v6031_v47 = vmul.f32 %v10140_v55, %v6023_v46 }
0x3459   : > { %v6038_v58 = vmul.f32 %v8713_v56, %v6031_v47 }
0x345b   : > { %v6045_v59 = vadd.f32 %v8714_v57, %v6038_v58 }
0x345d   : > { %v6046_v60 = vpack.c.bf16 %v6045_v59, %v6045_v59 }
0x345f   : > { %9373 = vmatmul.mubr.msk.bf16.vlgmr.msra.gmra.mrb[116].mxu1 %vm2620_vm1, %v6046_v60 }
0x3460   : > { %9392 = vmatprep.mubr.msk.bf16.mxu1 %vm11287_vm0, %v11286_v0  ;;  %9389 = vmatpush3.bf16.msra.mxu1 %v10049_v24 }
0x3461   : > { %9390 = vmatprep.subr.bf16.mxu1 %v11286_v0 }
0x3464   : > { %9391 = vmatpush3.bf16.msra.mxu1 %v10050_v25 }
0x3465   : > { %9396 = vmatprep.subr.bf16.mxu1 %v11286_v0 }
0x3532   : > { %v6107_v17 = vpop.f32.mrb[116].mxu1 }
0x3533   : > { %v6108_v1 = vadd.f32 %v8715_v62, %v6107_v17  ;;  %v9374_v2 = vpop.f32.mrb[117].mxu1 }
0x3534   : > { %v6110_v4 = vpop.f32.mrb[118].mxu1 }
0x3535   : > { %v6113_v5 = vmax.f32 %v6108_v1, 0.0  ;;  %v9375_v6 = vpop.f32.mrb[119].mxu1 }
0x3537   : > { %v6114_v7 = vpack.c.bf16 %v6113_v5, %v6113_v5 }
0x3539   : > { %9385 = vmatmul.mubr.msk.bf16.vlgmr.msra.gmra.mrb[112].mxu0 %vm3456_vm4, %v6114_v7 }
0x353a   : > { %9404 = vmatprep.mubr.msk.bf16.mxu0 %vm11287_vm0, %v11286_v0 }
0x360c   : > { %v6191_v19 = vpop.f32.mrb[112].mxu0 }
0x360d   : > { %v6192_v8 = vadd.f32 %v8719_v9, %v6191_v19  ;;  %v9386_v12 = vpop.f32.mrb[113].mxu0 }
0x360e   : > { %v6194_v13 = vpop.f32.mrb[114].mxu0 }
0x360f   : > { %v9387_v35 = vpop.f32.mrb[115].mxu0  ;;  %v6197_v44 = vadd.f32 %v6192_v8, %v6045_v59 }
0x3611   : > { %v6200_v15 = vsel %vm2620_vm1, %v6197_v44, 0.0 }
0x3612   : > { %6201 = vadd.xlane.f32.xlu1 %v6200_v15 }
0x369f   : > { %v6202_v18 = vpop.xlane.xlu1 %6201 }
0x36a0   : > { %v6203_v16 = vmul.f32 0.03125, %v6202_v18 }
0x36a2   : > { %v6204_v23 = vsub.f32 %v6197_v44, %v6203_v16 }
0x36a4   : > { %v6205_v21 = vmul.f32 %v6204_v23, %v6204_v23 }
0x36a6   : > { %v6206_v22 = vsel %vm2620_vm1, %v6205_v21, 0.0 }
0x36a7   : > { %6207 = vadd.xlane.f32.xlu1 %v6206_v22 }
0x3734   : > { %v6208_v26 = vpop.xlane.xlu1 %6207 }
0x3735   : > { %v6209_v27 = vmul.f32 0.03125, %v6208_v26 }
0x3737   : > { %v6210_v28 = vadd.f32 1e-05, %v6209_v27 }
0x3739   : > { %10141 = vrsqrt.f32 %v6210_v28 }
0x3743   : > { %v10142_v3 = vpop.eup %10141 }
0x3744   : > { %v6212_v30 = vmul.f32 %v10142_v3, %v6204_v23 }
0x3746   : > { %v6219_v33 = vmul.f32 %v8725_v29, %v6212_v30 }
0x3748   : > { %v12795_v34 = vadd.f32 %v8726_v32, %v6219_v33 }
0x374a   : > { %v6227_v11 = vpack.c.bf16 %v12795_v34, %v12795_v34 }
0x374c   : > { %9393 = vmatmul.mubr.msk.bf16.vlgmr.msra.gmra.mrb[120].mxu1 %vm2620_vm1, %v6227_v11 }
0x374d   : > { %9398 = vmatprep.mubr.msk.bf16.mxu1 %vm11287_vm0, %v11286_v0 }
0x381f   : > { %v6288_v37 = vpop.f32.mrb[120].mxu1 }
0x3820   : > { %v6289_v38 = vadd.f32 %v8727_v36, %v6288_v37  ;;  %v9394_v39 = vpop.f32.mrb[121].mxu1 }
0x3821   : > { %v6291_v40 = vpop.f32.mrb[122].mxu1 }
0x3822   : > { %v12802_v41 = vpack.c.bf16 %v6289_v38, %v6289_v38  ;;  %v9395_v42 = vpop.f32.mrb[123].mxu1 }
0x3824   : > { %6408 = vrot.lane.b32.xlu0 %v12802_v41, %s13369_s2  ;;  %6296 = vrot.lane.b32.xlu1 %v12802_v41, %s13370_s0 }
0x3828   : > { %6406 = vrot.lane.b32.xlu0 %v12802_v41, %s13371_s3 }
0x3896   : > { %v6297_v43 = vpop.permute.xlu1 %6296  ;;  %v6409_v46 = vpop.permute.xlu0 %6408 }
0x3897   : > { %v6302_v45 = vsel %vm2674_vm2, %v6297_v43, 0  ;;  %v6414_v48 = vsel %vm2674_vm2, %v6409_v46, 0 }
0x3898   : > { %9397 = vmatpush3.bf16.xpose.msra.mxu1 %v6302_v45 }
0x3899   : > { %9408 = vmatprep.subr.bf16.mxu1 %v11286_v0 }
0x389a   : > { %v6407_v49 = vpop.permute.xlu0 %6406 }
0x389f   : > { %9399 = vmatmul.mubr.msk.bf16.vlgmr.msra.gmra.mrb[124].mxu1 %vm2674_vm2, %v12802_v41 }
0x38a0   : > { %9409 = vmatpush3.bf16.xpose.msra.mxu1 %v6414_v48  ;;  %9410 = vmatprep.mubr.msk.bf16.mxu1 %vm11287_vm0, %v11286_v0 }
0x38a1   : > { %9420 = vmatprep.subr.bf16.mxu1 %v11286_v0 }
0x38a7   : > { %9411 = vmatmul.mubr.msk.bf16.vlgmr.msra.gmra.mrb[128].mxu1 %vm2674_vm2, %v6407_v49 }
0x38a8   : > { %9422 = vmatprep.mubr.msk.bf16.mxu1 %vm11287_vm0, %v11286_v0 }
0x3972   : > { %v6338_v50 = vpop.f32.mrb[124].mxu1 }
0x3973   : > { %v6339_v51 = vadd.f32 %v6338_v50, %v12540_v20  ;;  %v9400_v14 = vpop.f32.mrb[125].mxu1 }
0x3974   : > { %v6341_v52 = vpop.f32.mrb[126].mxu1 }
0x3975   : > { %v9401_v53 = vpop.f32.mrb[127].mxu1  ;;  %v6344_v31 = vsel %vm2674_vm2, %v6339_v51, -inf }
0x3976   : > { %6345 = vmax.xlane.f32.xlu0 %v6344_v31 }
0x397a   : > { %v6450_v54 = vpop.f32.mrb[128].mxu1 }
0x397b   : > { %v6451_v55 = vadd.f32 %v6450_v54, %v12540_v20  ;;  %v9412_v56 = vpop.f32.mrb[129].mxu1 }
0x397c   : > { %v6453_v47 = vpop.f32.mrb[130].mxu1 }
0x397d   : > { %v9413_v57 = vpop.f32.mrb[131].mxu1  ;;  %v6456_v58 = vsel %vm2674_vm2, %v6451_v55, -inf }
0x397e   : > { %6457 = vmax.xlane.f32.xlu1 %v6456_v58 }
0x398f   : > { %6468 = vrot.lane.b32.xlu1 %v12802_v41, %s13372_s16  ;;  %s13401_s16 = sld [smem:[#allocation119_spill]] }
0x3993   : > { %6611 = vrot.lane.b32.xlu1 %v12802_v41, %s13373_s4 }
0x3995   : > { %s13402_s9 = smov %s13401_s16  ;;  %v6405_v23 = vld [vmem:[%s13401_s16] sm:$0xf] }
0x3996   : > { %v6569_v21 = vsel %vm2738_vm3, %v6405_v23, 0  ;;  %v8735_v22 = vld [vmem:[%s13402_s9 + $0x4] sm:$0xf] }
0x3997   : > { %v6523_v24 = vsel %vm2738_vm3, %v8735_v22, 0 }
0x3998   : > { %9421 = vmatpush3.bf16.msra.mxu1 %v6523_v24 }
0x3999   : > { %9432 = vmatprep.subr.bf16.mxu1 %v11286_v0 }
0x3a03   : > { %v6346_v59 = vpop.xlane.xlu0 %6345 }
0x3a04   : > { %v6347_v60 = vsub.f32 %v6339_v51, %v6346_v59 }
0x3a06   : > { %v6348_v10 = vmul.f32 1.442695, %v6347_v60 }
0x3a08   : > { %10143 = vpow2.f32 %v6348_v10 }
0x3a0b   : > { %v6458_v61 = vpop.xlane.xlu1 %6457 }
0x3a0c   : > { %v6459_v62 = vsub.f32 %v6451_v55, %v6458_v61 }
0x3a0e   : > { %v6460_v17 = vmul.f32 1.442695, %v6459_v62 }
0x3a0f   : > { %v6469_v13 = vpop.permute.xlu1 %6468 }
0x3a10   : > { %10145 = vpow2.f32 %v6460_v17  ;;  %v6474_v44 = vsel %vm2738_vm3, %v6469_v13, 0 }
0x3a12   : > { %v10144_v1 = vpop.eup %10143 }
0x3a13   : > { %v6350_v2 = vsel %vm2674_vm2, %v10144_v1, 0.0  ;;  %v6612_v38 = vpop.permute.xlu1 %6611 }
0x3a14   : > { %6351 = vadd.xlane.f32.xlu0 %v6350_v2 }
0x3a1a   : > { %v10146_v4 = vpop.eup %10145 }
0x3a1b   : > { %v6462_v5 = vsel %vm2674_vm2, %v10146_v4, 0.0 }
0x3a1c   : > { %6463 = vadd.xlane.f32.xlu0 %v6462_v5  ;;  %v8740_v5 = vld [vmem:[%s13402_s9 + $0x8] sm:$0xf] }
0x3a32   : > { %6356 = vrot.lane.b32.xlu0 %v12802_v41, %s13374_s6  ;;  %s13403_s6 = sld [smem:[#allocation124_spill]] }
0x3a36   : > { %6613 = vrot.lane.b32.xlu0 %v12802_v41, %s13375_s8 }
0x3aa1   : > { %v6352_v6 = vpop.xlane.xlu0 %6351 }
0x3aa2   : > { %10147 = vrcp.f32 %v6352_v6  ;;  %v6728_v6 = vsel %vm2738_vm3, %v8740_v5, 0 }
0x3aa9   : > { %v6464_v7 = vpop.xlane.xlu0 %6463 }
0x3aaa   : > { %10149 = vrcp.f32 %v6464_v7 }
0x3aac   : > { %v10148_v9 = vpop.eup %10147 }
0x3aad   : > { %v6354_v19 = vmul.f32 %v10148_v9, %v10144_v1  ;;  %v6357_v8 = vpop.permute.xlu0 %6356 }
0x3aae   : > { %v6362_v12 = vsel %vm2738_vm3, %v6357_v8, 0 }
0x3aaf   : > { %9403 = vmatpush3.bf16.msra.mxu0 %v6362_v12  ;;  %v6355_v35 = vpack.c.bf16 %v6354_v19, %v6354_v19 }
0x3ab0   : > { %9414 = vmatprep.subr.bf16.mxu0 %v11286_v0 }
0x3ab1   : > { %v6614_v29 = vpop.permute.xlu0 %6613 }
0x3ab2   : > { %9405 = vmatmul.mubr.msk.bf16.vlgmr.msra.gmra.mrb[116].mxu0 %vm2674_vm2, %v6355_v35  ;;  %v6619_v36 = vsel %vm2674_vm2, %v6614_v29, 0 }
0x3ab3   : > { %9415 = vmatpush3.bf16.msra.mxu0 %v6474_v44  ;;  %9416 = vmatprep.mubr.msk.bf16.mxu0 %vm11287_vm0, %v11286_v0 }
0x3ab4   : > { %v10150_v15 = vpop.eup %10149  ;;  %9426 = vmatprep.subr.bf16.mxu0 %v11286_v0 }
0x3ab5   : > { %v6466_v18 = vmul.f32 %v10150_v15, %v10146_v4 }
0x3ab7   : > { %v6467_v16 = vpack.c.bf16 %v6466_v18, %v6466_v18 }
0x3aba   : > { %9417 = vmatmul.mubr.msk.bf16.vlgmr.msra.gmra.mrb[120].mxu0 %vm2674_vm2, %v6467_v16 }
0x3abb   : > { %9428 = vmatprep.mubr.msk.bf16.mxu0 %vm11287_vm0, %v11286_v0  ;;  %9427 = vmatpush3.bf16.msra.mxu0 %v6569_v21 }
0x3abc   : > { %9438 = vmatprep.subr.bf16.mxu0 %v11286_v0 }
0x3b85   : > { %v6398_v25 = vpop.f32.mrb[116].mxu0 }
0x3b86   : > { %v6404_v26 = vpack.c.bf16 %v6398_v25, %v6398_v25  ;;  %v9406_v27 = vpop.f32.mrb[117].mxu0 }
0x3b87   : > { %v6401_v28 = vpop.f32.mrb[118].mxu0 }
0x3b88   : > { %v9407_v3 = vpop.f32.mrb[119].mxu0  ;;  %9429 = vmatmul.mubr.msk.bf16.vlgmr.msra.gmra.mrb[124].mxu0 %vm2674_vm2, %v6404_v26 }
0x3b89   : > { %9440 = vmatprep.mubr.msk.bf16.mxu0 %vm11287_vm0, %v11286_v0 }
0x3b8d   : > { %v6510_v30 = vpop.f32.mrb[120].mxu0 }
0x3b8e   : > { %v6516_v32 = vpack.c.bf16 %v6510_v30, %v6510_v30  ;;  %v9418_v33 = vpop.f32.mrb[121].mxu0 }
0x3b8f   : > { %v6513_v11 = vpop.f32.mrb[122].mxu0 }
0x3b90   : > { %v9419_v37 = vpop.f32.mrb[123].mxu0  ;;  %9423 = vmatmul.mubr.msk.bf16.vlgmr.msra.gmra.mrb[132].mxu1 %vm2674_vm2, %v6516_v32 }
0x3b91   : > { %9433 = vmatpush3.bf16.xpose.msra.mxu1 %v6619_v36  ;;  %9434 = vmatprep.mubr.msk.bf16.mxu1 %vm11287_vm0, %v11286_v0  ;;  %v8744_v36 = vld [vmem:[%s13402_s9 + $0xc] sm:$0xf] }
0x3b92   : > { %9444 = vmatprep.subr.bf16.mxu1 %v11286_v0  ;;  %v6888_v37 = vsel %vm2738_vm3, %v8744_v36, 0 }
0x3b98   : > { %9435 = vmatmul.mubr.msk.bf16.vlgmr.msra.gmra.mrb[136].mxu1 %vm2674_vm2, %v6612_v38 }
0x3b99   : > { %9446 = vmatprep.mubr.msk.bf16.mxu1 %vm11287_vm0, %v11286_v0  ;;  %9445 = vmatpush3.bf16.msra.mxu1 %v6728_v6 }
0x3b9a   : > { %9456 = vmatprep.subr.bf16.mxu1 %v11286_v0 }
0x3c5b   : > { %v6605_v39 = vpop.f32.mrb[124].mxu0 }
0x3c5c   : > { %v9430_v40 = vpop.f32.mrb[125].mxu0 }
0x3c5d   : > { %v6608_v42 = vpop.f32.mrb[126].mxu0 }
0x3c5e   : > { %v9431_v43 = vpop.f32.mrb[127].mxu0 }
0x3c63   : > { %v6559_v45 = vpop.f32.mrb[132].mxu1 }
0x3c64   : > { %v12862_v46 = vadd.f32 %v6605_v39, %v6559_v45  ;;  %v9424_v48 = vpop.f32.mrb[133].mxu1  ;;  %v10051_v39 = vld [vmem:[%s13403_s6] sm:$0xff]  }
0x3c65   : > { %v6562_v49 = vpop.f32.mrb[134].mxu1 }
0x3c66   : > { %v9425_v50 = vpop.f32.mrb[135].mxu1  ;;  %v8746_v49 = vld [vmem:[#allocation28] ss:$0 sm:$0xff] }
0x3c6b   : > { %v6655_v51 = vpop.f32.mrb[136].mxu1 }
0x3c6c   : > { %v6656_v14 = vadd.f32 %v6655_v51, %v12540_v20  ;;  %v9436_v52 = vpop.f32.mrb[137].mxu1 }
0x3c6d   : > { %v6658_v53 = vpop.f32.mrb[138].mxu1 }
0x3c6e   : > { %v9437_v31 = vpop.f32.mrb[139].mxu1  ;;  %v6661_v54 = vsel %vm2674_vm2, %v6656_v14, -inf }
0x3c6f   : > { %6662 = vmax.xlane.f32.xlu0 %v6661_v54 }
0x3c85   : > { %6673 = vrot.lane.b32.xlu0 %v12802_v41, %s13377_s10  ;;  %s13406_s10 = sld [smem:[#allocation129_spill]] }
0x3c89   : > { %6771 = vrot.lane.b32.xlu0 %v12802_v41, %s13378_s11 }
0x3cfc   : > { %v6663_v55 = vpop.xlane.xlu0 %6662 }
0x3cfd   : > { %v6664_v56 = vsub.f32 %v6656_v14, %v6663_v55 }
0x3cff   : > { %v6665_v47 = vmul.f32 1.442695, %v6664_v56 }
0x3d00   : > { %v6674_v57 = vpop.permute.xlu0 %6673 }
0x3d01   : > { %10151 = vpow2.f32 %v6665_v47  ;;  %v6679_v58 = vsel %vm2738_vm3, %v6674_v57, 0 }
0x3d02   : > { %9439 = vmatpush3.bf16.msra.mxu0 %v6679_v58 }
0x3d03   : > { %9450 = vmatprep.subr.bf16.mxu0 %v11286_v0 }
0x3d04   : > { %v6772_v4 = vpop.permute.xlu0 %6771 }
0x3d0b   : > { %v10152_v59 = vpop.eup %10151 }
0x3d0c   : > { %v6667_v60 = vsel %vm2674_vm2, %v10152_v59, 0.0 }
0x3d0d   : > { %6668 = vadd.xlane.f32.xlu1 %v6667_v60 }
0x3d1e   : > { %6773 = vrot.lane.b32.xlu1 %v12802_v41, %s13379_s12 }
0x3d9a   : > { %v6669_v10 = vpop.xlane.xlu1 %6668 }
0x3d9b   : > { %10153 = vrcp.f32 %v6669_v10 }
0x3d9e   : > { %v6774_v17 = vpop.permute.xlu1 %6773 }
0x3d9f   : > { %v6779_v2 = vsel %vm2674_vm2, %v6774_v17, 0 }
0x3da5   : > { %v10154_v61 = vpop.eup %10153 }
0x3da6   : > { %v6671_v62 = vmul.f32 %v10154_v61, %v10152_v59  ;;  %v8753_v61 = vld [vmem:[#allocation34] ss:$0 sm:$0xff] }
0x3da8   : > { %v6672_v1 = vpack.c.bf16 %v6671_v62, %v6671_v62 }
0x3daa   : > { %9441 = vmatmul.mubr.msk.bf16.vlgmr.msra.gmra.mrb[128].mxu0 %vm2674_vm2, %v6672_v1 }
0x3dab   : > { %9451 = vmatpush3.bf16.xpose.msra.mxu0 %v6779_v2  ;;  %9452 = vmatprep.mubr.msk.bf16.mxu0 %vm11287_vm0, %v11286_v0 }
0x3dac   : > { %9462 = vmatprep.subr.bf16.mxu0 %v11286_v0 }
0x3db2   : > { %9453 = vmatmul.mubr.msk.bf16.vlgmr.msra.gmra.mrb[132].mxu0 %vm2674_vm2, %v6772_v4 }
0x3db3   : > { %9464 = vmatprep.mubr.msk.bf16.mxu0 %vm11287_vm0, %v11286_v0  ;;  %9463 = vmatpush3.bf16.msra.mxu0 %v6888_v37 }
0x3db4   : > { %9476 = vmatprep.subr.bf16.mxu0 %v11286_v0 }
0x3e7d   : > { %v6715_v7 = vpop.f32.mrb[128].mxu0 }
0x3e7e   : > { %v6721_v9 = vpack.c.bf16 %v6715_v7, %v6715_v7  ;;  %v9442_v19 = vpop.f32.mrb[129].mxu0  ;;  %v8747_v7 = vld [vmem:[#allocation29] ss:$0 sm:$0xff] }
0x3e7f   : > { %v6718_v8 = vpop.f32.mrb[130].mxu0  ;;  %v8748_v19 = vld [vmem:[#allocation31] ss:$0 sm:$0xff] }
0x3e80   : > { %v9443_v12 = vpop.f32.mrb[131].mxu0  ;;  %9447 = vmatmul.mubr.msk.bf16.vlgmr.msra.gmra.mrb[140].mxu1 %vm2674_vm2, %v6721_v9 }
0x3e81   : > { %9458 = vmatprep.mubr.msk.bf16.mxu1 %vm11287_vm0, %v11286_v0 }
0x3e85   : > { %v6815_v13 = vpop.f32.mrb[132].mxu0 }
0x3e86   : > { %v6816_v35 = vadd.f32 %v6815_v13, %v12540_v20  ;;  %v9454_v44 = vpop.f32.mrb[133].mxu0 }
0x3e87   : > { %v6818_v15 = vpop.f32.mrb[134].mxu0  ;;  %v8749_v44 = vld [vmem:[#allocation32] ss:$0 sm:$0xff] }
0x3e88   : > { %v9455_v18 = vpop.f32.mrb[135].mxu0  ;;  %v6821_v16 = vsel %vm2674_vm2, %v6816_v35, -inf }
0x3e89   : > { %6822 = vmax.xlane.f32.xlu1 %v6821_v16 }
0x3f16   : > { %v6823_v23 = vpop.xlane.xlu1 %6822 }
0x3f17   : > { %v6824_v21 = vsub.f32 %v6816_v35, %v6823_v23 }
0x3f19   : > { %v6825_v22 = vmul.f32 1.442695, %v6824_v21 }
0x3f1b   : > { %10155 = vpow2.f32 %v6825_v22 }
0x3f25   : > { %v10156_v24 = vpop.eup %10155 }
0x3f26   : > { %v6827_v25 = vsel %vm2674_vm2, %v10156_v24, 0.0 }
0x3f27   : > { %6828 = vadd.xlane.f32.xlu0 %v6827_v25 }
0x3f3d   : > { %6833 = vrot.lane.b32.xlu0 %v12802_v41, %s13380_s13  ;;  %s13404_s13 = sld [smem:[#allocation122_spill]] }
0x3f43   : > { %v10054_v1 = vld [vmem:[%s13404_s13 + $0x8] sm:$0xff]  }
0x3f53   : > { %v6764_v26 = vpop.f32.mrb[140].mxu1 }
0x3f54   : > { %v6770_v20 = vadd.f32 %v6764_v26, %v12862_v46  ;;  %v9448_v27 = vpop.f32.mrb[141].mxu1  ;;  %v10052_v46 = vld [vmem:[%s13403_s6 + $0x8] sm:$0xff]  }
0x3f55   : > { %v6767_v28 = vpop.f32.mrb[142].mxu1  ;;  %v12949_v27 = vld [vmem:[%s12237_s1] ss:$0 sm:$0xff]  ;;  %s8794_s1 = sshll.u32 %s11701_s22, 7  ;;  %s11299_s22 = smov [#allocation50]  }
0x3f56   : > { %v9449_v3 = vpop.f32.mrb[143].mxu1 }
0x3fb4   : > { %v6829_v29 = vpop.xlane.xlu0 %6828 }
0x3fb5   : > { %10157 = vrcp.f32 %v6829_v29 }
0x3fb8   : > { %v6834_v30 = vpop.permute.xlu0 %6833 }
0x3fb9   : > { %v6839_v32 = vsel %vm2738_vm3, %v6834_v30, 0 }
0x3fba   : > { %9457 = vmatpush3.bf16.msra.mxu1 %v6839_v32 }
0x3fbb   : > { %9468 = vmatprep.subr.bf16.mxu1 %v11286_v0 }
0x3fbf   : > { %v10158_v33 = vpop.eup %10157 }
0x3fc0   : > { %v6831_v11 = vmul.f32 %v10158_v33, %v10156_v24 }
0x3fc2   : > { %v6832_v41 = vpack.c.bf16 %v6831_v11, %v6831_v11 }
0x3fc4   : > { %9459 = vmatmul.mubr.msk.bf16.vlgmr.msra.gmra.mrb[144].mxu1 %vm2674_vm2, %v6832_v41 }
0x3fc5   : > { %9472 = vmatprep.mubr.msk.bf16.mxu1 %vm11287_vm0, %v11286_v0 }
0x4097   : > { %v6875_v38 = vpop.f32.mrb[144].mxu1 }
0x4098   : > { %v6881_v40 = vpack.c.bf16 %v6875_v38, %v6875_v38  ;;  %v9460_v42 = vpop.f32.mrb[145].mxu1 }
0x4099   : > { %v6878_v43 = vpop.f32.mrb[146].mxu1 }
0x409a   : > { %v9461_v45 = vpop.f32.mrb[147].mxu1  ;;  %9465 = vmatmul.mubr.msk.bf16.vlgmr.msra.gmra.mrb[136].mxu0 %vm2674_vm2, %v6881_v40 }
0x409b   : > { %9477 = vmatpush3.bf16.msra.mxu0 %v10051_v39  ;;  %9480 = vmatprep.mubr.msk.bf16.mxu0 %vm11287_vm0, %v11286_v0 }
0x409c   : > { %9478 = vmatprep.subr.bf16.mxu0 %v11286_v0 }
0x409f   : > { %9479 = vmatpush3.bf16.msra.mxu0 %v10052_v46 }
0x40a0   : > { %9490 = vmatprep.subr.bf16.mxu0 %v11286_v0 }
0x40a2   : > { %9481 = vmatmul.mubr.msk.bf16.vlgmr.msra.gmra.mrb[140].mxu0 %vm2620_vm1, %v12643_v63 }
0x40a3   : > { %9492 = vmatprep.mubr.msk.bf16.mxu0 %vm11287_vm0, %v11286_v0 }
0x416d   : > { %v6924_v48 = vpop.f32.mrb[136].mxu0 }
0x416e   : > { %v6930_v50 = vadd.f32 %v6924_v48, %v6770_v20  ;;  %v9466_v51 = vpop.f32.mrb[137].mxu0 }
0x416f   : > { %v6927_v14 = vpop.f32.mrb[138].mxu0 }
0x4170   : > { %v6938_v52 = vadd.f32 %v8746_v49, %v6930_v50  ;;  %v9467_v53 = vpop.f32.mrb[139].mxu0 }
0x4172   : > { %v6939_v31 = vadd.f32 %v6938_v52, %v12795_v34  ;;  %v10053_v34 = vld [vmem:[%s13404_s13] sm:$0xff]  }
0x4173   : > { %9469 = vmatpush3.bf16.msra.mxu1 %v10053_v34 }
0x4174   : > { %v6942_v54 = vsel %vm2620_vm1, %v6939_v31, 0.0  ;;  %9470 = vmatprep.subr.bf16.mxu1 %v11286_v0 }
0x4175   : > { %6943 = vadd.xlane.f32.xlu1 %v6942_v54  ;;  %v7093_v55 = vpop.f32.mrb[140].mxu0 }
0x4176   : > { %v9482_v56 = vpop.f32.mrb[141].mxu0  ;;  %v7094_v62 = vadd.f32 %v8753_v61, %v7093_v55 }
0x4177   : > { %v7096_v63 = vpop.f32.mrb[142].mxu0  ;;  %9471 = vmatpush3.bf16.msra.mxu1 %v10054_v1 }
0x4178   : > { %v9483_v47 = vpop.f32.mrb[143].mxu0  ;;  %v12917_v17 = vpack.c.bf16 %v7094_v62, %v7094_v62  ;;  %9484 = vmatprep.subr.bf16.mxu1 %v11286_v0 }
0x417a   : > { %v7105_v35 = vsel %vm2674_vm2, %v12917_v17, 0 }
0x4202   : > { %v6944_v57 = vpop.xlane.xlu1 %6943 }
0x4203   : > { %v6945_v58 = vmul.f32 0.03125, %v6944_v57 }
0x4205   : > { %v6946_v59 = vsub.f32 %v6939_v31, %v6945_v58 }
0x4207   : > { %v6947_v60 = vmul.f32 %v6946_v59, %v6946_v59 }
0x4209   : > { %v6948_v10 = vsel %vm2620_vm1, %v6947_v60, 0.0 }
0x420a   : > { %6949 = vadd.xlane.f32.xlu1 %v6948_v10 }
0x421b   : > { %7213 = vrot.lane.b32.xlu1 %v12917_v17, %s13371_s3 }
0x4297   : > { %v6950_v2 = vpop.xlane.xlu1 %6949 }
0x4298   : > { %v6951_v4 = vmul.f32 0.03125, %v6950_v2 }
0x429a   : > { %v6952_v5 = vadd.f32 1e-05, %v6951_v4 }
0x429b   : > { %v7214_v23 = vpop.permute.xlu1 %7213 }
0x429c   : > { %10159 = vrsqrt.f32 %v6952_v5  ;;  %v7219_v25 = vsel %vm2674_vm2, %v7214_v23, 0 }
0x42a6   : > { %v10160_v6 = vpop.eup %10159 }
0x42a7   : > { %v6954_v9 = vmul.f32 %v10160_v6, %v6946_v59 }
0x42a9   : > { %v6961_v8 = vmul.f32 %v8747_v7, %v6954_v9 }
0x42ab   : > { %v12925_v12 = vadd.f32 %v8748_v19, %v6961_v8 }
0x42ad   : > { %v6969_v13 = vpack.c.bf16 %v12925_v12, %v12925_v12 }
0x42af   : > { %9473 = vmatmul.mubr.msk.bf16.vlgmr.msra.gmra.mrb[148].mxu1 %vm2620_vm1, %v6969_v13 }
0x42b0   : > { %9485 = vmatpush3.bf16.xpose.msra.mxu1 %v7105_v35  ;;  %9486 = vmatprep.mubr.msk.bf16.mxu1 %vm11287_vm0, %v11286_v0 }
0x42b1   : > { %9496 = vmatprep.subr.bf16.mxu1 %v11286_v0 }
0x4382   : > { %v7030_v15 = vpop.f32.mrb[148].mxu1 }
0x4383   : > { %v7031_v18 = vadd.f32 %v8749_v44, %v7030_v15  ;;  %v9474_v16 = vpop.f32.mrb[149].mxu1 }
0x4384   : > { %v7033_v21 = vpop.f32.mrb[150].mxu1 }
0x4385   : > { %v12935_v22 = vpack.c.bf16 %v7031_v18, %v7031_v18  ;;  %v9475_v24 = vpop.f32.mrb[151].mxu1 }
0x4387   : > { %7211 = vrot.lane.b32.xlu0 %v12935_v22, %s13371_s3  ;;  %9487 = vmatmul.mubr.msk.bf16.vlgmr.msra.gmra.mrb[152].mxu1 %vm2674_vm2, %v12935_v22  ;;  %s13405_s3 = sld [smem:[#allocation126_spill]] }
0x4388   : > { %9497 = vmatpush3.bf16.xpose.msra.mxu1 %v7219_v25  ;;  %9498 = vmatprep.mubr.msk.bf16.mxu1 %vm11287_vm0, %v11286_v0 }
0x4389   : > { %9508 = vmatprep.subr.bf16.mxu1 %v11286_v0 }
0x438d   : > { %v8761_v56 = vld [vmem:[%s13405_s3 + $0x4] sm:$0xf]  ;;  %v7209_v60 = vld [vmem:[%s13405_s3] sm:$0xf] }
0x438e   : > { %v7328_v63 = vsel %vm2738_vm3, %v8761_v56, 0  ;;  %v7374_v62 = vsel %vm2738_vm3, %v7209_v60, 0 }
0x43f9   : > { %v7212_v26 = vpop.permute.xlu0 %7211 }
0x43fa   : > { %9499 = vmatmul.mubr.msk.bf16.vlgmr.msra.gmra.mrb[156].mxu1 %vm2674_vm2, %v7212_v26 }
0x43fb   : > { %9510 = vmatprep.mubr.msk.bf16.mxu1 %vm11287_vm0, %v11286_v0  ;;  %9509 = vmatpush3.bf16.msra.mxu1 %v7328_v63 }
0x43fc   : > { %9520 = vmatprep.subr.bf16.mxu1 %v11286_v0 }
0x445a   : > { %v7141_v20 = vpop.f32.mrb[152].mxu1 }
0x445b   : > { %v7142_v28 = vadd.f32 %v12949_v27, %v7141_v20  ;;  %v9488_v3 = vpop.f32.mrb[153].mxu1 }
0x445c   : > { %v7144_v29 = vpop.f32.mrb[154].mxu1 }
0x445d   : > { %v9489_v30 = vpop.f32.mrb[155].mxu1  ;;  %v7147_v32 = vsel %vm2674_vm2, %v7142_v28, -inf }
0x445e   : > { %7148 = vmax.xlane.f32.xlu0 %v7147_v32 }
0x44cd   : > { %v7255_v33 = vpop.f32.mrb[156].mxu1 }
0x44ce   : > { %v7256_v11 = vadd.f32 %v12949_v27, %v7255_v33  ;;  %v9500_v41 = vpop.f32.mrb[157].mxu1 }
0x44cf   : > { %v7258_v36 = vpop.f32.mrb[158].mxu1 }
0x44d0   : > { %v9501_v37 = vpop.f32.mrb[159].mxu1  ;;  %v7261_v38 = vsel %vm2674_vm2, %v7256_v11, -inf }
0x44d1   : > { %7262 = vmax.xlane.f32.xlu1 %v7261_v38 }
0x44e2   : > { %7160 = vrot.lane.b32.xlu1 %v12917_v17, %s13370_s0  ;;  %s13065_s0 = scalar_lea.hbm %s11678_s19, %s8794_s1 }
0x44e6   : > { %7418 = vrot.lane.b32.xlu1 %v12917_v17, %s13373_s4 }
0x44ea   : > { %7416 = vrot.lane.b32.xlu1 %v12935_v22, %s13373_s4  ;;  %s2574_s4 = sand.u32 1, %s11171_s15  }
0x44eb   : > { %v7149_v39 = vpop.xlane.xlu0 %7148  ;;  %s8053_s16 = scalar_lea.sflag [#allocation4], %s2574_s4 }
0x44ec   : > { %v7150_v40 = vsub.f32 %v7142_v28, %v7149_v39 }
0x44ee   : > { %v7151_v42 = vmul.f32 1.442695, %v7150_v40 }
0x44f0   : > { %10161 = vpow2.f32 %v7151_v42 }
0x44fa   : > { %v10162_v43 = vpop.eup %10161 }
0x44fb   : > { %v7153_v45 = vsel %vm2674_vm2, %v10162_v43, 0.0 }
0x44fc   : > { %7154 = vadd.xlane.f32.xlu0 %v7153_v45 }
0x455e   : > { %v7263_v46 = vpop.xlane.xlu1 %7262 }
0x455f   : > { %v7264_v48 = vsub.f32 %v7256_v11, %v7263_v46 }
0x4561   : > { %v7265_v49 = vmul.f32 1.442695, %v7264_v48 }
0x4562   : > { %v7161_v50 = vpop.permute.xlu1 %7160 }
0x4563   : > { %10163 = vpow2.f32 %v7265_v49  ;;  %v7166_v51 = vsel %vm2738_vm3, %v7161_v50, 0  ;;  %v8766_v50 = vld [vmem:[%s13405_s3 + $0x8] sm:$0xf] }
0x4564   : > { %9491 = vmatpush3.bf16.msra.mxu0 %v7166_v51  ;;  %v7533_v51 = vsel %vm2738_vm3, %v8766_v50, 0 }
0x4565   : > { %9502 = vmatprep.subr.bf16.mxu0 %v11286_v0 }
0x4566   : > { %v7419_v6 = vpop.permute.xlu1 %7418 }
0x4567   : > { %v7424_v13 = vsel %vm2674_vm2, %v7419_v6, 0 }
0x456a   : > { %v7417_v44 = vpop.permute.xlu1 %7416 }
0x456d   : > { %v10164_v14 = vpop.eup %10163 }
0x456e   : > { %v7267_v52 = vsel %vm2674_vm2, %v10164_v14, 0.0 }
0x456f   : > { %7268 = vadd.xlane.f32.xlu0 %v7267_v52 }
0x4585   : > { %7273 = vrot.lane.b32.xlu0 %v12917_v17, %s13369_s2 }
0x4589   : > { %v7155_v53 = vpop.xlane.xlu0 %7154 }
0x458a   : > { %10165 = vrcp.f32 %v7155_v53 }
0x4594   : > { %v10166_v31 = vpop.eup %10165 }
0x4595   : > { %v7157_v54 = vmul.f32 %v10166_v31, %v10162_v43 }
0x4597   : > { %v7158_v55 = vpack.c.bf16 %v7157_v54, %v7157_v54 }
0x4599   : > { %9493 = vmatmul.mubr.msk.bf16.vlgmr.msra.gmra.mrb[144].mxu0 %vm2674_vm2, %v7158_v55 }
0x459a   : > { %9504 = vmatprep.mubr.msk.bf16.mxu0 %vm11287_vm0, %v11286_v0 }
0x45fc   : > { %v7269_v47 = vpop.xlane.xlu0 %7268 }
0x45fd   : > { %10167 = vrcp.f32 %v7269_v47 }
0x4600   : > { %v7274_v57 = vpop.permute.xlu0 %7273 }
0x4601   : > { %v7279_v58 = vsel %vm2738_vm3, %v7274_v57, 0 }
0x4602   : > { %9503 = vmatpush3.bf16.msra.mxu0 %v7279_v58 }
0x4603   : > { %9514 = vmatprep.subr.bf16.mxu0 %v11286_v0 }
0x4607   : > { %v10168_v59 = vpop.eup %10167 }
0x4608   : > { %v7271_v10 = vmul.f32 %v10168_v59, %v10164_v14 }
0x460a   : > { %v7272_v61 = vpack.c.bf16 %v7271_v10, %v7271_v10 }
0x460c   : > { %9505 = vmatmul.mubr.msk.bf16.vlgmr.msra.gmra.mrb[148].mxu0 %vm2674_vm2, %v7272_v61 }
0x460d   : > { %9515 = vmatpush3.bf16.msra.mxu0 %v7374_v62  ;;  %9516 = vmatprep.mubr.msk.bf16.mxu0 %vm11287_vm0, %v11286_v0 }
0x460e   : > { %9526 = vmatprep.subr.bf16.mxu0 %v11286_v0 }
0x466c   : > { %v7202_v34 = vpop.f32.mrb[144].mxu0 }
0x466d   : > { %v7208_v1 = vpack.c.bf16 %v7202_v34, %v7202_v34  ;;  %v9494_v2 = vpop.f32.mrb[145].mxu0 }
0x466e   : > { %v7205_v4 = vpop.f32.mrb[146].mxu0 }
0x466f   : > { %v9495_v5 = vpop.f32.mrb[147].mxu0  ;;  %9517 = vmatmul.mubr.msk.bf16.vlgmr.msra.gmra.mrb[152].mxu0 %vm2674_vm2, %v7208_v1 }
0x4670   : > { %9528 = vmatprep.mubr.msk.bf16.mxu0 %vm11287_vm0, %v11286_v0 }
0x46df   : > { %v7315_v7 = vpop.f32.mrb[148].mxu0 }
0x46e0   : > { %v7321_v9 = vpack.c.bf16 %v7315_v7, %v7315_v7  ;;  %v9506_v19 = vpop.f32.mrb[149].mxu0 }
0x46e1   : > { %v7318_v8 = vpop.f32.mrb[150].mxu0 }
0x46e2   : > { %v9507_v35 = vpop.f32.mrb[151].mxu0  ;;  %9511 = vmatmul.mubr.msk.bf16.vlgmr.msra.gmra.mrb[160].mxu1 %vm2674_vm2, %v7321_v9 }
0x46e3   : > { %9521 = vmatpush3.bf16.xpose.msra.mxu1 %v7424_v13  ;;  %9522 = vmatprep.mubr.msk.bf16.mxu1 %vm11287_vm0, %v11286_v0 }
0x46e4   : > { %9532 = vmatprep.subr.bf16.mxu1 %v11286_v0 }
0x46ea   : > { %9523 = vmatmul.mubr.msk.bf16.vlgmr.msra.gmra.mrb[164].mxu1 %vm2674_vm2, %v7417_v44 }
0x46eb   : > { %9534 = vmatprep.mubr.msk.bf16.mxu1 %vm11287_vm0, %v11286_v0  ;;  %9533 = vmatpush3.bf16.msra.mxu1 %v7533_v51 }
0x46ec   : > { %9544 = vmatprep.subr.bf16.mxu1 %v11286_v0 }
0x4742   : > { %v7410_v15 = vpop.f32.mrb[152].mxu0 }
0x4743   : > { %v9518_v18 = vpop.f32.mrb[153].mxu0 }
0x4744   : > { %v7413_v16 = vpop.f32.mrb[154].mxu0 }
0x4745   : > { %v9519_v23 = vpop.f32.mrb[155].mxu0 }
0x47b5   : > { %v7364_v21 = vpop.f32.mrb[160].mxu1 }
0x47b6   : > { %v12992_v24 = vadd.f32 %v7410_v15, %v7364_v21  ;;  %v9512_v25 = vpop.f32.mrb[161].mxu1  ;;  %v8772_v21 = vld [vmem:[#allocation35] ss:$0 sm:$0xff] }
0x47b7   : > { %v7367_v26 = vpop.f32.mrb[162].mxu1 }
0x47b8   : > { %v9513_v20 = vpop.f32.mrb[163].mxu1 }
0x47bd   : > { %v7460_v28 = vpop.f32.mrb[164].mxu1 }
0x47be   : > { %v7461_v3 = vadd.f32 %v12949_v27, %v7460_v28  ;;  %v9524_v29 = vpop.f32.mrb[165].mxu1 }
0x47bf   : > { %v7463_v30 = vpop.f32.mrb[166].mxu1 }
0x47c0   : > { %v9525_v32 = vpop.f32.mrb[167].mxu1  ;;  %v7466_v33 = vsel %vm2674_vm2, %v7461_v3, -inf }
0x47c1   : > { %7467 = vmax.xlane.f32.xlu0 %v7466_v33 }
0x47d7   : > { %7478 = vrot.lane.b32.xlu0 %v12917_v17, %s13375_s8 }
0x47db   : > { %7576 = vrot.lane.b32.xlu0 %v12935_v22, %s13378_s11 }
0x484e   : > { %v7468_v11 = vpop.xlane.xlu0 %7467 }
0x484f   : > { %v7469_v41 = vsub.f32 %v7461_v3, %v7468_v11 }
0x4851   : > { %v7470_v36 = vmul.f32 1.442695, %v7469_v41 }
0x4852   : > { %v7479_v37 = vpop.permute.xlu0 %7478 }
0x4853   : > { %10169 = vpow2.f32 %v7470_v36  ;;  %v7484_v38 = vsel %vm2738_vm3, %v7479_v37, 0  ;;  %v10055_v36 = vld [vmem:[%s13406_s10] sm:$0xff]   ;;  %v10056_v37 = vld [vmem:[%s13406_s10 + $0x8] sm:$0xff]  }
0x4854   : > { %9527 = vmatpush3.bf16.msra.mxu0 %v7484_v38 }
0x4855   : > { %9538 = vmatprep.subr.bf16.mxu0 %v11286_v0 }
0x4856   : > { %v7577_v49 = vpop.permute.xlu0 %7576 }
0x485d   : > { %v10170_v39 = vpop.eup %10169 }
0x485e   : > { %v7472_v40 = vsel %vm2674_vm2, %v10170_v39, 0.0 }
0x485f   : > { %7473 = vadd.xlane.f32.xlu1 %v7472_v40 }
0x4870   : > { %7578 = vrot.lane.b32.xlu1 %v12917_v17, %s13378_s11  ;;  %s13407_s11 = sld [smem:[#allocation131_spill]] }
0x4876   : > { %v10058_v38 = vld [vmem:[%s13407_s11 + $0x8] sm:$0xff]   ;;  %v10059_v51 = vld [vmem:[%s13407_s11 + $0x10] sm:$0xff]  }
0x48ec   : > { %v7474_v42 = vpop.xlane.xlu1 %7473 }
0x48ed   : > { %10171 = vrcp.f32 %v7474_v42 }
0x48f0   : > { %v7579_v45 = vpop.permute.xlu1 %7578 }
0x48f1   : > { %v7584_v48 = vsel %vm2674_vm2, %v7579_v45, 0 }
0x48f7   : > { %v10172_v22 = vpop.eup %10171 }
0x48f8   : > { %v7476_v43 = vmul.f32 %v10172_v22, %v10170_v39 }
0x48fa   : > { %v7477_v46 = vpack.c.bf16 %v7476_v43, %v7476_v43  ;;  %v8773_v43 = vld [vmem:[#allocation37] ss:$0 sm:$0xff] }
0x48fc   : > { %9529 = vmatmul.mubr.msk.bf16.vlgmr.msra.gmra.mrb[156].mxu0 %vm2674_vm2, %v7477_v46  ;;  %v8774_v46 = vld [vmem:[#allocation38] ss:$0 sm:$0xff] }
0x48fd   : > { %9539 = vmatpush3.bf16.xpose.msra.mxu0 %v7584_v48  ;;  %9540 = vmatprep.mubr.msk.bf16.mxu0 %vm11287_vm0, %v11286_v0 }
0x48fe   : > { %9550 = vmatprep.subr.bf16.mxu0 %v11286_v0 }
0x4904   : > { %9541 = vmatmul.mubr.msk.bf16.vlgmr.msra.gmra.mrb[160].mxu0 %vm2674_vm2, %v7577_v49 }
0x4905   : > { %9552 = vmatprep.mubr.msk.bf16.mxu0 %vm11287_vm0, %v11286_v0 }
0x49cf   : > { %v7520_v14 = vpop.f32.mrb[156].mxu0 }
0x49d0   : > { %v7526_v52 = vpack.c.bf16 %v7520_v14, %v7520_v14  ;;  %v9530_v53 = vpop.f32.mrb[157].mxu0  ;;  %v10060_v14 = vld [vmem:[%s13407_s11 + $0x18] sm:$0xff]  }
0x49d1   : > { %v7523_v31 = vpop.f32.mrb[158].mxu0 }
0x49d2   : > { %v9531_v54 = vpop.f32.mrb[159].mxu0  ;;  %9535 = vmatmul.mubr.msk.bf16.vlgmr.msra.gmra.mrb[168].mxu1 %vm2674_vm2, %v7526_v52  ;;  %v8775_v52 = vld [vmem:[#allocation40] ss:$0 sm:$0xff] }
0x49d3   : > { %9546 = vmatprep.mubr.msk.bf16.mxu1 %vm11287_vm0, %v11286_v0 }
0x49d7   : > { %v7620_v55 = vpop.f32.mrb[160].mxu0 }
0x49d8   : > { %v7621_v56 = vadd.f32 %v12949_v27, %v7620_v55  ;;  %v9542_v63 = vpop.f32.mrb[161].mxu0 }
0x49d9   : > { %v7623_v47 = vpop.f32.mrb[162].mxu0 }
0x49da   : > { %v9543_v57 = vpop.f32.mrb[163].mxu0  ;;  %v7626_v58 = vsel %vm2674_vm2, %v7621_v56, -inf }
0x49db   : > { %7627 = vmax.xlane.f32.xlu1 %v7626_v58  ;;  %v8779_v57 = vld [vmem:[#allocation41] ss:$0 sm:$0xff] }
0x4a68   : > { %v7628_v59 = vpop.xlane.xlu1 %7627 }
0x4a69   : > { %v7629_v60 = vsub.f32 %v7621_v56, %v7628_v59 }
0x4a6b   : > { %v7630_v10 = vmul.f32 1.442695, %v7629_v60 }
0x4a6d   : > { %10173 = vpow2.f32 %v7630_v10 }
0x4a77   : > { %v10174_v61 = vpop.eup %10173 }
0x4a78   : > { %v7632_v62 = vsel %vm2674_vm2, %v10174_v61, 0.0 }
0x4a79   : > { %7633 = vadd.xlane.f32.xlu0 %v7632_v62 }
0x4a8f   : > { %7638 = vrot.lane.b32.xlu0 %v12917_v17, %s13379_s12  ;;  %v8770_v17 = vld [vmem:[%s13405_s3 + $0xc] sm:$0xf]  ;;  %s8592_s12 = sshll.u32 %s2574_s4, 3 }
0x4a90   : > { %v7693_v13 = vsel %vm2738_vm3, %v8770_v17, 0  ;;  %s2576_s8 = scalar_lea.vmem [#allocation50], %s8592_s12  ;;  %s11057_s12 = sshll.u32 %s11299_s22, 4  ;;  %s11058_s12 = int_to_ptr.vmem [resolvable:$false] %s11057_s12 }
0x4a91   : > { %9551 = vmatpush3.bf16.msra.mxu0 %v7693_v13  ;;  %v8786_v13 = vld [vmem:[#allocation44] ss:$0 sm:$0xff]  ;;  %s8066_s2 = sshll.u32 %s2576_s8, 4  ;;  %s13067_s2 = int_to_ptr.vmem [resolvable:$true] %s8066_s2 }
0x4a92   : > { %9564 = vmatprep.subr.bf16.mxu0 %v11286_v0  ;;  %s11053_s3 = scalar_lea.vmem %s13067_s2, 128  ;;  %p11060_p10 = scmp.lt.s32.totalorder %s13067_s2, %s11058_s12 }
0x4a93   : > { %p11054_p12 = scmp.ne.s32.totalorder %s13067_s2, %s11053_s3 }
0x4a95   : > { %p11055_p6 = pnand %p11054_p12, %p13408_p5 }
0x4a97   : > { %p11056_p9 = pneg %p11055_p6 }
0x4aa5   : > { %v7569_v34 = vpop.f32.mrb[168].mxu1 }
0x4aa6   : > { %v7575_v27 = vadd.f32 %v7569_v34, %v12992_v24  ;;  %v9536_v1 = vpop.f32.mrb[169].mxu1 }
0x4aa7   : > { %v7572_v2 = vpop.f32.mrb[170].mxu1 }
0x4aa8   : > { %v9537_v4 = vpop.f32.mrb[171].mxu1 }
0x4b06   : > { %v7634_v5 = vpop.xlane.xlu0 %7633 }
0x4b07   : > { %10175 = vrcp.f32 %v7634_v5 }
0x4b0a   : > { %v7639_v6 = vpop.permute.xlu0 %7638 }
0x4b0b   : > { %v7644_v7 = vsel %vm2738_vm3, %v7639_v6, 0 }
0x4b0c   : > { %9545 = vmatpush3.bf16.msra.mxu1 %v7644_v7 }
0x4b0d   : > { %9556 = vmatprep.subr.bf16.mxu1 %v11286_v0 }
0x4b11   : > { %v10176_v9 = vpop.eup %10175 }
0x4b12   : > { %v7636_v19 = vmul.f32 %v10176_v9, %v10174_v61 }
0x4b14   : > { %v7637_v8 = vpack.c.bf16 %v7636_v19, %v7636_v19 }
0x4b16   : > { %9547 = vmatmul.mubr.msk.bf16.vlgmr.msra.gmra.mrb[172].mxu1 %vm2674_vm2, %v7637_v8  ;;  %v8785_v8 = vld [vmem:[#allocation43] ss:$0 sm:$0xff] }
0x4b17   : > { %9560 = vmatprep.mubr.msk.bf16.mxu1 %vm11287_vm0, %v11286_v0  ;;  %9557 = vmatpush3.bf16.msra.mxu1 %v10055_v36 }
0x4b18   : > { %9558 = vmatprep.subr.bf16.mxu1 %v11286_v0 }
0x4b1b   : > { %9559 = vmatpush3.bf16.msra.mxu1 %v10056_v37 }
0x4b1c   : > { %9576 = vmatprep.subr.bf16.mxu1 %v11286_v0 }
0x4be9   : > { %v7680_v35 = vpop.f32.mrb[172].mxu1 }
0x4bea   : > { %v7686_v44 = vpack.c.bf16 %v7680_v35, %v7680_v35  ;;  %v9548_v15 = vpop.f32.mrb[173].mxu1 }
0x4beb   : > { %v7683_v18 = vpop.f32.mrb[174].mxu1 }
0x4bec   : > { %v9549_v16 = vpop.f32.mrb[175].mxu1  ;;  %9553 = vmatmul.mubr.msk.bf16.vlgmr.msra.gmra.mrb[164].mxu0 %vm2674_vm2, %v7686_v44 }
0x4bed   : > { %9572 = vmatprep.mubr.msk.bf16.mxu0 %vm11287_vm0, %v11286_v0 }
0x4cbf   : > { %v7729_v23 = vpop.f32.mrb[164].mxu0 }
0x4cc0   : > { %v7735_v24 = vadd.f32 %v7729_v23, %v7575_v27  ;;  %v9554_v25 = vpop.f32.mrb[165].mxu0 }
0x4cc1   : > { %v7732_v26 = vpop.f32.mrb[166].mxu0  ;;  %v10061_v25 = vld [vmem:[%s13280_s5] sm:$0xff]  }
0x4cc2   : > { %v7743_v20 = vadd.f32 %v8772_v21, %v7735_v24  ;;  %v9555_v28 = vpop.f32.mrb[167].mxu0  ;;  %v10062_v26 = vld [vmem:[%s13280_s5 + $0x8] sm:$0xff]   ;;  %s11059_s5 = scalar_lea.vmem %s11058_s12, 256 }
0x4cc3   : > { %p11061_p7 = scmp.lt.s32.totalorder %s11059_s5, %s11053_s3 }
0x4cc4   : > { %v7744_v3 = vadd.f32 %v7743_v20, %v12925_v12  ;;  %v10057_v12 = vld [vmem:[%s13407_s11] sm:$0xff]  }
0x4cc5   : > { %9565 = vmatpush3.bf16.msra.mxu0 %v10057_v12  ;;  %p11062_p8 = por %p11061_p7, %p11060_p10 }
0x4cc6   : > { %v7747_v29 = vsel %vm2620_vm1, %v7744_v3, 0.0  ;;  %9566 = vmatprep.subr.bf16.mxu0 %v11286_v0 }
0x4cc7   : > { %7748 = vadd.xlane.f32.xlu1 %v7747_v29  ;;  %p11063_p11 = pnand %p11062_p8, %p11056_p9 }
0x4cc9   : > { %9567 = vmatpush3.bf16.msra.mxu0 %v10058_v38 }
0x4cca   : > { %9568 = vmatprep.subr.bf16.mxu0 %v11286_v0 }
0x4ccd   : > { %9569 = vmatpush3.bf16.msra.mxu0 %v10059_v51 }
0x4cce   : > { %9570 = vmatprep.subr.bf16.mxu0 %v11286_v0 }
0x4cd1   : > { %9571 = vmatpush3.bf16.msra.mxu0 %v10060_v14 }
0x4d54   : > { %v7749_v30 = vpop.xlane.xlu1 %7748 }
0x4d55   : > { %v7750_v32 = vmul.f32 0.03125, %v7749_v30  ;;  %v8787_v30 = vld [vmem:[#allocation46] ss:$0 sm:$0xff] }
0x4d57   : > { %v7751_v33 = vsub.f32 %v7744_v3, %v7750_v32 }
0x4d59   : > { %v7752_v11 = vmul.f32 %v7751_v33, %v7751_v33 }
0x4d5b   : > { %v7753_v41 = vsel %vm2620_vm1, %v7752_v11, 0.0 }
0x4d5c   : > { %7754 = vadd.xlane.f32.xlu1 %v7753_v41 }
0x4de9   : > { %v7755_v39 = vpop.xlane.xlu1 %7754 }
0x4dea   : > { %v7756_v40 = vmul.f32 0.03125, %v7755_v39 }
0x4dec   : > { %v7757_v42 = vadd.f32 1e-05, %v7756_v40 }
0x4dee   : > { %10177 = vrsqrt.f32 %v7757_v42 }
0x4df8   : > { %v10178_v22 = vpop.eup %10177 }
0x4df9   : > { %v7759_v45 = vmul.f32 %v10178_v22, %v7751_v33  ;;  %v8788_v33 = vld [vmem:[#allocation47] ss:$0 sm:$0xff] }
0x4dfb   : > { %v7766_v48 = vmul.f32 %v8773_v43, %v7759_v45 }
0x4dfd   : > { %v7773_v49 = vadd.f32 %v8774_v46, %v7766_v48 }
0x4dff   : > { %v7774_v50 = vpack.c.bf16 %v7773_v49, %v7773_v49 }
0x4e01   : > { %9561 = vmatmul.mubr.msk.bf16.vlgmr.msra.gmra.mrb[176].mxu1 %vm2620_vm1, %v7774_v50 }
0x4e02   : > { %9580 = vmatprep.mubr.msk.bf16.mxu1 %vm11287_vm0, %v11286_v0  ;;  %9577 = vmatpush3.bf16.msra.mxu1 %v10061_v25 }
0x4e03   : > { %9578 = vmatprep.subr.bf16.mxu1 %v11286_v0  ;;  %v8789_v0 = vld [vmem:[#allocation49] ss:$0 sm:$0xff] }
0x4e06   : > { %9579 = vmatpush3.bf16.msra.mxu1 %v10062_v26 }
0x4ed4   : > { %v7835_v53 = vpop.f32.mrb[176].mxu1 }
0x4ed5   : > { %v7836_v31 = vadd.f32 %v8775_v52, %v7835_v53  ;;  %v9562_v54 = vpop.f32.mrb[177].mxu1 }
0x4ed6   : > { %v7838_v55 = vpop.f32.mrb[178].mxu1 }
0x4ed7   : > { %v7841_v56 = vmax.f32 %v7836_v31, 0.0  ;;  %v9563_v63 = vpop.f32.mrb[179].mxu1 }
0x4ed9   : > { %v7842_v47 = vpack.c.bf16 %v7841_v56, %v7841_v56 }
0x4edb   : > { %9573 = vmatmul.mubr.msk.bf16.vlgmr.msra.gmra.mrb[168].mxu0 %vm3456_vm4, %v7842_v47 }
0x4fae   : > { %v7919_v58 = vpop.f32.mrb[168].mxu0 }
0x4faf   : > { %v7920_v59 = vadd.f32 %v8779_v57, %v7919_v58  ;;  %v9574_v60 = vpop.f32.mrb[169].mxu0 }
0x4fb0   : > { %v7922_v10 = vpop.f32.mrb[170].mxu0 }
0x4fb1   : > { %v7925_v61 = vadd.f32 %v7920_v59, %v7773_v49  ;;  %v9575_v62 = vpop.f32.mrb[171].mxu0 }
0x4fb3   : > { %v7928_v34 = vsel %vm2620_vm1, %v7925_v61, 0.0 }
0x4fb4   : > { %7929 = vadd.xlane.f32.xlu1 %v7928_v34 }
0x5041   : > { %v7930_v27 = vpop.xlane.xlu1 %7929 }
0x5042   : > { %v7931_v1 = vmul.f32 0.03125, %v7930_v27 }
0x5044   : > { %v7932_v2 = vsub.f32 %v7925_v61, %v7931_v1 }
0x5046   : > { %v7933_v4 = vmul.f32 %v7932_v2, %v7932_v2 }
0x5048   : > { %v7934_v5 = vsel %vm2620_vm1, %v7933_v4, 0.0 }
0x5049   : > { %7935 = vadd.xlane.f32.xlu1 %v7934_v5 }
0x50d6   : > { %v7936_v6 = vpop.xlane.xlu1 %7935 }
0x50d7   : > { %v7937_v7 = vmul.f32 0.03125, %v7936_v6 }
0x50d9   : > { %v7938_v9 = vadd.f32 1e-05, %v7937_v7 }
0x50db   : > { %10179 = vrsqrt.f32 %v7938_v9 }
0x50e5   : > { %v10180_v19 = vpop.eup %10179 }
0x50e6   : > { %v7940_v17 = vmul.f32 %v10180_v19, %v7932_v2 }
0x50e8   : > { %v7947_v35 = vmul.f32 %v8785_v8, %v7940_v17 }
0x50ea   : > { %v7954_v44 = vadd.f32 %v8786_v13, %v7947_v35 }
0x50ec   : > { %v7957_v15 = vsel %vm2620_vm1, %v7954_v44, 0.0 }
0x50ed   : > { %7958 = vadd.xlane.f32.xlu1 %v7957_v15 }
0x517a   : > { %v7959_v18 = vpop.xlane.xlu1 %7958 }
0x517b   : > { %v7960_v16 = vmul.f32 0.03125, %v7959_v18 }
0x517d   : > { %v7961_v23 = vsub.f32 %v7954_v44, %v7960_v16 }
0x517f   : > { %v7962_v21 = vmul.f32 %v7961_v23, %v7961_v23 }
0x5181   : > { %v7963_v24 = vsel %vm2620_vm1, %v7962_v21, 0.0 }
0x5182   : > { %7964 = vadd.xlane.f32.xlu1 %v7963_v24 }
0x520f   : > { %v7965_v20 = vpop.xlane.xlu1 %7964 }
0x5210   : > { %v7966_v28 = vmul.f32 0.03125, %v7965_v20 }
0x5212   : > { %v7967_v3 = vadd.f32 1e-05, %v7966_v28 }
0x5214   : > { %10181 = vrsqrt.f32 %v7967_v3 }
0x521e   : > { %v10182_v29 = vpop.eup %10181 }
0x521f   : > { %v7969_v32 = vmul.f32 %v10182_v29, %v7961_v23 }
0x5221   : > { %v7976_v11 = vmul.f32 %v8787_v30, %v7969_v32 }
0x5223   : > { %v7983_v41 = vadd.f32 %v8788_v33, %v7976_v11 }
0x5225   : > { %v7984_v36 = vpack.c.bf16 %v7983_v41, %v7983_v41 }
0x5227   : > { %9581 = vmatmul.mubr.msk.bf16.vlgmr.msra.gmra.mrb[180].mxu1 %vm2620_vm1, %v7984_v36 }
0x52fa   : > { %v8045_v37 = vpop.f32.mrb[180].mxu1 }
0x52fb   : > { %v8046_v12 = vadd.f32 %v8789_v0, %v8045_v37  ;;  %v9582_v38 = vpop.f32.mrb[181].mxu1 }
0x52fc   : > { %v8048_v39 = vpop.f32.mrb[182].mxu1 }
0x52fd   : > { %8051 = vst [vmem:[%s2576_s8] sm:$0xff] %v8046_v12  ;;  %v9583_v40 = vpop.f32.mrb[183].mxu1 }
0x52fe   : > { %11066 = shalt.err (!%p11063_p11)
}
0x52ff   : > { %s11067_s4 = scalar_lea.hbm %s13065_s0, 128  ;;  %s11071_s1 = scalar_lea.hbm %s11678_s19, 256 }
0x5300   : > { %p11068_p13 = scmp.ne.s32.totalorder %s13065_s0, %s11067_s4  ;;  %p11072_p0 = scmp.lt.u32.totalorder %s13065_s0, %s11678_s19 }
0x5301   : > { %p11073_p3 = scmp.lt.u32.totalorder %s11071_s1, %s11067_s4  ;;  %p11075_p12 = scmp.lt.u32.totalorder %s11067_s4, %s13065_s0 }
0x5302   : > { %p11069_p1 = pnand %p11068_p13, %p13408_p5 }
0x5303   : > { %p11074_p4 = por %p11073_p3, %p11072_p0 }
0x5304   : > { %p11070_p2 = pneg %p11069_p1 }
0x5305   : > { %p11076_p6 = por %p11075_p12, %p11074_p4 }
0x5307   : > { %p11077_p9 = pnand %p11076_p6, %p11070_p2 }
0x5309   : > { %11080 = shalt.err (!%p11077_p9)
}
0x530a   : > { %9708 = dma.vmem_to_hbm [thread:$0]  (%p13408_p5), %s13067_s2, 128, %s13065_s0, %s8053_s16  }
0x530b PF: > { %s13409_s5 = sld [smem:[#allocation139_spill]]  ;;  %s13410_s3 = sld [smem:[#allocation143_spill]] }
0x530c   : > { %p9870_p10 = scmp.ge.s32.totalorder %s11179_s18, 2 }
0x5311   : > { %s8078_s8 = sand.u32 1, %s13409_s5   ;;  %p13411_p7 = scmp.ne.s32.totalorder %s13410_s3, 0 }
0x5312   : > { %s8079_s22 = scalar_lea.sflag [#allocation4], %s8078_s8 }
0x5313   : > { %p9805_p8 = pnand %p9870_p10, %p13411_p7 }
0x5315   : > { %11162 = dma.done.wait (!%p9805_p8), %s8079_s22, 128  }
0x5316   : > { %11164 = vsyncadd (!%p9805_p8), %s8079_s22, 4294967168  ;;  %s13412_s18 = sld [smem:[#allocation141_spill]]  ;;  %s13413_s12 = sld [smem:[#allocation140_spill]] }
0x5317   : > { %s13414_s16 = sld [smem:[#allocation142_spill]]  ;;  %s13415_s0 = smov %s11171_s15 }
0x531c   : > { %p175_p11 = scmp.ge.s32.totalorder %s13412_s18, 4   ;;  %s13416_s15 = smov %s13413_s12 }
0x531e   :  { %177 = sbr.rel (!%p175_p11) target bundleno = 176 (0xb0), region = 577 }
0x5325   :  { %8084 = vsyncpa [#allocation3], 1 }
0x5326   :  { %8086 = vsyncpa [#allocation3 + $0x1], 1 }
0x5327   :  { %8087 = vsyncpa [#allocation6], 1 }
0x5328   :  { %8088 = vsyncpa [#allocation9], 1 }
0x5329   :  { %8089 = vsyncpa [#allocation12], 1 }
0x532a   :  { %8090 = vsyncpa [#allocation15], 1 }
0x532b   :  { %8091 = vsyncpa [#allocation18], 1 }
0x532c   :  { %8092 = vsyncpa [#allocation21], 1 }
0x532d   :  { %8093 = vsyncpa [#allocation24], 1 }
0x532e   :  { %8094 = vsyncpa [#allocation27], 1 }
0x532f   :  { %8095 = vsyncpa [#allocation30], 1 }
0x5330   :  { %8096 = vsyncpa [#allocation33], 1 }
0x5331   :  { %8097 = vsyncpa [#allocation36], 1 }
0x5332   :  { %8098 = vsyncpa [#allocation39], 1 }
0x5333   :  { %8099 = vsyncpa [#allocation42], 1 }
0x5334   :  { %8100 = vsyncpa [#allocation45], 1 }
0x5335   :  { %8101 = vsyncpa [#allocation48], 1 }
0x5336   :  { %8102 = vsyncpa [#allocation4], 1 }
0x5337   :  { %8104 = vsyncpa [#allocation4 + $0x1], 1 }

</bundles_post_ra>
